<compile_context>
chip_gen: v5e
topology: v5e:2x2
jax: 0.10.0
libtpu: 0.0.40
codegen_flags: <defaults>
</compile_context>

<pallas_src>
import functools
import numpy as np
import jax
import jax.numpy as jnp
from jax.experimental import pallas as pl
from jax.experimental.pallas import tpu as pltpu

LEAKY_SLOPE = 0.01            # nn.LeakyReLU default
BN_EPS = 1e-5                 # nn.BatchNorm2d default
FUSED_VMEM_BUDGET = 40 * 1024 * 1024   # conservative: v7x has 64 MiB physical VMEM


def _round_up(x, m):
    return (x + m - 1) // m * m


def _vmem_tile_bytes(rows, cols, itemsize):
    # (sublane, lane)-padded footprint of a 2-D VMEM tile.
    return _round_up(max(rows, 1), 32 // itemsize) * _round_up(max(cols, 1), 128) * itemsize


def _plan_np(cout):
    # Output-channel padding: keep small channel counts unpadded (8-aligned); make large
    # ones lane-dense multiples of 256.
    return _round_up(cout, 8) if cout <= 512 else _round_up(cout, 256)


def _fused_vmem_estimate(H, W, cin, np_out, out_bytes):
    wp = W + 2
    lp = (H + 4) * wp
    m_out = H * wp
    tn = np_out if np_out <= 512 else 256
    return (2 * _vmem_tile_bytes(lp, cin, 2)            # double-buffered image slab
            + 2 * 9 * _vmem_tile_bytes(cin, tn, 2)      # double-buffered weights
            + 2 * _vmem_tile_bytes(m_out, tn, out_bytes)  # double-buffered output
            + _vmem_tile_bytes(m_out, tn, 4)            # f32 accumulator value
            + 2 * _vmem_tile_bytes(m_out, cin, 2))      # tap-slice temporaries (slack)


# ----------------------------------------------------------------------------
# Fused 3x3 conv kernel: in-kernel im2col (9 shifted views) + BN/bias + LeakyReLU
# ----------------------------------------------------------------------------
def _conv3x3_kernel(a_ref, w_ref, shift_ref, mask_ref, o_ref, *, wp, m_out):
    """One fused 3x3 conv (pad=1) + bias/BN shift + LeakyReLU over a whole flattened image.

    a_ref:     (1, Lp, Cin)   bf16  zero-padded image: [2 zero rows][H rows: W data + 2
                                    zero cols][2 zero rows], rows of length wp, flattened.
    w_ref:     (9, Cin, tn)   bf16  per-tap weights with BN scale folded in (VMEM resident).
    shift_ref: (1, tn)        f32   folded conv-bias + BN shift.
    mask_ref:  (m_out, 1)     f32   zeroes the (wp - W) garbage columns of each output row.
    o_ref:     (1, m_out, tn)
    """
    acc = None
    for ki in range(3):
        for kj in range(3):
            start = (ki + 1) * wp + (kj - 1)            # static tap offset into the slab
            a_tap = a_ref[0, pl.ds(start, m_out), :]    # (m_out, Cin) shifted view
            part = jnp.dot(a_tap, w_ref[ki * 3 + kj],
                           preferred_element_type=jnp.float32)
            acc = part if acc is None else acc + part
    y = acc + shift_ref[...]
    y = jnp.where(y >= 0, y, LEAKY_SLOPE * y)           # LeakyReLU
    y = y * mask_ref[...]                               # zero the garbage columns -> rows
    o_ref[0] = y.astype(o_ref.dtype)                    #   are already next-layer padded


def _fused_conv(a_flat, w9, shift, mask, *, H, W, out_dtype):
    B, lp, cin = a_flat.shape
    _, _, np_out = w9.shape
    wp = W + 2
    m_out = H * wp
    assert lp == (H + 4) * wp

    tn = np_out if np_out <= 512 else 256
    # keep >= 2 parallel grid steps for 2-TensorCore (v7x) chips when cheaply possible
    if B * (np_out // tn) < 2 and tn % 256 == 0:
        tn //= 2
    n_ct = np_out // tn

    out_bytes = np.dtype(out_dtype).itemsize
    est = _fused_vmem_estimate(H, W, cin, np_out, out_bytes)
    vmem_limit = int(min(96 * 2**20, max(32 * 2**20, 2 * est)))

    cost = pl.CostEstimate(
        flops=2 * B * m_out * np_out * 9 * cin,
        transcendentals=0,
        bytes_accessed=B * lp * cin * 2 + 9 * cin * np_out * 2
                       + B * m_out * np_out * out_bytes)

    return pl.pallas_call(
        functools.partial(_conv3x3_kernel, wp=wp, m_out=m_out),
        out_shape=jax.ShapeDtypeStruct((B, m_out, np_out), out_dtype),
        grid_spec=pltpu.PrefetchScalarGridSpec(
            num_scalar_prefetch=0,
            grid=(B, n_ct),
            in_specs=[
                # image slab: constant in j -> not re-fetched across cout tiles
                pl.BlockSpec((1, lp, cin), lambda b, j: (b, 0, 0)),
                # weights: constant in b -> VMEM resident when n_ct == 1
                pl.BlockSpec((9, cin, tn), lambda b, j: (0, 0, j)),
                pl.BlockSpec((1, tn), lambda b, j: (0, j)),
                pl.BlockSpec((m_out, 1), lambda b, j: (0, 0)),
            ],
            out_specs=pl.BlockSpec((1, m_out, tn), lambda b, j: (b, 0, j)),
        ),
        compiler_params=pltpu.CompilerParams(
            dimension_semantics=("parallel", "parallel"),
            vmem_limit_bytes=vmem_limit),
        cost_estimate=cost,
    )(a_flat, w9, shift, mask)


# ----------------------------------------------------------------------------
# Fallback for very large shapes: im2col + tiled GEMM with fused epilogue
# ----------------------------------------------------------------------------
def _gemm_kernel(a_ref, w_ref, shift_ref, o_ref, acc_ref):
    k = pl.program_id(2)

    @pl.when(k == 0)
    def _():
        acc_ref[...] = jnp.zeros_like(acc_ref)

    acc_ref[...] += jnp.dot(a_ref[...], w_ref[...], preferred_element_type=jnp.float32)

    @pl.when(k == pl.num_programs(2) - 1)
    def _():
        y = acc_ref[...] + shift_ref[...]
        y = jnp.where(y >= 0, y, LEAKY_SLOPE * y)
        o_ref[...] = y.astype(o_ref.dtype)


def _gemm_kernel_1k(a_ref, w_ref, shift_ref, o_ref):
    # single-K-step variant: no accumulator scratch, no zero-init pass
    y = jnp.dot(a_ref[...], w_ref[...], preferred_element_type=jnp.float32) + shift_ref[...]
    y = jnp.where(y >= 0, y, LEAKY_SLOPE * y)
    o_ref[...] = y.astype(o_ref.dtype)


def _pad2d(x, rows, cols):
    pr, pc = rows - x.shape[0], cols - x.shape[1]
    if pr == 0 and pc == 0:
        return x
    return jnp.pad(x, ((0, pr), (0, pc)))


def fused_gemm(a, w, shift, out_dtype=jnp.float32):
    """out = leaky_relu((a @ w) + shift); BN scale must already be folded into w."""
    M, K = a.shape
    _, N = w.shape

    Mp = _round_up(M, 16)
    tm = Mp if Mp <= 512 else 512
    Mp = _round_up(Mp, tm)
    Kp = _round_up(K, 128)
    tk = Kp if Kp <= 2048 else 512          # single K step for all realistic 3x3 convs
    Kp = _round_up(Kp, tk)
    Np = _round_up(N, 128)
    if Np <= 512:
        tn = Np
    elif Np % 512 == 0:
        tn = 512
    elif Np % 256 == 0:
        tn = 256
    else:
        tn = 128

    a_p = _pad2d(a.astype(jnp.bfloat16), Mp, Kp)
    w_p = _pad2d(w.astype(jnp.bfloat16), Kp, Np)
    s_p = _pad2d(shift.astype(jnp.float32).reshape(1, N), 1, Np)

    nk = Kp // tk
    grid = (Mp // tm, Np // tn, nk)
    out_bytes = np.dtype(out_dtype).itemsize
    est = (2 * _vmem_tile_bytes(tm, tk, 2) + 2 * _vmem_tile_bytes(tk, tn, 2)
           + 2 * _vmem_tile_bytes(tm, tn, out_bytes) + _vmem_tile_bytes(tm, tn, 4))
    cost = pl.CostEstimate(flops=2 * Mp * Np * Kp, transcendentals=0,
                           bytes_accessed=Mp * Kp * 2 + Kp * Np * 2 + Mp * Np * out_bytes)

    kernel = _gemm_kernel if nk > 1 else _gemm_kernel_1k
    scratch = [pltpu.VMEM((tm, tn), jnp.float32)] if nk > 1 else []

    out = pl.pallas_call(
        kernel,
        out_shape=jax.ShapeDtypeStruct((Mp, Np), out_dtype),
        grid_spec=pltpu.PrefetchScalarGridSpec(
            num_scalar_prefetch=0,
            grid=grid,
            in_specs=[
                pl.BlockSpec((tm, tk), lambda i, j, k: (i, k)),
                # weight panel: when K and N axes collapse the block index is constant and
                # the panel stays VMEM-resident across all M tiles
                pl.BlockSpec((tk, tn), lambda i, j, k: (k, j)),
                pl.BlockSpec((1, tn), lambda i, j, k: (0, j)),
            ],
            out_specs=pl.BlockSpec((tm, tn), lambda i, j, k: (i, j)),
            scratch_shapes=scratch,
        ),
        compiler_params=pltpu.CompilerParams(
            dimension_semantics=("parallel", "parallel", "arbitrary"),
            vmem_limit_bytes=int(min(96 * 2**20, max(32 * 2**20, 2 * est)))),
        cost_estimate=cost,
    )(a_p, w_p, s_p)
    return out[:M, :N]


def _im2col(x, kh, kw, stride, dilation, pads):
    # x: (B, H, W, C), pads = (top, bottom, left, right)
    B, H, W, C = x.shape
    pt, pb, plft, prgt = pads
    xp = jnp.pad(x, ((0, 0), (pt, pb), (plft, prgt), (0, 0)))
    Hp, Wpad = H + pt + pb, W + plft + prgt
    OH = (Hp - dilation * (kh - 1) - 1) // stride + 1
    OW = (Wpad - dilation * (kw - 1) - 1) // stride + 1
    cols = []
    for i in range(kh):
        for j in range(kw):
            patch = jax.lax.slice(
                xp,
                (0, i * dilation, j * dilation, 0),
                (B, i * dilation + (OH - 1) * stride + 1,
                 j * dilation + (OW - 1) * stride + 1, C),
                (1, stride, stride, 1))
            cols.append(patch)
    patches = jnp.concatenate(cols, axis=-1)   # tap-major (ki, kj, cin) order
    return patches.reshape(B * OH * OW, kh * kw * C), (B, OH, OW)


# ----------------------------------------------------------------------------
# Parameter prep: fold conv bias + eval-mode BN into (scaled weights, shift)
# ----------------------------------------------------------------------------
def _fold_bn(bias, bn):
    scale = bn["gamma"] * jax.lax.rsqrt(bn["var"] + BN_EPS)
    shift = (bias - bn["mean"]) * scale + bn["beta"]
    return scale, shift


def _prep_conv(conv_p, bn_p, cin_eff, np_out):
    """Return (9, cin_eff, np_out) bf16 weights (BN scale folded) + (1, np_out) f32 shift."""
    w, b = conv_p["w"], conv_p["b"]               # w: (Cout, Cin, 3, 3) PyTorch layout
    cout, cin, kh, kw = w.shape
    scale, shift = _fold_bn(b, bn_p)
    w9 = jnp.transpose(w, (2, 3, 1, 0)).reshape(kh * kw, cin, cout)
    w9 = w9 * scale.reshape(1, 1, cout)
    w9 = jnp.pad(w9, ((0, 0), (0, cin_eff - cin), (0, np_out - cout)))
    shift = jnp.pad(shift.reshape(1, cout), ((0, 0), (0, np_out - cout)))
    return w9.astype(jnp.bfloat16), shift.astype(jnp.float32)


# ----------------------------------------------------------------------------
# Forward pass (mirrors DoubleConv.forward: (conv => BN => LeakyReLU) * 2)
# ----------------------------------------------------------------------------
def _double_conv_fused(params, x_nhwc):
    B, H, W, cin = x_nhwc.shape
    wp, m_out = W + 2, H * (W + 2)
    cin_p = _round_up(cin, 8)
    cmid = params["c1"]["w"].shape[0]
    cout = params["c2"]["w"].shape[0]
    np1, np2 = _plan_np(cmid), _plan_np(cout)

    # flat padded layout: [2 zero rows][H rows of (W data + 2 zero cols)][2 zero rows]
    xb = x_nhwc.astype(jnp.bfloat16)
    xb = jnp.pad(xb, ((0, 0), (2, 2), (0, 2), (0, cin_p - cin)))
    a1 = xb.reshape(B, (H + 4) * wp, cin_p)

    mask = jnp.asarray((np.arange(m_out) % wp < W).astype(np.float32)).reshape(m_out, 1)

    w1, s1 = _prep_conv(params["c1"], params["bn1"], cin_p, np1)
    y1 = _fused_conv(a1, w1, s1, mask, H=H, W=W, out_dtype=jnp.bfloat16)

    # masked rows already carry the trailing zero pad columns; just add zero pad rows and
    # feed conv2 directly at the (possibly padded) channel width — no slice / re-pad.
    a2 = jnp.pad(y1, ((0, 0), (2 * wp, 2 * wp), (0, 0)))
    w2, s2 = _prep_conv(params["c2"], params["bn2"], np1, np2)
    y2 = _fused_conv(a2, w2, s2, mask, H=H, W=W, out_dtype=jnp.float32)

    return y2.reshape(B, H, wp, np2)[:, :, :W, :cout]            # NHWC


def _double_conv_gemm(params, x_nhwc):
    # TODO(synk): large-shape fallback still materializes the 9-tap im2col matrix in HBM.
    x = x_nhwc
    for cname, bname, odt in (("c1", "bn1", jnp.bfloat16), ("c2", "bn2", jnp.float32)):
        w = params[cname]["w"]
        cout, cin, kh, kw = w.shape
        w9, shift = _prep_conv(params[cname], params[bname], cin, cout)
        A, (B_, OH, OW) = _im2col(x.astype(jnp.bfloat16), kh, kw, 1, 1, (1, 1, 1, 1))
        y = fused_gemm(A, w9.reshape(kh * kw * cin, cout), shift, out_dtype=odt)
        x = y.reshape(B_, OH, OW, cout)
    return x


def double_conv_forward(params, x_nchw, use_fused=None):
    x = jnp.transpose(x_nchw, (0, 2, 3, 1))             # NCHW -> NHWC
    B, H, W, cin = x.shape
    if use_fused is None:
        cin_p = _round_up(cin, 8)
        np1 = _plan_np(params["c1"]["w"].shape[0])
        np2 = _plan_np(params["c2"]["w"].shape[0])
        est = max(_fused_vmem_estimate(H, W, cin_p, np1, 2),
                  _fused_vmem_estimate(H, W, np1, np2, 4))
        use_fused = est <= FUSED_VMEM_BUDGET
    y = _double_conv_fused(params, x) if use_fused else _double_conv_gemm(params, x)
    return jnp.transpose(y, (0, 3, 1, 2))               # NHWC -> NCHW


# ----------------------------------------------------------------------------
# Parameters (shapes per DoubleConv.__init__)
# ----------------------------------------------------------------------------
def _init_conv(key, cout, cin, kh, kw):
    kw_, kb = jax.random.split(key)
    fan_in = cin * kh * kw
    w = jax.random.normal(kw_, (cout, cin, kh, kw), jnp.float32) / np.sqrt(fan_in)
    b = 0.01 * jax.random.normal(kb, (cout,), jnp.float32)
    return {"w": w, "b": b}


def _init_bn(c):
    return {"gamma": jnp.ones((c,), jnp.float32),
            "beta": jnp.zeros((c,), jnp.float32),
            "mean": jnp.zeros((c,), jnp.float32),
            "var": jnp.ones((c,), jnp.float32)}


def init_double_conv(key, cin, cout, cmid=None):
    cmid = cmid or cout
    k1, k2 = jax.random.split(key)
    return {"c1": _init_conv(k1, cmid, cin, 3, 3), "bn1": _init_bn(cmid),
            "c2": _init_conv(k2, cout, cmid, 3, 3), "bn2": _init_bn(cout)}


# ----------------------------------------------------------------------------
# Pure-JAX (f32) reference for a numeric sanity check
# ----------------------------------------------------------------------------
def _ref_double_conv(params, x_nchw):
    x = jnp.transpose(x_nchw, (0, 2, 3, 1))
    for cname, bname in (("c1", "bn1"), ("c2", "bn2")):
        w, b = params[cname]["w"], params[cname]["b"]
        bn = params[bname]
        y = jax.lax.conv_general_dilated(
            x, jnp.transpose(w, (2, 3, 1, 0)), window_strides=(1, 1),
            padding=((1, 1), (1, 1)),
            dimension_numbers=("NHWC", "HWIO", "NHWC")) + b
        s = bn["gamma"] / jnp.sqrt(bn["var"] + BN_EPS)
        y = (y - bn["mean"]) * s + bn["beta"]
        x = jnp.where(y >= 0, y, LEAKY_SLOPE * y)
    return jnp.transpose(x, (0, 3, 1, 2))


if __name__ == "__main__":
    key = jax.random.PRNGKey(0)
    kp, kx = jax.random.split(key)
    B, Cin, Cout, H, W = 2, 4, 32, 16, 16
    params = init_double_conv(kp, Cin, Cout)
    x = jax.random.normal(kx, (B, Cin, H, W), jnp.float32)

    ref = _ref_double_conv(params, x)

    # Primary path: fused in-kernel-im2col conv (auto-selected for these shapes).
    fwd = jax.jit(double_conv_forward)
    out = jax.block_until_ready(fwd(params, x))
    assert out.shape == (B, Cout, H, W), out.shape
    assert bool(jnp.all(jnp.isfinite(out)))
    err_fused = float(jnp.max(jnp.abs(out - ref)))
    assert err_fused < 1e-1, f"fused path max abs err vs reference: {err_fused}"

    # Also exercise the large-shape fallback (im2col + tiled GEMM) on the same input.
    fwd_gemm = jax.jit(functools.partial(double_conv_forward, use_fused=False))
    out_gemm = jax.block_until_ready(fwd_gemm(params, x))
    err_gemm = float(jnp.max(jnp.abs(out_gemm - ref)))
    assert err_gemm < 1e-1, f"GEMM fallback max abs err vs reference: {err_gemm}"

    print("KERNEL_OK")
</pallas_src>

<mosaic_0001>
module attributes {stable_mosaic.version = 11 : i64} {
  func.func @_conv3x3_kernel(%arg0: i32, %arg1: i32, %arg2: memref<1x360x8xbf16, #tpu.memory_space<vmem>>, %arg3: memref<9x8x32xbf16, #tpu.memory_space<vmem>>, %arg4: memref<1x32xf32, #tpu.memory_space<vmem>>, %arg5: memref<288x1xf32, #tpu.memory_space<vmem>>, %arg6: memref<1x288x32xbf16, #tpu.memory_space<vmem>>) attributes {dimension_semantics = [#tpu.dimension_semantics<parallel>, #tpu.dimension_semantics<parallel>], iteration_bounds = array<i64: 2, 1>, scalar_prefetch = 0 : i64, scratch_operands = 0 : i64, tpu.core_type = #tpu.core_type<tc>, window_params = [{transform_indices = @transform_0, window_bounds = array<i64: 1, 360, 8>}, {transform_indices = @transform_1, window_bounds = array<i64: 9, 8, 32>}, {transform_indices = @transform_2, window_bounds = array<i64: 1, 32>}, {pipeline_mode = #tpu.pipeline_mode<synchronous>, transform_indices = @transform_3, window_bounds = array<i64: 288, 1>}, {transform_indices = @transform_4, window_bounds = array<i64: 1, 288, 32>}]} {
    %c0 = arith.constant 0 : index
    %c17 = arith.constant 17 : index
    %c0_0 = arith.constant 0 : index
    %0 = vector.load %arg2[%c0, %c17, %c0_0] : memref<1x360x8xbf16, #tpu.memory_space<vmem>>, vector<1x288x8xbf16>
    %1 = vector.shape_cast %0 : vector<1x288x8xbf16> to vector<288x8xbf16>
    %c0_1 = arith.constant 0 : index
    %c0_2 = arith.constant 0 : index
    %c0_3 = arith.constant 0 : index
    %2 = vector.load %arg3[%c0_1, %c0_2, %c0_3] : memref<9x8x32xbf16, #tpu.memory_space<vmem>>, vector<1x8x32xbf16>
    %3 = vector.shape_cast %2 : vector<1x8x32xbf16> to vector<8x32xbf16>
    %cst = arith.constant dense<0.000000e+00> : vector<288x32xf32>
    %4 = tpu.matmul %1, %3, %cst {dimension_numbers = #tpu.dot_dimension_numbers<[1], [0], [0], [1], [0, 0, 1, 1], [], []>} : vector<288x8xbf16>, vector<8x32xbf16>, vector<288x32xf32> -> vector<288x32xf32>
    %c0_4 = arith.constant 0 : index
    %c18 = arith.constant 18 : index
    %c0_5 = arith.constant 0 : index
    %5 = vector.load %arg2[%c0_4, %c18, %c0_5] : memref<1x360x8xbf16, #tpu.memory_space<vmem>>, vector<1x288x8xbf16>
    %6 = vector.shape_cast %5 : vector<1x288x8xbf16> to vector<288x8xbf16>
    %c1 = arith.constant 1 : index
    %c0_6 = arith.constant 0 : index
    %c0_7 = arith.constant 0 : index
    %7 = vector.load %arg3[%c1, %c0_6, %c0_7] : memref<9x8x32xbf16, #tpu.memory_space<vmem>>, vector<1x8x32xbf16>
    %8 = vector.shape_cast %7 : vector<1x8x32xbf16> to vector<8x32xbf16>
    %cst_8 = arith.constant dense<0.000000e+00> : vector<288x32xf32>
    %9 = tpu.matmul %6, %8, %cst_8 {dimension_numbers = #tpu.dot_dimension_numbers<[1], [0], [0], [1], [0, 0, 1, 1], [], []>} : vector<288x8xbf16>, vector<8x32xbf16>, vector<288x32xf32> -> vector<288x32xf32>
    %10 = arith.addf %4, %9 : vector<288x32xf32>
    %c0_9 = arith.constant 0 : index
    %c19 = arith.constant 19 : index
    %c0_10 = arith.constant 0 : index
    %11 = vector.load %arg2[%c0_9, %c19, %c0_10] : memref<1x360x8xbf16, #tpu.memory_space<vmem>>, vector<1x288x8xbf16>
    %12 = vector.shape_cast %11 : vector<1x288x8xbf16> to vector<288x8xbf16>
    %c2 = arith.constant 2 : index
    %c0_11 = arith.constant 0 : index
    %c0_12 = arith.constant 0 : index
    %13 = vector.load %arg3[%c2, %c0_11, %c0_12] : memref<9x8x32xbf16, #tpu.memory_space<vmem>>, vector<1x8x32xbf16>
    %14 = vector.shape_cast %13 : vector<1x8x32xbf16> to vector<8x32xbf16>
    %cst_13 = arith.constant dense<0.000000e+00> : vector<288x32xf32>
    %15 = tpu.matmul %12, %14, %cst_13 {dimension_numbers = #tpu.dot_dimension_numbers<[1], [0], [0], [1], [0, 0, 1, 1], [], []>} : vector<288x8xbf16>, vector<8x32xbf16>, vector<288x32xf32> -> vector<288x32xf32>
    %16 = arith.addf %10, %15 : vector<288x32xf32>
    %c0_14 = arith.constant 0 : index
    %c35 = arith.constant 35 : index
    %c0_15 = arith.constant 0 : index
    %17 = vector.load %arg2[%c0_14, %c35, %c0_15] : memref<1x360x8xbf16, #tpu.memory_space<vmem>>, vector<1x288x8xbf16>
    %18 = vector.shape_cast %17 : vector<1x288x8xbf16> to vector<288x8xbf16>
    %c3 = arith.constant 3 : index
    %c0_16 = arith.constant 0 : index
    %c0_17 = arith.constant 0 : index
    %19 = vector.load %arg3[%c3, %c0_16, %c0_17] : memref<9x8x32xbf16, #tpu.memory_space<vmem>>, vector<1x8x32xbf16>
    %20 = vector.shape_cast %19 : vector<1x8x32xbf16> to vector<8x32xbf16>
    %cst_18 = arith.constant dense<0.000000e+00> : vector<288x32xf32>
    %21 = tpu.matmul %18, %20, %cst_18 {dimension_numbers = #tpu.dot_dimension_numbers<[1], [0], [0], [1], [0, 0, 1, 1], [], []>} : vector<288x8xbf16>, vector<8x32xbf16>, vector<288x32xf32> -> vector<288x32xf32>
    %22 = arith.addf %16, %21 : vector<288x32xf32>
    %c0_19 = arith.constant 0 : index
    %c36 = arith.constant 36 : index
    %c0_20 = arith.constant 0 : index
    %23 = vector.load %arg2[%c0_19, %c36, %c0_20] : memref<1x360x8xbf16, #tpu.memory_space<vmem>>, vector<1x288x8xbf16>
    %24 = vector.shape_cast %23 : vector<1x288x8xbf16> to vector<288x8xbf16>
    %c4 = arith.constant 4 : index
    %c0_21 = arith.constant 0 : index
    %c0_22 = arith.constant 0 : index
    %25 = vector.load %arg3[%c4, %c0_21, %c0_22] : memref<9x8x32xbf16, #tpu.memory_space<vmem>>, vector<1x8x32xbf16>
    %26 = vector.shape_cast %25 : vector<1x8x32xbf16> to vector<8x32xbf16>
    %cst_23 = arith.constant dense<0.000000e+00> : vector<288x32xf32>
    %27 = tpu.matmul %24, %26, %cst_23 {dimension_numbers = #tpu.dot_dimension_numbers<[1], [0], [0], [1], [0, 0, 1, 1], [], []>} : vector<288x8xbf16>, vector<8x32xbf16>, vector<288x32xf32> -> vector<288x32xf32>
    %28 = arith.addf %22, %27 : vector<288x32xf32>
    %c0_24 = arith.constant 0 : index
    %c37 = arith.constant 37 : index
    %c0_25 = arith.constant 0 : index
    %29 = vector.load %arg2[%c0_24, %c37, %c0_25] : memref<1x360x8xbf16, #tpu.memory_space<vmem>>, vector<1x288x8xbf16>
    %30 = vector.shape_cast %29 : vector<1x288x8xbf16> to vector<288x8xbf16>
    %c5 = arith.constant 5 : index
    %c0_26 = arith.constant 0 : index
    %c0_27 = arith.constant 0 : index
    %31 = vector.load %arg3[%c5, %c0_26, %c0_27] : memref<9x8x32xbf16, #tpu.memory_space<vmem>>, vector<1x8x32xbf16>
    %32 = vector.shape_cast %31 : vector<1x8x32xbf16> to vector<8x32xbf16>
    %cst_28 = arith.constant dense<0.000000e+00> : vector<288x32xf32>
    %33 = tpu.matmul %30, %32, %cst_28 {dimension_numbers = #tpu.dot_dimension_numbers<[1], [0], [0], [1], [0, 0, 1, 1], [], []>} : vector<288x8xbf16>, vector<8x32xbf16>, vector<288x32xf32> -> vector<288x32xf32>
    %34 = arith.addf %28, %33 : vector<288x32xf32>
    %c0_29 = arith.constant 0 : index
    %c53 = arith.constant 53 : index
    %c0_30 = arith.constant 0 : index
    %35 = vector.load %arg2[%c0_29, %c53, %c0_30] : memref<1x360x8xbf16, #tpu.memory_space<vmem>>, vector<1x288x8xbf16>
    %36 = vector.shape_cast %35 : vector<1x288x8xbf16> to vector<288x8xbf16>
    %c6 = arith.constant 6 : index
    %c0_31 = arith.constant 0 : index
    %c0_32 = arith.constant 0 : index
    %37 = vector.load %arg3[%c6, %c0_31, %c0_32] : memref<9x8x32xbf16, #tpu.memory_space<vmem>>, vector<1x8x32xbf16>
    %38 = vector.shape_cast %37 : vector<1x8x32xbf16> to vector<8x32xbf16>
    %cst_33 = arith.constant dense<0.000000e+00> : vector<288x32xf32>
    %39 = tpu.matmul %36, %38, %cst_33 {dimension_numbers = #tpu.dot_dimension_numbers<[1], [0], [0], [1], [0, 0, 1, 1], [], []>} : vector<288x8xbf16>, vector<8x32xbf16>, vector<288x32xf32> -> vector<288x32xf32>
    %40 = arith.addf %34, %39 : vector<288x32xf32>
    %c0_34 = arith.constant 0 : index
    %c54 = arith.constant 54 : index
    %c0_35 = arith.constant 0 : index
    %41 = vector.load %arg2[%c0_34, %c54, %c0_35] : memref<1x360x8xbf16, #tpu.memory_space<vmem>>, vector<1x288x8xbf16>
    %42 = vector.shape_cast %41 : vector<1x288x8xbf16> to vector<288x8xbf16>
    %c7 = arith.constant 7 : index
    %c0_36 = arith.constant 0 : index
    %c0_37 = arith.constant 0 : index
    %43 = vector.load %arg3[%c7, %c0_36, %c0_37] : memref<9x8x32xbf16, #tpu.memory_space<vmem>>, vector<1x8x32xbf16>
    %44 = vector.shape_cast %43 : vector<1x8x32xbf16> to vector<8x32xbf16>
    %cst_38 = arith.constant dense<0.000000e+00> : vector<288x32xf32>
    %45 = tpu.matmul %42, %44, %cst_38 {dimension_numbers = #tpu.dot_dimension_numbers<[1], [0], [0], [1], [0, 0, 1, 1], [], []>} : vector<288x8xbf16>, vector<8x32xbf16>, vector<288x32xf32> -> vector<288x32xf32>
    %46 = arith.addf %40, %45 : vector<288x32xf32>
    %c0_39 = arith.constant 0 : index
    %c55 = arith.constant 55 : index
    %c0_40 = arith.constant 0 : index
    %47 = vector.load %arg2[%c0_39, %c55, %c0_40] : memref<1x360x8xbf16, #tpu.memory_space<vmem>>, vector<1x288x8xbf16>
    %48 = vector.shape_cast %47 : vector<1x288x8xbf16> to vector<288x8xbf16>
    %c8 = arith.constant 8 : index
    %c0_41 = arith.constant 0 : index
    %c0_42 = arith.constant 0 : index
    %49 = vector.load %arg3[%c8, %c0_41, %c0_42] : memref<9x8x32xbf16, #tpu.memory_space<vmem>>, vector<1x8x32xbf16>
    %50 = vector.shape_cast %49 : vector<1x8x32xbf16> to vector<8x32xbf16>
    %cst_43 = arith.constant dense<0.000000e+00> : vector<288x32xf32>
    %51 = tpu.matmul %48, %50, %cst_43 {dimension_numbers = #tpu.dot_dimension_numbers<[1], [0], [0], [1], [0, 0, 1, 1], [], []>} : vector<288x8xbf16>, vector<8x32xbf16>, vector<288x32xf32> -> vector<288x32xf32>
    %52 = arith.addf %46, %51 : vector<288x32xf32>
    %c0_44 = arith.constant 0 : index
    %c0_45 = arith.constant 0 : index
    %53 = vector.load %arg4[%c0_44, %c0_45] : memref<1x32xf32, #tpu.memory_space<vmem>>, vector<1x32xf32>
    %54 = vector.broadcast %53 : vector<1x32xf32> to vector<288x32xf32>
    %55 = arith.addf %52, %54 : vector<288x32xf32>
    %cst_46 = arith.constant 0.000000e+00 : f32
    %56 = vector.broadcast %cst_46 : f32 to vector<288x32xf32>
    %57 = arith.cmpf oge, %55, %56 : vector<288x32xf32>
    %cst_47 = arith.constant 0.00999999977 : f32
    %58 = vector.broadcast %cst_47 : f32 to vector<288x32xf32>
    %59 = arith.mulf %58, %55 : vector<288x32xf32>
    %60 = arith.select %57, %55, %59 : vector<288x32xi1>, vector<288x32xf32>
    %c0_48 = arith.constant 0 : index
    %c0_49 = arith.constant 0 : index
    %61 = vector.load %arg5[%c0_48, %c0_49] : memref<288x1xf32, #tpu.memory_space<vmem>>, vector<288x1xf32>
    %62 = vector.broadcast %61 : vector<288x1xf32> to vector<288x32xf32>
    %63 = arith.mulf %60, %62 : vector<288x32xf32>
    %64 = arith.truncf %63 : vector<288x32xf32> to vector<288x32xbf16>
    %c0_50 = arith.constant 0 : index
    %c0_51 = arith.constant 0 : index
    %c0_52 = arith.constant 0 : index
    %65 = vector.load %arg6[%c0_50, %c0_51, %c0_52] : memref<1x288x32xbf16, #tpu.memory_space<vmem>>, vector<1x288x32xbf16>
    %66 = vector.shape_cast %65 : vector<1x288x32xbf16> to vector<288x32xbf16>
    %67 = vector.shape_cast %64 : vector<288x32xbf16> to vector<1x288x32xbf16>
    tpu.vector_store %arg6[%c0_50, %c0_51, %c0_52], %67 {strides = array<i32>} : memref<1x288x32xbf16, #tpu.memory_space<vmem>>, vector<1x288x32xbf16>,
    return
  }
  func.func @transform_0(%arg0: i32, %arg1: i32) -> (i32, i32, i32) {
    %c0_i32 = arith.constant 0 : i32
    %c0_i32_0 = arith.constant 0 : i32
    %c0_i32_1 = arith.constant 0 : i32
    return %arg0, %c0_i32, %c0_i32_0 : i32, i32, i32
  }
  func.func @transform_1(%arg0: i32, %arg1: i32) -> (i32, i32, i32) {
    %c0_i32 = arith.constant 0 : i32
    %c0_i32_0 = arith.constant 0 : i32
    %c0_i32_1 = arith.constant 0 : i32
    return %c0_i32, %c0_i32_0, %arg1 : i32, i32, i32
  }
  func.func @transform_2(%arg0: i32, %arg1: i32) -> (i32, i32) {
    %c0_i32 = arith.constant 0 : i32
    %c0_i32_0 = arith.constant 0 : i32
    return %c0_i32, %arg1 : i32, i32
  }
  func.func @transform_3(%arg0: i32, %arg1: i32) -> (i32, i32) {
    %c0_i32 = arith.constant 0 : i32
    %c0_i32_0 = arith.constant 0 : i32
    %c0_i32_1 = arith.constant 0 : i32
    return %c0_i32, %c0_i32_0 : i32, i32
  }
  func.func @transform_4(%arg0: i32, %arg1: i32) -> (i32, i32, i32) {
    %c0_i32 = arith.constant 0 : i32
    %c0_i32_0 = arith.constant 0 : i32
    return %arg0, %c0_i32, %arg1 : i32, i32, i32
  }
}

module attributes {stable_mosaic.version = 11 : i64} {
  func.func @_conv3x3_kernel(%arg0: i32, %arg1: i32, %arg2: memref<1x360x32xbf16, #tpu.memory_space<vmem>>, %arg3: memref<9x32x32xbf16, #tpu.memory_space<vmem>>, %arg4: memref<1x32xf32, #tpu.memory_space<vmem>>, %arg5: memref<288x1xf32, #tpu.memory_space<vmem>>, %arg6: memref<1x288x32xf32, #tpu.memory_space<vmem>>) attributes {dimension_semantics = [#tpu.dimension_semantics<parallel>, #tpu.dimension_semantics<parallel>], iteration_bounds = array<i64: 2, 1>, scalar_prefetch = 0 : i64, scratch_operands = 0 : i64, tpu.core_type = #tpu.core_type<tc>, window_params = [{transform_indices = @transform_0, window_bounds = array<i64: 1, 360, 32>}, {transform_indices = @transform_1, window_bounds = array<i64: 9, 32, 32>}, {transform_indices = @transform_2, window_bounds = array<i64: 1, 32>}, {pipeline_mode = #tpu.pipeline_mode<synchronous>, transform_indices = @transform_3, window_bounds = array<i64: 288, 1>}, {transform_indices = @transform_4, window_bounds = array<i64: 1, 288, 32>}]} {
    %c0 = arith.constant 0 : index
    %c17 = arith.constant 17 : index
    %c0_0 = arith.constant 0 : index
    %0 = vector.load %arg2[%c0, %c17, %c0_0] : memref<1x360x32xbf16, #tpu.memory_space<vmem>>, vector<1x288x32xbf16>
    %1 = vector.shape_cast %0 : vector<1x288x32xbf16> to vector<288x32xbf16>
    %c0_1 = arith.constant 0 : index
    %c0_2 = arith.constant 0 : index
    %c0_3 = arith.constant 0 : index
    %2 = vector.load %arg3[%c0_1, %c0_2, %c0_3] : memref<9x32x32xbf16, #tpu.memory_space<vmem>>, vector<1x32x32xbf16>
    %3 = vector.shape_cast %2 : vector<1x32x32xbf16> to vector<32x32xbf16>
    %cst = arith.constant dense<0.000000e+00> : vector<288x32xf32>
    %4 = tpu.matmul %1, %3, %cst {dimension_numbers = #tpu.dot_dimension_numbers<[1], [0], [0], [1], [0, 0, 1, 1], [], []>} : vector<288x32xbf16>, vector<32x32xbf16>, vector<288x32xf32> -> vector<288x32xf32>
    %c0_4 = arith.constant 0 : index
    %c18 = arith.constant 18 : index
    %c0_5 = arith.constant 0 : index
    %5 = vector.load %arg2[%c0_4, %c18, %c0_5] : memref<1x360x32xbf16, #tpu.memory_space<vmem>>, vector<1x288x32xbf16>
    %6 = vector.shape_cast %5 : vector<1x288x32xbf16> to vector<288x32xbf16>
    %c1 = arith.constant 1 : index
    %c0_6 = arith.constant 0 : index
    %c0_7 = arith.constant 0 : index
    %7 = vector.load %arg3[%c1, %c0_6, %c0_7] : memref<9x32x32xbf16, #tpu.memory_space<vmem>>, vector<1x32x32xbf16>
    %8 = vector.shape_cast %7 : vector<1x32x32xbf16> to vector<32x32xbf16>
    %cst_8 = arith.constant dense<0.000000e+00> : vector<288x32xf32>
    %9 = tpu.matmul %6, %8, %cst_8 {dimension_numbers = #tpu.dot_dimension_numbers<[1], [0], [0], [1], [0, 0, 1, 1], [], []>} : vector<288x32xbf16>, vector<32x32xbf16>, vector<288x32xf32> -> vector<288x32xf32>
    %10 = arith.addf %4, %9 : vector<288x32xf32>
    %c0_9 = arith.constant 0 : index
    %c19 = arith.constant 19 : index
    %c0_10 = arith.constant 0 : index
    %11 = vector.load %arg2[%c0_9, %c19, %c0_10] : memref<1x360x32xbf16, #tpu.memory_space<vmem>>, vector<1x288x32xbf16>
    %12 = vector.shape_cast %11 : vector<1x288x32xbf16> to vector<288x32xbf16>
    %c2 = arith.constant 2 : index
    %c0_11 = arith.constant 0 : index
    %c0_12 = arith.constant 0 : index
    %13 = vector.load %arg3[%c2, %c0_11, %c0_12] : memref<9x32x32xbf16, #tpu.memory_space<vmem>>, vector<1x32x32xbf16>
    %14 = vector.shape_cast %13 : vector<1x32x32xbf16> to vector<32x32xbf16>
    %cst_13 = arith.constant dense<0.000000e+00> : vector<288x32xf32>
    %15 = tpu.matmul %12, %14, %cst_13 {dimension_numbers = #tpu.dot_dimension_numbers<[1], [0], [0], [1], [0, 0, 1, 1], [], []>} : vector<288x32xbf16>, vector<32x32xbf16>, vector<288x32xf32> -> vector<288x32xf32>
    %16 = arith.addf %10, %15 : vector<288x32xf32>
    %c0_14 = arith.constant 0 : index
    %c35 = arith.constant 35 : index
    %c0_15 = arith.constant 0 : index
    %17 = vector.load %arg2[%c0_14, %c35, %c0_15] : memref<1x360x32xbf16, #tpu.memory_space<vmem>>, vector<1x288x32xbf16>
    %18 = vector.shape_cast %17 : vector<1x288x32xbf16> to vector<288x32xbf16>
    %c3 = arith.constant 3 : index
    %c0_16 = arith.constant 0 : index
    %c0_17 = arith.constant 0 : index
    %19 = vector.load %arg3[%c3, %c0_16, %c0_17] : memref<9x32x32xbf16, #tpu.memory_space<vmem>>, vector<1x32x32xbf16>
    %20 = vector.shape_cast %19 : vector<1x32x32xbf16> to vector<32x32xbf16>
    %cst_18 = arith.constant dense<0.000000e+00> : vector<288x32xf32>
    %21 = tpu.matmul %18, %20, %cst_18 {dimension_numbers = #tpu.dot_dimension_numbers<[1], [0], [0], [1], [0, 0, 1, 1], [], []>} : vector<288x32xbf16>, vector<32x32xbf16>, vector<288x32xf32> -> vector<288x32xf32>
    %22 = arith.addf %16, %21 : vector<288x32xf32>
    %c0_19 = arith.constant 0 : index
    %c36 = arith.constant 36 : index
    %c0_20 = arith.constant 0 : index
    %23 = vector.load %arg2[%c0_19, %c36, %c0_20] : memref<1x360x32xbf16, #tpu.memory_space<vmem>>, vector<1x288x32xbf16>
    %24 = vector.shape_cast %23 : vector<1x288x32xbf16> to vector<288x32xbf16>
    %c4 = arith.constant 4 : index
    %c0_21 = arith.constant 0 : index
    %c0_22 = arith.constant 0 : index
    %25 = vector.load %arg3[%c4, %c0_21, %c0_22] : memref<9x32x32xbf16, #tpu.memory_space<vmem>>, vector<1x32x32xbf16>
    %26 = vector.shape_cast %25 : vector<1x32x32xbf16> to vector<32x32xbf16>
    %cst_23 = arith.constant dense<0.000000e+00> : vector<288x32xf32>
    %27 = tpu.matmul %24, %26, %cst_23 {dimension_numbers = #tpu.dot_dimension_numbers<[1], [0], [0], [1], [0, 0, 1, 1], [], []>} : vector<288x32xbf16>, vector<32x32xbf16>, vector<288x32xf32> -> vector<288x32xf32>
    %28 = arith.addf %22, %27 : vector<288x32xf32>
    %c0_24 = arith.constant 0 : index
    %c37 = arith.constant 37 : index
    %c0_25 = arith.constant 0 : index
    %29 = vector.load %arg2[%c0_24, %c37, %c0_25] : memref<1x360x32xbf16, #tpu.memory_space<vmem>>, vector<1x288x32xbf16>
    %30 = vector.shape_cast %29 : vector<1x288x32xbf16> to vector<288x32xbf16>
    %c5 = arith.constant 5 : index
    %c0_26 = arith.constant 0 : index
    %c0_27 = arith.constant 0 : index
    %31 = vector.load %arg3[%c5, %c0_26, %c0_27] : memref<9x32x32xbf16, #tpu.memory_space<vmem>>, vector<1x32x32xbf16>
    %32 = vector.shape_cast %31 : vector<1x32x32xbf16> to vector<32x32xbf16>
    %cst_28 = arith.constant dense<0.000000e+00> : vector<288x32xf32>
    %33 = tpu.matmul %30, %32, %cst_28 {dimension_numbers = #tpu.dot_dimension_numbers<[1], [0], [0], [1], [0, 0, 1, 1], [], []>} : vector<288x32xbf16>, vector<32x32xbf16>, vector<288x32xf32> -> vector<288x32xf32>
    %34 = arith.addf %28, %33 : vector<288x32xf32>
    %c0_29 = arith.constant 0 : index
    %c53 = arith.constant 53 : index
    %c0_30 = arith.constant 0 : index
    %35 = vector.load %arg2[%c0_29, %c53, %c0_30] : memref<1x360x32xbf16, #tpu.memory_space<vmem>>, vector<1x288x32xbf16>
    %36 = vector.shape_cast %35 : vector<1x288x32xbf16> to vector<288x32xbf16>
    %c6 = arith.constant 6 : index
    %c0_31 = arith.constant 0 : index
    %c0_32 = arith.constant 0 : index
    %37 = vector.load %arg3[%c6, %c0_31, %c0_32] : memref<9x32x32xbf16, #tpu.memory_space<vmem>>, vector<1x32x32xbf16>
    %38 = vector.shape_cast %37 : vector<1x32x32xbf16> to vector<32x32xbf16>
    %cst_33 = arith.constant dense<0.000000e+00> : vector<288x32xf32>
    %39 = tpu.matmul %36, %38, %cst_33 {dimension_numbers = #tpu.dot_dimension_numbers<[1], [0], [0], [1], [0, 0, 1, 1], [], []>} : vector<288x32xbf16>, vector<32x32xbf16>, vector<288x32xf32> -> vector<288x32xf32>
    %40 = arith.addf %34, %39 : vector<288x32xf32>
    %c0_34 = arith.constant 0 : index
    %c54 = arith.constant 54 : index
    %c0_35 = arith.constant 0 : index
    %41 = vector.load %arg2[%c0_34, %c54, %c0_35] : memref<1x360x32xbf16, #tpu.memory_space<vmem>>, vector<1x288x32xbf16>
    %42 = vector.shape_cast %41 : vector<1x288x32xbf16> to vector<288x32xbf16>
    %c7 = arith.constant 7 : index
    %c0_36 = arith.constant 0 : index
    %c0_37 = arith.constant 0 : index
    %43 = vector.load %arg3[%c7, %c0_36, %c0_37] : memref<9x32x32xbf16, #tpu.memory_space<vmem>>, vector<1x32x32xbf16>
    %44 = vector.shape_cast %43 : vector<1x32x32xbf16> to vector<32x32xbf16>
    %cst_38 = arith.constant dense<0.000000e+00> : vector<288x32xf32>
    %45 = tpu.matmul %42, %44, %cst_38 {dimension_numbers = #tpu.dot_dimension_numbers<[1], [0], [0], [1], [0, 0, 1, 1], [], []>} : vector<288x32xbf16>, vector<32x32xbf16>, vector<288x32xf32> -> vector<288x32xf32>
    %46 = arith.addf %40, %45 : vector<288x32xf32>
    %c0_39 = arith.constant 0 : index
    %c55 = arith.constant 55 : index
    %c0_40 = arith.constant 0 : index
    %47 = vector.load %arg2[%c0_39, %c55, %c0_40] : memref<1x360x32xbf16, #tpu.memory_space<vmem>>, vector<1x288x32xbf16>
    %48 = vector.shape_cast %47 : vector<1x288x32xbf16> to vector<288x32xbf16>
    %c8 = arith.constant 8 : index
    %c0_41 = arith.constant 0 : index
    %c0_42 = arith.constant 0 : index
    %49 = vector.load %arg3[%c8, %c0_41, %c0_42] : memref<9x32x32xbf16, #tpu.memory_space<vmem>>, vector<1x32x32xbf16>
    %50 = vector.shape_cast %49 : vector<1x32x32xbf16> to vector<32x32xbf16>
    %cst_43 = arith.constant dense<0.000000e+00> : vector<288x32xf32>
    %51 = tpu.matmul %48, %50, %cst_43 {dimension_numbers = #tpu.dot_dimension_numbers<[1], [0], [0], [1], [0, 0, 1, 1], [], []>} : vector<288x32xbf16>, vector<32x32xbf16>, vector<288x32xf32> -> vector<288x32xf32>
    %52 = arith.addf %46, %51 : vector<288x32xf32>
    %c0_44 = arith.constant 0 : index
    %c0_45 = arith.constant 0 : index
    %53 = vector.load %arg4[%c0_44, %c0_45] : memref<1x32xf32, #tpu.memory_space<vmem>>, vector<1x32xf32>
    %54 = vector.broadcast %53 : vector<1x32xf32> to vector<288x32xf32>
    %55 = arith.addf %52, %54 : vector<288x32xf32>
    %cst_46 = arith.constant 0.000000e+00 : f32
    %56 = vector.broadcast %cst_46 : f32 to vector<288x32xf32>
    %57 = arith.cmpf oge, %55, %56 : vector<288x32xf32>
    %cst_47 = arith.constant 0.00999999977 : f32
    %58 = vector.broadcast %cst_47 : f32 to vector<288x32xf32>
    %59 = arith.mulf %58, %55 : vector<288x32xf32>
    %60 = arith.select %57, %55, %59 : vector<288x32xi1>, vector<288x32xf32>
    %c0_48 = arith.constant 0 : index
    %c0_49 = arith.constant 0 : index
    %61 = vector.load %arg5[%c0_48, %c0_49] : memref<288x1xf32, #tpu.memory_space<vmem>>, vector<288x1xf32>
    %62 = vector.broadcast %61 : vector<288x1xf32> to vector<288x32xf32>
    %63 = arith.mulf %60, %62 : vector<288x32xf32>
    %c0_50 = arith.constant 0 : index
    %c0_51 = arith.constant 0 : index
    %c0_52 = arith.constant 0 : index
    %64 = vector.load %arg6[%c0_50, %c0_51, %c0_52] : memref<1x288x32xf32, #tpu.memory_space<vmem>>, vector<1x288x32xf32>
    %65 = vector.shape_cast %64 : vector<1x288x32xf32> to vector<288x32xf32>
    %66 = vector.shape_cast %63 : vector<288x32xf32> to vector<1x288x32xf32>
    tpu.vector_store %arg6[%c0_50, %c0_51, %c0_52], %66 {strides = array<i32>} : memref<1x288x32xf32, #tpu.memory_space<vmem>>, vector<1x288x32xf32>,
    return
  }
  func.func @transform_0(%arg0: i32, %arg1: i32) -> (i32, i32, i32) {
    %c0_i32 = arith.constant 0 : i32
    %c0_i32_0 = arith.constant 0 : i32
    %c0_i32_1 = arith.constant 0 : i32
    return %arg0, %c0_i32, %c0_i32_0 : i32, i32, i32
  }
  func.func @transform_1(%arg0: i32, %arg1: i32) -> (i32, i32, i32) {
    %c0_i32 = arith.constant 0 : i32
    %c0_i32_0 = arith.constant 0 : i32
    %c0_i32_1 = arith.constant 0 : i32
    return %c0_i32, %c0_i32_0, %arg1 : i32, i32, i32
  }
  func.func @transform_2(%arg0: i32, %arg1: i32) -> (i32, i32) {
    %c0_i32 = arith.constant 0 : i32
    %c0_i32_0 = arith.constant 0 : i32
    return %c0_i32, %arg1 : i32, i32
  }
  func.func @transform_3(%arg0: i32, %arg1: i32) -> (i32, i32) {
    %c0_i32 = arith.constant 0 : i32
    %c0_i32_0 = arith.constant 0 : i32
    %c0_i32_1 = arith.constant 0 : i32
    return %c0_i32, %c0_i32_0 : i32, i32
  }
  func.func @transform_4(%arg0: i32, %arg1: i32) -> (i32, i32, i32) {
    %c0_i32 = arith.constant 0 : i32
    %c0_i32_0 = arith.constant 0 : i32
    return %arg0, %c0_i32, %arg1 : i32, i32, i32
  }
}

</mosaic_0001>

<bundles_post_ra>
// kernel: double_conv_forward.3
= control target key start
LH: loop header
LB: loop body
LE: loop exit
PB: predicated region body
PF: predicated region fallthrough
CT: control target
= control target key end

     0   :  { %s4497_s15 = smov 0   ;;  %s4499_s16 = smov 0   ;;  %s6170_s0 = inlined_call_operand.vmem [shape: bf16[2,360,32], index: 0, kind: input, shape index: {}]   ;;  %s6171_s1 = inlined_call_operand.vmem [shape: bf16[9,32,32], index: 1, kind: input, shape index: {}]   ;;  %s6172_s2 = inlined_call_operand.vmem [shape: f32[1,32], index: 2, kind: input, shape index: {}]   ;;  %s6173_s3 = inlined_call_operand.vmem [shape: f32[288,1], index: 3, kind: input, shape index: {}]   ;;  %s6174_s4 = inlined_call_operand.vmem [shape: f32[2,288,32], index: 4, kind: output, shape index: {}]  }
   0x1   :  { %s4501_s17 = smov 0  }
   0x2 LB: > { %s26_s18 = sadd.s32 1, %s4465_s16  ;;  %p3854_p0 = scmp.ge.s32.totalorder %s4469_s17, 1  ;;  %s4469_s17 = sphi %s4501_s17, %s14_s17   ;;  %s4465_s16 = sphi %s4499_s16, %s6322_s16   ;;  %s4461_s15 = sphi %s4497_s15, %s6321_s15  }
   0x3   : > { %p28_p1 = scmp.ge.s32.totalorder %s26_s18, 2  ;;  %p193_p2 = scmp.lt.s32.totalorder %s4469_s17, 3 }
   0x5   : > { %s6324_s18 = smov (%p28_p1, %s26_s18), 0  ;;  %p194_p3 = pnand %p3854_p0, %p193_p2 }
   0x7   : > { %197 = sbr.rel (%p194_p3) target bundleno = 817 (0x331), region = 36 }
   0xc   : > { %v4349_v0 = vld [vmem:[%s6171_s1 + $0x18] sm:$0xff]  ;;  %p229_p4 = scmp.lt.s32.totalorder %s4461_s15, 1  ;;  %v4348_v1 = vld [vmem:[%s6171_s1 + $0x10] sm:$0xff]  ;;  %v4351_v2 = vld [vmem:[%s6171_s1 + $0x28] sm:$0xff]  ;;  %vm390_vm0 = vcmask 1046528   ;;  %vm440_vm1 = vcmask 261120  }
   0xd   : > { %4406 = vmatpush.bf16.msra.mxu1 %v4349_v0  ;;  %4407 = vmatpush.bf16.msra.mxu2 %v4349_v0  ;;  %v4347_v3 = vld [vmem:[%s6171_s1 + $0x8] sm:$0xff]  ;;  %v4370_v27 = vld [vmem:[%s6171_s1 + $0x38] sm:$0xff]  ;;  %v4350_v28 = vld [vmem:[%s6171_s1 + $0x20] sm:$0xff]  ;;  %vm920_vm2 = vsmask.f32 6400  ;;  %vm1722_vm4 = vcmask 1045504  }
   0xe   : > { %s6326_s15 = smov (!%p229_p4, %s4461_s15), 1  ;;  %501 = vmatpush.bf16.msra.mxu0 %v4349_v0  ;;  %4408 = vmatpush.bf16.msra.mxu3 %v4349_v0  ;;  %v4372_v4 = vld [vmem:[%s6171_s1 + $0x48] sm:$0xff]  ;;  %v4346_v29 = vld [vmem:[%s6171_s1] sm:$0xff]  ;;  %v4369_v46 = vld [vmem:[%s6171_s1 + $0x30] sm:$0xff]  ;;  %vm597_vm3 = vsmask.f32 7424 }
   0xf   : > { %s4412_s25 = smul.u32 180, %s6326_s15  ;;  %v4371_v44 = vld [vmem:[%s6171_s1 + $0x40] sm:$0xff]  ;;  %vm2772_vm5 = vcmask 1044480   ;;  %vm1970_vm6 = vsmask.f32 5376 }
  0x10   : > { %vm3020_vm7 = vsmask.f32 4352  ;;  %s4413_s5 = smul.u32 288, %s6326_s15 }
  0x11   : > { %4409 = vmatpush.bf16.msra.mxu1 %v4348_v1  ;;  %4410 = vmatpush.bf16.msra.mxu2 %v4348_v1  ;;  %s4536_s6 = scalar_lea.vmem %s6170_s0, %s4412_s25 }
  0x12   : > { %502 = vmatpush.bf16.msra.mxu0 %v4348_v1  ;;  %v4539_v5 = vld [vmem:[%s4536_s6 + $0x30] sm:$0xff]  ;;  %v4542_v6 = vld [vmem:[%s4536_s6 + $0x38] sm:$0xff]  ;;  %v4548_v8 = vld [vmem:[%s4536_s6 + $0x60] sm:$0xff]  ;;  %4411 = vmatpush.bf16.msra.mxu3 %v4348_v1  ;;  %s5659_s10 = scalar_lea.vmem %s6174_s4, %s4413_s5 }
  0x13   : > { %v4545_v7 = vld [vmem:[%s4536_s6 + $0x58] sm:$0xff]  ;;  %v4403_v9 = vld [vmem:[%s4536_s6 + $0x8] sm:$0xf0]  ;;  %v4552_v10 = vld [vmem:[%s4536_s6 + $0x10] sm:$0xff]  ;;  %v400_v11 = vrot.slane %v4539_v5, 1  ;;  %v402_v12 = vrot.slane %v4542_v6, 1 }
  0x14   : > { %v410_v13 = vrot.slane %v4545_v7, 1  ;;  %v4404_v14 = vld [vmem:[%s4536_s6 + $0x8] sm:$0xe]  ;;  %v412_v15 = vrot.slane %v4548_v8, 1  ;;  %v392_v17 = vrot.slane %v4552_v10, 1  ;;  %v4563_v18 = vld [vmem:[%s4536_s6 + $0x80] sm:$0xff] }
  0x15   : > { %1078 = vmatpush.bf16.msrb.mxu2 %v4351_v2  ;;  %818 = vmatpush.bf16.msrb.mxu1 %v4347_v3  ;;  %v4559_v16 = vor.u32 %v4404_v14, %v4403_v9  ;;  %v403_v19 = vsel %vm390_vm0, %v400_v11, %v402_v12  ;;  %v4344_v20 = vld [vmem:[%s4536_s6 + $0x88] sm:$0xff]  ;;  %v420_v23 = vrot.slane %v4563_v18, 1  ;;  %v4590_v30 = vld [vmem:[%s4536_s6 + $0x40] sm:$0xff]  ;;  %v4596_v32 = vld [vmem:[%s4536_s6 + $0x18] sm:$0xff] }
  0x16   : > { %1832 = vmatpush.bf16.msrb.mxu0 %v4372_v4  ;;  %3942 = vmatmul.msk.bf16.vlgmr.msra.gmra.mxu1 %vm440_vm1, %v403_v19  ;;  %v413_v21 = vsel %vm390_vm0, %v410_v13, %v412_v15  ;;  %v422_v24 = vrot.slane %v4344_v20, 1  ;;  %v4593_v31 = vld [vmem:[%s4536_s6 + $0x68] sm:$0xff]  ;;  %v404_v33 = vrot.slane %v4590_v30, 1  ;;  %v4345_v34 = vld [vmem:[%s4536_s6 + $0x90] sm:$0xff]  ;;  %v394_v36 = vrot.slane %v4596_v32, 1  ;;  %v4631_v51 = vld [vmem:[%s4536_s6 + $0x20] sm:$0xff] }
  0x17   : > { %v391_v22 = vrot.slane %v4559_v16, 1  ;;  %3947 = vmatmul.msk.bf16.vlgmr.msra.gmra.mxu2 %vm440_vm1, %v413_v21  ;;  %1584 = vmatpush.bf16.msrb.mxu3 %v4370_v27  ;;  %v414_v35 = vrot.slane %v4593_v31, 1  ;;  %v424_v38 = vrot.slane %v4345_v34, 1  ;;  %v4604_v39 = vld [vmem:[%s4536_s6 + $0x50] sm:$0xff]  ;;  %v286_v45 = vld [vmem:[%s4536_s6 + $0x98] sm:$0x1] }
  0x18   : > { %v423_v26 = vsel %vm390_vm0, %v420_v23, %v422_v24  ;;  %v405_v37 = vsel %vm390_vm0, %v402_v12, %v404_v33  ;;  %v395_v41 = vsel %vm390_vm0, %v392_v17, %v394_v36  ;;  %v408_v43 = vrot.slane %v4604_v39, 1  ;;  %v4625_v48 = vld [vmem:[%s4536_s6 + $0x48] sm:$0xff]  ;;  %v4628_v50 = vld [vmem:[%s4536_s6 + $0x70] sm:$0xff]  ;;  %v4660_v4 = vld [vmem:[%s4536_s6 + $0x18] sm:$0xff] }
  0x19   : > { %v393_v25 = vsel %vm390_vm0, %v391_v22, %v392_v17  ;;  %3952 = vmatmul.msk.bf16.vlgmr.msra.gmra.mxu3 %vm440_vm1, %v423_v26  ;;  %1079 = vmatpush.bf16.msrb.mxu2 %v4350_v28  ;;  %v415_v40 = vsel %vm390_vm0, %v412_v15, %v414_v35  ;;  %v425_v42 = vsel %vm390_vm0, %v422_v24, %v424_v38  ;;  %v370_v49 = vunpack.c.l.b16 %v286_v45  ;;  %v4638_v55 = vld [vmem:[%s4536_s6 + $0x28] sm:$0xff]  ;;  %v1207_v61 = vld [vmem:[%s4536_s6 + $0x10] sm:$0xe]  ;;  %v4647_v62 = vld [vmem:[%s4536_s6 + $0x14] sm:$0xf] }
  0x1a   : > { %3937 = vmatmul.msk.bf16.vlgmr.msra.gmra.mxu0 %vm440_vm1, %v393_v25  ;;  %819 = vmatpush.bf16.msrb.mxu1 %v4346_v29  ;;  %v4621_v47 = vsel %vm390_vm0, %v408_v43, %v410_v13  ;;  %v406_v52 = vrot.slane %v4625_v48, 1  ;;  %v416_v54 = vrot.slane %v4628_v50, 1  ;;  %v396_v56 = vrot.slane %v4631_v51, 1  ;;  %v4669_v17 = vld [vmem:[%s4536_s6 + $0x78] sm:$0xff]  ;;  %v4691_v45 = vld [vmem:[%s4536_s6 + $0x20] sm:$0xff] }
  0x1b   : > { %1833 = vmatpush.bf16.msrb.mxu0 %v4371_v44  ;;  %1585 = vmatpush.bf16.msrb.mxu3 %v4369_v46  ;;  %v4634_v53 = vpack.c.b16 %v370_v49, %v370_v49  ;;  %v398_v60 = vrot.slane %v4638_v55, 1  ;;  %v1286_v0 = vunpack.c.l.b16 %v1207_v61  ;;  %v1287_v1 = vunpack.c.l.b16 %v4647_v62  ;;  %v4395_v46 = vld [vmem:[%s6171_s1 + $0x78] sm:$0xff] }
  0x1c   : > { %v407_v57 = vsel %vm390_vm0, %v404_v33, %v406_v52  ;;  %v417_v59 = vsel %vm390_vm0, %v414_v35, %v416_v54  ;;  %v397_v63 = vsel %vm390_vm0, %v394_v36, %v396_v56  ;;  %v6192_v14 = vshrl.u32 %v4660_v4, 16  ;;  %v4374_v49 = vld [vmem:[%s6171_s1 + $0x58] sm:$0xff] }
  0x1d   : > { %v426_v58 = vrot.slane %v4634_v53, 1  ;;  %v4657_v3 = vsel %vm390_vm0, %v398_v60, %v400_v11  ;;  %v1323_v9 = vpack.c.b16 %v1287_v1, %v1286_v0  ;;  %v6191_v15 = vshll.u32 %v4660_v4, 16 }
  0x1e   : > { %v606_v11 = vshll.u32 %v4552_v10, 16  ;;  %v1353_v21 = vrot.slane %v6192_v14, 1  ;;  %v418_v24 = vrot.slane %v4669_v17, 1  ;;  %v610_v25 = vshrl.u32 %v4552_v10, 16  ;;  %2128 = vmatpush.bf16.msra.mxu1 %v4374_v49 }
  0x1f   : > { %v427_v2 = vsel %vm390_vm0, %v424_v38, %v426_v58  ;;  %v1343_v12 = vshrl.u32 %v1323_v9, 16  ;;  %v1346_v13 = vshll.u32 %v1323_v9, 16  ;;  %v1356_v22 = vrot.slane %v6191_v15, 2  ;;  %2882 = vmatpush.bf16.msra.mxu3 %v4395_v46 }
  0x20   : > { %v922_v26 = vshrl.u32 %v4559_v16, 16  ;;  %v925_v27 = vshll.u32 %v4559_v16, 16  ;;  %v929_v33 = vrot.slane %v610_v25, 1  ;;  %v930_v34 = vrot.slane %v606_v11, 2 }
  0x21   : > { %v1345_v19 = vrot.slane %v1343_v12, 1  ;;  %v1348_v20 = vrot.slane %v1346_v13, 2  ;;  %v409_v35 = vsel %vm390_vm0, %v406_v52, %v408_v43  ;;  %v419_v38 = vsel %vm390_vm0, %v416_v54, %v418_v24  ;;  %v4393_v43 = vld [vmem:[%s6171_s1 + $0x68] sm:$0xff] }
  0x22   : > { %v924_v28 = vrot.slane %v922_v26, 1  ;;  %v927_v29 = vrot.slane %v925_v27, 2  ;;  %v399_v10 = vsel %vm390_vm0, %v396_v56, %v398_v60  ;;  %v608_v44 = vrot.slane %v606_v11, 1  ;;  %2634 = vmatpush.bf16.msra.mxu2 %v4393_v43  ;;  %v4397_v52 = vld [vmem:[%s6171_s1 + $0x88] sm:$0xff] }
  0x23   : > { %v1349_v36 = vor.u32 %v1348_v20, %v1345_v19  ;;  %v614_v56 = vshll.u32 %v4596_v32, 16  ;;  %v6187_v58 = vshll.u32 %v4691_v45, 16  ;;  %3178 = vmatpush.bf16.msra.mxu0 %v4397_v52  ;;  %v618_v0 = vshrl.u32 %v4596_v32, 16  ;;  %v4402_v11 = vld [vmem:[%s4536_s6 + $0x8] sm:$0xff]   ;;  %v4765_v52 = vld [vmem:[%s4536_s6 + $0x38] sm:$0xff] }
  0x24   : > { %v612_v54 = vor.u32 %v610_v25, %v608_v44  ;;  %v421_v13 = vsel %vm390_vm0, %v418_v24, %v420_v23  ;;  %v4724_v25 = vld [vmem:[%s4536_s6 + $0x28] sm:$0xff]  ;;  %v599_v23 = vshrl.u32 %v4402_v11, 16  ;;  %v622_v46 = vshll.u32 %v4631_v51, 16  ;;  %6227 = vst [vmem:[#allocation4_spill] sm:$0xff] %v4765_v52 }
  0x25   : > { %v934_v9 = vrot.slane %v614_v56, 2  ;;  %6225 = vst [vmem:[#allocation2_spill] sm:$0xff] %v4724_v25  ;;  %v6185_v26 = vshll.u32 %v4724_v25, 16  ;;  %v626_v49 = vshrl.u32 %v4631_v51, 16 }
  0x26   : > { %3943 = vmatmul.msk.bf16.gmra.mxu1 %vm440_vm1, %v405_v37  ;;  %v1357_v37 = vor.u32 %v1356_v22, %v1353_v21  ;;  %v601_v21 = vshll.u32 %v4402_v11, 16  ;;  %v1713_v22 = vld [vmem:[%s4536_s6 + $0x10] sm:$0xc] }
  0x27   : > { %3948 = vmatmul.msk.bf16.gmra.mxu2 %vm440_vm1, %v415_v40  ;;  %v928_v40 = vor.u32 %v927_v29, %v924_v28  ;;  %v1720_v18 = vunpack.c.l.b16 %v1713_v22 }
  0x28   : > { %v603_v24 = vrot.slane %v601_v21, 1 }
  0x29   : > { %3953 = vmatmul.msk.bf16.gmra.mxu3 %vm440_vm1, %v425_v42  ;;  %v1358_v42 = vsel %vm920_vm2, %v1349_v36, %v1357_v37  ;;  %v4733_v27 = vpack.c.b16 %v1287_v1, %v1720_v18  ;;  %v4785_v18 = vld [vmem:[%s4536_s6 + $0x40] sm:$0xff] }
  0x2a   : > { %3938 = vmatmul.msk.bf16.gmra.mxu0 %vm440_vm1, %v395_v41  ;;  %v931_v41 = vor.u32 %v930_v34, %v929_v33  ;;  %v604_v28 = vor.u32 %v603_v24, %v599_v23  ;;  %v1724_v34 = vrot.slane %v4660_v4, 2  ;;  %6228 = vst [vmem:[#allocation5_spill] sm:$0xff] %v4785_v18  ;;  %v6177_v23 = vshll.u32 %v4785_v18, 16 }
  0x2b   : > { %v1723_v33 = vrot.slane %v4733_v27, 2 }
  0x2c   : > { %v932_v16 = vsel %vm920_vm2, %v928_v40, %v931_v41 }
  0x2d   : > { %v1725_v62 = vsel %vm1722_vm4, %v1723_v33, %v1724_v34 }
  0x36   : > { %3944 = vmatmul.msk.bf16.gmra.mxu1 %vm440_vm1, %v407_v57  ;;  %v6190_v57 = vshrl.u32 %v4691_v45, 16 }
  0x37   : > { %3949 = vmatmul.msk.bf16.gmra.mxu2 %vm440_vm1, %v417_v59  ;;  %v616_v59 = vrot.slane %v614_v56, 1  ;;  %v6181_v56 = vshll.u32 %v4765_v52, 16 }
  0x38   : > { %v1362_v61 = vrot.slane %v6190_v57, 1 }
  0x39   : > { %3954 = vmatmul.msk.bf16.gmra.mxu3 %vm440_vm1, %v427_v2  ;;  %v617_v60 = vsel %vm597_vm3, %v612_v54, %v616_v59  ;;  %v933_v2 = vrot.slane %v618_v0, 1  ;;  %v6182_v54 = vshrl.u32 %v4765_v52, 16  ;;  %v1392_v51 = vrot.slane %v6181_v56, 2 }
  0x3a   : > { %3939 = vmatmul.msk.bf16.gmra.mxu0 %vm440_vm1, %v397_v63  ;;  %v1365_v63 = vrot.slane %v6187_v58, 2 }
  0x3b   : > { %v935_v19 = vor.u32 %v934_v9, %v933_v2  ;;  %v624_v2 = vrot.slane %v622_v46, 1  ;;  %v1389_v9 = vrot.slane %v6182_v54, 1 }
  0x3c   : > { %v1366_v12 = vor.u32 %v1365_v63, %v1362_v61  ;;  %v938_v61 = vrot.slane %v622_v46, 2  ;;  %v620_v63 = vor.u32 %v618_v0, %v616_v59  ;;  %v630_v0 = vshll.u32 %v4638_v55, 16  ;;  %v4809_v46 = vld [vmem:[%s4536_s6 + $0x48] sm:$0xff] }
  0x3d   : > { %v936_v20 = vsel %vm920_vm2, %v931_v41, %v935_v19  ;;  %6229 = vst [vmem:[#allocation6_spill] sm:$0xff] %v4809_v46 }
  0x3e   : > { %v1367_v32 = vsel %vm920_vm2, %v1357_v37, %v1366_v12  ;;  %v4747_v37 = vld [vmem:[%s4536_s6 + $0x30] sm:$0xff]  ;;  %v625_v11 = vsel %vm597_vm3, %v620_v63, %v624_v2  ;;  %v6175_v63 = vshll.u32 %v4809_v46, 16 }
  0x3f   : > { %6226 = vst [vmem:[#allocation3_spill] sm:$0xff] %v4747_v37  ;;  %v6183_v40 = vshll.u32 %v4747_v37, 16 }
  0x46   : > { %3945 = vmatmul.msk.bf16.gmra.mxu1 %vm440_vm1, %v409_v35  ;;  %v609_v35 = vsel %vm597_vm3, %v604_v28, %v608_v44  ;;  %v942_v28 = vrot.slane %v630_v0, 2 }
  0x47   : > { %3950 = vmatmul.msk.bf16.gmra.mxu2 %vm440_vm1, %v419_v38  ;;  %v6184_v38 = vshrl.u32 %v4747_v37, 16 }
  0x49   : > { %4091 = vmatmul.msk.bf16.vlgmr.msrb.gmra.mxu3 %vm440_vm1, %v1358_v42  ;;  %v1380_v41 = vrot.slane %v6184_v38, 1  ;;  %v1736_v38 = vrot.slane %v4809_v46, 2 }
  0x4a   : > { %3940 = vmatmul.msk.bf16.gmra.mxu0 %vm440_vm1, %v399_v10  ;;  %v1383_v10 = vrot.slane %v6183_v40, 2 }
  0x4c   : > { %v1384_v42 = vor.u32 %v1383_v10, %v1380_v41 }
  0x56   : > { %3946 = vmatmul.msk.bf16.gmra.mxu1 %vm440_vm1, %v4621_v47  ;;  %v6186_v47 = vshrl.u32 %v4724_v25, 16 }
  0x57   : > { %3951 = vmatmul.msk.bf16.gmra.mxu2 %vm440_vm1, %v421_v13  ;;  %v1728_v13 = vrot.slane %v4724_v25, 2 }
  0x58   : > { %v1371_v29 = vrot.slane %v6186_v47, 1 }
  0x59   : > { %4092 = vmatmul.msk.bf16.gmra.mxu3 %vm440_vm1, %v1367_v32  ;;  %v634_v32 = vshrl.u32 %v4638_v55, 16  ;;  %v1401_v55 = vrot.slane %v6177_v23, 2 }
  0x5a   : > { %3941 = vmatmul.msk.bf16.gmra.mxu0 %vm440_vm1, %v4657_v3  ;;  %v1374_v3 = vrot.slane %v6185_v26, 2 }
  0x5b   : > { %v941_v24 = vrot.slane %v634_v32, 1 }
  0x5c   : > { %v1375_v36 = vor.u32 %v1374_v3, %v1371_v29  ;;  %v628_v29 = vor.u32 %v626_v49, %v624_v2  ;;  %v632_v3 = vrot.slane %v630_v0, 1 }
  0x5e   : > { %v1376_v1 = vsel %vm920_vm2, %v1366_v12, %v1375_v36  ;;  %v1385_v43 = vsel %vm920_vm2, %v1375_v36, %v1384_v42 }
  0x66   : > { %3963 = vmatmul.msk.bf16.vlgmr.msrb.gmra.mxu1 %vm440_vm1, %v609_v35  ;;  %v1730_v35 = vrot.slane %v4747_v37, 2 }
  0x67   : > { %3993 = vmatmul.msk.bf16.vlgmr.msrb.gmra.mxu2 %vm440_vm1, %v932_v16  ;;  %v1726_v16 = vrot.slane %v4691_v45, 2 }
  0x69   : > { %4093 = vmatmul.msk.bf16.gmra.mxu3 %vm440_vm1, %v1376_v1  ;;  %v1727_v44 = vsel %vm1722_vm4, %v1724_v34, %v1726_v16  ;;  %v1729_v22 = vsel %vm1722_vm4, %v1726_v16, %v1728_v13  ;;  %v943_v34 = vor.u32 %v942_v28, %v941_v24  ;;  %v1731_v16 = vsel %vm1722_vm4, %v1728_v13, %v1730_v35 }
  0x6a   : > { %4121 = vmatmul.msk.bf16.vlgmr.msrb.gmra.mxu0 %vm440_vm1, %v1725_v62  ;;  %v633_v62 = vsel %vm597_vm3, %v628_v29, %v632_v3 }
  0x76   : > { %3964 = vmatmul.msk.bf16.gmra.mxu1 %vm440_vm1, %v617_v60  ;;  %v937_v60 = vrot.slane %v626_v49, 1 }
  0x77   : > { %3994 = vmatmul.msk.bf16.gmra.mxu2 %vm440_vm1, %v936_v20  ;;  %v1393_v20 = vor.u32 %v1392_v51, %v1389_v9 }
  0x78   : > { %v939_v12 = vor.u32 %v938_v61, %v937_v60  ;;  %v6176_v61 = vshrl.u32 %v4809_v46, 16 }
  0x79   : > { %4094 = vmatmul.msk.bf16.gmra.mxu3 %vm440_vm1, %v1385_v43  ;;  %v1394_v59 = vsel %vm920_vm2, %v1384_v42, %v1393_v20  ;;  %v642_v43 = vshrl.u32 %v4539_v5, 16 }
  0x7a   : > { %4122 = vmatmul.msk.bf16.gmra.mxu0 %vm440_vm1, %v1727_v44  ;;  %v940_v21 = vsel %vm920_vm2, %v935_v19, %v939_v12  ;;  %v6180_v19 = vshrl.u32 %v4785_v18, 16  ;;  %v944_v41 = vsel %vm920_vm2, %v939_v12, %v943_v34  ;;  %v638_v44 = vshll.u32 %v4539_v5, 16 }
  0x7b   : > { %v945_v2 = vrot.slane %v642_v43, 1  ;;  %v636_v5 = vor.u32 %v634_v32, %v632_v3 }
  0x7c   : > { %v1398_v33 = vrot.slane %v6180_v19, 1  ;;  %v946_v9 = vrot.slane %v638_v44, 2  ;;  %v640_v13 = vrot.slane %v638_v44, 1 }
  0x7e   : > { %v1402_v1 = vor.u32 %v1401_v55, %v1398_v33  ;;  %v641_v24 = vsel %vm597_vm3, %v636_v5, %v640_v13 }
  0x80   : > { %v1403_v42 = vsel %vm920_vm2, %v1393_v20, %v1402_v1  ;;  %v1410_v20 = vrot.slane %v6175_v63, 2 }
  0x86   : > { %3965 = vmatmul.msk.bf16.gmra.mxu1 %vm440_vm1, %v625_v11  ;;  %v1407_v11 = vrot.slane %v6176_v61, 1 }
  0x87   : > { %3995 = vmatmul.msk.bf16.gmra.mxu2 %vm440_vm1, %v940_v21  ;;  %v947_v21 = vor.u32 %v946_v9, %v945_v2 }
  0x88   : > { %v1411_v28 = vor.u32 %v1410_v20, %v1407_v11 }
  0x89   : > { %4095 = vmatmul.msk.bf16.gmra.mxu3 %vm440_vm1, %v1394_v59  ;;  %v1732_v59 = vrot.slane %v4765_v52, 2  ;;  %v948_v32 = vsel %vm920_vm2, %v943_v34, %v947_v21 }
  0x8a   : > { %4123 = vmatmul.msk.bf16.gmra.mxu0 %vm440_vm1, %v1729_v22  ;;  %v1412_v55 = vsel %vm920_vm2, %v1402_v1, %v1411_v28 }
  0x8b   : > { %v1733_v33 = vsel %vm1722_vm4, %v1730_v35, %v1732_v59 }
  0x93   : > { %v4796_v36 = vpop.f32.mrf.mxu1 }
  0x96   : > { %3966 = vmatmul.msk.bf16.gmra.mxu1 %vm440_vm1, %v633_v62  ;;  %v646_v62 = vshll.u32 %v4542_v6, 16 }
  0x97   : > { %v4800_v10 = vpop.f32.mrf.mxu0  ;;  %3996 = vmatmul.msk.bf16.gmra.mxu2 %vm440_vm1, %v944_v41  ;;  %v650_v41 = vshrl.u32 %v4542_v6, 16  ;;  %v644_v6 = vor.u32 %v642_v43, %v640_v13 }
  0x98   : > { %v950_v1 = vrot.slane %v646_v62, 2  ;;  %v648_v11 = vrot.slane %v646_v62, 1 }
  0x99   : > { %4096 = vmatmul.msk.bf16.gmra.mxu3 %vm440_vm1, %v1403_v42  ;;  %v949_v2 = vrot.slane %v650_v41, 1 }
  0x9a   : > { %4124 = vmatmul.msk.bf16.gmra.mxu0 %vm440_vm1, %v1731_v16  ;;  %v4812_v49 = vpop.f32.mrf.mxu2  ;;  %v4845_v16 = vld [vmem:[%s4536_s6 + $0x50] sm:$0xff]  ;;  %v649_v61 = vsel %vm597_vm3, %v644_v6, %v648_v11  ;;  %v4881_v6 = vld [vmem:[%s4536_s6 + $0x58] sm:$0xff] }
  0x9b   : > { %v4815_v60 = vpop.f32.mrf.mxu1  ;;  %6232 = vst [vmem:[#allocation9_spill] sm:$0xff] %v4845_v16  ;;  %v6179_v35 = vshrl.u32 %v4845_v16, 16  ;;  %v6178_v44 = vshll.u32 %v4845_v16, 16  ;;  %v1740_v52 = vrot.slane %v4881_v6, 2 }
  0x9c   : > { %v4819_v51 = vpop.f32.mrf.mxu3  ;;  %6236 = vst [vmem:[#allocation13_spill] sm:$0xff] %v4881_v6 }
  0x9d   : > { %6230 = vst [vmem:[#allocation7_spill] sm:$0xff] %v4819_v51  ;;  %v1416_v20 = vrot.slane %v6179_v35, 1  ;;  %v658_v35 = vshrl.u32 %v4590_v30, 16 }
  0x9f   : > { %v4821_v12 = vpop.f32.mrf.mxu0 }
  0xa2   : > { %v4827_v22 = vpop.f32.mrf.mxu2 }
  0xa3   : > { %v4830_v0 = vpop.f32.mrf.mxu1 }
  0xa4   : > { %v4834_v29 = vpop.f32.mrf.mxu3 }
  0xa5   : > { %6231 = vst [vmem:[#allocation8_spill] sm:$0xff] %v4834_v29 }
  0xa6   : > { %3967 = vmatmul.msk.bf16.gmra.mxu1 %vm440_vm1, %v641_v24  ;;  %v1419_v24 = vrot.slane %v6178_v44, 2 }
  0xa7   : > { %v4836_v3 = vpop.f32.mrf.mxu0  ;;  %3997 = vmatmul.msk.bf16.gmra.mxu2 %vm440_vm1, %v948_v32  ;;  %v951_v32 = vor.u32 %v950_v1, %v949_v2  ;;  %v654_v1 = vshll.u32 %v4590_v30, 16  ;;  %v652_v30 = vor.u32 %v650_v41, %v648_v11 }
  0xa8   : > { %v1420_v23 = vor.u32 %v1419_v24, %v1416_v20  ;;  %v953_v24 = vrot.slane %v658_v35, 1 }
  0xa9   : > { %4097 = vmatmul.msk.bf16.gmra.mxu3 %vm440_vm1, %v1412_v55  ;;  %v1734_v55 = vrot.slane %v4785_v18, 2  ;;  %v952_v43 = vsel %vm920_vm2, %v947_v21, %v951_v32  ;;  %v656_v56 = vrot.slane %v654_v1, 1 }
  0xaa   : > { %4125 = vmatmul.msk.bf16.gmra.mxu0 %vm440_vm1, %v1733_v33  ;;  %v4848_v34 = vpop.f32.mrf.mxu2  ;;  %v1421_v2 = vsel %vm920_vm2, %v1411_v28, %v1420_v23  ;;  %v954_v28 = vrot.slane %v654_v1, 2 }
  0xab   : > { %v4851_v42 = vpop.f32.mrf.mxu1  ;;  %v1735_v44 = vsel %vm1722_vm4, %v1732_v59, %v1734_v55  ;;  %v6188_v59 = vshll.u32 %v4881_v6, 16  ;;  %v657_v47 = vsel %vm597_vm3, %v652_v30, %v656_v56  ;;  %v4917_v30 = vld [vmem:[%s4536_s6 + $0x60] sm:$0xff] }
  0xac   : > { %v4855_v9 = vpop.f32.mrf.mxu3  ;;  %v955_v54 = vor.u32 %v954_v28, %v953_v24  ;;  %v662_v28 = vshll.u32 %v4625_v48, 16 }
  0xad   : > { %6233 = vst [vmem:[#allocation10_spill] sm:$0xff] %v4855_v9 }
  0xae   : > { %v956_v41 = vsel %vm920_vm2, %v951_v32, %v955_v54  ;;  %v664_v15 = vrot.slane %v662_v28, 1 }
  0xaf   : > { %v4857_v5 = vpop.f32.mrf.mxu0 }
  0xb2   : > { %v4863_v33 = vpop.f32.mrf.mxu2 }
  0xb3   : > { %6234 = vst [vmem:[#allocation11_spill] sm:$0xff] %v4863_v33  ;;  %v4866_v63 = vpop.f32.mrf.mxu1  ;;  %v1742_v33 = vrot.slane %v4917_v30, 2 }
  0xb4   : > { %v4870_v13 = vpop.f32.mrf.mxu3 }
  0xb5   : > { %6235 = vst [vmem:[#allocation12_spill] sm:$0xff] %v4870_v13 }
  0xb6   : > { %3968 = vmatmul.msk.bf16.gmra.mxu1 %vm440_vm1, %v649_v61  ;;  %v6189_v61 = vshrl.u32 %v4881_v6, 16 }
  0xb7   : > { %v4872_v62 = vpop.f32.mrf.mxu0  ;;  %3998 = vmatmul.msk.bf16.gmra.mxu2 %vm440_vm1, %v952_v43 }
  0xb9   : > { %4098 = vmatmul.msk.bf16.gmra.mxu3 %vm440_vm1, %v1421_v2  ;;  %v1428_v2 = vrot.slane %v6188_v59, 2  ;;  %v1737_v59 = vsel %vm1722_vm4, %v1734_v55, %v1736_v38  ;;  %v6193_v55 = vshll.u32 %v4917_v30, 16 }
  0xba   : > { %4126 = vmatmul.msk.bf16.gmra.mxu0 %vm440_vm1, %v1735_v44  ;;  %v4884_v21 = vpop.f32.mrf.mxu2  ;;  %v1425_v44 = vrot.slane %v6189_v61, 1  ;;  %v666_v61 = vshrl.u32 %v4625_v48, 16  ;;  %v660_v48 = vor.u32 %v658_v35, %v656_v56 }
  0xbb   : > { %6237 = vst [vmem:[#allocation14_spill] sm:$0xff] %v4884_v21  ;;  %v4887_v20 = vpop.f32.mrf.mxu1 }
  0xbc   : > { %v4891_v43 = vpop.f32.mrf.mxu3  ;;  %v1429_v58 = vor.u32 %v1428_v2, %v1425_v44  ;;  %v957_v2 = vrot.slane %v666_v61, 1  ;;  %v665_v9 = vsel %vm597_vm3, %v660_v48, %v664_v15  ;;  %v670_v48 = vshll.u32 %v4604_v39, 16 }
  0xbd   : > { %6238 = vst [vmem:[#allocation15_spill] sm:$0xff] %v4891_v43  ;;  %v1738_v43 = vrot.slane %v4845_v16, 2  ;;  %v668_v46 = vor.u32 %v666_v61, %v664_v15 }
  0xbe   : > { %v1430_v24 = vsel %vm920_vm2, %v1420_v23, %v1429_v58  ;;  %v958_v23 = vrot.slane %v662_v28, 2 }
  0xbf   : > { %v4893_v19 = vpop.f32.mrf.mxu0 }
  0xc0   : > { %v959_v14 = vor.u32 %v958_v23, %v957_v2  ;;  %v1739_v2 = vsel %vm1722_vm4, %v1736_v38, %v1738_v43  ;;  %v4394_v38 = vld [vmem:[%s6171_s1 + $0x70] sm:$0xff] }
  0xc1   : > { %2883 = vmatpush.bf16.msra.mxu3 %v4394_v38  ;;  %v672_v38 = vrot.slane %v670_v48, 1 }
  0xc2   : > { %v4899_v40 = vpop.f32.mrf.mxu2  ;;  %v960_v56 = vsel %vm920_vm2, %v955_v54, %v959_v14  ;;  %v674_v54 = vshrl.u32 %v4604_v39, 16 }
  0xc3   : > { %6239 = vst [vmem:[#allocation16_spill] sm:$0xff] %v4899_v40  ;;  %v4902_v26 = vpop.f32.mrf.mxu1  ;;  %v673_v40 = vsel %vm597_vm3, %v668_v46, %v672_v38 }
  0xc4   : > { %v4906_v11 = vpop.f32.mrf.mxu3 }
  0xc5   : > { %6240 = vst [vmem:[#allocation17_spill] sm:$0xff] %v4906_v11 }
  0xc6   : > { %3969 = vmatmul.msk.bf16.gmra.mxu1 %vm440_vm1, %v657_v47  ;;  %v6194_v47 = vshrl.u32 %v4917_v30, 16 }
  0xc7   : > { %v4908_v1 = vpop.f32.mrf.mxu0  ;;  %3999 = vmatmul.msk.bf16.gmra.mxu2 %vm440_vm1, %v956_v41 }
  0xc9   : > { %4099 = vmatmul.msk.bf16.gmra.mxu3 %vm440_vm1, %v1430_v24  ;;  %v1437_v24 = vrot.slane %v6193_v55, 2  ;;  %v4392_v55 = vld [vmem:[%s6171_s1 + $0x60] sm:$0xff] }
  0xca   : > { %4127 = vmatmul.msk.bf16.gmra.mxu0 %vm440_vm1, %v1737_v59  ;;  %v4920_v32 = vpop.f32.mrf.mxu2  ;;  %v1434_v59 = vrot.slane %v6194_v47, 1  ;;  %2635 = vmatpush.bf16.msra.mxu2 %v4392_v55  ;;  %v962_v47 = vrot.slane %v670_v48, 2  ;;  %v4373_v55 = vld [vmem:[%s6171_s1 + $0x50] sm:$0xff] }
  0xcb   : > { %6241 = vst [vmem:[#allocation18_spill] sm:$0xff] %v4920_v32  ;;  %v4923_v44 = vpop.f32.mrf.mxu1  ;;  %2129 = vmatpush.bf16.msra.mxu1 %v4373_v55  ;;  %v682_v55 = vshrl.u32 %v4545_v7, 16 }
  0xcc   : > { %v4927_v41 = vpop.f32.mrf.mxu3  ;;  %v1438_v29 = vor.u32 %v1437_v24, %v1434_v59  ;;  %v4956_v59 = vld [vmem:[%s4536_s6 + $0x68] sm:$0xff] }
  0xcd   : > { %v6205_v24 = vshrl.u32 %v4956_v59, 16  ;;  %v6244_v51 = vshll.u32 %v4956_v59, 16 }
  0xce   : > { %v1439_v23 = vsel %vm920_vm2, %v1429_v58, %v1438_v29 }
  0xcf   : > { %v4929_v57 = vpop.f32.mrf.mxu0  ;;  %v1443_v39 = vrot.slane %v6205_v24, 1  ;;  %v1446_v18 = vrot.slane %v6244_v51, 2  ;;  %v1741_v51 = vsel %vm1722_vm4, %v1738_v43, %v1740_v52 }
  0xd1   : > { %v1447_v37 = vor.u32 %v1446_v18, %v1443_v39 }
  0xd2   : > { %v4935_v11 = vpop.f32.mrf.mxu2 }
  0xd3   : > { %6242 = vst [vmem:[#allocation19_spill] sm:$0xff] %v4935_v11  ;;  %v4938_v13 = vpop.f32.mrf.mxu1 }
  0xd4   : > { %v4942_v35 = vpop.f32.mrf.mxu3 }
  0xd6   : > { %3970 = vmatmul.msk.bf16.gmra.mxu1 %vm440_vm1, %v665_v9 }
  0xd7   : > { %v4944_v28 = vpop.f32.mrf.mxu0  ;;  %4000 = vmatmul.msk.bf16.gmra.mxu2 %vm440_vm1, %v960_v56  ;;  %v961_v56 = vrot.slane %v674_v54, 1 }
  0xd9   : > { %4100 = vmatmul.msk.bf16.gmra.mxu3 %vm440_vm1, %v1439_v23  ;;  %v4396_v23 = vld [vmem:[%s6171_s1 + $0x80] sm:$0xff] }
  0xda   : > { %4128 = vmatmul.msk.bf16.gmra.mxu0 %vm440_vm1, %v1739_v2  ;;  %v4962_v9 = vpop.f32.mrf.mxu2 }
  0xdb   : > { %6243 = vst [vmem:[#allocation20_spill] sm:$0xff] %v4962_v9  ;;  %v4965_v58 = vpop.f32.mrf.mxu1  ;;  %v963_v9 = vor.u32 %v962_v47, %v961_v56  ;;  %3179 = vmatpush.bf16.msra.mxu0 %v4396_v23  ;;  %v1448_v47 = vsel %vm920_vm2, %v1438_v29, %v1447_v37  ;;  %v678_v56 = vshll.u32 %v4545_v7, 16  ;;  %v4997_v23 = vld [vmem:[%s4536_s6 + $0x70] sm:$0xff]  ;;  %v965_v29 = vrot.slane %v682_v55, 1 }
  0xdc   : > { %v4969_v16 = vpop.f32.mrf.mxu3  ;;  %v6208_v43 = vshrl.u32 %v4997_v23, 16  ;;  %v6212_v39 = vshll.u32 %v4997_v23, 16 }
  0xdd   : > { %v964_v15 = vsel %vm920_vm2, %v959_v14, %v963_v9 }
  0xdf   : > { %v4974_v2 = vpop.f32.mrf.mxu0 }
  0xe2   : > { %v4983_v11 = vpop.f32.mrf.mxu2 }
  0xe3   : > { %6245 = vst [vmem:[#allocation21_spill] sm:$0xff] %v4983_v11  ;;  %v821_v32 = vpop.f32.mrf.mxu1  ;;  %v676_v11 = vor.u32 %v674_v54, %v672_v38 }
  0xe4   : > { %v4988_v61 = vpop.f32.mrf.mxu3  ;;  %v822_v18 = vadd.f32 %v821_v32, %v4800_v10  ;;  %v680_v10 = vrot.slane %v678_v56, 1  ;;  %v1452_v32 = vrot.slane %v6208_v43, 1 }
  0xe6   : > { %3971 = vmatmul.msk.bf16.gmra.mxu1 %vm440_vm1, %v673_v40  ;;  %v681_v54 = vsel %vm597_vm3, %v676_v11, %v680_v10  ;;  %v686_v11 = vshll.u32 %v4548_v8, 16 }
  0xe7   : > { %v1835_v48 = vpop.f32.mrf.mxu0  ;;  %4001 = vmatmul.msk.bf16.gmra.mxu2 %vm440_vm1, %v964_v15  ;;  %v966_v15 = vrot.slane %v678_v56, 2 }
  0xe9   : > { %4101 = vmatmul.msk.bf16.gmra.mxu3 %vm440_vm1, %v1448_v47 }
  0xea   : > { %4129 = vmatmul.msk.bf16.gmra.mxu0 %vm440_vm1, %v1741_v51  ;;  %v1081_v14 = vpop.f32.mrf.mxu2  ;;  %v1455_v51 = vrot.slane %v6212_v39, 2 }
  0xeb   : > { %v1171_v40 = vadd.f32 %v1081_v14, %v822_v18  ;;  %v823_v46 = vpop.f32.mrf.mxu1  ;;  %v967_v18 = vor.u32 %v966_v15, %v965_v29 }
  0xec   : > { %v5005_v7 = vpop.f32.mrf.mxu3  ;;  %v824_v14 = vadd.f32 %v823_v46, %v4821_v12  ;;  %v1456_v38 = vor.u32 %v1455_v51, %v1452_v32  ;;  %v1743_v12 = vsel %vm1722_vm4, %v1740_v52, %v1742_v33  ;;  %v690_v46 = vshrl.u32 %v4548_v8, 16 }
  0xed   : > { %v1677_v24 = vadd.f32 %v4927_v41, %v1171_v40  ;;  %v968_v56 = vsel %vm920_vm2, %v963_v9, %v967_v18  ;;  %v5029_v9 = vld [vmem:[%s4536_s6 + $0x78] sm:$0xff] }
  0xee   : > { %v6211_v32 = vshrl.u32 %v5029_v9, 16 }
  0xef   : > { %v1837_v6 = vpop.f32.mrf.mxu0  ;;  %v5011_v47 = vadd.f32 %v1835_v48, %v1677_v24  ;;  %v1457_v48 = vsel %vm920_vm2, %v1447_v37, %v1456_v38  ;;  %v6214_v37 = vshll.u32 %v5029_v9, 16 }
  0xf2   : > { %v1083_v21 = vpop.f32.mrf.mxu2 }
  0xf3   : > { %v1172_v41 = vadd.f32 %v1083_v21, %v824_v14  ;;  %v826_v40 = vpop.f32.mrf.mxu1 }
  0xf4   : > { %v5018_v25 = vpop.f32.mrf.mxu3 }
  0xf5   : > { %v1678_v43 = vadd.f32 %v4942_v35, %v1172_v41  ;;  %v827_v35 = vadd.f32 %v826_v40, %v4836_v3  ;;  %v684_v41 = vor.u32 %v682_v55, %v680_v10  ;;  %v688_v3 = vrot.slane %v686_v11, 1 }
  0xf6   : > { %3972 = vmatmul.msk.bf16.gmra.mxu1 %vm440_vm1, %v681_v54  ;;  %v1461_v40 = vrot.slane %v6211_v32, 1  ;;  %v1464_v54 = vrot.slane %v6214_v37, 2 }
  0xf7   : > { %v1840_v24 = vpop.f32.mrf.mxu0  ;;  %4002 = vmatmul.msk.bf16.gmra.mxu2 %vm440_vm1, %v968_v56  ;;  %v5024_v21 = vadd.f32 %v1837_v6, %v1678_v43  ;;  %v969_v6 = vrot.slane %v690_v46, 1  ;;  %v970_v43 = vrot.slane %v686_v11, 2  ;;  %v689_v55 = vsel %vm597_vm3, %v684_v41, %v688_v3 }
  0xf8   : > { %v1465_v10 = vor.u32 %v1464_v54, %v1461_v40 }
  0xf9   : > { %4102 = vmatmul.msk.bf16.gmra.mxu3 %vm440_vm1, %v1457_v48 }
  0xfa   : > { %4130 = vmatmul.msk.bf16.gmra.mxu0 %vm440_vm1, %v1743_v12  ;;  %v1086_v29 = vpop.f32.mrf.mxu2  ;;  %v971_v12 = vor.u32 %v970_v43, %v969_v6  ;;  %v694_v43 = vshll.u32 %v4593_v31, 16 }
  0xfb   : > { %v1173_v52 = vadd.f32 %v1086_v29, %v827_v35  ;;  %v828_v15 = vpop.f32.mrf.mxu1  ;;  %v1744_v29 = vrot.slane %v4956_v59, 2 }
  0xfc   : > { %v5037_v8 = vpop.f32.mrf.mxu3  ;;  %v829_v48 = vadd.f32 %v828_v15, %v4857_v5  ;;  %v972_v11 = vsel %vm920_vm2, %v967_v18, %v971_v12  ;;  %v1466_v15 = vsel %vm920_vm2, %v1456_v38, %v1465_v10  ;;  %v5061_v18 = vld [vmem:[%s4536_s6 + $0x80] sm:$0xff] }
  0xfd   : > { %v1679_v51 = vadd.f32 %v4969_v16, %v1173_v52  ;;  %v1745_v5 = vsel %vm1722_vm4, %v1742_v33, %v1744_v29  ;;  %v6213_v54 = vshrl.u32 %v5061_v18, 16  ;;  %v6216_v38 = vshll.u32 %v5061_v18, 16 }
  0xff   : > { %v1842_v14 = vpop.f32.mrf.mxu0  ;;  %v5043_v56 = vadd.f32 %v1840_v24, %v1679_v51  ;;  %v698_v51 = vshrl.u32 %v4593_v31, 16 }
 0x102   : > { %v1088_v35 = vpop.f32.mrf.mxu2 }
 0x103   : > { %v1174_v16 = vadd.f32 %v1088_v35, %v829_v48  ;;  %v831_v52 = vpop.f32.mrf.mxu1 }
 0x104   : > { %v5050_v39 = vpop.f32.mrf.mxu3 }
 0x105   : > { %v1680_v32 = vadd.f32 %v4988_v61, %v1174_v16  ;;  %v832_v61 = vadd.f32 %v831_v52, %v4872_v62  ;;  %v692_v16 = vor.u32 %v690_v46, %v688_v3  ;;  %v696_v62 = vrot.slane %v694_v43, 1 }
 0x106   : > { %3973 = vmatmul.msk.bf16.gmra.mxu1 %vm440_vm1, %v689_v55  ;;  %v1470_v52 = vrot.slane %v6213_v54, 1  ;;  %v1473_v55 = vrot.slane %v6216_v38, 2 }
 0x107   : > { %v1845_v24 = vpop.f32.mrf.mxu0  ;;  %4003 = vmatmul.msk.bf16.gmra.mxu2 %vm440_vm1, %v972_v11  ;;  %v5056_v6 = vadd.f32 %v1842_v14, %v1680_v32  ;;  %v973_v32 = vrot.slane %v698_v51, 1  ;;  %v974_v14 = vrot.slane %v694_v43, 2  ;;  %v697_v46 = vsel %vm597_vm3, %v692_v16, %v696_v62 }
 0x108   : > { %v1474_v3 = vor.u32 %v1473_v55, %v1470_v52 }
 0x109   : > { %4103 = vmatmul.msk.bf16.gmra.mxu3 %vm440_vm1, %v1466_v15 }
 0x10a   : > { %4131 = vmatmul.msk.bf16.gmra.mxu0 %vm440_vm1, %v1745_v5  ;;  %v1091_v41 = vpop.f32.mrf.mxu2  ;;  %v975_v5 = vor.u32 %v974_v14, %v973_v32  ;;  %v702_v14 = vshll.u32 %v4628_v50, 16 }
 0x10b   : > { %v1175_v33 = vadd.f32 %v1091_v41, %v832_v61  ;;  %v833_v40 = vpop.f32.mrf.mxu1  ;;  %v1746_v41 = vrot.slane %v4997_v23, 2 }
 0x10c   : > { %v5069_v31 = vpop.f32.mrf.mxu3  ;;  %v834_v15 = vadd.f32 %v833_v40, %v4893_v19  ;;  %v976_v43 = vsel %vm920_vm2, %v971_v12, %v975_v5  ;;  %v1475_v40 = vsel %vm920_vm2, %v1465_v10, %v1474_v3  ;;  %v5093_v12 = vld [vmem:[%s4536_s6 + $0x88] sm:$0xff] }
 0x10d   : > { %v1681_v48 = vadd.f32 %v5005_v7, %v1175_v33  ;;  %v1747_v19 = vsel %vm1722_vm4, %v1744_v29, %v1746_v41  ;;  %6246 = vst [vmem:[#allocation22_spill] sm:$0xff] %v5093_v12  ;;  %v6215_v55 = vshrl.u32 %v5093_v12, 16  ;;  %v6219_v10 = vshll.u32 %v5093_v12, 16 }
 0x10f   : > { %v1847_v35 = vpop.f32.mrf.mxu0  ;;  %v5075_v11 = vadd.f32 %v1845_v24, %v1681_v48  ;;  %v706_v48 = vshrl.u32 %v4628_v50, 16 }
 0x112   : > { %v1093_v61 = vpop.f32.mrf.mxu2 }
 0x113   : > { %v1176_v7 = vadd.f32 %v1093_v61, %v834_v15  ;;  %v836_v33 = vpop.f32.mrf.mxu1 }
 0x114   : > { %v5082_v37 = vpop.f32.mrf.mxu3 }
 0x115   : > { %v1682_v54 = vadd.f32 %v5018_v25, %v1176_v7  ;;  %v837_v25 = vadd.f32 %v836_v33, %v4908_v1  ;;  %v700_v7 = vor.u32 %v698_v51, %v696_v62  ;;  %v704_v1 = vrot.slane %v702_v14, 1 }
 0x116   : > { %3974 = vmatmul.msk.bf16.gmra.mxu1 %vm440_vm1, %v697_v46  ;;  %v1479_v33 = vrot.slane %v6215_v55, 1  ;;  %v1482_v46 = vrot.slane %v6219_v10, 2 }
 0x117   : > { %v1850_v24 = vpop.f32.mrf.mxu0  ;;  %4004 = vmatmul.msk.bf16.gmra.mxu2 %vm440_vm1, %v976_v43  ;;  %v5088_v32 = vadd.f32 %v1847_v35, %v1682_v54  ;;  %v977_v54 = vrot.slane %v706_v48, 1  ;;  %v978_v35 = vrot.slane %v702_v14, 2  ;;  %v705_v51 = vsel %vm597_vm3, %v700_v7, %v704_v1 }
 0x118   : > { %v1483_v62 = vor.u32 %v1482_v46, %v1479_v33 }
 0x119   : > { %4104 = vmatmul.msk.bf16.gmra.mxu3 %vm440_vm1, %v1475_v40 }
 0x11a   : > { %4132 = vmatmul.msk.bf16.gmra.mxu0 %vm440_vm1, %v1747_v19  ;;  %v1096_v16 = vpop.f32.mrf.mxu2  ;;  %v979_v19 = vor.u32 %v978_v35, %v977_v54  ;;  %v710_v35 = vshll.u32 %v4669_v17, 16 }
 0x11b   : > { %v1177_v29 = vadd.f32 %v1096_v16, %v837_v25  ;;  %v838_v52 = vpop.f32.mrf.mxu1  ;;  %v1748_v16 = vrot.slane %v5029_v9, 2 }
 0x11c   : > { %v5101_v50 = vpop.f32.mrf.mxu3  ;;  %v839_v40 = vadd.f32 %v838_v52, %v4929_v57  ;;  %v980_v14 = vsel %vm920_vm2, %v975_v5, %v979_v19  ;;  %v1484_v52 = vsel %vm920_vm2, %v1474_v3, %v1483_v62  ;;  %v5125_v5 = vld [vmem:[%s4536_s6 + $0x90] sm:$0xff] }
 0x11d   : > { %v1683_v15 = vadd.f32 %v5037_v8, %v1177_v29  ;;  %v1749_v57 = vsel %vm1722_vm4, %v1746_v41, %v1748_v16  ;;  %v6217_v46 = vshrl.u32 %v5125_v5, 16  ;;  %v6218_v3 = vshll.u32 %v5125_v5, 16 }
 0x11f   : > { %v1852_v61 = vpop.f32.mrf.mxu0  ;;  %v5107_v43 = vadd.f32 %v1850_v24, %v1683_v15  ;;  %v714_v15 = vshrl.u32 %v4669_v17, 16 }
 0x122   : > { %v1098_v25 = vpop.f32.mrf.mxu2 }
 0x123   : > { %v1178_v8 = vadd.f32 %v1098_v25, %v839_v40  ;;  %v841_v29 = vpop.f32.mrf.mxu1 }
 0x124   : > { %v5114_v38 = vpop.f32.mrf.mxu3 }
 0x125   : > { %v1684_v55 = vadd.f32 %v5050_v39, %v1178_v8  ;;  %v842_v39 = vadd.f32 %v841_v29, %v4944_v28  ;;  %v708_v8 = vor.u32 %v706_v48, %v704_v1  ;;  %v712_v28 = vrot.slane %v710_v35, 1 }
 0x126   : > { %3975 = vmatmul.msk.bf16.gmra.mxu1 %vm440_vm1, %v705_v51  ;;  %v1488_v29 = vrot.slane %v6217_v46, 1  ;;  %v1491_v51 = vrot.slane %v6218_v3, 2 }
 0x127   : > { %v1855_v24 = vpop.f32.mrf.mxu0  ;;  %4005 = vmatmul.msk.bf16.gmra.mxu2 %vm440_vm1, %v980_v14  ;;  %v5120_v54 = vadd.f32 %v1852_v61, %v1684_v55  ;;  %v981_v55 = vrot.slane %v714_v15, 1  ;;  %v982_v61 = vrot.slane %v710_v35, 2  ;;  %v713_v48 = vsel %vm597_vm3, %v708_v8, %v712_v28 }
 0x128   : > { %v1492_v1 = vor.u32 %v1491_v51, %v1488_v29  ;;  %v5156_v29 = vld [vmem:[%s4536_s6 + $0x98] sm:$0xff] }
 0x129   : > { %4105 = vmatmul.msk.bf16.gmra.mxu3 %vm440_vm1, %v1484_v52 }
 0x12a   : > { %4133 = vmatmul.msk.bf16.gmra.mxu0 %vm440_vm1, %v1749_v57  ;;  %v1101_v7 = vpop.f32.mrf.mxu2  ;;  %v983_v57 = vor.u32 %v982_v61, %v981_v55  ;;  %v4443_v61 = vld [vmem:[%s4536_s6 + $0x80] sm:$0xff] }
 0x12b   : > { %v1179_v41 = vadd.f32 %v1101_v7, %v842_v39  ;;  %v843_v33 = vpop.f32.mrf.mxu1  ;;  %v722_v8 = vshrl.u32 %v4443_v61, 16 }
 0x12c   : > { %v5133_v17 = vpop.f32.mrf.mxu3  ;;  %v844_v52 = vadd.f32 %v843_v33, %v4974_v2  ;;  %v984_v35 = vsel %vm920_vm2, %v979_v19, %v983_v57  ;;  %v1493_v33 = vsel %vm920_vm2, %v1483_v62, %v1492_v1  ;;  %v6221_v62 = vshll.u32 %v5156_v29, 16 }
 0x12d   : > { %v1685_v40 = vadd.f32 %v5069_v31, %v1179_v41  ;;  %v1750_v31 = vrot.slane %v5061_v18, 2 }
 0x12f   : > { %v1857_v25 = vpop.f32.mrf.mxu0  ;;  %v5139_v14 = vadd.f32 %v1855_v24, %v1685_v40  ;;  %v1751_v2 = vsel %vm1722_vm4, %v1748_v16, %v1750_v31  ;;  %v718_v40 = vshll.u32 %v4443_v61, 16 }
 0x132   : > { %v1103_v39 = vpop.f32.mrf.mxu2 }
 0x133   : > { %v1180_v7 = vadd.f32 %v1103_v39, %v844_v52  ;;  %v846_v41 = vpop.f32.mrf.mxu1  ;;  %v6220_v52 = vshrl.u32 %v5156_v29, 16 }
 0x134   : > { %v5146_v3 = vpop.f32.mrf.mxu3 }
 0x135   : > { %v1686_v46 = vadd.f32 %v5082_v37, %v1180_v7  ;;  %v847_v37 = vadd.f32 %v846_v41, %v4796_v36  ;;  %v720_v36 = vrot.slane %v718_v40, 1  ;;  %v1497_v41 = vrot.slane %v6220_v52, 1 }
 0x136   : > { %3976 = vmatmul.msk.bf16.gmra.mxu1 %vm440_vm1, %v713_v48 }
 0x137   : > { %v1860_v24 = vpop.f32.mrf.mxu0  ;;  %4006 = vmatmul.msk.bf16.gmra.mxu2 %vm440_vm1, %v984_v35  ;;  %v5152_v55 = vadd.f32 %v1857_v25, %v1686_v46  ;;  %v985_v46 = vrot.slane %v722_v8, 1  ;;  %v986_v25 = vrot.slane %v718_v40, 2  ;;  %v716_v35 = vor.u32 %v714_v15, %v712_v28 }
 0x139   : > { %6247 = vst [vmem:[#allocation23_spill] sm:$0xff] %v5152_v55  ;;  %4106 = vmatmul.msk.bf16.gmra.mxu3 %vm440_vm1, %v1493_v33  ;;  %v987_v61 = vor.u32 %v986_v25, %v985_v46  ;;  %v721_v15 = vsel %vm597_vm3, %v716_v35, %v720_v36  ;;  %v4444_v35 = vld [vmem:[%s4536_s6 + $0x88] sm:$0xff] }
 0x13a   : > { %4134 = vmatmul.msk.bf16.gmra.mxu0 %vm440_vm1, %v1751_v2  ;;  %v1106_v19 = vpop.f32.mrf.mxu2  ;;  %v1500_v2 = vrot.slane %v6221_v62, 2  ;;  %v1754_v62 = vrot.slane %v5125_v5, 2 }
 0x13b   : > { %v1181_v51 = vadd.f32 %v1106_v19, %v847_v37  ;;  %v848_v16 = vpop.f32.mrf.mxu1  ;;  %v988_v40 = vsel %vm920_vm2, %v983_v57, %v987_v61  ;;  %v730_v57 = vshrl.u32 %v4444_v35, 16 }
 0x13c   : > { %v5164_v7 = vpop.f32.mrf.mxu3  ;;  %v849_v37 = vadd.f32 %v848_v16, %v4815_v60  ;;  %v1501_v28 = vor.u32 %v1500_v2, %v1497_v41  ;;  %v726_v41 = vshll.u32 %v4444_v35, 16 }
 0x13d   : > { %v1687_v39 = vadd.f32 %v5101_v50, %v1181_v51  ;;  %v1752_v50 = vrot.slane %v5093_v12, 2 }
 0x13e   : > { %v1502_v46 = vsel %vm920_vm2, %v1492_v1, %v1501_v28 }
 0x13f   : > { %v1862_v48 = vpop.f32.mrf.mxu0  ;;  %v5170_v33 = vadd.f32 %v1860_v24, %v1687_v39  ;;  %v1243_v24 = vld [vmem:[%s4536_s6 + $0xa0] sm:$0x3]  ;;  %v1753_v60 = vsel %vm1722_vm4, %v1750_v31, %v1752_v50 }
 0x140   : > { %v1322_v16 = vunpack.c.l.b16 %v1243_v24 }
 0x142   : > { %v1108_v19 = vpop.f32.mrf.mxu2  ;;  %v5187_v2 = vpack.c.b16 %v1322_v16, %v1322_v16  ;;  %v724_v16 = vor.u32 %v722_v8, %v720_v36 }
 0x143   : > { %v1182_v51 = vadd.f32 %v1108_v19, %v849_v37  ;;  %v851_v10 = vpop.f32.mrf.mxu1 }
 0x144   : > { %v5177_v55 = vpop.f32.mrf.mxu3  ;;  %v1507_v1 = vshll.u32 %v5187_v2, 16 }
 0x145   : > { %v1688_v52 = vadd.f32 %v5114_v38, %v1182_v51  ;;  %v852_v38 = vadd.f32 %v851_v10, %v4830_v0  ;;  %v1504_v51 = vshrl.u32 %v5187_v2, 16  ;;  %v728_v0 = vrot.slane %v726_v41, 1 }
 0x146   : > { %3977 = vmatmul.msk.bf16.gmra.mxu1 %vm440_vm1, %v721_v15 }
 0x147   : > { %v1865_v39 = vpop.f32.mrf.mxu0  ;;  %4007 = vmatmul.msk.bf16.gmra.mxu2 %vm440_vm1, %v988_v40  ;;  %v5184_v25 = vadd.f32 %v1862_v48, %v1688_v52  ;;  %v989_v52 = vrot.slane %v730_v57, 1  ;;  %v990_v48 = vrot.slane %v726_v41, 2  ;;  %v1506_v10 = vrot.slane %v1504_v51, 1 }
 0x149   : > { %6248 = vst [vmem:[#allocation24_spill] sm:$0xff] %v5184_v25  ;;  %4107 = vmatmul.msk.bf16.gmra.mxu3 %vm440_vm1, %v1502_v46  ;;  %v991_v46 = vor.u32 %v990_v48, %v989_v52 }
 0x14a   : > { %4135 = vmatmul.msk.bf16.gmra.mxu0 %vm440_vm1, %v1753_v60  ;;  %v1111_v37 = vpop.f32.mrf.mxu2  ;;  %v1509_v60 = vrot.slane %v1507_v1, 2  ;;  %v5213_v1 = vld [vmem:[%s4536_s6 + $0x90] sm:$0xff] }
 0x14b   : > { %v1183_v31 = vadd.f32 %v1111_v37, %v852_v38  ;;  %v853_v19 = vpop.f32.mrf.mxu1  ;;  %v992_v8 = vsel %vm920_vm2, %v987_v61, %v991_v46  ;;  %v734_v52 = vshll.u32 %v5213_v1, 16 }
 0x14c   : > { %v5195_v40 = vpop.f32.mrf.mxu3  ;;  %v854_v38 = vadd.f32 %v853_v19, %v4851_v42  ;;  %v1755_v42 = vsel %vm1722_vm4, %v1752_v50, %v1754_v62  ;;  %v2763_v50 = vld [vmem:[%s4536_s6 + $0x18] sm:$0x8] }
 0x14d   : > { %v1689_v15 = vadd.f32 %v5133_v17, %v1183_v31  ;;  %v729_v17 = vsel %vm597_vm3, %v724_v16, %v728_v0  ;;  %v1510_v31 = vor.u32 %v1509_v60, %v1506_v10  ;;  %v2770_v16 = vunpack.c.l.b16 %v2763_v50 }
 0x14e   : > { %v994_v60 = vrot.slane %v734_v52, 2 }
 0x14f   : > { %v1867_v24 = vpop.f32.mrf.mxu0  ;;  %v5197_v35 = vadd.f32 %v1865_v39, %v1689_v15  ;;  %v1511_v19 = vsel %vm920_vm2, %v1501_v28, %v1510_v31  ;;  %v736_v31 = vrot.slane %v734_v52, 1 }
 0x152   : > { %v1113_v37 = vpop.f32.mrf.mxu2 }
 0x153   : > { %v1184_v25 = vadd.f32 %v1113_v37, %v854_v38  ;;  %v856_v12 = vpop.f32.mrf.mxu1 }
 0x154   : > { %v5204_v39 = vpop.f32.mrf.mxu3  ;;  %v857_v61 = vadd.f32 %v856_v12, %v4866_v63  ;;  %v911_v63 = vld [vmem:[%s4536_s6 + $0x98] sm:$0x3] }
 0x155   : > { %v1690_v36 = vadd.f32 %v5146_v3, %v1184_v25  ;;  %v738_v3 = vshrl.u32 %v5213_v1, 16  ;;  %v5220_v25 = vld [vmem:[%s4536_s6 + $0x1c] sm:$0xf] }
 0x156   : > { %3978 = vmatmul.msk.bf16.gmra.mxu1 %vm440_vm1, %v729_v17  ;;  %v732_v17 = vor.u32 %v730_v57, %v728_v0  ;;  %v1756_v0 = vrot.slane %v5156_v29, 2 }
 0x157   : > { %v1870_v41 = vpop.f32.mrf.mxu0  ;;  %4008 = vmatmul.msk.bf16.gmra.mxu2 %vm440_vm1, %v992_v8  ;;  %v5210_v51 = vadd.f32 %v1867_v24, %v1690_v36  ;;  %v6224_v24 = vunpack.c.l.b16 %v5220_v25  ;;  %v993_v10 = vrot.slane %v738_v3, 1  ;;  %v5230_v8 = vld [vmem:[%s4536_s6 + $0x20] sm:$0xff] }
 0x159   : > { %6249 = vst [vmem:[#allocation25_spill] sm:$0xff] %v5210_v51  ;;  %4108 = vmatmul.msk.bf16.gmra.mxu3 %vm440_vm1, %v1511_v19  ;;  %v5234_v36 = vpack.c.b16 %v6224_v24, %v2770_v16  ;;  %v6250_v19 = vshrl.u32 %v4660_v4, 16  ;;  %v995_v50 = vor.u32 %v994_v60, %v993_v10  ;;  %v737_v16 = vsel %vm597_vm3, %v732_v17, %v736_v31 }
 0x15a   : > { %4136 = vmatmul.msk.bf16.gmra.mxu0 %vm440_vm1, %v1755_v42  ;;  %v1116_v48 = vpop.f32.mrf.mxu2  ;;  %v1757_v60 = vsel %vm1722_vm4, %v1754_v62, %v1756_v0  ;;  %v742_v62 = vshll.u32 %v4634_v53, 16  ;;  %v1758_v53 = vrot.slane %v5187_v2, 2  ;;  %v1972_v2 = vshrl.u32 %v4733_v27, 16 }
 0x15b   : > { %v1185_v28 = vadd.f32 %v1116_v48, %v857_v61  ;;  %v858_v15 = vpop.f32.mrf.mxu1  ;;  %v1979_v1 = vrot.slane %v6250_v19, 2  ;;  %v6251_v61 = vshll.u32 %v4660_v4, 16  ;;  %v918_v48 = vunpack.c.l.b16 %v911_v63 }
 0x15c   : > { %v5226_v37 = vpop.f32.mrf.mxu3  ;;  %v996_v19 = vsel %vm920_vm2, %v991_v46, %v995_v50 }
 0x15d   : > { %v1691_v38 = vadd.f32 %v5164_v7, %v1185_v28  ;;  %v1980_v7 = vrot.slane %v6251_v61, 3  ;;  %v859_v28 = vadd.f32 %v858_v15, %v4887_v20  ;;  %v919_v24 = vpack.c.b16 %v918_v48, %v918_v48 }
 0x15f   : > { %v1872_v12 = vpop.f32.mrf.mxu0  ;;  %v5236_v42 = vadd.f32 %v1870_v41, %v1691_v38  ;;  %v2773_v41 = vrot.slane %v5234_v36, 3  ;;  %v2774_v38 = vrot.slane %v5230_v8, 3  ;;  %v5248_v4 = vor.u32 %v1980_v7, %v1979_v1 }
 0x160   : > { %v998_v46 = vshrl.u32 %v919_v24, 16  ;;  %v1001_v61 = vshll.u32 %v919_v24, 16 }
 0x161   : > { %v2775_v63 = vsel %vm2772_vm5, %v2773_v41, %v2774_v38  ;;  %v740_v41 = vor.u32 %v738_v3, %v736_v31  ;;  %v6252_v31 = vunpack.c.l.b16 %v5220_v25 }
 0x162   : > { %v1118_v57 = vpop.f32.mrf.mxu2 }
 0x163   : > { %v1186_v52 = vadd.f32 %v1118_v57, %v859_v28  ;;  %v861_v51 = vpop.f32.mrf.mxu1  ;;  %v1000_v28 = vrot.slane %v998_v46, 1  ;;  %v1003_v57 = vrot.slane %v1001_v61, 2 }
 0x164   : > { %v5251_v20 = vpop.f32.mrf.mxu3  ;;  %v862_v1 = vadd.f32 %v861_v51, %v4902_v26  ;;  %v5268_v26 = vld [vmem:[%s4536_s6 + $0x28] sm:$0xff] }
 0x165   : > { %v1692_v10 = vadd.f32 %v5177_v55, %v1186_v52 }
 0x166   : > { %3979 = vmatmul.msk.bf16.gmra.mxu1 %vm440_vm1, %v737_v16  ;;  %v2257_v16 = vld [vmem:[%s4536_s6 + $0x18] sm:$0xc] }
 0x167   : > { %v1875_v15 = vpop.f32.mrf.mxu0  ;;  %4009 = vmatmul.msk.bf16.gmra.mxu2 %vm440_vm1, %v996_v19  ;;  %v5257_v17 = vadd.f32 %v1872_v12, %v1692_v10  ;;  %v744_v19 = vrot.slane %v742_v62, 1  ;;  %v1004_v10 = vor.u32 %v1003_v57, %v1000_v28 }
 0x169   : > { %4279 = vmatmul.msk.bf16.vlgmr.msra.gmra.mxu3 %vm440_vm1, %v2775_v63  ;;  %v1005_v3 = vsel %vm920_vm2, %v995_v50, %v1004_v10  ;;  %v1974_v10 = vrot.slane %v1972_v2, 2 }
 0x16a   : > { %4137 = vmatmul.msk.bf16.gmra.mxu0 %vm440_vm1, %v1757_v60  ;;  %v1121_v55 = vpop.f32.mrf.mxu2  ;;  %v2336_v60 = vunpack.c.l.b16 %v2257_v16  ;;  %v2404_v16 = vshll.u32 %v5230_v8, 16 }
 0x16b   : > { %v1187_v7 = vadd.f32 %v1121_v55, %v862_v1  ;;  %v863_v48 = vpop.f32.mrf.mxu1  ;;  %v2776_v55 = vrot.slane %v5268_v26, 3 }
 0x16c   : > { %v5264_v12 = vpop.f32.mrf.mxu3  ;;  %v864_v63 = vadd.f32 %v863_v48, %v4923_v44  ;;  %v1759_v44 = vsel %vm1722_vm4, %v1756_v0, %v1758_v53  ;;  %v1975_v48 = vshll.u32 %v4733_v27, 16  ;;  %v3025_v27 = vshll.u32 %v5234_v36, 16 }
 0x16d   : > { %v1693_v52 = vadd.f32 %v5195_v40, %v1187_v7  ;;  %v745_v40 = vsel %vm597_vm3, %v740_v41, %v744_v19  ;;  %v2373_v7 = vpack.c.b16 %v6252_v31, %v2336_v60  ;;  %v2777_v25 = vsel %vm2772_vm5, %v2774_v38, %v2776_v55 }
 0x16e   : > { %v3022_v41 = vshrl.u32 %v5234_v36, 16  ;;  %v1977_v60 = vrot.slane %v1975_v48, 3  ;;  %v3030_v36 = vrot.slane %v2404_v16, 4 }
 0x16f   : > { %v1877_v24 = vpop.f32.mrf.mxu0  ;;  %v5270_v51 = vadd.f32 %v1875_v15, %v1693_v52  ;;  %v2396_v57 = vshll.u32 %v2373_v7, 16  ;;  %v2401_v52 = vshrl.u32 %v5230_v8, 16  ;;  %v2406_v8 = vrot.slane %v2404_v16, 3 }
 0x171   : > { %v2403_v53 = vrot.slane %v2401_v52, 2  ;;  %v3029_v31 = vrot.slane %v2401_v52, 3  ;;  %v3455_v52 = vld [vmem:[%s6173_s3] sm:$0xff] }
 0x172   : > { %v1123_v1 = vpop.f32.mrf.mxu2 }
 0x173   : > { %v1188_v46 = vadd.f32 %v1123_v1, %v864_v63  ;;  %v866_v61 = vpop.f32.mrf.mxu1  ;;  %v2398_v1 = vrot.slane %v2396_v57, 3 }
 0x174   : > { %v5280_v62 = vpop.f32.mrf.mxu3  ;;  %v867_v0 = vadd.f32 %v866_v61, %v4938_v13 }
 0x175   : > { %v1694_v15 = vadd.f32 %v5204_v39, %v1188_v46  ;;  %v2393_v39 = vshrl.u32 %v2373_v7, 16  ;;  %v3024_v46 = vrot.slane %v3022_v41, 3  ;;  %v1978_v7 = vor.u32 %v1977_v60, %v1974_v10 }
 0x176   : > { %3980 = vmatmul.msk.bf16.gmra.mxu1 %vm440_vm1, %v745_v40 }
 0x177   : > { %v1880_v28 = vpop.f32.mrf.mxu0  ;;  %4010 = vmatmul.msk.bf16.gmra.mxu2 %vm440_vm1, %v1005_v3  ;;  %v5290_v50 = vadd.f32 %v1877_v24, %v1694_v15  ;;  %v2395_v63 = vrot.slane %v2393_v39, 2  ;;  %v3027_v3 = vrot.slane %v3025_v27, 4  ;;  %v5303_v15 = vld [vmem:[%s4536_s6 + $0x30] sm:$0xff] }
 0x179   : > { %4280 = vmatmul.msk.bf16.gmra.mxu3 %vm440_vm1, %v2777_v25  ;;  %v2399_v48 = vor.u32 %v2398_v1, %v2395_v63  ;;  %v2407_v25 = vor.u32 %v2406_v8, %v2403_v53  ;;  %v3028_v57 = vor.u32 %v3027_v3, %v3024_v46  ;;  %v2410_v1 = vshrl.u32 %v5268_v26, 16 }
 0x17a   : > { %4138 = vmatmul.msk.bf16.gmra.mxu0 %vm440_vm1, %v1759_v44  ;;  %v1126_v19 = vpop.f32.mrf.mxu2  ;;  %v4471_v44 = vmov 0   ;;  %v2413_v53 = vshll.u32 %v5268_v26, 16 }
 0x17b   : > { %v1189_v38 = vadd.f32 %v1126_v19, %v867_v0  ;;  %v868_v24 = vpop.f32.mrf.mxu1  ;;  %4439 = vset.pattern.permute.xlu0 %v4471_v44  ;;  %4440 = vset.pattern.permute.xlu1 %v4471_v44  ;;  %v3031_v0 = vor.u32 %v3030_v36, %v3029_v31  ;;  %v1982_v19 = vsel %vm1970_vm6, %v1978_v7, %v5248_v4  ;;  %v6254_v31 = vshll.u32 %v4691_v45, 16 }
 0x17c   : > { %v5300_v61 = vpop.f32.mrf.mxu3  ;;  %4441 = vset.pattern.permute.xlu2 %v4471_v44  ;;  %3493 = vperm.xlu0 %4439, %v3455_v52   ;;  %v2408_v27 = vsel %vm1970_vm6, %v2399_v48, %v2407_v25  ;;  %v2415_v36 = vrot.slane %v2413_v53, 3  ;;  %v5342_v52 = vld [vmem:[%s4536_s6 + $0x38] sm:$0xff] }
 0x17d   : > { %v1695_v13 = vadd.f32 %v5226_v37, %v1189_v38  ;;  %v869_v37 = vadd.f32 %v868_v24, %v4965_v58  ;;  %v3032_v10 = vsel %vm3020_vm7, %v3028_v57, %v3031_v0  ;;  %v1984_v26 = vrot.slane %v6254_v31, 3 }
 0x17f   : > { %v1882_v40 = vpop.f32.mrf.mxu0  ;;  %v5305_v2 = vadd.f32 %v1880_v28, %v1695_v13  ;;  %v2778_v28 = vrot.slane %v5303_v15, 3  ;;  %v3456_v13 = vld [vmem:[%s6173_s3 + $0x8] sm:$0xff] }
 0x181   : > { %v2779_v60 = vsel %vm2772_vm5, %v2776_v55, %v2778_v28 }
 0x182   : > { %v1128_v39 = vpop.f32.mrf.mxu2 }
 0x183   : > { %v1190_v16 = vadd.f32 %v1128_v39, %v869_v37  ;;  %v871_v41 = vpop.f32.mrf.mxu1  ;;  %v3033_v37 = vrot.slane %v2410_v1, 3  ;;  %v3034_v39 = vrot.slane %v2413_v53, 4 }
 0x184   : > { %v5316_v38 = vpop.f32.mrf.mxu3  ;;  %3498 = vperm.xlu0 %4439, %v3456_v13  }
 0x185   : > { %v1696_v58 = vadd.f32 %v5251_v20, %v1190_v16  ;;  %v872_v20 = vadd.f32 %v871_v41, %v4812_v49  ;;  %v2412_v49 = vrot.slane %v2410_v1, 2  ;;  %v2780_v1 = vrot.slane %v5342_v52, 3 }
 0x186   : > { %4151 = vmatmul.msk.bf16.vlgmr.msra.gmra.mxu1 %vm440_vm1, %v1982_v19 }
 0x187   : > { %v1885_v24 = vpop.f32.mrf.mxu0  ;;  %4249 = vmatmul.msk.bf16.vlgmr.msra.gmra.mxu2 %vm440_vm1, %v2408_v27  ;;  %v5324_v63 = vadd.f32 %v1882_v40, %v1696_v58  ;;  %v6253_v40 = vshrl.u32 %v4691_v45, 16  ;;  %v2416_v41 = vor.u32 %v2415_v36, %v2412_v49  ;;  %v3035_v27 = vor.u32 %v3034_v39, %v3033_v37  ;;  %v3457_v58 = vld [vmem:[%s6173_s3 + $0x10] sm:$0xff] }
 0x188   : > { %3503 = vperm.xlu1 %4440, %v3457_v58   ;;  %v2781_v13 = vsel %vm2772_vm5, %v2778_v28, %v2780_v1  ;;  %v5379_v58 = vld [vmem:[%s4536_s6 + $0x40] sm:$0xff] }
 0x189   : > { %4281 = vmatmul.msk.bf16.gmra.mxu3 %vm440_vm1, %v2779_v60  ;;  %v1983_v3 = vrot.slane %v6253_v40, 2 }
 0x18a   : > { %4309 = vmatmul.msk.bf16.vlgmr.msra.gmra.mxu0 %vm440_vm1, %v3032_v10  ;;  %v1131_v8 = vpop.f32.mrf.mxu2 }
 0x18b   : > { %v1191_v46 = vadd.f32 %v1131_v8, %v872_v20  ;;  %v873_v55 = vpop.f32.mrf.mxu1  ;;  %v1985_v57 = vor.u32 %v1984_v26, %v1983_v3  ;;  %v3036_v8 = vsel %vm3020_vm7, %v3031_v0, %v3035_v27  ;;  %v3458_v0 = vld [vmem:[%s6173_s3 + $0x18] sm:$0xff]  ;;  %v6255_v3 = vld [vmem:[#allocation2_spill] sm:$0xff] }
 0x18c   : > { %v5339_v44 = vpop.f32.mrf.mxu3  ;;  %v874_v19 = vadd.f32 %v873_v55, %v4827_v22  ;;  %v2422_v55 = vshll.u32 %v5303_v15, 16  ;;  %v6256_v31 = vshrl.u32 %v6255_v3, 16  ;;  %v6257_v49 = vshll.u32 %v6255_v3, 16 }
 0x18d   : > { %v1697_v7 = vadd.f32 %v5264_v12, %v1191_v46  ;;  %v1986_v60 = vsel %vm1970_vm6, %v5248_v4, %v1985_v57  ;;  %v2419_v4 = vshrl.u32 %v5303_v15, 16 }
 0x18e   : > { %v1987_v26 = vrot.slane %v6256_v31, 2  ;;  %v1988_v15 = vrot.slane %v6257_v49, 3  ;;  %v2424_v36 = vrot.slane %v2422_v55, 3  ;;  %v2431_v31 = vshll.u32 %v5342_v52, 16 }
 0x18f   : > { %v1887_v48 = vpop.f32.mrf.mxu0  ;;  %v5344_v16 = vadd.f32 %v1885_v24, %v1697_v7  ;;  %v2417_v24 = vsel %vm1970_vm6, %v2407_v25, %v2416_v41  ;;  %v3037_v39 = vrot.slane %v2419_v4, 3 }
 0x190   : > { %3508 = vperm.xlu1 %4440, %v3458_v0  }
 0x192   : > { %v1133_v45 = vpop.f32.mrf.mxu2 }
 0x193   : > { %v1192_v12 = vadd.f32 %v1133_v45, %v874_v19  ;;  %v876_v10 = vpop.f32.mrf.mxu1  ;;  %v3038_v19 = vrot.slane %v2422_v55, 4  ;;  %v1989_v45 = vor.u32 %v1988_v15, %v1987_v26  ;;  %v6260_v15 = vld [vmem:[#allocation3_spill] sm:$0xff] }
 0x194   : > { %v5355_v20 = vpop.f32.mrf.mxu3  ;;  %v877_v25 = vadd.f32 %v876_v10, %v4848_v34  ;;  %v2421_v34 = vrot.slane %v2419_v4, 2 }
 0x195   : > { %v1698_v53 = vadd.f32 %v5280_v62, %v1192_v12 }
 0x196   : > { %4152 = vmatmul.msk.bf16.gmra.mxu1 %vm440_vm1, %v1986_v60  ;;  %v2425_v10 = vor.u32 %v2424_v36, %v2421_v34  ;;  %v6258_v60 = vld [vmem:[#allocation11_spill] sm:$0xff]  ;;  %v6261_v34 = vshrl.u32 %v6260_v15, 16 }
 0x197   : > { %v1890_v22 = vpop.f32.mrf.mxu0  ;;  %4250 = vmatmul.msk.bf16.gmra.mxu2 %vm440_vm1, %v2417_v24  ;;  %v5361_v46 = vadd.f32 %v1887_v48, %v1698_v53 }
 0x198   : > { %v2426_v0 = vsel %vm1970_vm6, %v2416_v41, %v2425_v10  ;;  %v6259_v41 = vld [vmem:[#allocation14_spill] sm:$0xff]  ;;  %v1991_v36 = vrot.slane %v6261_v34, 2 }
 0x199   : > { %4282 = vmatmul.msk.bf16.gmra.mxu3 %vm440_vm1, %v2781_v13 }
 0x19a   : > { %4310 = vmatmul.msk.bf16.gmra.mxu0 %vm440_vm1, %v3036_v8  ;;  %v1136_v62 = vpop.f32.mrf.mxu2  ;;  %v3039_v8 = vor.u32 %v3038_v19, %v3037_v39  ;;  %v2433_v39 = vrot.slane %v2431_v31, 3 }
 0x19b   : > { %v1193_v40 = vadd.f32 %v1136_v62, %v877_v25  ;;  %v878_v28 = vpop.f32.mrf.mxu1  ;;  %v1990_v62 = vsel %vm1970_vm6, %v1985_v57, %v1989_v45  ;;  %v2428_v57 = vshrl.u32 %v5342_v52, 16 }
 0x19c   : > { %v5376_v48 = vpop.f32.mrf.mxu3  ;;  %v879_v24 = vadd.f32 %v878_v28, %v6258_v60 }
 0x19d   : > { %v1699_v7 = vadd.f32 %v5300_v61, %v1193_v40  ;;  %v2782_v61 = vrot.slane %v5379_v58, 3 }
 0x19f   : > { %v1892_v37 = vpop.f32.mrf.mxu0  ;;  %v5381_v12 = vadd.f32 %v1890_v22, %v1699_v7  ;;  %v3040_v22 = vsel %vm3020_vm7, %v3035_v27, %v3039_v8  ;;  %v2783_v28 = vsel %vm2772_vm5, %v2780_v1, %v2782_v61  ;;  %v6262_v1 = vshll.u32 %v6260_v15, 16 }
 0x1a1   : > { %v1992_v7 = vrot.slane %v6262_v1, 3 }
 0x1a2   : > { %v1138_v53 = vpop.f32.mrf.mxu2 }
 0x1a3   : > { %v1194_v13 = vadd.f32 %v1138_v53, %v879_v24  ;;  %v881_v25 = vpop.f32.mrf.mxu1  ;;  %v3041_v24 = vrot.slane %v2428_v57, 3  ;;  %v3042_v53 = vrot.slane %v2431_v31, 4 }
 0x1a4   : > { %v5388_v55 = vpop.f32.mrf.mxu3  ;;  %v882_v26 = vadd.f32 %v881_v25, %v6259_v41  ;;  %v5409_v25 = vld [vmem:[%s4536_s6 + $0x48] sm:$0xff] }
 0x1a5   : > { %v1700_v4 = vadd.f32 %v5316_v38, %v1194_v13  ;;  %v1993_v13 = vor.u32 %v1992_v7, %v1991_v36  ;;  %v3043_v41 = vor.u32 %v3042_v53, %v3041_v24  ;;  %v2440_v7 = vshll.u32 %v5379_v58, 16 }
 0x1a6   : > { %4153 = vmatmul.msk.bf16.gmra.mxu1 %vm440_vm1, %v1990_v62 }
 0x1a7   : > { %v1895_v40 = vpop.f32.mrf.mxu0  ;;  %4251 = vmatmul.msk.bf16.gmra.mxu2 %vm440_vm1, %v2426_v0  ;;  %v5394_v3 = vadd.f32 %v1892_v37, %v1700_v4  ;;  %v2430_v37 = vrot.slane %v2428_v57, 2  ;;  %v6263_v4 = vld [vmem:[#allocation16_spill] sm:$0xff]  ;;  %v2784_v57 = vrot.slane %v5409_v25, 3  ;;  %v3044_v34 = vsel %vm3020_vm7, %v3039_v8, %v3043_v41  ;;  %v3459_v8 = vld [vmem:[%s6173_s3 + $0x20] sm:$0xff] }
 0x1a8   : > { %3513 = vperm.xlu2 %4441, %v3459_v8  }
 0x1a9   : > { %4283 = vmatmul.msk.bf16.gmra.mxu3 %vm440_vm1, %v2783_v28  ;;  %v2434_v0 = vor.u32 %v2433_v39, %v2430_v37  ;;  %v2785_v36 = vsel %vm2772_vm5, %v2782_v61, %v2784_v57  ;;  %v3462_v61 = vld [vmem:[%s6173_s3 + $0x38] sm:$0xff] }
 0x1aa   : > { %4311 = vmatmul.msk.bf16.gmra.mxu0 %vm440_vm1, %v3040_v22  ;;  %v1141_v38 = vpop.f32.mrf.mxu2  ;;  %3528 = vperm.xlu1 %4440, %v3462_v61   ;;  %v3460_v61 = vld [vmem:[%s6173_s3 + $0x28] sm:$0xff] }
 0x1ab   : > { %v1195_v49 = vadd.f32 %v1141_v38, %v882_v26  ;;  %v883_v27 = vpop.f32.mrf.mxu1  ;;  %v3461_v26 = vld [vmem:[%s6173_s3 + $0x30] sm:$0xff]  ;;  %v2435_v31 = vsel %vm1970_vm6, %v2425_v10, %v2434_v0  ;;  %v6264_v10 = vld [vmem:[#allocation18_spill] sm:$0xff] }
 0x1ac   : > { %v5406_v19 = vpop.f32.mrf.mxu3  ;;  %v884_v22 = vadd.f32 %v883_v27, %v6263_v4  ;;  %3523 = vperm.xlu0 %4439, %v3461_v26  }
 0x1ad   : > { %v1701_v52 = vadd.f32 %v5339_v44, %v1195_v49  ;;  %v1994_v49 = vsel %vm1970_vm6, %v1989_v45, %v1993_v13  ;;  %v2437_v45 = vshrl.u32 %v5379_v58, 16 }
 0x1af   : > { %v1897_v60 = vpop.f32.mrf.mxu0  ;;  %v5411_v62 = vadd.f32 %v1895_v40, %v1701_v52 }
 0x1b0   : > { %3518 = vperm.xlu2 %4441, %v3460_v61  }
 0x1b2   : > { %v1143_v28 = vpop.f32.mrf.mxu2 }
 0x1b3   : > { %v1196_v44 = vadd.f32 %v1143_v28, %v884_v22  ;;  %v886_v38 = vpop.f32.mrf.mxu1  ;;  %v2439_v22 = vrot.slane %v2437_v45, 2  ;;  %v2442_v28 = vrot.slane %v2440_v7, 3 }
 0x1b4   : > { %v5421_v15 = vpop.f32.mrf.mxu3  ;;  %v887_v37 = vadd.f32 %v886_v38, %v6264_v10 }
 0x1b5   : > { %v1702_v40 = vadd.f32 %v5355_v20, %v1196_v44  ;;  %v2443_v10 = vor.u32 %v2442_v28, %v2439_v22  ;;  %v2449_v28 = vshll.u32 %v5409_v25, 16 }
 0x1b6   : > { %4154 = vmatmul.msk.bf16.gmra.mxu1 %vm440_vm1, %v1994_v49  ;;  %v3045_v49 = vrot.slane %v2437_v45, 3 }
 0x1b7   : > { %v1900_v27 = vpop.f32.mrf.mxu0  ;;  %4252 = vmatmul.msk.bf16.gmra.mxu2 %vm440_vm1, %v2435_v31  ;;  %v5427_v1 = vadd.f32 %v1897_v60, %v1702_v40  ;;  %v6265_v60 = vld [vmem:[#allocation4_spill] sm:$0xff]  ;;  %v3046_v31 = vrot.slane %v2440_v7, 4  ;;  %v2444_v7 = vsel %vm1970_vm6, %v2434_v0, %v2443_v10  ;;  %v2451_v61 = vrot.slane %v2449_v28, 3 }
 0x1b8   : > { %v6266_v58 = vshrl.u32 %v6265_v60, 16  ;;  %v6267_v53 = vshll.u32 %v6265_v60, 16  ;;  %v6270_v0 = vld [vmem:[#allocation20_spill] sm:$0xff] }
 0x1b9   : > { %4284 = vmatmul.msk.bf16.gmra.mxu3 %vm440_vm1, %v2785_v36  ;;  %v3047_v8 = vor.u32 %v3046_v31, %v3045_v49 }
 0x1ba   : > { %4312 = vmatmul.msk.bf16.gmra.mxu0 %vm440_vm1, %v3044_v34  ;;  %v1146_v20 = vpop.f32.mrf.mxu2  ;;  %v1995_v24 = vrot.slane %v6266_v58, 2  ;;  %v1996_v4 = vrot.slane %v6267_v53, 3  ;;  %v5448_v34 = vld [vmem:[%s4536_s6 + $0x50] sm:$0xff] }
 0x1bb   : > { %v1197_v39 = vadd.f32 %v1146_v20, %v887_v37  ;;  %v888_v52 = vpop.f32.mrf.mxu1  ;;  %v6268_v37 = vld [vmem:[#allocation19_spill] sm:$0xff]  ;;  %v2786_v45 = vrot.slane %v5448_v34, 3  ;;  %v3048_v53 = vsel %vm3020_vm7, %v3043_v41, %v3047_v8 }
 0x1bc   : > { %v5445_v44 = vpop.f32.mrf.mxu3  ;;  %v1997_v40 = vor.u32 %v1996_v4, %v1995_v24  ;;  %v889_v20 = vadd.f32 %v888_v52, %v6268_v37  ;;  %v3464_v41 = vld [vmem:[%s6173_s3 + $0x48] sm:$0xff] }
 0x1bd   : > { %v1703_v26 = vadd.f32 %v5376_v48, %v1197_v39  ;;  %v2787_v4 = vsel %vm2772_vm5, %v2784_v57, %v2786_v45  ;;  %3538 = vperm.xlu0 %4439, %v3464_v41   ;;  %v3465_v41 = vld [vmem:[%s6173_s3 + $0x50] sm:$0xff] }
 0x1be   : > { %v1998_v58 = vsel %vm1970_vm6, %v1993_v13, %v1997_v40  ;;  %v2446_v13 = vshrl.u32 %v5409_v25, 16  ;;  %3543 = vperm.xlu1 %4440, %v3465_v41  }
 0x1bf   : > { %v1902_v38 = vpop.f32.mrf.mxu0  ;;  %v5450_v36 = vadd.f32 %v1900_v27, %v1703_v26 }
 0x1c2   : > { %v1148_v60 = vpop.f32.mrf.mxu2 }
 0x1c3   : > { %v1198_v48 = vadd.f32 %v1148_v60, %v889_v20  ;;  %v891_v39 = vpop.f32.mrf.mxu1  ;;  %v2448_v60 = vrot.slane %v2446_v13, 2 }
 0x1c4   : > { %v5460_v24 = vpop.f32.mrf.mxu3  ;;  %v892_v26 = vadd.f32 %v891_v39, %v6270_v0 }
 0x1c5   : > { %v1704_v27 = vadd.f32 %v5388_v55, %v1198_v48 }
 0x1c6   : > { %4155 = vmatmul.msk.bf16.gmra.mxu1 %vm440_vm1, %v1998_v58 }
 0x1c7   : > { %v1905_v52 = vpop.f32.mrf.mxu0  ;;  %4253 = vmatmul.msk.bf16.gmra.mxu2 %vm440_vm1, %v2444_v7  ;;  %v5466_v22 = vadd.f32 %v1902_v38, %v1704_v27  ;;  %v6271_v38 = vld [vmem:[#allocation5_spill] sm:$0xff]  ;;  %v3049_v7 = vrot.slane %v2446_v13, 3  ;;  %v3050_v27 = vrot.slane %v2449_v28, 4 }
 0x1c8   : > { %v6272_v31 = vshrl.u32 %v6271_v38, 16  ;;  %v6273_v20 = vshll.u32 %v6271_v38, 16 }
 0x1c9   : > { %6269 = vst [vmem:[#allocation2_spill] sm:$0xff] %v5466_v22  ;;  %4285 = vmatmul.msk.bf16.gmra.mxu3 %vm440_vm1, %v2787_v4  ;;  %v5484_v4 = vld [vmem:[%s4536_s6 + $0x58] sm:$0xff] }
 0x1ca   : > { %4313 = vmatmul.msk.bf16.gmra.mxu0 %vm440_vm1, %v3048_v53  ;;  %v1151_v55 = vpop.f32.mrf.mxu2  ;;  %v1999_v37 = vrot.slane %v6272_v31, 2  ;;  %v2000_v25 = vrot.slane %v6273_v20, 3  ;;  %v3051_v20 = vor.u32 %v3050_v27, %v3049_v7  ;;  %v2788_v13 = vrot.slane %v5484_v4, 3 }
 0x1cb   : > { %v1199_v49 = vadd.f32 %v1151_v55, %v892_v26  ;;  %v893_v57 = vpop.f32.mrf.mxu1  ;;  %v2452_v26 = vor.u32 %v2451_v61, %v2448_v60  ;;  %v6275_v55 = vld [vmem:[#allocation21_spill] sm:$0xff] }
 0x1cc   : > { %v5481_v39 = vpop.f32.mrf.mxu3  ;;  %v2001_v53 = vor.u32 %v2000_v25, %v1999_v37  ;;  %v894_v31 = vadd.f32 %v893_v57, %v6275_v55  ;;  %v3052_v25 = vsel %vm3020_vm7, %v3047_v8, %v3051_v20  ;;  %v2789_v60 = vsel %vm2772_vm5, %v2786_v45, %v2788_v13  ;;  %v3463_v8 = vld [vmem:[%s6173_s3 + $0x40] sm:$0xff] }
 0x1cd   : > { %v1705_v48 = vadd.f32 %v5406_v19, %v1199_v49  ;;  %v2453_v28 = vsel %vm1970_vm6, %v2443_v10, %v2452_v26  ;;  %v6277_v10 = vld [vmem:[#allocation7_spill] sm:$0xff]  ;;  %3533 = vperm.xlu2 %4441, %v3463_v8   ;;  %v3467_v8 = vld [vmem:[%s6173_s3 + $0x60] sm:$0xff] }
 0x1ce   : > { %v2002_v22 = vsel %vm1970_vm6, %v1997_v40, %v2001_v53  ;;  %v2455_v40 = vshrl.u32 %v5448_v34, 16  ;;  %3553 = vperm.xlu0 %4439, %v3467_v8  }
 0x1cf   : > { %v1907_v58 = vpop.f32.mrf.mxu0  ;;  %v5486_v0 = vadd.f32 %v1905_v52, %v1705_v48  ;;  %v2458_v48 = vshll.u32 %v5448_v34, 16 }
 0x1d1   : > { %6274 = vst [vmem:[#allocation11_spill] sm:$0xff] %v5486_v0  ;;  %v2460_v41 = vrot.slane %v2458_v48, 3 }
 0x1d2   : > { %v1153_v38 = vpop.f32.mrf.mxu2 }
 0x1d3   : > { %v1200_v19 = vadd.f32 %v1153_v38, %v894_v31  ;;  %v896_v49 = vpop.f32.mrf.mxu1  ;;  %v2457_v38 = vrot.slane %v2455_v40, 2 }
 0x1d4   : > { %v5496_v37 = vpop.f32.mrf.mxu3  ;;  %v897_v7 = vadd.f32 %v896_v49, %v6277_v10  ;;  %v5520_v10 = vld [vmem:[%s4536_s6 + $0x60] sm:$0xff] }
 0x1d5   : > { %v1706_v52 = vadd.f32 %v5421_v15, %v1200_v19 }
 0x1d6   : > { %4156 = vmatmul.msk.bf16.gmra.mxu1 %vm440_vm1, %v2002_v22 }
 0x1d7   : > { %v1910_v57 = vpop.f32.mrf.mxu0  ;;  %4254 = vmatmul.msk.bf16.gmra.mxu2 %vm440_vm1, %v2453_v28  ;;  %v5502_v61 = vadd.f32 %v1907_v58, %v1706_v52  ;;  %v6278_v58 = vld [vmem:[#allocation6_spill] sm:$0xff]  ;;  %v3053_v52 = vrot.slane %v2455_v40, 3  ;;  %v2790_v40 = vrot.slane %v5520_v10, 3 }
 0x1d8   : > { %v6279_v27 = vshrl.u32 %v6278_v58, 16  ;;  %v6280_v31 = vshll.u32 %v6278_v58, 16 }
 0x1d9   : > { %6276 = vst [vmem:[#allocation14_spill] sm:$0xff] %v5502_v61  ;;  %4286 = vmatmul.msk.bf16.gmra.mxu3 %vm440_vm1, %v2789_v60 }
 0x1da   : > { %4314 = vmatmul.msk.bf16.gmra.mxu0 %vm440_vm1, %v3052_v25  ;;  %v1156_v15 = vpop.f32.mrf.mxu2  ;;  %v2003_v55 = vrot.slane %v6279_v27, 2  ;;  %v2004_v34 = vrot.slane %v6280_v31, 3  ;;  %v3054_v25 = vrot.slane %v2458_v48, 4  ;;  %v6282_v27 = vld [vmem:[#allocation8_spill] sm:$0xff] }
 0x1db   : > { %v1201_v22 = vadd.f32 %v1156_v15, %v897_v7  ;;  %v898_v45 = vpop.f32.mrf.mxu1  ;;  %v2461_v15 = vor.u32 %v2460_v41, %v2457_v38  ;;  %v2467_v41 = vshll.u32 %v5484_v4, 16 }
 0x1dc   : > { %v5517_v49 = vpop.f32.mrf.mxu3  ;;  %v2005_v60 = vor.u32 %v2004_v34, %v2003_v55  ;;  %v899_v61 = vadd.f32 %v898_v45, %v6282_v27  ;;  %v3055_v31 = vor.u32 %v3054_v25, %v3053_v52 }
 0x1dd   : > { %v1707_v19 = vadd.f32 %v5445_v44, %v1201_v22  ;;  %v2462_v48 = vsel %vm1970_vm6, %v2452_v26, %v2461_v15  ;;  %v6284_v26 = vld [vmem:[#allocation10_spill] sm:$0xff]  ;;  %v2469_v8 = vrot.slane %v2467_v41, 3 }
 0x1de   : > { %v2006_v0 = vsel %vm1970_vm6, %v2001_v53, %v2005_v60  ;;  %v3056_v34 = vsel %vm3020_vm7, %v3051_v20, %v3055_v31  ;;  %v2464_v53 = vshrl.u32 %v5484_v4, 16 }
 0x1df   : > { %v1912_v28 = vpop.f32.mrf.mxu0  ;;  %v5522_v7 = vadd.f32 %v1910_v57, %v1707_v19 }
 0x1e1   : > { %6281 = vst [vmem:[#allocation3_spill] sm:$0xff] %v5522_v7 }
 0x1e2   : > { %v1158_v58 = vpop.f32.mrf.mxu2 }
 0x1e3   : > { %v1202_v44 = vadd.f32 %v1158_v58, %v899_v61  ;;  %v901_v22 = vpop.f32.mrf.mxu1  ;;  %v2791_v61 = vsel %vm2772_vm5, %v2788_v13, %v2790_v40  ;;  %v2466_v58 = vrot.slane %v2464_v53, 2 }
 0x1e4   : > { %v5532_v55 = vpop.f32.mrf.mxu3  ;;  %v902_v19 = vadd.f32 %v901_v22, %v6284_v26  ;;  %v5556_v26 = vld [vmem:[%s4536_s6 + $0x68] sm:$0xff] }
 0x1e5   : > { %v1708_v57 = vadd.f32 %v5460_v24, %v1202_v44 }
 0x1e6   : > { %4157 = vmatmul.msk.bf16.gmra.mxu1 %vm440_vm1, %v2006_v0  ;;  %v3468_v0 = vld [vmem:[%s6173_s3 + $0x68] sm:$0xff] }
 0x1e7   : > { %v1915_v45 = vpop.f32.mrf.mxu0  ;;  %4255 = vmatmul.msk.bf16.gmra.mxu2 %vm440_vm1, %v2462_v48  ;;  %v5538_v38 = vadd.f32 %v1912_v28, %v1708_v57  ;;  %v6285_v28 = vld [vmem:[#allocation9_spill] sm:$0xff]  ;;  %3558 = vperm.xlu1 %4440, %v3468_v0   ;;  %v3057_v57 = vrot.slane %v2464_v53, 3  ;;  %v2792_v53 = vrot.slane %v5556_v26, 3 }
 0x1e8   : > { %v6286_v52 = vshrl.u32 %v6285_v28, 16  ;;  %v6287_v27 = vshll.u32 %v6285_v28, 16  ;;  %v3466_v0 = vld [vmem:[%s6173_s3 + $0x58] sm:$0xff] }
 0x1e9   : > { %6283 = vst [vmem:[#allocation16_spill] sm:$0xff] %v5538_v38  ;;  %4287 = vmatmul.msk.bf16.gmra.mxu3 %vm440_vm1, %v2791_v61  ;;  %3548 = vperm.xlu2 %4441, %v3466_v0  }
 0x1ea   : > { %4315 = vmatmul.msk.bf16.gmra.mxu0 %vm440_vm1, %v3056_v34  ;;  %v1161_v24 = vpop.f32.mrf.mxu2  ;;  %v2007_v25 = vrot.slane %v6286_v52, 2  ;;  %v2008_v4 = vrot.slane %v6287_v27, 3  ;;  %v3058_v34 = vrot.slane %v2467_v41, 4  ;;  %v6288_v52 = vld [vmem:[#allocation12_spill] sm:$0xff] }
 0x1eb   : > { %v1203_v20 = vadd.f32 %v1161_v24, %v902_v19  ;;  %v903_v13 = vpop.f32.mrf.mxu1  ;;  %v2470_v24 = vor.u32 %v2469_v8, %v2466_v58  ;;  %v2476_v8 = vshll.u32 %v5520_v10, 16 }
 0x1ec   : > { %v5553_v22 = vpop.f32.mrf.mxu3  ;;  %v2009_v61 = vor.u32 %v2008_v4, %v2007_v25  ;;  %v904_v38 = vadd.f32 %v903_v13, %v6288_v52  ;;  %v3059_v27 = vor.u32 %v3058_v34, %v3057_v57 }
 0x1ed   : > { %v1709_v44 = vadd.f32 %v5481_v39, %v1203_v20  ;;  %v2471_v41 = vsel %vm1970_vm6, %v2461_v15, %v2470_v24  ;;  %v6290_v15 = vld [vmem:[#allocation15_spill] sm:$0xff]  ;;  %v2478_v0 = vrot.slane %v2476_v8, 3 }
 0x1ee   : > { %v2010_v7 = vsel %vm1970_vm6, %v2005_v60, %v2009_v61  ;;  %v3060_v4 = vsel %vm3020_vm7, %v3055_v31, %v3059_v27  ;;  %v2473_v60 = vshrl.u32 %v5520_v10, 16 }
 0x1ef   : > { %v1917_v48 = vpop.f32.mrf.mxu0  ;;  %v5558_v19 = vadd.f32 %v1915_v45, %v1709_v44 }
 0x1f2   : > { %v1163_v28 = vpop.f32.mrf.mxu2 }
 0x1f3   : > { %v1204_v39 = vadd.f32 %v1163_v28, %v904_v38  ;;  %v906_v20 = vpop.f32.mrf.mxu1  ;;  %v2793_v38 = vsel %vm2772_vm5, %v2790_v40, %v2792_v53  ;;  %v2475_v28 = vrot.slane %v2473_v60, 2 }
 0x1f4   : > { %v5568_v25 = vpop.f32.mrf.mxu3  ;;  %v907_v44 = vadd.f32 %v906_v20, %v6290_v15  ;;  %v5592_v15 = vld [vmem:[%s4536_s6 + $0x70] sm:$0xff] }
 0x1f5   : > { %v1710_v45 = vadd.f32 %v5496_v37, %v1204_v39 }
 0x1f6   : > { %4158 = vmatmul.msk.bf16.gmra.mxu1 %vm440_vm1, %v2010_v7  ;;  %v3470_v7 = vld [vmem:[%s6173_s3 + $0x78] sm:$0xff] }
 0x1f7   : > { %v1920_v13 = vpop.f32.mrf.mxu0  ;;  %4256 = vmatmul.msk.bf16.gmra.mxu2 %vm440_vm1, %v2471_v41  ;;  %v5574_v58 = vadd.f32 %v1917_v48, %v1710_v45  ;;  %v6291_v48 = vld [vmem:[#allocation13_spill] sm:$0xff]  ;;  %3568 = vperm.xlu0 %4439, %v3470_v7   ;;  %v3061_v45 = vrot.slane %v2473_v60, 3 }
 0x1f8   : > { %v6292_v57 = vshrl.u32 %v6291_v48, 16  ;;  %v6293_v52 = vshll.u32 %v6291_v48, 16 }
 0x1f9   : > { %6289 = vst [vmem:[#allocation18_spill] sm:$0xff] %v5574_v58  ;;  %4288 = vmatmul.msk.bf16.gmra.mxu3 %vm440_vm1, %v2793_v38 }
 0x1fa   : > { %4316 = vmatmul.msk.bf16.gmra.mxu0 %vm440_vm1, %v3060_v4  ;;  %v1166_v37 = vpop.f32.mrf.mxu2  ;;  %v2011_v34 = vrot.slane %v6292_v57, 2  ;;  %v2012_v10 = vrot.slane %v6293_v52, 3  ;;  %v3062_v4 = vrot.slane %v2476_v8, 4  ;;  %v6294_v57 = vld [vmem:[#allocation17_spill] sm:$0xff]  ;;  %v2794_v8 = vrot.slane %v5592_v15, 3 }
 0x1fb   : > { %v1205_v31 = vadd.f32 %v1166_v37, %v907_v44  ;;  %v908_v40 = vpop.f32.mrf.mxu1  ;;  %v2479_v37 = vor.u32 %v2478_v0, %v2475_v28  ;;  %v2482_v0 = vshrl.u32 %v5556_v26, 16 }
 0x1fc   : > { %v5589_v20 = vpop.f32.mrf.mxu3  ;;  %v2013_v38 = vor.u32 %v2012_v10, %v2011_v34  ;;  %v909_v58 = vadd.f32 %v908_v40, %v6294_v57  ;;  %v5597_v52 = vor.u32 %v3062_v4, %v3061_v45  ;;  %v6295_v45 = vshrl.u32 %v4917_v30, 16 }
 0x1fd   : > { %v1711_v39 = vadd.f32 %v5517_v49, %v1205_v31  ;;  %v3471_v49 = vld [vmem:[%s6173_s3 + $0x80] sm:$0xff] }
 0x1fe   : > { %v2014_v60 = vsel %vm1970_vm6, %v2009_v61, %v2013_v38  ;;  %3573 = vperm.xlu1 %4440, %v3471_v49   ;;  %v3064_v28 = vsel %vm3020_vm7, %v3059_v27, %v5597_v52  ;;  %v2015_v4 = vrot.slane %v6295_v45, 2  ;;  %v6296_v27 = vshll.u32 %v4917_v30, 16  ;;  %v5631_v30 = vld [vmem:[%s6172_s2] ss:$0 sm:$0xff] }
 0x1ff   : > { %v1922_v41 = vpop.f32.mrf.mxu0  ;;  %v5594_v44 = vadd.f32 %v1920_v13, %v1711_v39  ;;  %v2480_v13 = vsel %vm1970_vm6, %v2470_v24, %v2479_v37  ;;  %v2485_v24 = vshll.u32 %v5556_v26, 16 }
 0x200   : > { %v2016_v57 = vrot.slane %v6296_v27, 3 }
 0x202   : > { %v1168_v48 = vpop.f32.mrf.mxu2 }
 0x203   : > { %v1206_v7 = vadd.f32 %v1168_v48, %v909_v58  ;;  %v2131_v31 = vpop.f32.mrf.mxu1  ;;  %v2795_v58 = vsel %vm2772_vm5, %v2792_v53, %v2794_v8  ;;  %v3469_v53 = vld [vmem:[%s6173_s3 + $0x70] sm:$0xff]  ;;  %v2487_v48 = vrot.slane %v2485_v24, 3 }
 0x204   : > { %v5606_v10 = vpop.f32.mrf.mxu3  ;;  %3563 = vperm.xlu2 %4441, %v3469_v53  }
 0x205   : > { %v1712_v34 = vadd.f32 %v5532_v55, %v1206_v7  ;;  %v2221_v55 = vadd.f32 %v2131_v31, %v5011_v47  ;;  %v2484_v47 = vrot.slane %v2482_v0, 2 }
 0x206   : > { %4159 = vmatmul.msk.bf16.gmra.mxu1 %vm440_vm1, %v2014_v60  ;;  %v5635_v60 = vor.u32 %v2016_v57, %v2015_v4 }
 0x207   : > { %v3181_v40 = vpop.f32.mrf.mxu0  ;;  %4257 = vmatmul.msk.bf16.gmra.mxu2 %vm440_vm1, %v2480_v13  ;;  %v5613_v61 = vadd.f32 %v1922_v41, %v1712_v34  ;;  %v3065_v13 = vrot.slane %v2482_v0, 3  ;;  %v3066_v34 = vrot.slane %v2485_v24, 4 }
 0x208   : > { %v2018_v53 = vsel %vm1970_vm6, %v2013_v38, %v5635_v60 }
 0x209   : > { %4289 = vmatmul.msk.bf16.gmra.mxu3 %vm440_vm1, %v2795_v58  ;;  %v5638_v58 = vld [vmem:[%s4536_s6 + $0x78] sm:$0xff] }
 0x20a   : > { %4317 = vmatmul.msk.bf16.gmra.mxu0 %vm440_vm1, %v3064_v28  ;;  %v2637_v39 = vpop.f32.mrf.mxu2 }
 0x20b   : > { %v2727_v41 = vadd.f32 %v2637_v39, %v2221_v55  ;;  %v2133_v26 = vpop.f32.mrf.mxu1  ;;  %v5640_v55 = vor.u32 %v2487_v48, %v2484_v47 }
 0x20c   : > { %v5633_v7 = vpop.f32.mrf.mxu3  ;;  %v2222_v39 = vadd.f32 %v2133_v26, %v5024_v21  ;;  %v2796_v21 = vrot.slane %v5638_v58, 3 }
 0x20d   : > { %v2975_v49 = vadd.f32 %v5553_v22, %v2727_v41  ;;  %v3494_v22 = vpop.permute.xlu0 %3493  ;;  %v5647_v41 = vor.u32 %v3066_v34, %v3065_v13  ;;  %v2489_v57 = vsel %vm1970_vm6, %v2479_v37, %v5640_v55  ;;  %v2491_v34 = vshrl.u32 %v5592_v15, 16 }
 0x20f   : > { %v3183_v31 = vpop.f32.mrf.mxu0  ;;  %v3271_v28 = vadd.f32 %v3181_v40, %v2975_v49  ;;  %v3473_v40 = vld [vmem:[%s6173_s3 + $0x90] sm:$0xff]  ;;  %v3068_v13 = vsel %vm3020_vm7, %v5597_v52, %v5647_v41 }
 0x210   : > { %3583 = vperm.xlu0 %4439, %v3473_v40  }
 0x211   : > { %v3311_v45 = vadd.f32 %v5631_v30, %v3271_v28  ;;  %v2494_v28 = vshll.u32 %v5592_v15, 16 }
 0x212   : > { %v2639_v27 = vpop.f32.mrf.mxu2 }
 0x213   : > { %v2728_v0 = vadd.f32 %v2639_v27, %v2222_v39  ;;  %v2136_v24 = vpop.f32.mrf.mxu1  ;;  %vm3347_vm8 = vcmp.ge.f32.partialorder %v3311_v45, 0.0  ;;  %v3383_v4 = vmul.f32 0.01, %v3311_v45  ;;  %v6298_v27 = vshll.u32 %v4956_v59, 16 }
 0x214   : > { %v5661_v47 = vpop.f32.mrf.mxu3  ;;  %v2223_v39 = vadd.f32 %v2136_v24, %v5043_v56  ;;  %v2493_v24 = vrot.slane %v2491_v34, 2 }
 0x215   : > { %v2976_v26 = vadd.f32 %v5568_v25, %v2728_v0  ;;  %v3419_v38 = vsel %vm3347_vm8, %v3311_v45, %v3383_v4  ;;  %v2797_v25 = vsel %vm2772_vm5, %v2794_v8, %v2796_v21  ;;  %v3474_v8 = vld [vmem:[%s6173_s3 + $0x98] sm:$0xff]  ;;  %v3499_v56 = vpop.permute.xlu0 %3498  ;;  %v2496_v4 = vrot.slane %v2494_v28, 3 }
 0x216   : > { %v3671_v48 = vmul.f32 %v3494_v22, %v3419_v38  ;;  %4160 = vmatmul.msk.bf16.gmra.mxu1 %vm440_vm1, %v2018_v53  ;;  %v2020_v53 = vrot.slane %v6298_v27, 3  ;;  %3588 = vperm.xlu1 %4440, %v3474_v8   ;;  %v3504_v8 = vpop.permute.xlu1 %3503 }
 0x217   : > { %v3186_v49 = vpop.f32.mrf.mxu0  ;;  %v3272_v37 = vadd.f32 %v3183_v31, %v2976_v26  ;;  %4258 = vmatmul.msk.bf16.gmra.mxu2 %vm440_vm1, %v2489_v57  ;;  %v6297_v31 = vshrl.u32 %v4956_v59, 16 }
 0x218   : > { %3707 = vst.msk [vmem:[%s5659_s10] sm:$0xff] %vm440_vm1, %v3671_v48 }
 0x219   : > { %v3312_v22 = vadd.f32 %v5631_v30, %v3272_v37  ;;  %v2019_v45 = vrot.slane %v6297_v31, 2  ;;  %4290 = vmatmul.msk.bf16.gmra.mxu3 %vm440_vm1, %v2797_v25  ;;  %v3069_v37 = vrot.slane %v2491_v34, 3  ;;  %v3070_v25 = vrot.slane %v2494_v28, 4  ;;  %v3477_v34 = vld [vmem:[%s6173_s3 + $0xb0] sm:$0xff] }
 0x21a   : > { %4318 = vmatmul.msk.bf16.gmra.mxu0 %vm440_vm1, %v3068_v13  ;;  %v2642_v52 = vpop.f32.mrf.mxu2  ;;  %v5696_v31 = vor.u32 %v2496_v4, %v2493_v24 }
 0x21b   : > { %v2729_v15 = vadd.f32 %v2642_v52, %v2223_v39  ;;  %v2138_v40 = vpop.f32.mrf.mxu1  ;;  %vm3348_vm9 = vcmp.ge.f32.partialorder %v3312_v22, 0.0  ;;  %v3384_v0 = vmul.f32 0.01, %v3312_v22  ;;  %v5689_v13 = vor.u32 %v2020_v53, %v2019_v45  ;;  %v5692_v52 = vld [vmem:[%s4536_s6 + $0x80] sm:$0xff] }
 0x21c   : > { %v5687_v26 = vpop.f32.mrf.mxu3  ;;  %v2224_v27 = vadd.f32 %v2138_v40, %v5056_v6  ;;  %v5703_v53 = vor.u32 %v3070_v25, %v3069_v37  ;;  %v3476_v6 = vld [vmem:[%s6173_s3 + $0xa8] sm:$0xff]  ;;  %v2503_v25 = vshll.u32 %v5638_v58, 16 }
 0x21d   : > { %v2977_v57 = vadd.f32 %v5589_v20, %v2729_v15  ;;  %v3420_v59 = vsel %vm3348_vm9, %v3312_v22, %v3384_v0  ;;  %v2022_v45 = vsel %vm1970_vm6, %v5635_v60, %v5689_v13  ;;  %v2798_v60 = vrot.slane %v5692_v52, 3  ;;  %3598 = vperm.xlu0 %4439, %v3476_v6  }
 0x21e   : > { %v3672_v38 = vmul.f32 %v3499_v56, %v3420_v59  ;;  %3603 = vperm.xlu1 %4440, %v3477_v34   ;;  %v2498_v56 = vsel %vm1970_vm6, %v5640_v55, %v5696_v31  ;;  %v2500_v55 = vshrl.u32 %v5638_v58, 16  ;;  %v2505_v6 = vrot.slane %v2503_v25, 3 }
 0x21f   : > { %v3188_v48 = vpop.f32.mrf.mxu0  ;;  %v3273_v39 = vadd.f32 %v3186_v49, %v2977_v57  ;;  %v3472_v49 = vld [vmem:[%s6173_s3 + $0x88] sm:$0xff] }
 0x220   : > { %3708 = vst.msk [vmem:[%s5659_s10 + $0x8] sm:$0xff] %vm440_vm1, %v3672_v38  ;;  %3578 = vperm.xlu2 %4441, %v3472_v49   ;;  %v3072_v38 = vsel %vm3020_vm7, %v5647_v41, %v5703_v53  ;;  %v3509_v49 = vpop.permute.xlu1 %3508 }
 0x221   : > { %v3313_v20 = vadd.f32 %v5631_v30, %v3273_v39 }
 0x222   : > { %v2644_v22 = vpop.f32.mrf.mxu2 }
 0x223   : > { %v2730_v28 = vadd.f32 %v2644_v22, %v2224_v27  ;;  %v2141_v15 = vpop.f32.mrf.mxu1  ;;  %vm3349_vm10 = vcmp.ge.f32.partialorder %v3313_v20, 0.0  ;;  %v3385_v40 = vmul.f32 0.01, %v3313_v20  ;;  %v6299_v27 = vshrl.u32 %v4997_v23, 16 }
 0x224   : > { %v5719_v4 = vpop.f32.mrf.mxu3  ;;  %v2225_v39 = vadd.f32 %v2141_v15, %v5075_v11  ;;  %v3479_v11 = vld [vmem:[%s6173_s3 + $0xc0] sm:$0xff] }
 0x225   : > { %v2978_v0 = vadd.f32 %v5606_v10, %v2730_v28  ;;  %v3421_v24 = vsel %vm3349_vm10, %v3313_v20, %v3385_v40  ;;  %v2799_v10 = vsel %vm2772_vm5, %v2796_v21, %v2798_v60  ;;  %v6300_v20 = vshll.u32 %v4997_v23, 16  ;;  %v3480_v21 = vld [vmem:[%s6173_s3 + $0xc8] sm:$0xff]  ;;  %3613 = vperm.xlu0 %4439, %v3479_v11  }
 0x226   : > { %v3673_v57 = vmul.f32 %v3504_v8, %v3421_v24  ;;  %4161 = vmatmul.msk.bf16.gmra.mxu1 %vm440_vm1, %v2022_v45  ;;  %v2023_v8 = vrot.slane %v6299_v27, 2  ;;  %3618 = vperm.xlu1 %4440, %v3480_v21   ;;  %v2502_v23 = vrot.slane %v2500_v55, 2  ;;  %v3514_v27 = vpop.permute.xlu2 %3513 }
 0x227   : > { %v3191_v59 = vpop.f32.mrf.mxu0  ;;  %v3274_v37 = vadd.f32 %v3188_v48, %v2978_v0  ;;  %4259 = vmatmul.msk.bf16.gmra.mxu2 %vm440_vm1, %v2498_v56  ;;  %v2024_v22 = vrot.slane %v6300_v20, 3 }
 0x228   : > { %3709 = vst.msk [vmem:[%s5659_s10 + $0x10] sm:$0xff] %vm440_vm1, %v3673_v57  ;;  %v3073_v57 = vrot.slane %v2500_v55, 3  ;;  %v3483_v55 = vld [vmem:[%s6173_s3 + $0xe0] sm:$0xff] }
 0x229   : > { %v3314_v41 = vadd.f32 %v5631_v30, %v3274_v37  ;;  %4291 = vmatmul.msk.bf16.gmra.mxu3 %vm440_vm1, %v2799_v10  ;;  %v5752_v24 = vor.u32 %v2024_v22, %v2023_v8  ;;  %v5755_v10 = vld [vmem:[%s4536_s6 + $0x88] sm:$0xff] }
 0x22a   : > { %4319 = vmatmul.msk.bf16.gmra.mxu0 %vm440_vm1, %v3072_v38  ;;  %v2647_v48 = vpop.f32.mrf.mxu2  ;;  %v3074_v38 = vrot.slane %v2503_v25, 4 }
 0x22b   : > { %v2731_v58 = vadd.f32 %v2647_v48, %v2225_v39  ;;  %v2143_v45 = vpop.f32.mrf.mxu1  ;;  %vm3350_vm11 = vcmp.ge.f32.partialorder %v3314_v41, 0.0  ;;  %v3386_v34 = vmul.f32 0.01, %v3314_v41  ;;  %v5759_v39 = vor.u32 %v2505_v6, %v2502_v23 }
 0x22c   : > { %v5750_v40 = vpop.f32.mrf.mxu3  ;;  %v2226_v48 = vadd.f32 %v2143_v45, %v5088_v32  ;;  %v2026_v8 = vsel %vm1970_vm6, %v5689_v13, %v5752_v24  ;;  %v5766_v20 = vor.u32 %v3074_v38, %v3073_v57  ;;  %v3482_v32 = vld [vmem:[%s6173_s3 + $0xd8] sm:$0xff]  ;;  %v2800_v13 = vrot.slane %v5755_v10, 3 }
 0x22d   : > { %v2979_v28 = vadd.f32 %v5633_v7, %v2731_v58  ;;  %v3422_v15 = vsel %vm3350_vm11, %v3314_v41, %v3386_v34  ;;  %v2507_v11 = vsel %vm1970_vm6, %v5696_v31, %v5759_v39  ;;  %3628 = vperm.xlu0 %4439, %v3482_v32   ;;  %v2509_v31 = vshrl.u32 %v5692_v52, 16 }
 0x22e   : > { %v3674_v56 = vmul.f32 %v3509_v49, %v3422_v15  ;;  %3633 = vperm.xlu1 %4440, %v3483_v55   ;;  %v3076_v6 = vsel %vm3020_vm7, %v5703_v53, %v5766_v20  ;;  %v2512_v15 = vshll.u32 %v5692_v52, 16  ;;  %v6301_v57 = vshrl.u32 %v5029_v9, 16  ;;  %v3485_v52 = vld [vmem:[%s6173_s3 + $0xf0] sm:$0xff] }
 0x22f   : > { %v3193_v0 = vpop.f32.mrf.mxu0  ;;  %v3275_v37 = vadd.f32 %v3191_v59, %v2979_v28  ;;  %v3475_v59 = vld [vmem:[%s6173_s3 + $0xa0] sm:$0xff] }
 0x230   : > { %3710 = vst.msk [vmem:[%s5659_s10 + $0x18] sm:$0xff] %vm440_vm1, %v3674_v56  ;;  %3593 = vperm.xlu2 %4441, %v3475_v59   ;;  %v2027_v38 = vrot.slane %v6301_v57, 2  ;;  %v2514_v59 = vrot.slane %v2512_v15, 3 }
 0x231   : > { %v3315_v7 = vadd.f32 %v5631_v30, %v3275_v37  ;;  %v6302_v37 = vshll.u32 %v5029_v9, 16 }
 0x232   : > { %v2649_v41 = vpop.f32.mrf.mxu2 }
 0x233   : > { %v2732_v25 = vadd.f32 %v2649_v41, %v2226_v48  ;;  %v2146_v22 = vpop.f32.mrf.mxu1  ;;  %vm3351_vm12 = vcmp.ge.f32.partialorder %v3315_v7, 0.0  ;;  %v3387_v21 = vmul.f32 0.01, %v3315_v7  ;;  %v2028_v48 = vrot.slane %v6302_v37, 3  ;;  %v3519_v41 = vpop.permute.xlu2 %3518 }
 0x234   : > { %v5782_v49 = vpop.f32.mrf.mxu3  ;;  %v2227_v56 = vadd.f32 %v2146_v22, %v5107_v43  ;;  %v3486_v43 = vld [vmem:[%s6173_s3 + $0xf8] sm:$0xff] }
 0x235   : > { %v2980_v58 = vadd.f32 %v5661_v47, %v2732_v25  ;;  %v3423_v45 = vsel %vm3351_vm12, %v3315_v7, %v3387_v21  ;;  %v2801_v47 = vsel %vm2772_vm5, %v2798_v60, %v2800_v13  ;;  %v3478_v60 = vld [vmem:[%s6173_s3 + $0xb8] sm:$0xff]  ;;  %3643 = vperm.xlu0 %4439, %v3485_v52  }
 0x236   : > { %v3675_v34 = vmul.f32 %v3514_v27, %v3423_v45  ;;  %4162 = vmatmul.msk.bf16.gmra.mxu1 %vm440_vm1, %v2026_v8  ;;  %3648 = vperm.xlu1 %4440, %v3486_v43   ;;  %v2511_v8 = vrot.slane %v2509_v31, 2  ;;  %v3078_v45 = vrot.slane %v2512_v15, 4 }
 0x237   : > { %v3196_v23 = vpop.f32.mrf.mxu0  ;;  %v3276_v28 = vadd.f32 %v3193_v0, %v2980_v58  ;;  %4260 = vmatmul.msk.bf16.gmra.mxu2 %vm440_vm1, %v2507_v11  ;;  %v5818_v11 = vor.u32 %v2028_v48, %v2027_v38  ;;  %v3077_v58 = vrot.slane %v2509_v31, 3  ;;  %v3489_v31 = vld [vmem:[%s6173_s3 + $0x110] sm:$0xff]  ;;  %v3524_v38 = vpop.permute.xlu0 %3523 }
 0x238   : > { %3711 = vst.msk [vmem:[%s5659_s10 + $0x20] sm:$0xff] %vm440_vm1, %v3675_v34  ;;  %3608 = vperm.xlu2 %4441, %v3478_v60  }
 0x239   : > { %v3316_v53 = vadd.f32 %v5631_v30, %v3276_v28  ;;  %4292 = vmatmul.msk.bf16.gmra.mxu3 %vm440_vm1, %v2801_v47  ;;  %v5825_v28 = vor.u32 %v2514_v59, %v2511_v8  ;;  %v2521_v8 = vshll.u32 %v5755_v10, 16 }
 0x23a   : > { %4320 = vmatmul.msk.bf16.gmra.mxu0 %vm440_vm1, %v3076_v6  ;;  %v2652_v0 = vpop.f32.mrf.mxu2  ;;  %v5821_v6 = vld [vmem:[%s4536_s6 + $0x90] sm:$0xff] }
 0x23b   : > { %v2733_v27 = vadd.f32 %v2652_v0, %v2227_v56  ;;  %v2148_v7 = vpop.f32.mrf.mxu1  ;;  %vm3352_vm13 = vcmp.ge.f32.partialorder %v3316_v53, 0.0  ;;  %v3388_v9 = vmul.f32 0.01, %v3316_v53  ;;  %v5832_v0 = vor.u32 %v3078_v45, %v3077_v58 }
 0x23c   : > { %v5816_v25 = vpop.f32.mrf.mxu3  ;;  %v2228_v47 = vadd.f32 %v2148_v7, %v5120_v54  ;;  %v3488_v54 = vld [vmem:[%s6173_s3 + $0x108] sm:$0xff]  ;;  %v2516_v48 = vsel %vm1970_vm6, %v5759_v39, %v5825_v28  ;;  %v2518_v39 = vshrl.u32 %v5755_v10, 16 }
 0x23d   : > { %v2981_v55 = vadd.f32 %v5687_v26, %v2733_v27  ;;  %v3424_v32 = vsel %vm3352_vm13, %v3316_v53, %v3388_v9  ;;  %v2030_v53 = vsel %vm1970_vm6, %v5752_v24, %v5818_v11  ;;  %v2802_v24 = vrot.slane %v5821_v6, 3  ;;  %3658 = vperm.xlu0 %4439, %v3488_v54  }
 0x23e   : > { %v3676_v22 = vmul.f32 %v3519_v41, %v3424_v32  ;;  %3663 = vperm.xlu1 %4440, %v3489_v31   ;;  %v3080_v41 = vsel %vm3020_vm7, %v5766_v20, %v5832_v0  ;;  %v6303_v32 = vshrl.u32 %v5061_v18, 16 }
 0x23f   : > { %v3198_v21 = vpop.f32.mrf.mxu0  ;;  %v3277_v34 = vadd.f32 %v3196_v23, %v2981_v55  ;;  %v3481_v23 = vld [vmem:[%s6173_s3 + $0xd0] sm:$0xff] }
 0x240   : > { %3712 = vst.msk [vmem:[%s5659_s10 + $0x28] sm:$0xff] %vm440_vm1, %v3676_v22  ;;  %3623 = vperm.xlu2 %4441, %v3481_v23   ;;  %v2031_v22 = vrot.slane %v6303_v32, 2 }
 0x241   : > { %v3317_v26 = vadd.f32 %v5631_v30, %v3277_v34 }
 0x242   : > { %v2654_v56 = vpop.f32.mrf.mxu2 }
 0x243   : > { %v2734_v15 = vadd.f32 %v2654_v56, %v2228_v47  ;;  %v2151_v57 = vpop.f32.mrf.mxu1  ;;  %vm3353_vm14 = vcmp.ge.f32.partialorder %v3317_v26, 0.0  ;;  %v3389_v37 = vmul.f32 0.01, %v3317_v26  ;;  %v2520_v47 = vrot.slane %v2518_v39, 2 }
 0x244   : > { %v5848_v52 = vpop.f32.mrf.mxu3  ;;  %v2229_v59 = vadd.f32 %v2151_v57, %v5139_v14  ;;  %v3529_v14 = vpop.permute.xlu1 %3528  ;;  %v3082_v57 = vrot.slane %v2521_v8, 4 }
 0x245   : > { %v2982_v60 = vadd.f32 %v5719_v4, %v2734_v15  ;;  %v3425_v43 = vsel %vm3353_vm14, %v3317_v26, %v3389_v37  ;;  %v2803_v4 = vsel %vm2772_vm5, %v2800_v13, %v2802_v24  ;;  %v3484_v13 = vld [vmem:[%s6173_s3 + $0xe8] sm:$0xff]  ;;  %v2523_v26 = vrot.slane %v2521_v8, 3  ;;  %v5881_v37 = vld [vmem:[%s4536_s6 + $0x98] sm:$0xff]  ;;  %v3534_v8 = vpop.permute.xlu2 %3533 }
 0x246   : > { %v3677_v27 = vmul.f32 %v3524_v38, %v3425_v43  ;;  %4163 = vmatmul.msk.bf16.gmra.mxu1 %vm440_vm1, %v2030_v53  ;;  %v3081_v15 = vrot.slane %v2518_v39, 3 }
 0x247   : > { %v3201_v7 = vpop.f32.mrf.mxu0  ;;  %v3278_v9 = vadd.f32 %v3198_v21, %v2982_v60  ;;  %4261 = vmatmul.msk.bf16.gmra.mxu2 %vm440_vm1, %v2516_v48  ;;  %v6304_v21 = vshll.u32 %v5061_v18, 16  ;;  %v5885_v48 = vor.u32 %v2523_v26, %v2520_v47  ;;  %v6305_v60 = vld [vmem:[#allocation23_spill] sm:$0xff]  ;;  %v6306_v47 = vld [vmem:[#allocation22_spill] sm:$0xff] }
 0x248   : > { %3713 = vst.msk [vmem:[%s5659_s10 + $0x30] sm:$0xff] %vm440_vm1, %v3677_v27  ;;  %3638 = vperm.xlu2 %4441, %v3484_v13   ;;  %v6307_v26 = vshrl.u32 %v6306_v47, 16 }
 0x249   : > { %v3318_v20 = vadd.f32 %v5631_v30, %v3278_v9  ;;  %v2032_v58 = vrot.slane %v6304_v21, 3  ;;  %4293 = vmatmul.msk.bf16.gmra.mxu3 %vm440_vm1, %v2803_v4  ;;  %v5892_v9 = vor.u32 %v3082_v57, %v3081_v15 }
 0x24a   : > { %4321 = vmatmul.msk.bf16.gmra.mxu0 %vm440_vm1, %v3080_v41  ;;  %v2657_v55 = vpop.f32.mrf.mxu2 }
 0x24b   : > { %v2735_v10 = vadd.f32 %v2657_v55, %v2229_v59  ;;  %v2153_v45 = vpop.f32.mrf.mxu1  ;;  %vm3354_vm15 = vcmp.ge.f32.partialorder %v3318_v20, 0.0  ;;  %v3390_v34 = vmul.f32 0.01, %v3318_v20  ;;  %v5878_v54 = vor.u32 %v2032_v58, %v2031_v22 }
 0x24c   : > { %v5876_v53 = vpop.f32.mrf.mxu3  ;;  %v2230_v43 = vadd.f32 %v2153_v45, %v6305_v60  ;;  %v2525_v55 = vsel %vm1970_vm6, %v5825_v28, %v5885_v48  ;;  %v3084_v13 = vsel %vm3020_vm7, %v5832_v0, %v5892_v9  ;;  %v2527_v28 = vshrl.u32 %v5821_v6, 16 }
 0x24d   : > { %v2983_v56 = vadd.f32 %v5750_v40, %v2735_v10  ;;  %v3426_v18 = vsel %vm3354_vm15, %v3318_v20, %v3390_v34  ;;  %v2034_v41 = vsel %vm1970_vm6, %v5818_v11, %v5878_v54  ;;  %v2804_v20 = vrot.slane %v5881_v37, 3 }
 0x24e   : > { %v3678_v23 = vmul.f32 %v3529_v14, %v3426_v18  ;;  %v2530_v45 = vshll.u32 %v5821_v6, 16  ;;  %v6308_v18 = vshll.u32 %v6306_v47, 16  ;;  %v2529_v57 = vrot.slane %v2527_v28, 2 }
 0x24f   : > { %v3203_v31 = vpop.f32.mrf.mxu0  ;;  %v3279_v38 = vadd.f32 %v3201_v7, %v2983_v56  ;;  %v3487_v7 = vld [vmem:[%s6173_s3 + $0x100] sm:$0xff]  ;;  %v2035_v56 = vrot.slane %v6307_v26, 2 }
 0x250   : > { %3714 = vst.msk [vmem:[%s5659_s10 + $0x38] sm:$0xff] %vm440_vm1, %v3678_v23  ;;  %3653 = vperm.xlu2 %4441, %v3487_v7   ;;  %v2036_v23 = vrot.slane %v6308_v18, 3 }
 0x251   : > { %v3319_v40 = vadd.f32 %v5631_v30, %v3279_v38  ;;  %v2532_v38 = vrot.slane %v2530_v45, 3 }
 0x252   : > { %v2659_v27 = vpop.f32.mrf.mxu2  ;;  %v5932_v7 = vor.u32 %v2036_v23, %v2035_v56 }
 0x253   : > { %v2736_v4 = vadd.f32 %v2659_v27, %v2230_v43  ;;  %v2156_v39 = vpop.f32.mrf.mxu1  ;;  %vm3355_vm0 = vcmp.ge.f32.partialorder %v3319_v40, 0.0  ;;  %v3391_v59 = vmul.f32 0.01, %v3319_v40 }
 0x254   : > { %v5902_v22 = vpop.f32.mrf.mxu3  ;;  %v2231_v14 = vadd.f32 %v2156_v39, %v5170_v33  ;;  %v3539_v33 = vpop.permute.xlu0 %3538  ;;  %v3086_v39 = vrot.slane %v2530_v45, 4 }
 0x255   : > { %v2984_v11 = vadd.f32 %v5782_v49, %v2736_v4  ;;  %v3427_v32 = vsel %vm3355_vm0, %v3319_v40, %v3391_v59  ;;  %v2805_v49 = vsel %vm2772_vm5, %v2802_v24, %v2804_v20  ;;  %v3490_v24 = vld [vmem:[%s6173_s3 + $0x118] sm:$0xff]  ;;  %v3085_v4 = vrot.slane %v2527_v28, 3  ;;  %v5935_v59 = vld [vmem:[%s4536_s6 + $0xa0] sm:$0xff] }
 0x256   : > { %v3679_v21 = vmul.f32 %v3534_v8, %v3427_v32  ;;  %4164 = vmatmul.msk.bf16.gmra.mxu1 %vm440_vm1, %v2034_v41 }
 0x257   : > { %v3206_v58 = vpop.f32.mrf.mxu0  ;;  %v3280_v10 = vadd.f32 %v3203_v31, %v2984_v11  ;;  %4262 = vmatmul.msk.bf16.gmra.mxu2 %vm440_vm1, %v2525_v55  ;;  %v5939_v55 = vor.u32 %v2532_v38, %v2529_v57  ;;  %v6309_v11 = vld [vmem:[#allocation24_spill] sm:$0xff]  ;;  %v6311_v38 = vshll.u32 %v5125_v5, 16 }
 0x258   : > { %3715 = vst.msk [vmem:[%s5659_s10 + $0x40] sm:$0xff] %vm440_vm1, %v3679_v21  ;;  %3668 = vperm.xlu2 %4441, %v3490_v24   ;;  %v2539_v24 = vshll.u32 %v5881_v37, 16 }
 0x259   : > { %v3320_v0 = vadd.f32 %v5631_v30, %v3280_v10  ;;  %4294 = vmatmul.msk.bf16.gmra.mxu3 %vm440_vm1, %v2805_v49  ;;  %v5946_v10 = vor.u32 %v3086_v39, %v3085_v4 }
 0x25a   : > { %4322 = vmatmul.msk.bf16.gmra.mxu0 %vm440_vm1, %v3084_v13  ;;  %v2662_v34 = vpop.f32.mrf.mxu2  ;;  %v2038_v13 = vsel %vm1970_vm6, %v5878_v54, %v5932_v7  ;;  %v2541_v4 = vrot.slane %v2539_v24, 3 }
 0x25b   : > { %v2737_v6 = vadd.f32 %v2662_v34, %v2231_v14  ;;  %v2158_v31 = vpop.f32.mrf.mxu1  ;;  %vm3356_vm2 = vcmp.ge.f32.partialorder %v3320_v0, 0.0  ;;  %v3392_v15 = vmul.f32 0.01, %v3320_v0  ;;  %v2806_v14 = vrot.slane %v5935_v59, 3 }
 0x25c   : > { %v5930_v40 = vpop.f32.mrf.mxu3  ;;  %v2232_v32 = vadd.f32 %v2158_v31, %v6309_v11  ;;  %v3088_v18 = vsel %vm3020_vm7, %v5892_v9, %v5946_v10  ;;  %v2293_v31 = vld [vmem:[%s4536_s6 + $0xa8] sm:$0x7] }
 0x25d   : > { %v2985_v60 = vadd.f32 %v5816_v25, %v2737_v6  ;;  %v3428_v43 = vsel %vm3356_vm2, %v3320_v0, %v3392_v15  ;;  %v2534_v0 = vsel %vm1970_vm6, %v5885_v48, %v5939_v55  ;;  %v2536_v48 = vshrl.u32 %v5881_v37, 16 }
 0x25e   : > { %v3680_v27 = vmul.f32 %v3539_v33, %v3428_v43  ;;  %v6310_v15 = vshrl.u32 %v5125_v5, 16  ;;  %v2372_v37 = vunpack.c.l.b16 %v2293_v31 }
 0x25f   : > { %v3208_v41 = vpop.f32.mrf.mxu0  ;;  %v3281_v8 = vadd.f32 %v3206_v58, %v2985_v60  ;;  %v3544_v58 = vpop.permute.xlu1 %3543 }
 0x260   : > { %3716 = vst.msk [vmem:[%s5659_s10 + $0x48] sm:$0xff] %vm440_vm1, %v3680_v27  ;;  %v2039_v57 = vrot.slane %v6310_v15, 2  ;;  %v3549_v27 = vpop.permute.xlu2 %3548 }
 0x261   : > { %v3321_v25 = vadd.f32 %v5631_v30, %v3281_v8 }
 0x262   : > { %v2664_v21 = vpop.f32.mrf.mxu2 }
 0x263   : > { %v2738_v49 = vadd.f32 %v2664_v21, %v2232_v32  ;;  %v2161_v28 = vpop.f32.mrf.mxu1  ;;  %vm3357_vm3 = vcmp.ge.f32.partialorder %v3321_v25, 0.0  ;;  %v3393_v45 = vmul.f32 0.01, %v3321_v25  ;;  %v3089_v21 = vrot.slane %v2536_v48, 3 }
 0x264   : > { %v5953_v26 = vpop.f32.mrf.mxu3  ;;  %v2233_v6 = vadd.f32 %v2161_v28, %v5197_v35  ;;  %v5983_v28 = vpack.c.b16 %v2372_v37, %v2372_v37 }
 0x265   : > { %v2986_v34 = vadd.f32 %v5848_v52, %v2738_v49  ;;  %v3429_v47 = vsel %vm3357_vm3, %v3321_v25, %v3393_v45  ;;  %v2807_v52 = vsel %vm2772_vm5, %v2804_v20, %v2806_v14  ;;  %v2040_v20 = vrot.slane %v6311_v38, 3  ;;  %v6312_v45 = vld [vmem:[#allocation25_spill] sm:$0xff] }
 0x266   : > { %v3681_v54 = vmul.f32 %v3544_v58, %v3429_v47  ;;  %4165 = vmatmul.msk.bf16.gmra.mxu1 %vm440_vm1, %v2038_v13  ;;  %v3090_v13 = vrot.slane %v2539_v24, 4  ;;  %v2548_v38 = vshll.u32 %v5935_v59, 16 }
 0x267   : > { %v3211_v56 = vpop.f32.mrf.mxu0  ;;  %v3282_v23 = vadd.f32 %v3208_v41, %v2986_v34  ;;  %4263 = vmatmul.msk.bf16.gmra.mxu2 %vm440_vm1, %v2534_v0  ;;  %v2538_v41 = vrot.slane %v2536_v48, 2  ;;  %v5981_v5 = vor.u32 %v2040_v20, %v2039_v57  ;;  %v2808_v48 = vrot.slane %v5983_v28, 3  ;;  %v3559_v37 = vpop.permute.xlu1 %3558 }
 0x268   : > { %3717 = vst.msk [vmem:[%s5659_s10 + $0x50] sm:$0xff] %vm440_vm1, %v3681_v54  ;;  %v5994_v54 = vor.u32 %v3090_v13, %v3089_v21 }
 0x269   : > { %v3322_v9 = vadd.f32 %v5631_v30, %v3282_v23  ;;  %4295 = vmatmul.msk.bf16.gmra.mxu3 %vm440_vm1, %v2807_v52  ;;  %v5987_v58 = vor.u32 %v2541_v4, %v2538_v41  ;;  %v2042_v47 = vsel %vm1970_vm6, %v5932_v7, %v5981_v5  ;;  %v1961_v4 = vld [vmem:[%s4536_s6 + $0xa0] sm:$0x7] }
 0x26a   : > { %4323 = vmatmul.msk.bf16.gmra.mxu0 %vm440_vm1, %v3088_v18  ;;  %v2667_v33 = vpop.f32.mrf.mxu2  ;;  %v3092_v15 = vsel %vm3020_vm7, %v5946_v10, %v5994_v54 }
 0x26b   : > { %v2739_v60 = vadd.f32 %v2667_v33, %v2233_v6  ;;  %v2163_v43 = vpop.f32.mrf.mxu1  ;;  %vm3358_vm4 = vcmp.ge.f32.partialorder %v3322_v9, 0.0  ;;  %v3394_v35 = vmul.f32 0.01, %v3322_v9  ;;  %v2543_v24 = vsel %vm1970_vm6, %v5939_v55, %v5987_v58 }
 0x26c   : > { %v5979_v11 = vpop.f32.mrf.mxu3  ;;  %v2234_v0 = vadd.f32 %v2163_v43, %v6312_v45  ;;  %v2809_v55 = vsel %vm2772_vm5, %v2806_v14, %v2808_v48  ;;  %v6313_v43 = vshrl.u32 %v5156_v29, 16 }
 0x26d   : > { %v2987_v39 = vadd.f32 %v5876_v53, %v2739_v60  ;;  %v3430_v8 = vsel %vm3358_vm4, %v3322_v9, %v3394_v35 }
 0x26e   : > { %v3682_v32 = vmul.f32 %v3549_v27, %v3430_v8  ;;  %v2043_v27 = vrot.slane %v6313_v43, 2  ;;  %v2550_v8 = vrot.slane %v2548_v38, 3 }
 0x26f   : > { %v3213_v25 = vpop.f32.mrf.mxu0  ;;  %v3283_v49 = vadd.f32 %v3211_v56, %v2987_v39  ;;  %v3554_v56 = vpop.permute.xlu0 %3553 }
 0x270   : > { %3718 = vst.msk [vmem:[%s5659_s10 + $0x58] sm:$0xff] %vm440_vm1, %v3682_v32 }
 0x271   : > { %v3323_v53 = vadd.f32 %v5631_v30, %v3283_v49 }
 0x272   : > { %v2669_v34 = vpop.f32.mrf.mxu2 }
 0x273   : > { %v2740_v18 = vadd.f32 %v2669_v34, %v2234_v0  ;;  %v2166_v23 = vpop.f32.mrf.mxu1  ;;  %vm3359_vm8 = vcmp.ge.f32.partialorder %v3323_v53, 0.0  ;;  %v3395_v52 = vmul.f32 0.01, %v3323_v53  ;;  %v3094_v0 = vrot.slane %v2548_v38, 4 }
 0x274   : > { %v6001_v31 = vpop.f32.mrf.mxu3  ;;  %v2235_v20 = vadd.f32 %v2166_v23, %v5236_v42 }
 0x275   : > { %v2988_v6 = vadd.f32 %v5902_v22, %v2740_v18  ;;  %v3431_v9 = vsel %vm3359_vm8, %v3323_v53, %v3395_v52  ;;  %v2545_v22 = vshrl.u32 %v5935_v59, 16  ;;  %v6314_v59 = vshll.u32 %v5156_v29, 16  ;;  %v3011_v18 = vld [vmem:[%s4536_s6 + $0xa8] sm:$0xf] }
 0x276   : > { %v3683_v7 = vmul.f32 %v3554_v56, %v3431_v9  ;;  %4166 = vmatmul.msk.bf16.gmra.mxu1 %vm440_vm1, %v2042_v47  ;;  %v1968_v53 = vunpack.c.l.b16 %v1961_v4 }
 0x277   : > { %v3216_v33 = vpop.f32.mrf.mxu0  ;;  %v3284_v57 = vadd.f32 %v3213_v25, %v2988_v6  ;;  %4264 = vmatmul.msk.bf16.gmra.mxu2 %vm440_vm1, %v2543_v24  ;;  %v2044_v42 = vrot.slane %v6314_v59, 3  ;;  %v2547_v39 = vrot.slane %v2545_v22, 2  ;;  %v3093_v45 = vrot.slane %v2545_v22, 3 }
 0x278   : > { %3719 = vst.msk [vmem:[%s5659_s10 + $0x60] sm:$0xff] %vm440_vm1, %v3683_v7  ;;  %v1969_v48 = vpack.c.b16 %v1968_v53, %v1968_v53  ;;  %v3018_v24 = vunpack.c.l.b16 %v3011_v18  ;;  %v3564_v7 = vpop.permute.xlu2 %3563 }
 0x279   : > { %v3324_v10 = vadd.f32 %v5631_v30, %v3284_v57  ;;  %4296 = vmatmul.msk.bf16.gmra.mxu3 %vm440_vm1, %v2809_v55  ;;  %v6027_v47 = vor.u32 %v2044_v42, %v2043_v27  ;;  %v6032_v29 = vor.u32 %v2550_v8, %v2547_v39  ;;  %v6036_v52 = vor.u32 %v3094_v0, %v3093_v45  ;;  %v3569_v39 = vpop.permute.xlu0 %3568 }
 0x27a   : > { %4324 = vmatmul.msk.bf16.gmra.mxu0 %vm440_vm1, %v3092_v15  ;;  %v2672_v60 = vpop.f32.mrf.mxu2  ;;  %v3019_v43 = vpack.c.b16 %v3018_v24, %v3018_v24  ;;  %v2051_v27 = vshll.u32 %v1969_v48, 16 }
 0x27b   : > { %v2741_v14 = vadd.f32 %v2672_v60, %v2235_v20  ;;  %v2168_v35 = vpop.f32.mrf.mxu1  ;;  %vm3360_vm5 = vcmp.ge.f32.partialorder %v3324_v10, 0.0  ;;  %v3396_v41 = vmul.f32 0.01, %v3324_v10  ;;  %v2046_v15 = vsel %vm1970_vm6, %v5981_v5, %v6027_v47 }
 0x27c   : > { %v6025_v21 = vpop.f32.mrf.mxu3  ;;  %v2236_v23 = vadd.f32 %v2168_v35, %v5257_v17  ;;  %v2552_v17 = vsel %vm1970_vm6, %v5987_v58, %v6032_v29  ;;  %v2048_v60 = vshrl.u32 %v1969_v48, 16  ;;  %v2557_v58 = vshll.u32 %v5983_v28, 16 }
 0x27d   : > { %v2989_v32 = vadd.f32 %v5930_v40, %v2741_v14  ;;  %v3432_v25 = vsel %vm3360_vm5, %v3324_v10, %v3396_v41  ;;  %v3096_v10 = vsel %vm3020_vm7, %v5994_v54, %v6036_v52  ;;  %v3098_v41 = vshrl.u32 %v3019_v43, 16 }
 0x27e   : > { %v3684_v13 = vmul.f32 %v3559_v37, %v3432_v25  ;;  %v2050_v54 = vrot.slane %v2048_v60, 2  ;;  %v3101_v59 = vshll.u32 %v3019_v43, 16 }
 0x27f   : > { %v3218_v49 = vpop.f32.mrf.mxu0  ;;  %v3285_v34 = vadd.f32 %v3216_v33, %v2989_v32  ;;  %v2053_v32 = vrot.slane %v2051_v27, 3  ;;  %v3100_v0 = vrot.slane %v3098_v41, 3 }
 0x280   : > { %3720 = vst.msk [vmem:[%s5659_s10 + $0x68] sm:$0xff] %vm440_vm1, %v3684_v13  ;;  %v2559_v13 = vrot.slane %v2557_v58, 3  ;;  %v3103_v53 = vrot.slane %v3101_v59, 4  ;;  %v3579_v27 = vpop.permute.xlu2 %3578 }
 0x281   : > { %v3325_v40 = vadd.f32 %v5631_v30, %v3285_v34 }
 0x282   : > { %v2674_v56 = vpop.f32.mrf.mxu2 }
 0x283   : > { %v2742_v6 = vadd.f32 %v2674_v56, %v2236_v23  ;;  %v2171_v9 = vpop.f32.mrf.mxu1  ;;  %vm3361_vm9 = vcmp.ge.f32.partialorder %v3325_v40, 0.0  ;;  %v3397_v33 = vmul.f32 0.01, %v3325_v40  ;;  %v2054_v23 = vor.u32 %v2053_v32, %v2050_v54 }
 0x284   : > { %v6045_v22 = vpop.f32.mrf.mxu3  ;;  %v2237_v14 = vadd.f32 %v2171_v9, %v5270_v51 }
 0x285   : > { %v2990_v57 = vadd.f32 %v5953_v26, %v2742_v6  ;;  %v3433_v55 = vsel %vm3361_vm9, %v3325_v40, %v3397_v33  ;;  %v2554_v26 = vshrl.u32 %v5983_v28, 16  ;;  %v3104_v6 = vor.u32 %v3103_v53, %v3100_v0 }
 0x286   : > { %v3685_v38 = vmul.f32 %v3564_v7, %v3433_v55  ;;  %4167 = vmatmul.msk.bf16.gmra.mxu1 %vm440_vm1, %v2046_v15  ;;  %v3574_v7 = vpop.permute.xlu1 %3573  ;;  %v2055_v15 = vsel %vm1970_vm6, %v6027_v47, %v2054_v23 }
 0x287   : > { %v3221_v20 = vpop.f32.mrf.mxu0  ;;  %v3286_v5 = vadd.f32 %v3218_v49, %v2990_v57  ;;  %4265 = vmatmul.msk.bf16.gmra.mxu2 %vm440_vm1, %v2552_v17  ;;  %v2556_v25 = vrot.slane %v2554_v26, 2 }
 0x288   : > { %3721 = vst.msk [vmem:[%s5659_s10 + $0x70] sm:$0xff] %vm440_vm1, %v3685_v38 }
 0x289   : > { %v3326_v35 = vadd.f32 %v5631_v30, %v3286_v5  ;;  %v2560_v40 = vor.u32 %v2559_v13, %v2556_v25 }
 0x28a   : > { %4325 = vmatmul.msk.bf16.gmra.mxu0 %vm440_vm1, %v3096_v10  ;;  %v2677_v37 = vpop.f32.mrf.mxu2 }
 0x28b   : > { %v2743_v42 = vadd.f32 %v2677_v37, %v2237_v14  ;;  %v2173_v4 = vpop.f32.mrf.mxu1  ;;  %vm3362_vm10 = vcmp.ge.f32.partialorder %v3326_v35, 0.0  ;;  %v3398_v8 = vmul.f32 0.01, %v3326_v35  ;;  %v2561_v17 = vsel %vm1970_vm6, %v6032_v29, %v2560_v40 }
 0x28c   : > { %v6060_v34 = vpop.f32.mrf.mxu3  ;;  %v2238_v56 = vadd.f32 %v2173_v4, %v5290_v50 }
 0x28d   : > { %v2991_v28 = vadd.f32 %v5979_v11, %v2743_v42  ;;  %v3434_v51 = vsel %vm3362_vm10, %v3326_v35, %v3398_v8 }
 0x28e   : > { %v3686_v49 = vmul.f32 %v3569_v39, %v3434_v51  ;;  %v3584_v39 = vpop.permute.xlu0 %3583 }
 0x28f   : > { %v3223_v45 = vpop.f32.mrf.mxu0  ;;  %v3287_v18 = vadd.f32 %v3221_v20, %v2991_v28  ;;  %v3105_v20 = vsel %vm3020_vm7, %v6036_v52, %v3104_v6 }
 0x290   : > { %3722 = vst.msk [vmem:[%s5659_s10 + $0x78] sm:$0xff] %vm440_vm1, %v3686_v49 }
 0x291   : > { %v3327_v48 = vadd.f32 %v5631_v30, %v3287_v18 }
 0x292   : > { %v2679_v24 = vpop.f32.mrf.mxu2 }
 0x293   : > { %v2744_v11 = vadd.f32 %v2679_v24, %v2238_v56  ;;  %v2176_v9 = vpop.f32.mrf.mxu1  ;;  %vm3363_vm11 = vcmp.ge.f32.partialorder %v3327_v48, 0.0  ;;  %v3399_v33 = vmul.f32 0.01, %v3327_v48 }
 0x294   : > { %v2937_v47 = vpop.f32.mrf.mxu3  ;;  %v2239_v60 = vadd.f32 %v2176_v9, %v5305_v2 }
 0x295   : > { %v2992_v57 = vadd.f32 %v6001_v31, %v2744_v11  ;;  %v3435_v55 = vsel %vm3363_vm11, %v3327_v48, %v3399_v33 }
 0x296   : > { %v3687_v50 = vmul.f32 %v3574_v7, %v3435_v55  ;;  %4168 = vmatmul.msk.bf16.gmra.mxu1 %vm440_vm1, %v2055_v15  ;;  %v3594_v15 = vpop.permute.xlu2 %3593 }
 0x297   : > { %v3226_v38 = vpop.f32.mrf.mxu0  ;;  %v3288_v10 = vadd.f32 %v3223_v45, %v2992_v57  ;;  %4266 = vmatmul.msk.bf16.gmra.mxu2 %vm440_vm1, %v2561_v17 }
 0x298   : > { %3723 = vst.msk [vmem:[%s5659_s10 + $0x80] sm:$0xff] %vm440_vm1, %v3687_v50 }
 0x299   : > { %v3328_v31 = vadd.f32 %v5631_v30, %v3288_v10 }
 0x29a   : > { %4326 = vmatmul.msk.bf16.gmra.mxu0 %vm440_vm1, %v3105_v20  ;;  %v2682_v29 = vpop.f32.mrf.mxu2 }
 0x29b   : > { %v2745_v43 = vadd.f32 %v2682_v29, %v2239_v60  ;;  %v2178_v5 = vpop.f32.mrf.mxu1  ;;  %vm3364_vm6 = vcmp.ge.f32.partialorder %v3328_v31, 0.0  ;;  %v3400_v26 = vmul.f32 0.01, %v3328_v31 }
 0x29c   : > { %v2240_v2 = vadd.f32 %v2178_v5, %v5324_v63  ;;  %v2940_v59 = vpop.f32.mrf.mxu3 }
 0x29d   : > { %v2993_v52 = vadd.f32 %v6025_v21, %v2745_v43  ;;  %v3436_v58 = vsel %vm3364_vm6, %v3328_v31, %v3400_v26  ;;  %v3599_v43 = vpop.permute.xlu0 %3598 }
 0x29e   : > { %v3688_v14 = vmul.f32 %v3579_v27, %v3436_v58 }
 0x29f   : > { %v3228_v35 = vpop.f32.mrf.mxu0  ;;  %v3289_v37 = vadd.f32 %v3226_v38, %v2993_v52 }
 0x2a0   : > { %3724 = vst.msk [vmem:[%s5659_s10 + $0x88] sm:$0xff] %vm440_vm1, %v3688_v14 }
 0x2a1   : > { %v3329_v54 = vadd.f32 %v5631_v30, %v3289_v37  ;;  %v6092_v30 = vld [vmem:[%s6172_s2] ss:$0 sm:$0xff] }
 0x2a2   : > { %v2684_v41 = vpop.f32.mrf.mxu2 }
 0x2a3   : > { %v2746_v42 = vadd.f32 %v2684_v41, %v2240_v2  ;;  %v2181_v4 = vpop.f32.mrf.mxu1  ;;  %vm3365_vm7 = vcmp.ge.f32.partialorder %v3329_v54, 0.0  ;;  %v3401_v8 = vmul.f32 0.01, %v3329_v54 }
 0x2a4   : > { %v2241_v63 = vadd.f32 %v2181_v4, %v5344_v16  ;;  %v2942_v18 = vpop.f32.mrf.mxu3 }
 0x2a5   : > { %v2994_v21 = vadd.f32 %v6045_v22, %v2746_v42  ;;  %v3437_v32 = vsel %vm3365_vm7, %v3329_v54, %v3401_v8  ;;  %v3589_v22 = vpop.permute.xlu1 %3588 }
 0x2a6   : > { %v3689_v25 = vmul.f32 %v3584_v39, %v3437_v32 }
 0x2a7   : > { %v3231_v13 = vpop.f32.mrf.mxu0  ;;  %v3290_v28 = vadd.f32 %v3228_v35, %v2994_v21 }
 0x2a8   : > { %3725 = vst.msk [vmem:[%s5659_s10 + $0x90] sm:$0xff] %vm440_vm1, %v3689_v25 }
 0x2a9   : > { %v3330_v51 = vadd.f32 %v6092_v30, %v3290_v28 }
 0x2aa   : > { %v2687_v49 = vpop.f32.mrf.mxu2 }
 0x2ab   : > { %v2747_v45 = vadd.f32 %v2687_v49, %v2241_v63  ;;  %v2183_v0 = vpop.f32.mrf.mxu1  ;;  %vm3366_vm12 = vcmp.ge.f32.partialorder %v3330_v51, 0.0  ;;  %v3402_v53 = vmul.f32 0.01, %v3330_v51 }
 0x2ac   : > { %v2242_v24 = vadd.f32 %v2183_v0, %v5361_v46  ;;  %v2945_v50 = vpop.f32.mrf.mxu3 }
 0x2ad   : > { %v2995_v23 = vadd.f32 %v6060_v34, %v2747_v45  ;;  %v3438_v40 = vsel %vm3366_vm12, %v3330_v51, %v3402_v53  ;;  %v3604_v41 = vpop.permute.xlu1 %3603  ;;  %v3609_v51 = vpop.permute.xlu2 %3608 }
 0x2ae   : > { %v3690_v56 = vmul.f32 %v3589_v22, %v3438_v40 }
 0x2af   : > { %v3233_v48 = vpop.f32.mrf.mxu0  ;;  %v3291_v16 = vadd.f32 %v3231_v13, %v2995_v23 }
 0x2b0   : > { %3726 = vst.msk [vmem:[%s5659_s10 + $0x98] sm:$0xff] %vm440_vm1, %v3690_v56 }
 0x2b1   : > { %v3331_v6 = vadd.f32 %v6092_v30, %v3291_v16 }
 0x2b2   : > { %v2689_v11 = vpop.f32.mrf.mxu2 }
 0x2b3   : > { %vm3367_vm13 = vcmp.ge.f32.partialorder %v3331_v6, 0.0  ;;  %v3403_v9 = vmul.f32 0.01, %v3331_v6  ;;  %v2748_v7 = vadd.f32 %v2689_v11, %v2242_v24  ;;  %v2186_v33 = vpop.f32.mrf.mxu1  ;;  %v3614_v24 = vpop.permute.xlu0 %3613 }
 0x2b4   : > { %v2243_v20 = vadd.f32 %v2186_v33, %v5381_v12  ;;  %v2947_v58 = vpop.f32.mrf.mxu3 }
 0x2b5   : > { %v3439_v17 = vsel %vm3367_vm13, %v3331_v6, %v3403_v9  ;;  %v2996_v57 = vadd.f32 %v2937_v47, %v2748_v7 }
 0x2b6   : > { %v3691_v34 = vmul.f32 %v3594_v15, %v3439_v17 }
 0x2b7   : > { %v3236_v55 = vpop.f32.mrf.mxu0  ;;  %v3292_v38 = vadd.f32 %v3233_v48, %v2996_v57 }
 0x2b8   : > { %3727 = vst.msk [vmem:[%s5659_s10 + $0xa0] sm:$0xff] %vm440_vm1, %v3691_v34 }
 0x2b9   : > { %v3332_v46 = vadd.f32 %v6092_v30, %v3292_v38 }
 0x2ba   : > { %v2692_v10 = vpop.f32.mrf.mxu2 }
 0x2bb   : > { %vm3368_vm14 = vcmp.ge.f32.partialorder %v3332_v46, 0.0  ;;  %v3404_v60 = vmul.f32 0.01, %v3332_v46  ;;  %v2749_v31 = vadd.f32 %v2692_v10, %v2243_v20  ;;  %v2188_v29 = vpop.f32.mrf.mxu1 }
 0x2bc   : > { %v2244_v12 = vadd.f32 %v2188_v29, %v5394_v3  ;;  %v2950_v3 = vpop.f32.mrf.mxu3 }
 0x2bd   : > { %v3440_v5 = vsel %vm3368_vm14, %v3332_v46, %v3404_v60  ;;  %v2997_v27 = vadd.f32 %v2940_v59, %v2749_v31 }
 0x2be   : > { %v3692_v47 = vmul.f32 %v3599_v43, %v3440_v5  ;;  %v6315_v43 = vld [vmem:[#allocation2_spill] sm:$0xff] }
 0x2bf   : > { %v3238_v26 = vpop.f32.mrf.mxu0  ;;  %v3293_v52 = vadd.f32 %v3236_v55, %v2997_v27 }
 0x2c0   : > { %3728 = vst.msk [vmem:[%s5659_s10 + $0xa8] sm:$0xff] %vm440_vm1, %v3692_v47 }
 0x2c1   : > { %v3333_v14 = vadd.f32 %v6092_v30, %v3293_v52  ;;  %v3624_v52 = vpop.permute.xlu2 %3623 }
 0x2c2   : > { %v2694_v35 = vpop.f32.mrf.mxu2 }
 0x2c3   : > { %vm3369_vm15 = vcmp.ge.f32.partialorder %v3333_v14, 0.0  ;;  %v3405_v37 = vmul.f32 0.01, %v3333_v14  ;;  %v2750_v2 = vadd.f32 %v2694_v35, %v2244_v12  ;;  %v2191_v54 = vpop.f32.mrf.mxu1 }
 0x2c4   : > { %v2245_v32 = vadd.f32 %v2191_v54, %v5411_v62  ;;  %v2952_v16 = vpop.f32.mrf.mxu3 }
 0x2c5   : > { %v3441_v42 = vsel %vm3369_vm15, %v3333_v14, %v3405_v37  ;;  %v2998_v4 = vadd.f32 %v2942_v18, %v2750_v2 }
 0x2c6   : > { %v3693_v59 = vmul.f32 %v3604_v41, %v3441_v42  ;;  %v6316_v41 = vld [vmem:[#allocation11_spill] sm:$0xff] }
 0x2c7   : > { %v3241_v39 = vpop.f32.mrf.mxu0  ;;  %v3294_v8 = vadd.f32 %v3238_v26, %v2998_v4 }
 0x2c8   : > { %3729 = vst.msk [vmem:[%s5659_s10 + $0xb0] sm:$0xff] %vm440_vm1, %v3693_v59 }
 0x2c9   : > { %v3334_v21 = vadd.f32 %v6092_v30, %v3294_v8 }
 0x2ca   : > { %v2697_v25 = vpop.f32.mrf.mxu2 }
 0x2cb   : > { %vm3370_vm0 = vcmp.ge.f32.partialorder %v3334_v21, 0.0  ;;  %v3406_v13 = vmul.f32 0.01, %v3334_v21  ;;  %v2751_v28 = vadd.f32 %v2697_v25, %v2245_v32  ;;  %v2193_v63 = vpop.f32.mrf.mxu1 }
 0x2cc   : > { %v2246_v23 = vadd.f32 %v2193_v63, %v5427_v1  ;;  %v2955_v60 = vpop.f32.mrf.mxu3 }
 0x2cd   : > { %v3442_v49 = vsel %vm3370_vm0, %v3334_v21, %v3406_v13  ;;  %v2999_v45 = vadd.f32 %v2945_v50, %v2751_v28  ;;  %v3619_v50 = vpop.permute.xlu1 %3618  ;;  %v3629_v21 = vpop.permute.xlu0 %3628 }
 0x2ce   : > { %v3694_v0 = vmul.f32 %v3609_v51, %v3442_v49  ;;  %v6317_v51 = vld [vmem:[#allocation14_spill] sm:$0xff] }
 0x2cf   : > { %v3243_v22 = vpop.f32.mrf.mxu0  ;;  %v3295_v53 = vadd.f32 %v3241_v39, %v2999_v45 }
 0x2d0   : > { %3730 = vst.msk [vmem:[%s5659_s10 + $0xb8] sm:$0xff] %vm440_vm1, %v3694_v0 }
 0x2d1   : > { %v3335_v18 = vadd.f32 %v6092_v30, %v3295_v53 }
 0x2d2   : > { %v2699_v62 = vpop.f32.mrf.mxu2 }
 0x2d3   : > { %vm3371_vm2 = vcmp.ge.f32.partialorder %v3335_v18, 0.0  ;;  %v3407_v40 = vmul.f32 0.01, %v3335_v18  ;;  %v2752_v56 = vadd.f32 %v2699_v62, %v2246_v23  ;;  %v2196_v48 = vpop.f32.mrf.mxu1 }
 0x2d4   : > { %v2247_v17 = vadd.f32 %v2196_v48, %v5450_v36  ;;  %v2957_v2 = vpop.f32.mrf.mxu3 }
 0x2d5   : > { %v3443_v6 = vsel %vm3371_vm2, %v3335_v18, %v3407_v40  ;;  %v3000_v11 = vadd.f32 %v2947_v58, %v2752_v56  ;;  %v3634_v23 = vpop.permute.xlu1 %3633 }
 0x2d6   : > { %v3695_v9 = vmul.f32 %v3614_v24, %v3443_v6  ;;  %v6318_v6 = vld [vmem:[#allocation3_spill] sm:$0xff] }
 0x2d7   : > { %v3246_v7 = vpop.f32.mrf.mxu0  ;;  %v3296_v33 = vadd.f32 %v3243_v22, %v3000_v11 }
 0x2d8   : > { %3731 = vst.msk [vmem:[%s5659_s10 + $0xc0] sm:$0xff] %vm440_vm1, %v3695_v9 }
 0x2d9   : > { %v3336_v15 = vadd.f32 %v6092_v30, %v3296_v33 }
 0x2da   : > { %v2702_v1 = vpop.f32.mrf.mxu2 }
 0x2db   : > { %vm3372_vm3 = vcmp.ge.f32.partialorder %v3336_v15, 0.0  ;;  %v3408_v57 = vmul.f32 0.01, %v3336_v15  ;;  %v2753_v34 = vadd.f32 %v2702_v1, %v2247_v17  ;;  %v2198_v55 = vpop.f32.mrf.mxu1  ;;  %v3639_v1 = vpop.permute.xlu2 %3638 }
 0x2dc   : > { %v2248_v5 = vadd.f32 %v2198_v55, %v6315_v43  ;;  %v2960_v0 = vpop.f32.mrf.mxu3 }
 0x2dd   : > { %v3444_v38 = vsel %vm3372_vm3, %v3336_v15, %v3408_v57  ;;  %v3001_v20 = vadd.f32 %v2950_v3, %v2753_v34 }
 0x2de   : > { %v3696_v46 = vmul.f32 %v3619_v50, %v3444_v38 }
 0x2df   : > { %v3248_v10 = vpop.f32.mrf.mxu0  ;;  %v3297_v31 = vadd.f32 %v3246_v7, %v3001_v20 }
 0x2e0   : > { %3732 = vst.msk [vmem:[%s5659_s10 + $0xc8] sm:$0xff] %vm440_vm1, %v3696_v46  ;;  %v6319_v46 = vld [vmem:[#allocation16_spill] sm:$0xff] }
 0x2e1   : > { %v3337_v29 = vadd.f32 %v6092_v30, %v3297_v31 }
 0x2e2   : > { %v2704_v36 = vpop.f32.mrf.mxu2 }
 0x2e3   : > { %vm3373_vm4 = vcmp.ge.f32.partialorder %v3337_v29, 0.0  ;;  %v3409_v27 = vmul.f32 0.01, %v3337_v29  ;;  %v2754_v47 = vadd.f32 %v2704_v36, %v2248_v5  ;;  %v2201_v26 = vpop.f32.mrf.mxu1  ;;  %v3644_v5 = vpop.permute.xlu0 %3643 }
 0x2e4   : > { %v2249_v42 = vadd.f32 %v2201_v26, %v6316_v41  ;;  %v2962_v17 = vpop.f32.mrf.mxu3  ;;  %v3649_v41 = vpop.permute.xlu1 %3648 }
 0x2e5   : > { %v3445_v58 = vsel %vm3373_vm4, %v3337_v29, %v3409_v27  ;;  %v3002_v14 = vadd.f32 %v2952_v16, %v2754_v47 }
 0x2e6   : > { %v3697_v12 = vmul.f32 %v3624_v52, %v3445_v58 }
 0x2e7   : > { %v3251_v35 = vpop.f32.mrf.mxu0  ;;  %v3298_v37 = vadd.f32 %v3248_v10, %v3002_v14 }
 0x2e8   : > { %3733 = vst.msk [vmem:[%s5659_s10 + $0xd0] sm:$0xff] %vm440_vm1, %v3697_v12 }
 0x2e9   : > { %v3338_v54 = vadd.f32 %v6092_v30, %v3298_v37 }
 0x2ea   : > { %v2707_v4 = vpop.f32.mrf.mxu2 }
 0x2eb   : > { %vm3374_vm8 = vcmp.ge.f32.partialorder %v3338_v54, 0.0  ;;  %v3410_v59 = vmul.f32 0.01, %v3338_v54  ;;  %v2755_v39 = vadd.f32 %v2707_v4, %v2249_v42  ;;  %v2203_v8 = vpop.f32.mrf.mxu1 }
 0x2ec   : > { %v2250_v49 = vadd.f32 %v2203_v8, %v6317_v51  ;;  %v2965_v26 = vpop.f32.mrf.mxu3  ;;  %v3654_v51 = vpop.permute.xlu2 %3653 }
 0x2ed   : > { %v3446_v32 = vsel %vm3374_vm8, %v3338_v54, %v3410_v59  ;;  %v3003_v25 = vadd.f32 %v2955_v60, %v2755_v39 }
 0x2ee   : > { %v3698_v3 = vmul.f32 %v3629_v21, %v3446_v32  ;;  %v6320_v32 = vld [vmem:[#allocation18_spill] sm:$0xff] }
 0x2ef   : > { %v3253_v13 = vpop.f32.mrf.mxu0  ;;  %v3299_v28 = vadd.f32 %v3251_v35, %v3003_v25 }
 0x2f0   : > { %3734 = vst.msk [vmem:[%s5659_s10 + $0xd8] sm:$0xff] %vm440_vm1, %v3698_v3 }
 0x2f1   : > { %v3339_v63 = vadd.f32 %v6092_v30, %v3299_v28 }
 0x2f2   : > { %v2709_v45 = vpop.f32.mrf.mxu2 }
 0x2f3   : > { %vm3375_vm5 = vcmp.ge.f32.partialorder %v3339_v63, 0.0  ;;  %v3411_v22 = vmul.f32 0.01, %v3339_v63  ;;  %v2756_v53 = vadd.f32 %v2709_v45, %v2250_v49  ;;  %v2206_v18 = vpop.f32.mrf.mxu1 }
 0x2f4   : > { %v2251_v11 = vadd.f32 %v2206_v18, %v6318_v6  ;;  %v2967_v8 = vpop.f32.mrf.mxu3 }
 0x2f5   : > { %v3447_v62 = vsel %vm3375_vm5, %v3339_v63, %v3411_v22  ;;  %v3004_v40 = vadd.f32 %v2957_v2, %v2756_v53 }
 0x2f6   : > { %v3699_v56 = vmul.f32 %v3634_v23, %v3447_v62 }
 0x2f7   : > { %v3256_v48 = vpop.f32.mrf.mxu0  ;;  %v3300_v16 = vadd.f32 %v3253_v13, %v3004_v40 }
 0x2f8   : > { %3735 = vst.msk [vmem:[%s5659_s10 + $0xe0] sm:$0xff] %vm440_vm1, %v3699_v56 }
 0x2f9   : > { %v3340_v24 = vadd.f32 %v6092_v30, %v3300_v16  ;;  %v3659_v16 = vpop.permute.xlu0 %3658 }
 0x2fa   : > { %v2712_v9 = vpop.f32.mrf.mxu2 }
 0x2fb   : > { %vm3376_vm9 = vcmp.ge.f32.partialorder %v3340_v24, 0.0  ;;  %v3412_v7 = vmul.f32 0.01, %v3340_v24  ;;  %v2757_v33 = vadd.f32 %v2712_v9, %v2251_v11  ;;  %v2208_v15 = vpop.f32.mrf.mxu1 }
 0x2fc   : > { %v2252_v10 = vadd.f32 %v2208_v15, %v6319_v46  ;;  %v2970_v23 = vpop.f32.mrf.mxu3 }
 0x2fd   : > { %v3448_v57 = vsel %vm3376_vm9, %v3340_v24, %v3412_v7  ;;  %v3005_v34 = vadd.f32 %v2960_v0, %v2757_v33 }
 0x2fe   : > { %v3700_v55 = vmul.f32 %v3639_v1, %v3448_v57 }
 0x2ff   : > { %v3258_v50 = vpop.f32.mrf.mxu0  ;;  %v3301_v38 = vadd.f32 %v3256_v48, %v3005_v34  ;;  %v3664_v34 = vpop.permute.xlu1 %3663 }
 0x300   : > { %3736 = vst.msk [vmem:[%s5659_s10 + $0xe8] sm:$0xff] %vm440_vm1, %v3700_v55 }
 0x301   : > { %v3341_v20 = vadd.f32 %v6092_v30, %v3301_v38 }
 0x302   : > { %v2714_v60 = vpop.f32.mrf.mxu2 }
 0x303   : > { %vm3377_vm10 = vcmp.ge.f32.partialorder %v3341_v20, 0.0  ;;  %v3413_v31 = vmul.f32 0.01, %v3341_v20  ;;  %v2758_v29 = vadd.f32 %v2714_v60, %v2252_v10  ;;  %v2211_v43 = vpop.f32.mrf.mxu1 }
 0x304   : > { %v2253_v12 = vadd.f32 %v2211_v43, %v5558_v19  ;;  %v2972_v57 = vpop.f32.mrf.mxu3 }
 0x305   : > { %v3449_v36 = vsel %vm3377_vm10, %v3341_v20, %v3413_v31  ;;  %v3006_v27 = vadd.f32 %v2962_v17, %v2758_v29  ;;  %v3669_v31 = vpop.permute.xlu2 %3668 }
 0x306   : > { %v3701_v47 = vmul.f32 %v3644_v5, %v3449_v36 }
 0x307   : > { %v3302_v52 = vadd.f32 %v3258_v50, %v3006_v27  ;;  %v3261_v58 = vpop.f32.mrf.mxu0 }
 0x308   : > { %3737 = vst.msk [vmem:[%s5659_s10 + $0xf0] sm:$0xff] %vm440_vm1, %v3701_v47 }
 0x309   : > { %v3342_v14 = vadd.f32 %v6092_v30, %v3302_v52 }
 0x30a   : > { %v2717_v35 = vpop.f32.mrf.mxu2 }
 0x30b   : > { %vm3378_vm11 = vcmp.ge.f32.partialorder %v3342_v14, 0.0  ;;  %v3414_v37 = vmul.f32 0.01, %v3342_v14  ;;  %v2759_v2 = vadd.f32 %v2717_v35, %v2253_v12  ;;  %v2213_v54 = vpop.f32.mrf.mxu1 }
 0x30c   : > { %v2254_v25 = vadd.f32 %v2213_v54, %v6320_v32 }
 0x30d   : > { %v3450_v42 = vsel %vm3378_vm11, %v3342_v14, %v3414_v37  ;;  %v3007_v4 = vadd.f32 %v2965_v26, %v2759_v2 }
 0x30e   : > { %v3702_v59 = vmul.f32 %v3649_v41, %v3450_v42 }
 0x30f   : > { %v3303_v39 = vadd.f32 %v3261_v58, %v3007_v4  ;;  %v3263_v3 = vpop.f32.mrf.mxu0 }
 0x310   : > { %3738 = vst.msk [vmem:[%s5659_s10 + $0xf8] sm:$0xff] %vm440_vm1, %v3702_v59 }
 0x311   : > { %v3343_v21 = vadd.f32 %v6092_v30, %v3303_v39 }
 0x312   : > { %v2719_v19 = vpop.f32.mrf.mxu2 }
 0x313   : > { %vm3379_vm6 = vcmp.ge.f32.partialorder %v3343_v21, 0.0  ;;  %v3415_v13 = vmul.f32 0.01, %v3343_v21  ;;  %v2760_v28 = vadd.f32 %v2719_v19, %v2254_v25  ;;  %v2216_v63 = vpop.f32.mrf.mxu1 }
 0x314   : > { %v2255_v18 = vadd.f32 %v2216_v63, %v5594_v44 }
 0x315   : > { %v3451_v49 = vsel %vm3379_vm6, %v3343_v21, %v3415_v13  ;;  %v3008_v45 = vadd.f32 %v2967_v8, %v2760_v28 }
 0x316   : > { %v3703_v0 = vmul.f32 %v3654_v51, %v3451_v49 }
 0x317   : > { %v3304_v22 = vadd.f32 %v3263_v3, %v3008_v45  ;;  %v3266_v48 = vpop.f32.mrf.mxu0 }
 0x318   : > { %3739 = vst.msk [vmem:[%s5659_s10 + $0x100] sm:$0xff] %vm440_vm1, %v3703_v0 }
 0x319   : > { %v3344_v53 = vadd.f32 %v6092_v30, %v3304_v22 }
 0x31a   : > { %v2722_v62 = vpop.f32.mrf.mxu2 }
 0x31b   : > { %vm3380_vm7 = vcmp.ge.f32.partialorder %v3344_v53, 0.0  ;;  %v3416_v40 = vmul.f32 0.01, %v3344_v53  ;;  %v2761_v56 = vadd.f32 %v2722_v62, %v2255_v18  ;;  %v2218_v9 = vpop.f32.mrf.mxu1 }
 0x31c   : > { %v2256_v15 = vadd.f32 %v2218_v9, %v5613_v61 }
 0x31d   : > { %v3452_v24 = vsel %vm3380_vm7, %v3344_v53, %v3416_v40  ;;  %v3009_v6 = vadd.f32 %v2970_v23, %v2761_v56 }
 0x31e   : > { %v3704_v11 = vmul.f32 %v3659_v16, %v3452_v24 }
 0x31f   : > { %v3305_v7 = vadd.f32 %v3266_v48, %v3009_v6  ;;  %v3268_v20 = vpop.f32.mrf.mxu0 }
 0x320   : > { %3740 = vst.msk [vmem:[%s5659_s10 + $0x108] sm:$0xff] %vm440_vm1, %v3704_v11 }
 0x321   : > { %v3345_v33 = vadd.f32 %v6092_v30, %v3305_v7 }
 0x322   : > { %v2724_v44 = vpop.f32.mrf.mxu2 }
 0x323   : > { %vm3381_vm12 = vcmp.ge.f32.partialorder %v3345_v33, 0.0  ;;  %v3417_v17 = vmul.f32 0.01, %v3345_v33  ;;  %v2762_v1 = vadd.f32 %v2724_v44, %v2256_v15 }
 0x325   : > { %v3453_v55 = vsel %vm3381_vm12, %v3345_v33, %v3417_v17  ;;  %v3010_v50 = vadd.f32 %v2972_v57, %v2762_v1 }
 0x326   : > { %v3705_v38 = vmul.f32 %v3664_v34, %v3453_v55 }
 0x327   : > { %v3306_v46 = vadd.f32 %v3268_v20, %v3010_v50 }
 0x328   : > { %3741 = vst.msk [vmem:[%s5659_s10 + $0x110] sm:$0xff] %vm440_vm1, %v3705_v38 }
 0x329   : > { %v3346_v10 = vadd.f32 %v6092_v30, %v3306_v46 }
 0x32b   : > { %vm3382_vm13 = vcmp.ge.f32.partialorder %v3346_v10, 0.0  ;;  %v3418_v60 = vmul.f32 0.01, %v3346_v10 }
 0x32d   : > { %v3454_v61 = vsel %vm3382_vm13, %v3346_v10, %v3418_v60 }
 0x32e   : > { %v3706_v29 = vmul.f32 %v3669_v31, %v3454_v61 }
 0x330   : > { %3742 = vst.msk [vmem:[%s5659_s10 + $0x118] sm:$0xff] %vm440_vm1, %v3706_v29 }
 0x331 PF: > { %s14_s17 = sadd.s32 1, %s4469_s17   ;;  %s6321_s15 = smov %s4465_s16 }
 0x332   : > { %p11_p5 = scmp.ge.s32.totalorder %s14_s17, 4   ;;  %s6322_s16 = smov %s6324_s18 }
 0x334   :  { %13 = sbr.rel (!%p11_p5) target bundleno = 2 (0x2), region = 80 }

// kernel: double_conv_forward.2
= control target key start
LH: loop header
LB: loop body
LE: loop exit
PB: predicated region body
PF: predicated region fallthrough
CT: control target
= control target key end

     0   :  { %s4310_s15 = smov 0   ;;  %s4312_s16 = smov 0   ;;  %s5958_s0 = inlined_call_operand.vmem [shape: bf16[2,360,8], index: 0, kind: input, shape index: {}]   ;;  %s5959_s1 = inlined_call_operand.vmem [shape: bf16[9,8,32], index: 1, kind: input, shape index: {}]   ;;  %s5960_s2 = inlined_call_operand.vmem [shape: f32[1,32], index: 2, kind: input, shape index: {}]   ;;  %s5961_s3 = inlined_call_operand.vmem [shape: f32[288,1], index: 3, kind: input, shape index: {}]   ;;  %s5962_s4 = inlined_call_operand.vmem [shape: bf16[2,288,32], index: 4, kind: output, shape index: {}]  }
   0x1   :  { %s4314_s17 = smov 0  }
   0x2 LB: > { %s26_s18 = sadd.s32 1, %s4278_s16  ;;  %p3784_p0 = scmp.ge.s32.totalorder %s4282_s17, 1  ;;  %s4282_s17 = sphi %s4314_s17, %s14_s17   ;;  %s4278_s16 = sphi %s4312_s16, %s6112_s16   ;;  %s4274_s15 = sphi %s4310_s15, %s6111_s15  }
   0x3   : > { %p28_p1 = scmp.ge.s32.totalorder %s26_s18, 2  ;;  %p193_p2 = scmp.lt.s32.totalorder %s4282_s17, 3 }
   0x5   : > { %s6114_s18 = smov (%p28_p1, %s26_s18), 0  ;;  %p194_p3 = pnand %p3784_p0, %p193_p2 }
   0x7   : > { %197 = sbr.rel (%p194_p3) target bundleno = 819 (0x333), region = 36 }
   0xc   : > { %v3787_v0 = vld [vmem:[%s5959_s1 + $0x4] sm:$0xf]  ;;  %vm477_vm0 = vcmask 1043456   ;;  %p229_p4 = scmp.lt.s32.totalorder %s4274_s15, 1  ;;  %v3892_v2 = vld [vmem:[%s5959_s1 + $0x8] sm:$0xf] }
   0xd   : > { %v479_v1 = vsel %vm477_vm0, %v3787_v0, 0  ;;  %v287_v3 = vld [vmem:[%s5959_s1] sm:$0xf]  ;;  %v1035_v4 = vsel %vm477_vm0, %v3892_v2, 0  ;;  %v3998_v6 = vld [vmem:[%s5959_s1 + $0x10] sm:$0xf] }
   0xe   : > { %4222 = vmatpush.bf16.msra.mxu1 %v479_v1  ;;  %4223 = vmatpush.bf16.msra.mxu2 %v479_v1  ;;  %s6116_s15 = smov (!%p229_p4, %s4274_s15), 1  ;;  %v787_v5 = vsel %vm477_vm0, %v287_v3, 0  ;;  %v1765_v7 = vsel %vm477_vm0, %v3998_v6, 0  ;;  %vm384_vm1 = vcmask 1046528   ;;  %vm422_vm2 = vcmask 64512  }
   0xf   : > { %488 = vmatpush.bf16.msra.mxu0 %v479_v1  ;;  %s4225_s27 = smul.u32 180, %s6116_s15  ;;  %4224 = vmatpush.bf16.msra.mxu3 %v479_v1  ;;  %v3911_v30 = vld [vmem:[%s5959_s1 + $0xc] sm:$0xf]  ;;  %vm894_vm3 = vsmask.f32 6400  ;;  %vm1672_vm5 = vcmask 1045504  }
  0x10   : > { %v1529_v31 = vsel %vm477_vm0, %v3911_v30, 0  ;;  %vm583_vm4 = vsmask.f32 7424  ;;  %vm2686_vm6 = vcmask 1044480   ;;  %vm1908_vm7 = vsmask.f32 5376 }
  0x11   : > { %s4350_s30 = scalar_lea.vmem %s5958_s0, %s4225_s27  ;;  %vm2922_vm8 = vsmask.f32 4352  ;;  %s4226_s11 = smul.u32 144, %s6116_s15  ;;  %vm3636_vm10 = vcmask 257024  }
  0x12   : > { %1044 = vmatpush.bf16.msrb.mxu2 %v1035_v4  ;;  %796 = vmatpush.bf16.msrb.mxu1 %v787_v5  ;;  %v4353_v8 = vld [vmem:[%s4350_s30 + $0x30] sm:$0xff]  ;;  %v4356_v9 = vld [vmem:[%s4350_s30 + $0x38] sm:$0xff]  ;;  %v4362_v11 = vld [vmem:[%s4350_s30 + $0x60] sm:$0xff] }
  0x13   : > { %1774 = vmatpush.bf16.msrb.mxu0 %v1765_v7  ;;  %v4359_v10 = vld [vmem:[%s4350_s30 + $0x58] sm:$0xff]  ;;  %v4219_v12 = vld [vmem:[%s4350_s30 + $0x8] sm:$0xf0]  ;;  %v4366_v13 = vld [vmem:[%s4350_s30 + $0x10] sm:$0xff]  ;;  %v394_v14 = vrot.slane %v4353_v8, 1  ;;  %v396_v15 = vrot.slane %v4356_v9, 1  ;;  %1538 = vmatpush.bf16.msrb.mxu3 %v1529_v31  ;;  %s5453_s13 = scalar_lea.vmem %s5962_s4, %s4226_s11 }
  0x14   : > { %v404_v16 = vrot.slane %v4359_v10, 1  ;;  %v4220_v17 = vld [vmem:[%s4350_s30 + $0x8] sm:$0xe]  ;;  %v406_v18 = vrot.slane %v4362_v11, 1  ;;  %v386_v20 = vrot.slane %v4366_v13, 1  ;;  %v4377_v21 = vld [vmem:[%s4350_s30 + $0x80] sm:$0xff] }
  0x15   : > { %v4373_v19 = vor.u32 %v4220_v17, %v4219_v12  ;;  %v397_v22 = vsel %vm384_vm1, %v394_v14, %v396_v15  ;;  %v4178_v23 = vld [vmem:[%s4350_s30 + $0x88] sm:$0xff]  ;;  %v414_v26 = vrot.slane %v4377_v21, 1  ;;  %v4399_v32 = vld [vmem:[%s4350_s30 + $0x40] sm:$0xff]  ;;  %v4405_v34 = vld [vmem:[%s4350_s30 + $0x18] sm:$0xff] }
  0x16   : > { %3861 = vmatmul.msk.bf16.vlgmr.msra.gmra.mxu1 %vm422_vm2, %v397_v22  ;;  %v407_v24 = vsel %vm384_vm1, %v404_v16, %v406_v18  ;;  %v416_v27 = vrot.slane %v4178_v23, 1  ;;  %v4402_v33 = vld [vmem:[%s4350_s30 + $0x68] sm:$0xff]  ;;  %v398_v35 = vrot.slane %v4399_v32, 1  ;;  %v4179_v36 = vld [vmem:[%s4350_s30 + $0x90] sm:$0xff]  ;;  %v388_v38 = vrot.slane %v4405_v34, 1  ;;  %v4434_v51 = vld [vmem:[%s4350_s30 + $0x20] sm:$0xff] }
  0x17   : > { %v385_v25 = vrot.slane %v4373_v19, 1  ;;  %3866 = vmatmul.msk.bf16.vlgmr.msra.gmra.mxu2 %vm422_vm2, %v407_v24  ;;  %v408_v37 = vrot.slane %v4402_v33, 1  ;;  %v418_v40 = vrot.slane %v4179_v36, 1  ;;  %v4413_v41 = vld [vmem:[%s4350_s30 + $0x50] sm:$0xff]  ;;  %v286_v46 = vld [vmem:[%s4350_s30 + $0x98] sm:$0x1] }
  0x18   : > { %v417_v29 = vsel %vm384_vm1, %v414_v26, %v416_v27  ;;  %v399_v39 = vsel %vm384_vm1, %v396_v15, %v398_v35  ;;  %v389_v43 = vsel %vm384_vm1, %v386_v20, %v388_v38  ;;  %v402_v45 = vrot.slane %v4413_v41, 1  ;;  %v4428_v48 = vld [vmem:[%s4350_s30 + $0x48] sm:$0xff]  ;;  %v4431_v50 = vld [vmem:[%s4350_s30 + $0x70] sm:$0xff]  ;;  %v4463_v4 = vld [vmem:[%s4350_s30 + $0x18] sm:$0xff] }
  0x19   : > { %v387_v28 = vsel %vm384_vm1, %v385_v25, %v386_v20  ;;  %3871 = vmatmul.msk.bf16.vlgmr.msra.gmra.mxu3 %vm422_vm2, %v417_v29  ;;  %v409_v42 = vsel %vm384_vm1, %v406_v18, %v408_v37  ;;  %v419_v44 = vsel %vm384_vm1, %v416_v27, %v418_v40  ;;  %v364_v49 = vunpack.c.l.b16 %v286_v46  ;;  %v4441_v55 = vld [vmem:[%s4350_s30 + $0x28] sm:$0xff]  ;;  %v1172_v61 = vld [vmem:[%s4350_s30 + $0x10] sm:$0xe]  ;;  %v4450_v62 = vld [vmem:[%s4350_s30 + $0x14] sm:$0xf] }
  0x1a   : > { %3856 = vmatmul.msk.bf16.vlgmr.msra.gmra.mxu0 %vm422_vm2, %v387_v28  ;;  %v4424_v47 = vsel %vm384_vm1, %v402_v45, %v404_v16  ;;  %v400_v52 = vrot.slane %v4428_v48, 1  ;;  %v410_v54 = vrot.slane %v4431_v50, 1  ;;  %v390_v56 = vrot.slane %v4434_v51, 1  ;;  %v4472_v16 = vld [vmem:[%s4350_s30 + $0x78] sm:$0xff]  ;;  %v4495_v46 = vld [vmem:[%s4350_s30 + $0x20] sm:$0xff] }
  0x1b   : > { %v4437_v53 = vpack.c.b16 %v364_v49, %v364_v49  ;;  %v392_v60 = vrot.slane %v4441_v55, 1  ;;  %v1248_v0 = vunpack.c.l.b16 %v1172_v61  ;;  %v1249_v1 = vunpack.c.l.b16 %v4450_v62  ;;  %v4123_v49 = vld [vmem:[%s5959_s1 + $0x1c] sm:$0xf] }
  0x1c   : > { %v401_v57 = vsel %vm384_vm1, %v398_v35, %v400_v52  ;;  %v411_v59 = vsel %vm384_vm1, %v408_v37, %v410_v54  ;;  %v391_v63 = vsel %vm384_vm1, %v388_v38, %v390_v56  ;;  %v5980_v12 = vshrl.u32 %v4463_v4, 16 }
  0x1d   : > { %v420_v58 = vrot.slane %v4437_v53, 1  ;;  %v4460_v3 = vsel %vm384_vm1, %v392_v60, %v394_v14  ;;  %v1285_v5 = vpack.c.b16 %v1249_v1, %v1248_v0  ;;  %v5979_v15 = vshll.u32 %v4463_v4, 16 }
  0x1e   : > { %v592_v14 = vshll.u32 %v4366_v13, 16  ;;  %v1315_v20 = vrot.slane %v5980_v12, 1  ;;  %v412_v23 = vrot.slane %v4472_v16, 1  ;;  %v596_v24 = vshrl.u32 %v4366_v13, 16 }
  0x1f   : > { %v421_v2 = vsel %vm384_vm1, %v418_v40, %v420_v58  ;;  %v1305_v6 = vshrl.u32 %v1285_v5, 16  ;;  %v1308_v7 = vshll.u32 %v1285_v5, 16  ;;  %v1318_v22 = vrot.slane %v5979_v15, 2 }
  0x20   : > { %v896_v25 = vshrl.u32 %v4373_v19, 16  ;;  %v899_v27 = vshll.u32 %v4373_v19, 16  ;;  %v903_v30 = vrot.slane %v596_v24, 1  ;;  %v904_v31 = vrot.slane %v592_v14, 2 }
  0x21   : > { %v1307_v17 = vrot.slane %v1305_v6, 1  ;;  %v1310_v18 = vrot.slane %v1308_v7, 2  ;;  %v403_v35 = vsel %vm384_vm1, %v400_v52, %v402_v45  ;;  %v1319_v37 = vor.u32 %v1318_v22, %v1315_v20  ;;  %v4017_v52 = vld [vmem:[%s5959_s1 + $0x14] sm:$0xf]  ;;  %v4218_v22 = vld [vmem:[%s4350_s30 + $0x8] sm:$0xff]  }
  0x22   : > { %v898_v28 = vrot.slane %v896_v25, 1  ;;  %v901_v29 = vrot.slane %v899_v27, 2  ;;  %v413_v38 = vsel %vm384_vm1, %v410_v54, %v412_v23  ;;  %v905_v40 = vor.u32 %v904_v31, %v903_v30  ;;  %v4142_v54 = vld [vmem:[%s5959_s1 + $0x20] sm:$0xf] }
  0x23   : > { %v1311_v36 = vor.u32 %v1310_v18, %v1307_v17  ;;  %v393_v13 = vsel %vm384_vm1, %v390_v56, %v392_v60  ;;  %v2779_v56 = vsel %vm477_vm0, %v4123_v49, 0  ;;  %v5975_v60 = vshll.u32 %v4495_v46, 16 }
  0x24   : > { %2788 = vmatpush.bf16.msra.mxu3 %v2779_v56  ;;  %v3063_v61 = vsel %vm477_vm0, %v4142_v54, 0  ;;  %v604_v7 = vshrl.u32 %v4405_v34, 16  ;;  %v415_v20 = vsel %vm384_vm1, %v412_v23, %v414_v26  ;;  %v587_v27 = vshll.u32 %v4218_v22, 16 }
  0x25   : > { %3072 = vmatpush.bf16.msra.mxu0 %v3063_v61  ;;  %v1327_v5 = vrot.slane %v5975_v60, 2  ;;  %v585_v26 = vshrl.u32 %v4218_v22, 16  ;;  %v608_v56 = vshll.u32 %v4434_v51, 16 }
  0x26   : > { %3862 = vmatmul.msk.bf16.gmra.mxu1 %vm422_vm2, %v399_v39  ;;  %v902_v39 = vor.u32 %v901_v29, %v898_v28  ;;  %v1666_v28 = vld [vmem:[%s4350_s30 + $0x10] sm:$0xc]  ;;  %v4531_v29 = vld [vmem:[%s4350_s30 + $0x28] sm:$0xff]  ;;  %v589_v23 = vrot.slane %v587_v27, 1 }
  0x27   : > { %3867 = vmatmul.msk.bf16.gmra.mxu2 %vm422_vm2, %v409_v42  ;;  %v1320_v42 = vsel %vm894_vm3, %v1311_v36, %v1319_v37  ;;  %6014 = vst [vmem:[#allocation2_spill] sm:$0xff] %v4531_v29  ;;  %v1670_v21 = vunpack.c.l.b16 %v1666_v28  ;;  %v5973_v30 = vshll.u32 %v4531_v29, 16 }
  0x28   : > { %v906_v19 = vsel %vm894_vm3, %v902_v39, %v905_v40 }
  0x29   : > { %3872 = vmatmul.msk.bf16.gmra.mxu3 %vm422_vm2, %v419_v44  ;;  %v594_v44 = vrot.slane %v592_v14, 1  ;;  %v907_v14 = vrot.slane %v604_v7, 1  ;;  %v4540_v31 = vpack.c.b16 %v1249_v1, %v1670_v21  ;;  %v4592_v21 = vld [vmem:[%s4350_s30 + $0x40] sm:$0xff] }
  0x2a   : > { %3857 = vmatmul.msk.bf16.gmra.mxu0 %vm422_vm2, %v389_v43  ;;  %v4036_v43 = vld [vmem:[%s5959_s1 + $0x18] sm:$0xf]  ;;  %6017 = vst [vmem:[#allocation5_spill] sm:$0xff] %v4592_v21 }
  0x2b   : > { %v2543_v45 = vsel %vm477_vm0, %v4036_v43, 0  ;;  %v598_v58 = vor.u32 %v596_v24, %v594_v44 }
  0x2c   : > { %2552 = vmatpush.bf16.msra.mxu2 %v2543_v45 }
  0x36   : > { %3863 = vmatmul.msk.bf16.gmra.mxu1 %vm422_vm2, %v401_v57  ;;  %v2049_v57 = vsel %vm477_vm0, %v4017_v52, 0 }
  0x37   : > { %3868 = vmatmul.msk.bf16.gmra.mxu2 %vm422_vm2, %v411_v59  ;;  %2058 = vmatpush.bf16.msra.mxu1 %v2049_v57  ;;  %v5978_v59 = vshrl.u32 %v4495_v46, 16  ;;  %v612_v57 = vshrl.u32 %v4434_v51, 16 }
  0x39   : > { %3873 = vmatmul.msk.bf16.gmra.mxu3 %vm422_vm2, %v421_v2  ;;  %v1324_v2 = vrot.slane %v5978_v59, 1 }
  0x3a   : > { %3858 = vmatmul.msk.bf16.gmra.mxu0 %vm422_vm2, %v391_v63  ;;  %v600_v63 = vshll.u32 %v4405_v34, 16 }
  0x3b   : > { %v1328_v18 = vor.u32 %v1327_v5, %v1324_v2  ;;  %v911_v2 = vrot.slane %v612_v57, 1  ;;  %v912_v5 = vrot.slane %v608_v56, 2 }
  0x3c   : > { %v602_v0 = vrot.slane %v600_v63, 1  ;;  %v908_v17 = vrot.slane %v600_v63, 2 }
  0x3d   : > { %v1329_v34 = vsel %vm894_vm3, %v1319_v37, %v1328_v18  ;;  %v1673_v37 = vrot.slane %v4540_v31, 2 }
  0x3e   : > { %v603_v6 = vsel %vm583_vm4, %v598_v58, %v602_v0  ;;  %v909_v24 = vor.u32 %v908_v17, %v907_v14  ;;  %v4572_v58 = vld [vmem:[%s4350_s30 + $0x38] sm:$0xff]  ;;  %v610_v14 = vrot.slane %v608_v56, 1  ;;  %v4616_v56 = vld [vmem:[%s4350_s30 + $0x48] sm:$0xff] }
  0x3f   : > { %6016 = vst [vmem:[#allocation4_spill] sm:$0xff] %v4572_v58  ;;  %v5970_v61 = vshrl.u32 %v4572_v58, 16  ;;  %v5969_v63 = vshll.u32 %v4572_v58, 16 }
  0x40   : > { %v910_v25 = vsel %vm894_vm3, %v905_v40, %v909_v24  ;;  %6018 = vst [vmem:[#allocation6_spill] sm:$0xff] %v4616_v56 }
  0x41   : > { %v1351_v17 = vrot.slane %v5970_v61, 1  ;;  %v1354_v51 = vrot.slane %v5969_v63, 2 }
  0x46   : > { %3864 = vmatmul.msk.bf16.gmra.mxu1 %vm422_vm2, %v403_v35  ;;  %v590_v35 = vor.u32 %v589_v23, %v585_v26  ;;  %v5965_v26 = vshll.u32 %v4592_v21, 16 }
  0x47   : > { %3869 = vmatmul.msk.bf16.gmra.mxu2 %vm422_vm2, %v413_v38  ;;  %v1674_v38 = vrot.slane %v4463_v4, 2 }
  0x48   : > { %v595_v39 = vsel %vm583_vm4, %v590_v35, %v594_v44 }
  0x49   : > { %3980 = vmatmul.msk.bf16.vlgmr.msrb.gmra.mxu3 %vm422_vm2, %v1320_v42  ;;  %v1675_v62 = vsel %vm1672_vm5, %v1673_v37, %v1674_v38 }
  0x4a   : > { %3859 = vmatmul.msk.bf16.gmra.mxu0 %vm422_vm2, %v393_v13  ;;  %v4554_v13 = vld [vmem:[%s4350_s30 + $0x30] sm:$0xff] }
  0x4b   : > { %6015 = vst [vmem:[#allocation3_spill] sm:$0xff] %v4554_v13  ;;  %v5972_v42 = vshrl.u32 %v4554_v13, 16  ;;  %v5971_v43 = vshll.u32 %v4554_v13, 16 }
  0x4d   : > { %v1342_v44 = vrot.slane %v5972_v42, 1  ;;  %v1345_v45 = vrot.slane %v5971_v43, 2  ;;  %v1686_v42 = vrot.slane %v4616_v56, 2 }
  0x4f   : > { %v1346_v49 = vor.u32 %v1345_v45, %v1342_v44 }
  0x56   : > { %3865 = vmatmul.msk.bf16.gmra.mxu1 %vm422_vm2, %v4424_v47  ;;  %v5974_v47 = vshrl.u32 %v4531_v29, 16 }
  0x57   : > { %3870 = vmatmul.msk.bf16.gmra.mxu2 %vm422_vm2, %v415_v20  ;;  %v1678_v20 = vrot.slane %v4531_v29, 2 }
  0x58   : > { %v1333_v36 = vrot.slane %v5974_v47, 1 }
  0x59   : > { %3981 = vmatmul.msk.bf16.gmra.mxu3 %vm422_vm2, %v1329_v34  ;;  %v620_v34 = vshrl.u32 %v4441_v55, 16 }
  0x5a   : > { %3860 = vmatmul.msk.bf16.gmra.mxu0 %vm422_vm2, %v4460_v3  ;;  %v1336_v3 = vrot.slane %v5973_v30, 2 }
  0x5b   : > { %v915_v23 = vrot.slane %v620_v34, 1 }
  0x5c   : > { %v1337_v40 = vor.u32 %v1336_v3, %v1333_v36  ;;  %v614_v36 = vor.u32 %v612_v57, %v610_v14 }
  0x5e   : > { %v1338_v1 = vsel %vm894_vm3, %v1328_v18, %v1337_v40  ;;  %v1347_v54 = vsel %vm894_vm3, %v1337_v40, %v1346_v49  ;;  %v913_v18 = vor.u32 %v912_v5, %v911_v2  ;;  %v5964_v5 = vshrl.u32 %v4616_v56, 16 }
  0x60   : > { %v914_v27 = vsel %vm894_vm3, %v909_v24, %v913_v18  ;;  %v5968_v24 = vshrl.u32 %v4592_v21, 16 }
  0x62   : > { %v1360_v37 = vrot.slane %v5968_v24, 1 }
  0x66   : > { %3874 = vmatmul.msk.bf16.vlgmr.msrb.gmra.mxu1 %vm422_vm2, %v595_v39  ;;  %v1680_v39 = vrot.slane %v4554_v13, 2 }
  0x67   : > { %3893 = vmatmul.msk.bf16.vlgmr.msrb.gmra.mxu2 %vm422_vm2, %v906_v19  ;;  %v1676_v19 = vrot.slane %v4495_v46, 2 }
  0x69   : > { %3982 = vmatmul.msk.bf16.gmra.mxu3 %vm422_vm2, %v1338_v1  ;;  %v1677_v52 = vsel %vm1672_vm5, %v1674_v38, %v1676_v19  ;;  %v1679_v28 = vsel %vm1672_vm5, %v1676_v19, %v1678_v20  ;;  %v1681_v19 = vsel %vm1672_vm5, %v1678_v20, %v1680_v39 }
  0x6a   : > { %3999 = vmatmul.msk.bf16.vlgmr.msrb.gmra.mxu0 %vm422_vm2, %v1675_v62 }
  0x76   : > { %3875 = vmatmul.msk.bf16.gmra.mxu1 %vm422_vm2, %v603_v6  ;;  %v606_v6 = vor.u32 %v604_v7, %v602_v0  ;;  %v616_v7 = vshll.u32 %v4441_v55, 16  ;;  %v1363_v55 = vrot.slane %v5965_v26, 2 }
  0x77   : > { %3894 = vmatmul.msk.bf16.gmra.mxu2 %vm422_vm2, %v910_v25  ;;  %v1355_v25 = vor.u32 %v1354_v51, %v1351_v17 }
  0x78   : > { %v611_v22 = vsel %vm583_vm4, %v606_v6, %v610_v14  ;;  %v916_v35 = vrot.slane %v616_v7, 2  ;;  %v618_v3 = vrot.slane %v616_v7, 1  ;;  %v1364_v1 = vor.u32 %v1363_v55, %v1360_v37 }
  0x79   : > { %3983 = vmatmul.msk.bf16.gmra.mxu3 %vm422_vm2, %v1347_v54  ;;  %v1356_v0 = vsel %vm894_vm3, %v1346_v49, %v1355_v25  ;;  %v628_v54 = vshrl.u32 %v4353_v8, 16  ;;  %v5963_v6 = vshll.u32 %v4616_v56, 16 }
  0x7a   : > { %4000 = vmatmul.msk.bf16.gmra.mxu0 %vm422_vm2, %v1677_v52  ;;  %v917_v38 = vor.u32 %v916_v35, %v915_v23  ;;  %v619_v62 = vsel %vm583_vm4, %v614_v36, %v618_v3  ;;  %v1365_v49 = vsel %vm894_vm3, %v1355_v25, %v1364_v1  ;;  %v624_v52 = vshll.u32 %v4353_v8, 16 }
  0x7b   : > { %v919_v14 = vrot.slane %v628_v54, 1  ;;  %v622_v8 = vor.u32 %v620_v34, %v618_v3  ;;  %v1372_v25 = vrot.slane %v5963_v6, 2 }
  0x7c   : > { %v918_v44 = vsel %vm894_vm3, %v913_v18, %v917_v38  ;;  %v920_v17 = vrot.slane %v624_v52, 2  ;;  %v626_v20 = vrot.slane %v624_v52, 1 }
  0x7e   : > { %v627_v23 = vsel %vm583_vm4, %v622_v8, %v626_v20 }
  0x86   : > { %3876 = vmatmul.msk.bf16.gmra.mxu1 %vm422_vm2, %v611_v22  ;;  %v1369_v22 = vrot.slane %v5964_v5, 1 }
  0x87   : > { %3895 = vmatmul.msk.bf16.gmra.mxu2 %vm422_vm2, %v914_v27  ;;  %v921_v27 = vor.u32 %v920_v17, %v919_v14 }
  0x88   : > { %v1373_v35 = vor.u32 %v1372_v25, %v1369_v22 }
  0x89   : > { %3984 = vmatmul.msk.bf16.gmra.mxu3 %vm422_vm2, %v1356_v0  ;;  %v1682_v0 = vrot.slane %v4572_v58, 2  ;;  %v922_v34 = vsel %vm894_vm3, %v917_v38, %v921_v27 }
  0x8a   : > { %4001 = vmatmul.msk.bf16.gmra.mxu0 %vm422_vm2, %v1679_v28  ;;  %v1374_v55 = vsel %vm894_vm3, %v1364_v1, %v1373_v35 }
  0x8b   : > { %v1683_v37 = vsel %vm1672_vm5, %v1680_v39, %v1682_v0 }
  0x93   : > { %v4603_v40 = vpop.f32.mrf.mxu1 }
  0x96   : > { %3877 = vmatmul.msk.bf16.gmra.mxu1 %vm422_vm2, %v619_v62  ;;  %v632_v62 = vshll.u32 %v4356_v9, 16 }
  0x97   : > { %v4607_v45 = vpop.f32.mrf.mxu0  ;;  %3896 = vmatmul.msk.bf16.gmra.mxu2 %vm422_vm2, %v918_v44  ;;  %v636_v44 = vshrl.u32 %v4356_v9, 16  ;;  %v630_v9 = vor.u32 %v628_v54, %v626_v20 }
  0x98   : > { %v924_v1 = vrot.slane %v632_v62, 2  ;;  %v634_v22 = vrot.slane %v632_v62, 1 }
  0x99   : > { %3985 = vmatmul.msk.bf16.gmra.mxu3 %vm422_vm2, %v1365_v49  ;;  %v923_v14 = vrot.slane %v636_v44, 1 }
  0x9a   : > { %4002 = vmatmul.msk.bf16.gmra.mxu0 %vm422_vm2, %v1681_v19  ;;  %v4619_v57 = vpop.f32.mrf.mxu2  ;;  %v4652_v19 = vld [vmem:[%s4350_s30 + $0x50] sm:$0xff]  ;;  %v635_v5 = vsel %vm583_vm4, %v630_v9, %v634_v22  ;;  %v4688_v9 = vld [vmem:[%s4350_s30 + $0x58] sm:$0xff] }
  0x9b   : > { %v4622_v2 = vpop.f32.mrf.mxu1  ;;  %6021 = vst [vmem:[#allocation9_spill] sm:$0xff] %v4652_v19  ;;  %v5967_v39 = vshrl.u32 %v4652_v19, 16  ;;  %v5966_v52 = vshll.u32 %v4652_v19, 16 }
  0x9c   : > { %v4626_v51 = vpop.f32.mrf.mxu3  ;;  %6025 = vst [vmem:[#allocation13_spill] sm:$0xff] %v4688_v9 }
  0x9d   : > { %6019 = vst [vmem:[#allocation7_spill] sm:$0xff] %v4626_v51  ;;  %v1378_v25 = vrot.slane %v5967_v39, 1  ;;  %v644_v39 = vshrl.u32 %v4399_v32, 16 }
  0x9f   : > { %v4628_v18 = vpop.f32.mrf.mxu0 }
  0xa2   : > { %v4634_v28 = vpop.f32.mrf.mxu2 }
  0xa3   : > { %v4637_v7 = vpop.f32.mrf.mxu1 }
  0xa4   : > { %v4641_v36 = vpop.f32.mrf.mxu3 }
  0xa5   : > { %6020 = vst [vmem:[#allocation8_spill] sm:$0xff] %v4641_v36 }
  0xa6   : > { %3878 = vmatmul.msk.bf16.gmra.mxu1 %vm422_vm2, %v627_v23  ;;  %v1381_v23 = vrot.slane %v5966_v52, 2 }
  0xa7   : > { %v4643_v3 = vpop.f32.mrf.mxu0  ;;  %3897 = vmatmul.msk.bf16.gmra.mxu2 %vm422_vm2, %v922_v34  ;;  %v925_v34 = vor.u32 %v924_v1, %v923_v14  ;;  %v640_v1 = vshll.u32 %v4399_v32, 16  ;;  %v638_v32 = vor.u32 %v636_v44, %v634_v22 }
  0xa8   : > { %v1382_v26 = vor.u32 %v1381_v23, %v1378_v25  ;;  %v927_v23 = vrot.slane %v644_v39, 1 }
  0xa9   : > { %3986 = vmatmul.msk.bf16.gmra.mxu3 %vm422_vm2, %v1374_v55  ;;  %v1684_v55 = vrot.slane %v4592_v21, 2  ;;  %v926_v54 = vsel %vm894_vm3, %v921_v27, %v925_v34  ;;  %v642_v63 = vrot.slane %v640_v1, 1 }
  0xaa   : > { %4003 = vmatmul.msk.bf16.gmra.mxu0 %vm422_vm2, %v1683_v37  ;;  %v4655_v38 = vpop.f32.mrf.mxu2  ;;  %v1383_v14 = vsel %vm894_vm3, %v1373_v35, %v1382_v26  ;;  %v928_v35 = vrot.slane %v640_v1, 2 }
  0xab   : > { %v4658_v49 = vpop.f32.mrf.mxu1  ;;  %v1685_v52 = vsel %vm1672_vm5, %v1682_v0, %v1684_v55  ;;  %v5976_v0 = vshll.u32 %v4688_v9, 16  ;;  %v643_v47 = vsel %vm583_vm4, %v638_v32, %v642_v63  ;;  %v4724_v32 = vld [vmem:[%s4350_s30 + $0x60] sm:$0xff] }
  0xac   : > { %v4662_v17 = vpop.f32.mrf.mxu3  ;;  %v929_v61 = vor.u32 %v928_v35, %v927_v23  ;;  %v648_v35 = vshll.u32 %v4428_v48, 16 }
  0xad   : > { %6022 = vst [vmem:[#allocation10_spill] sm:$0xff] %v4662_v17 }
  0xae   : > { %v930_v44 = vsel %vm894_vm3, %v925_v34, %v929_v61  ;;  %v650_v15 = vrot.slane %v648_v35, 1 }
  0xaf   : > { %v4664_v8 = vpop.f32.mrf.mxu0 }
  0xb2   : > { %v4670_v37 = vpop.f32.mrf.mxu2 }
  0xb3   : > { %6023 = vst [vmem:[#allocation11_spill] sm:$0xff] %v4670_v37  ;;  %v4673_v6 = vpop.f32.mrf.mxu1  ;;  %v1692_v37 = vrot.slane %v4724_v32, 2 }
  0xb4   : > { %v4677_v20 = vpop.f32.mrf.mxu3 }
  0xb5   : > { %6024 = vst [vmem:[#allocation12_spill] sm:$0xff] %v4677_v20 }
  0xb6   : > { %3879 = vmatmul.msk.bf16.gmra.mxu1 %vm422_vm2, %v635_v5  ;;  %v5977_v5 = vshrl.u32 %v4688_v9, 16 }
  0xb7   : > { %v4679_v62 = vpop.f32.mrf.mxu0  ;;  %3898 = vmatmul.msk.bf16.gmra.mxu2 %vm422_vm2, %v926_v54 }
  0xb9   : > { %3987 = vmatmul.msk.bf16.gmra.mxu3 %vm422_vm2, %v1383_v14  ;;  %v1390_v14 = vrot.slane %v5976_v0, 2  ;;  %v1687_v0 = vsel %vm1672_vm5, %v1684_v55, %v1686_v42  ;;  %v5981_v55 = vshll.u32 %v4724_v32, 16 }
  0xba   : > { %4004 = vmatmul.msk.bf16.gmra.mxu0 %vm422_vm2, %v1685_v52  ;;  %v4691_v27 = vpop.f32.mrf.mxu2  ;;  %v1387_v52 = vrot.slane %v5977_v5, 1  ;;  %v652_v5 = vshrl.u32 %v4428_v48, 16  ;;  %v646_v48 = vor.u32 %v644_v39, %v642_v63 }
  0xbb   : > { %6026 = vst [vmem:[#allocation14_spill] sm:$0xff] %v4691_v27  ;;  %v4694_v25 = vpop.f32.mrf.mxu1  ;;  %v1399_v12 = vrot.slane %v5981_v55, 2 }
  0xbc   : > { %v4698_v54 = vpop.f32.mrf.mxu3  ;;  %v1391_v60 = vor.u32 %v1390_v14, %v1387_v52  ;;  %v931_v14 = vrot.slane %v652_v5, 1  ;;  %v651_v17 = vsel %vm583_vm4, %v646_v48, %v650_v15  ;;  %v4758_v48 = vld [vmem:[%s4350_s30 + $0x68] sm:$0xff] }
  0xbd   : > { %6027 = vst [vmem:[#allocation15_spill] sm:$0xff] %v4698_v54  ;;  %v1688_v54 = vrot.slane %v4652_v19, 2 }
  0xbe   : > { %v1392_v23 = vsel %vm894_vm3, %v1382_v26, %v1391_v60  ;;  %v932_v26 = vrot.slane %v648_v35, 2 }
  0xbf   : > { %v4700_v24 = vpop.f32.mrf.mxu0  ;;  %v1689_v55 = vsel %vm1672_vm5, %v1686_v42, %v1688_v54  ;;  %v5992_v42 = vshrl.u32 %v4758_v48, 16 }
  0xc2   : > { %v4706_v43 = vpop.f32.mrf.mxu2 }
  0xc3   : > { %6028 = vst [vmem:[#allocation16_spill] sm:$0xff] %v4706_v43  ;;  %v4709_v30 = vpop.f32.mrf.mxu1 }
  0xc4   : > { %v4713_v22 = vpop.f32.mrf.mxu3 }
  0xc5   : > { %6029 = vst [vmem:[#allocation17_spill] sm:$0xff] %v4713_v22 }
  0xc6   : > { %3880 = vmatmul.msk.bf16.gmra.mxu1 %vm422_vm2, %v643_v47  ;;  %v5982_v47 = vshrl.u32 %v4724_v32, 16 }
  0xc7   : > { %v4715_v1 = vpop.f32.mrf.mxu0  ;;  %3899 = vmatmul.msk.bf16.gmra.mxu2 %vm422_vm2, %v930_v44 }
  0xc9   : > { %3988 = vmatmul.msk.bf16.gmra.mxu3 %vm422_vm2, %v1392_v23  ;;  %v933_v23 = vor.u32 %v932_v26, %v931_v14  ;;  %v656_v26 = vshll.u32 %v4413_v41, 16 }
  0xca   : > { %4005 = vmatmul.msk.bf16.gmra.mxu0 %vm422_vm2, %v1687_v0  ;;  %v4727_v34 = vpop.f32.mrf.mxu2  ;;  %v1396_v0 = vrot.slane %v5982_v47, 1  ;;  %v660_v47 = vshrl.u32 %v4413_v41, 16  ;;  %v654_v41 = vor.u32 %v652_v5, %v650_v15 }
  0xcb   : > { %6030 = vst [vmem:[#allocation18_spill] sm:$0xff] %v4727_v34  ;;  %v4730_v52 = vpop.f32.mrf.mxu1  ;;  %v934_v63 = vsel %vm894_vm3, %v929_v61, %v933_v23  ;;  %v658_v56 = vrot.slane %v656_v26, 1 }
  0xcc   : > { %v1540_v44 = vpop.f32.mrf.mxu3  ;;  %v1400_v36 = vor.u32 %v1399_v12, %v1396_v0  ;;  %v935_v0 = vrot.slane %v660_v47, 1 }
  0xcd   : > { %v659_v58 = vsel %vm583_vm4, %v654_v41, %v658_v56  ;;  %v662_v13 = vor.u32 %v660_v47, %v658_v56 }
  0xce   : > { %v1401_v14 = vsel %vm894_vm3, %v1391_v60, %v1400_v36  ;;  %v936_v60 = vrot.slane %v656_v26, 2 }
  0xcf   : > { %v4734_v59 = vpop.f32.mrf.mxu0 }
  0xd0   : > { %v937_v51 = vor.u32 %v936_v60, %v935_v0  ;;  %v664_v60 = vshll.u32 %v4359_v10, 16 }
  0xd2   : > { %v4740_v22 = vpop.f32.mrf.mxu2  ;;  %v938_v43 = vsel %vm894_vm3, %v933_v23, %v937_v51  ;;  %v666_v27 = vrot.slane %v664_v60, 1 }
  0xd3   : > { %6031 = vst [vmem:[#allocation19_spill] sm:$0xff] %v4740_v22  ;;  %v4743_v20 = vpop.f32.mrf.mxu1 }
  0xd4   : > { %v4747_v39 = vpop.f32.mrf.mxu3  ;;  %v667_v56 = vsel %vm583_vm4, %v662_v13, %v666_v27  ;;  %v672_v13 = vshll.u32 %v4362_v11, 16 }
  0xd6   : > { %3881 = vmatmul.msk.bf16.gmra.mxu1 %vm422_vm2, %v651_v17  ;;  %v5991_v17 = vshll.u32 %v4758_v48, 16 }
  0xd7   : > { %v4749_v35 = vpop.f32.mrf.mxu0  ;;  %3900 = vmatmul.msk.bf16.gmra.mxu2 %vm422_vm2, %v934_v63 }
  0xd9   : > { %3989 = vmatmul.msk.bf16.gmra.mxu3 %vm422_vm2, %v1401_v14  ;;  %v1408_v14 = vrot.slane %v5991_v17, 2  ;;  %v668_v17 = vshrl.u32 %v4359_v10, 16 }
  0xda   : > { %4006 = vmatmul.msk.bf16.gmra.mxu0 %vm422_vm2, %v1689_v55  ;;  %v4761_v12 = vpop.f32.mrf.mxu2  ;;  %v1405_v55 = vrot.slane %v5992_v42, 1  ;;  %v4790_v42 = vld [vmem:[%s4350_s30 + $0x70] sm:$0xff] }
  0xdb   : > { %6032 = vst [vmem:[#allocation20_spill] sm:$0xff] %v4761_v12  ;;  %v4764_v61 = vpop.f32.mrf.mxu1  ;;  %v1690_v12 = vrot.slane %v4688_v9, 2 }
  0xdc   : > { %v4768_v63 = vpop.f32.mrf.mxu3  ;;  %v1409_v34 = vor.u32 %v1408_v14, %v1405_v55  ;;  %v940_v14 = vrot.slane %v664_v60, 2 }
  0xdd   : > { %v1691_v26 = vsel %vm1672_vm5, %v1688_v54, %v1690_v12  ;;  %v5997_v54 = vshrl.u32 %v4790_v42, 16 }
  0xde   : > { %v1410_v0 = vsel %vm894_vm3, %v1400_v36, %v1409_v34  ;;  %v939_v36 = vrot.slane %v668_v17, 1 }
  0xdf   : > { %v4770_v19 = vpop.f32.mrf.mxu0 }
  0xe2   : > { %v4776_v21 = vpop.f32.mrf.mxu2 }
  0xe3   : > { %6033 = vst [vmem:[#allocation21_spill] sm:$0xff] %v4776_v21  ;;  %v798_v22 = vpop.f32.mrf.mxu1 }
  0xe4   : > { %v4781_v15 = vpop.f32.mrf.mxu3  ;;  %v799_v41 = vadd.f32 %v798_v22, %v4607_v45  ;;  %v1414_v45 = vrot.slane %v5997_v54, 1 }
  0xe6   : > { %3882 = vmatmul.msk.bf16.gmra.mxu1 %vm422_vm2, %v659_v58 }
  0xe7   : > { %v1776_v5 = vpop.f32.mrf.mxu0  ;;  %3901 = vmatmul.msk.bf16.gmra.mxu2 %vm422_vm2, %v938_v43  ;;  %v6001_v43 = vshll.u32 %v4790_v42, 16 }
  0xe9   : > { %3990 = vmatmul.msk.bf16.gmra.mxu3 %vm422_vm2, %v1410_v0  ;;  %v1417_v22 = vrot.slane %v6001_v43, 2  ;;  %v941_v0 = vor.u32 %v940_v14, %v939_v36  ;;  %v676_v36 = vshrl.u32 %v4362_v11, 16 }
  0xea   : > { %4007 = vmatmul.msk.bf16.gmra.mxu0 %vm422_vm2, %v1691_v26  ;;  %v1046_v23 = vpop.f32.mrf.mxu2 }
  0xeb   : > { %v1136_v58 = vadd.f32 %v1046_v23, %v799_v41  ;;  %v800_v55 = vpop.f32.mrf.mxu1  ;;  %v1418_v47 = vor.u32 %v1417_v22, %v1414_v45  ;;  %v942_v60 = vsel %vm894_vm3, %v937_v51, %v941_v0  ;;  %v4821_v51 = vld [vmem:[%s4350_s30 + $0x78] sm:$0xff] }
  0xec   : > { %v4797_v21 = vpop.f32.mrf.mxu3  ;;  %v801_v41 = vadd.f32 %v800_v55, %v4628_v18  ;;  %v1693_v18 = vsel %vm1672_vm5, %v1690_v12, %v1692_v37  ;;  %v6000_v22 = vshrl.u32 %v4821_v51, 16 }
  0xed   : > { %v1630_v9 = vadd.f32 %v1540_v44, %v1136_v58 }
  0xef   : > { %v1778_v10 = vpop.f32.mrf.mxu0  ;;  %v4803_v26 = vadd.f32 %v1776_v5, %v1630_v9  ;;  %v1419_v5 = vsel %vm894_vm3, %v1409_v34, %v1418_v47  ;;  %v6003_v34 = vshll.u32 %v4821_v51, 16 }
  0xf2   : > { %v1048_v23 = vpop.f32.mrf.mxu2 }
  0xf3   : > { %v1137_v44 = vadd.f32 %v1048_v23, %v801_v41  ;;  %v803_v58 = vpop.f32.mrf.mxu1 }
  0xf4   : > { %v4810_v29 = vpop.f32.mrf.mxu3 }
  0xf5   : > { %v1631_v54 = vadd.f32 %v4747_v39, %v1137_v44  ;;  %v804_v39 = vadd.f32 %v803_v58, %v4643_v3  ;;  %v670_v44 = vor.u32 %v668_v17, %v666_v27  ;;  %v674_v3 = vrot.slane %v672_v13, 1 }
  0xf6   : > { %3883 = vmatmul.msk.bf16.gmra.mxu1 %vm422_vm2, %v667_v56  ;;  %v1423_v58 = vrot.slane %v6000_v22, 1  ;;  %v1426_v56 = vrot.slane %v6003_v34, 2 }
  0xf7   : > { %v1781_v9 = vpop.f32.mrf.mxu0  ;;  %3902 = vmatmul.msk.bf16.gmra.mxu2 %vm422_vm2, %v942_v60  ;;  %v4816_v55 = vadd.f32 %v1778_v10, %v1631_v54  ;;  %v943_v54 = vrot.slane %v676_v36, 1  ;;  %v944_v10 = vrot.slane %v672_v13, 2  ;;  %v675_v27 = vsel %vm583_vm4, %v670_v44, %v674_v3 }
  0xf8   : > { %v1427_v17 = vor.u32 %v1426_v56, %v1423_v58 }
  0xf9   : > { %3991 = vmatmul.msk.bf16.gmra.mxu3 %vm422_vm2, %v1419_v5 }
  0xfa   : > { %4008 = vmatmul.msk.bf16.gmra.mxu0 %vm422_vm2, %v1693_v18  ;;  %v1051_v14 = vpop.f32.mrf.mxu2  ;;  %v945_v18 = vor.u32 %v944_v10, %v943_v54  ;;  %v680_v10 = vshll.u32 %v4402_v33, 16 }
  0xfb   : > { %v1138_v12 = vadd.f32 %v1051_v14, %v804_v39  ;;  %v805_v45 = vpop.f32.mrf.mxu1  ;;  %v1694_v14 = vrot.slane %v4758_v48, 2 }
  0xfc   : > { %v4829_v11 = vpop.f32.mrf.mxu3  ;;  %v806_v5 = vadd.f32 %v805_v45, %v4664_v8  ;;  %v946_v13 = vsel %vm894_vm3, %v941_v0, %v945_v18  ;;  %v1428_v45 = vsel %vm894_vm3, %v1418_v47, %v1427_v17  ;;  %v4853_v0 = vld [vmem:[%s4350_s30 + $0x80] sm:$0xff] }
  0xfd   : > { %v1632_v41 = vadd.f32 %v4768_v63, %v1138_v12  ;;  %v1695_v8 = vsel %vm1672_vm5, %v1692_v37, %v1694_v14  ;;  %v6002_v56 = vshrl.u32 %v4853_v0, 16  ;;  %v6005_v47 = vshll.u32 %v4853_v0, 16 }
  0xff   : > { %v1783_v23 = vpop.f32.mrf.mxu0  ;;  %v4835_v60 = vadd.f32 %v1781_v9, %v1632_v41  ;;  %v684_v41 = vshrl.u32 %v4402_v33, 16 }
 0x102   : > { %v1053_v39 = vpop.f32.mrf.mxu2 }
 0x103   : > { %v1139_v63 = vadd.f32 %v1053_v39, %v806_v5  ;;  %v808_v12 = vpop.f32.mrf.mxu1 }
 0x104   : > { %v4842_v43 = vpop.f32.mrf.mxu3 }
 0x105   : > { %v1633_v22 = vadd.f32 %v4781_v15, %v1139_v63  ;;  %v809_v15 = vadd.f32 %v808_v12, %v4679_v62  ;;  %v678_v63 = vor.u32 %v676_v36, %v674_v3  ;;  %v682_v62 = vrot.slane %v680_v10, 1 }
 0x106   : > { %3884 = vmatmul.msk.bf16.gmra.mxu1 %vm422_vm2, %v675_v27  ;;  %v1432_v12 = vrot.slane %v6002_v56, 1  ;;  %v1435_v27 = vrot.slane %v6005_v47, 2 }
 0x107   : > { %v1786_v9 = vpop.f32.mrf.mxu0  ;;  %3903 = vmatmul.msk.bf16.gmra.mxu2 %vm422_vm2, %v946_v13  ;;  %v4848_v54 = vadd.f32 %v1783_v23, %v1633_v22  ;;  %v947_v22 = vrot.slane %v684_v41, 1  ;;  %v948_v23 = vrot.slane %v680_v10, 2  ;;  %v683_v36 = vsel %vm583_vm4, %v678_v63, %v682_v62 }
 0x108   : > { %v1436_v3 = vor.u32 %v1435_v27, %v1432_v12 }
 0x109   : > { %3992 = vmatmul.msk.bf16.gmra.mxu3 %vm422_vm2, %v1428_v45 }
 0x10a   : > { %4009 = vmatmul.msk.bf16.gmra.mxu0 %vm422_vm2, %v1695_v8  ;;  %v1056_v44 = vpop.f32.mrf.mxu2  ;;  %v949_v8 = vor.u32 %v948_v23, %v947_v22  ;;  %v688_v23 = vshll.u32 %v4431_v50, 16 }
 0x10b   : > { %v1140_v37 = vadd.f32 %v1056_v44, %v809_v15  ;;  %v810_v58 = vpop.f32.mrf.mxu1  ;;  %v1696_v44 = vrot.slane %v4790_v42, 2 }
 0x10c   : > { %v4861_v33 = vpop.f32.mrf.mxu3  ;;  %v811_v45 = vadd.f32 %v810_v58, %v4700_v24  ;;  %v950_v10 = vsel %vm894_vm3, %v945_v18, %v949_v8  ;;  %v1437_v58 = vsel %vm894_vm3, %v1427_v17, %v1436_v3  ;;  %v4885_v18 = vld [vmem:[%s4350_s30 + $0x88] sm:$0xff] }
 0x10d   : > { %v1634_v5 = vadd.f32 %v4797_v21, %v1140_v37  ;;  %v1697_v24 = vsel %vm1672_vm5, %v1694_v14, %v1696_v44  ;;  %6034 = vst [vmem:[#allocation22_spill] sm:$0xff] %v4885_v18  ;;  %v6004_v27 = vshrl.u32 %v4885_v18, 16  ;;  %v6008_v17 = vshll.u32 %v4885_v18, 16 }
 0x10f   : > { %v1788_v39 = vpop.f32.mrf.mxu0  ;;  %v4867_v13 = vadd.f32 %v1786_v9, %v1634_v5  ;;  %v692_v5 = vshrl.u32 %v4431_v50, 16 }
 0x112   : > { %v1058_v15 = vpop.f32.mrf.mxu2 }
 0x113   : > { %v1141_v21 = vadd.f32 %v1058_v15, %v811_v45  ;;  %v813_v37 = vpop.f32.mrf.mxu1 }
 0x114   : > { %v4874_v34 = vpop.f32.mrf.mxu3 }
 0x115   : > { %v1635_v56 = vadd.f32 %v4810_v29, %v1141_v21  ;;  %v814_v29 = vadd.f32 %v813_v37, %v4715_v1  ;;  %v686_v21 = vor.u32 %v684_v41, %v682_v62  ;;  %v690_v1 = vrot.slane %v688_v23, 1 }
 0x116   : > { %3885 = vmatmul.msk.bf16.gmra.mxu1 %vm422_vm2, %v683_v36  ;;  %v1441_v37 = vrot.slane %v6004_v27, 1  ;;  %v1444_v36 = vrot.slane %v6008_v17, 2 }
 0x117   : > { %v1791_v9 = vpop.f32.mrf.mxu0  ;;  %3904 = vmatmul.msk.bf16.gmra.mxu2 %vm422_vm2, %v950_v10  ;;  %v4880_v22 = vadd.f32 %v1788_v39, %v1635_v56  ;;  %v951_v56 = vrot.slane %v692_v5, 1  ;;  %v952_v39 = vrot.slane %v688_v23, 2  ;;  %v691_v41 = vsel %vm583_vm4, %v686_v21, %v690_v1 }
 0x118   : > { %v1445_v62 = vor.u32 %v1444_v36, %v1441_v37 }
 0x119   : > { %3993 = vmatmul.msk.bf16.gmra.mxu3 %vm422_vm2, %v1437_v58 }
 0x11a   : > { %4010 = vmatmul.msk.bf16.gmra.mxu0 %vm422_vm2, %v1697_v24  ;;  %v1061_v63 = vpop.f32.mrf.mxu2  ;;  %v953_v24 = vor.u32 %v952_v39, %v951_v56  ;;  %v696_v39 = vshll.u32 %v4472_v16, 16 }
 0x11b   : > { %v1142_v14 = vadd.f32 %v1061_v63, %v814_v29  ;;  %v815_v12 = vpop.f32.mrf.mxu1  ;;  %v1698_v63 = vrot.slane %v4821_v51, 2 }
 0x11c   : > { %v4893_v50 = vpop.f32.mrf.mxu3  ;;  %v816_v58 = vadd.f32 %v815_v12, %v4734_v59  ;;  %v954_v23 = vsel %vm894_vm3, %v949_v8, %v953_v24  ;;  %v1446_v12 = vsel %vm894_vm3, %v1436_v3, %v1445_v62  ;;  %v4917_v8 = vld [vmem:[%s4350_s30 + $0x90] sm:$0xff] }
 0x11d   : > { %v1636_v45 = vadd.f32 %v4829_v11, %v1142_v14  ;;  %v1699_v59 = vsel %vm1672_vm5, %v1696_v44, %v1698_v63  ;;  %v6006_v36 = vshrl.u32 %v4917_v8, 16  ;;  %v6007_v3 = vshll.u32 %v4917_v8, 16 }
 0x11f   : > { %v1793_v15 = vpop.f32.mrf.mxu0  ;;  %v4899_v10 = vadd.f32 %v1791_v9, %v1636_v45  ;;  %v700_v45 = vshrl.u32 %v4472_v16, 16 }
 0x122   : > { %v1063_v29 = vpop.f32.mrf.mxu2 }
 0x123   : > { %v1143_v11 = vadd.f32 %v1063_v29, %v816_v58  ;;  %v818_v14 = vpop.f32.mrf.mxu1 }
 0x124   : > { %v4906_v47 = vpop.f32.mrf.mxu3 }
 0x125   : > { %v1637_v27 = vadd.f32 %v4842_v43, %v1143_v11  ;;  %v819_v43 = vadd.f32 %v818_v14, %v4749_v35  ;;  %v694_v11 = vor.u32 %v692_v5, %v690_v1  ;;  %v698_v35 = vrot.slane %v696_v39, 1 }
 0x126   : > { %3886 = vmatmul.msk.bf16.gmra.mxu1 %vm422_vm2, %v691_v41  ;;  %v1450_v14 = vrot.slane %v6006_v36, 1  ;;  %v1453_v41 = vrot.slane %v6007_v3, 2 }
 0x127   : > { %v1796_v9 = vpop.f32.mrf.mxu0  ;;  %3905 = vmatmul.msk.bf16.gmra.mxu2 %vm422_vm2, %v954_v23  ;;  %v4912_v56 = vadd.f32 %v1793_v15, %v1637_v27  ;;  %v955_v27 = vrot.slane %v700_v45, 1  ;;  %v956_v15 = vrot.slane %v696_v39, 2  ;;  %v699_v5 = vsel %vm583_vm4, %v694_v11, %v698_v35 }
 0x128   : > { %v1454_v1 = vor.u32 %v1453_v41, %v1450_v14  ;;  %v4948_v14 = vld [vmem:[%s4350_s30 + $0x98] sm:$0xff] }
 0x129   : > { %3994 = vmatmul.msk.bf16.gmra.mxu3 %vm422_vm2, %v1446_v12 }
 0x12a   : > { %4011 = vmatmul.msk.bf16.gmra.mxu0 %vm422_vm2, %v1699_v59  ;;  %v1066_v21 = vpop.f32.mrf.mxu2  ;;  %v957_v59 = vor.u32 %v956_v15, %v955_v27  ;;  %v4256_v15 = vld [vmem:[%s4350_s30 + $0x80] sm:$0xff] }
 0x12b   : > { %v1144_v44 = vadd.f32 %v1066_v21, %v819_v43  ;;  %v820_v37 = vpop.f32.mrf.mxu1  ;;  %v708_v11 = vshrl.u32 %v4256_v15, 16 }
 0x12c   : > { %v4925_v16 = vpop.f32.mrf.mxu3  ;;  %v821_v12 = vadd.f32 %v820_v37, %v4770_v19  ;;  %v958_v39 = vsel %vm894_vm3, %v953_v24, %v957_v59  ;;  %v1455_v37 = vsel %vm894_vm3, %v1445_v62, %v1454_v1  ;;  %v6010_v62 = vshll.u32 %v4948_v14, 16 }
 0x12d   : > { %v1638_v58 = vadd.f32 %v4861_v33, %v1144_v44  ;;  %v1700_v33 = vrot.slane %v4853_v0, 2 }
 0x12f   : > { %v1798_v29 = vpop.f32.mrf.mxu0  ;;  %v4931_v23 = vadd.f32 %v1796_v9, %v1638_v58  ;;  %v1701_v19 = vsel %vm1672_vm5, %v1698_v63, %v1700_v33  ;;  %v704_v58 = vshll.u32 %v4256_v15, 16 }
 0x132   : > { %v1068_v43 = vpop.f32.mrf.mxu2 }
 0x133   : > { %v1145_v21 = vadd.f32 %v1068_v43, %v821_v12  ;;  %v823_v44 = vpop.f32.mrf.mxu1  ;;  %v6009_v12 = vshrl.u32 %v4948_v14, 16 }
 0x134   : > { %v4938_v3 = vpop.f32.mrf.mxu3 }
 0x135   : > { %v1639_v36 = vadd.f32 %v4874_v34, %v1145_v21  ;;  %v824_v34 = vadd.f32 %v823_v44, %v4603_v40  ;;  %v706_v40 = vrot.slane %v704_v58, 1  ;;  %v1459_v44 = vrot.slane %v6009_v12, 1 }
 0x136   : > { %3887 = vmatmul.msk.bf16.gmra.mxu1 %vm422_vm2, %v699_v5 }
 0x137   : > { %v1801_v9 = vpop.f32.mrf.mxu0  ;;  %3906 = vmatmul.msk.bf16.gmra.mxu2 %vm422_vm2, %v958_v39  ;;  %v4944_v27 = vadd.f32 %v1798_v29, %v1639_v36  ;;  %v959_v36 = vrot.slane %v708_v11, 1  ;;  %v960_v29 = vrot.slane %v704_v58, 2  ;;  %v702_v39 = vor.u32 %v700_v45, %v698_v35 }
 0x139   : > { %6035 = vst [vmem:[#allocation23_spill] sm:$0xff] %v4944_v27  ;;  %3995 = vmatmul.msk.bf16.gmra.mxu3 %vm422_vm2, %v1455_v37  ;;  %v961_v15 = vor.u32 %v960_v29, %v959_v36  ;;  %v707_v45 = vsel %vm583_vm4, %v702_v39, %v706_v40  ;;  %v4257_v39 = vld [vmem:[%s4350_s30 + $0x88] sm:$0xff] }
 0x13a   : > { %4012 = vmatmul.msk.bf16.gmra.mxu0 %vm422_vm2, %v1701_v19  ;;  %v1071_v24 = vpop.f32.mrf.mxu2  ;;  %v1462_v19 = vrot.slane %v6010_v62, 2  ;;  %v1704_v62 = vrot.slane %v4917_v8, 2 }
 0x13b   : > { %v1146_v41 = vadd.f32 %v1071_v24, %v824_v34  ;;  %v825_v63 = vpop.f32.mrf.mxu1  ;;  %v962_v58 = vsel %vm894_vm3, %v957_v59, %v961_v15  ;;  %v716_v59 = vshrl.u32 %v4257_v39, 16 }
 0x13c   : > { %v4956_v21 = vpop.f32.mrf.mxu3  ;;  %v826_v34 = vadd.f32 %v825_v63, %v4622_v2  ;;  %v1463_v35 = vor.u32 %v1462_v19, %v1459_v44  ;;  %v712_v44 = vshll.u32 %v4257_v39, 16 }
 0x13d   : > { %v1640_v43 = vadd.f32 %v4893_v50, %v1146_v41  ;;  %v1702_v50 = vrot.slane %v4885_v18, 2 }
 0x13e   : > { %v1464_v36 = vsel %vm894_vm3, %v1454_v1, %v1463_v35 }
 0x13f   : > { %v1803_v5 = vpop.f32.mrf.mxu0  ;;  %v4962_v37 = vadd.f32 %v1801_v9, %v1640_v43  ;;  %v1208_v9 = vld [vmem:[%s4350_s30 + $0xa0] sm:$0x3]  ;;  %v1703_v2 = vsel %vm1672_vm5, %v1700_v33, %v1702_v50 }
 0x140   : > { %v1284_v63 = vunpack.c.l.b16 %v1208_v9 }
 0x142   : > { %v1073_v24 = vpop.f32.mrf.mxu2  ;;  %v4979_v19 = vpack.c.b16 %v1284_v63, %v1284_v63  ;;  %v710_v63 = vor.u32 %v708_v11, %v706_v40 }
 0x143   : > { %v1147_v41 = vadd.f32 %v1073_v24, %v826_v34  ;;  %v828_v17 = vpop.f32.mrf.mxu1 }
 0x144   : > { %v4969_v27 = vpop.f32.mrf.mxu3  ;;  %v1469_v1 = vshll.u32 %v4979_v19, 16 }
 0x145   : > { %v1641_v12 = vadd.f32 %v4906_v47, %v1147_v41  ;;  %v829_v47 = vadd.f32 %v828_v17, %v4637_v7  ;;  %v1466_v41 = vshrl.u32 %v4979_v19, 16  ;;  %v714_v7 = vrot.slane %v712_v44, 1 }
 0x146   : > { %3888 = vmatmul.msk.bf16.gmra.mxu1 %vm422_vm2, %v707_v45 }
 0x147   : > { %v1806_v43 = vpop.f32.mrf.mxu0  ;;  %3907 = vmatmul.msk.bf16.gmra.mxu2 %vm422_vm2, %v962_v58  ;;  %v4976_v29 = vadd.f32 %v1803_v5, %v1641_v12  ;;  %v963_v12 = vrot.slane %v716_v59, 1  ;;  %v964_v5 = vrot.slane %v712_v44, 2  ;;  %v1468_v17 = vrot.slane %v1466_v41, 1 }
 0x149   : > { %6036 = vst [vmem:[#allocation24_spill] sm:$0xff] %v4976_v29  ;;  %3996 = vmatmul.msk.bf16.gmra.mxu3 %vm422_vm2, %v1464_v36  ;;  %v965_v36 = vor.u32 %v964_v5, %v963_v12 }
 0x14a   : > { %4013 = vmatmul.msk.bf16.gmra.mxu0 %vm422_vm2, %v1703_v2  ;;  %v1076_v34 = vpop.f32.mrf.mxu2  ;;  %v1471_v2 = vrot.slane %v1469_v1, 2  ;;  %v5005_v1 = vld [vmem:[%s4350_s30 + $0x90] sm:$0xff] }
 0x14b   : > { %v1148_v33 = vadd.f32 %v1076_v34, %v829_v47  ;;  %v830_v24 = vpop.f32.mrf.mxu1  ;;  %v966_v11 = vsel %vm894_vm3, %v961_v15, %v965_v36  ;;  %v720_v12 = vshll.u32 %v5005_v1, 16 }
 0x14c   : > { %v4987_v58 = vpop.f32.mrf.mxu3  ;;  %v831_v47 = vadd.f32 %v830_v24, %v4658_v49  ;;  %v1705_v49 = vsel %vm1672_vm5, %v1702_v50, %v1704_v62  ;;  %v2680_v50 = vld [vmem:[%s4350_s30 + $0x18] sm:$0x8] }
 0x14d   : > { %v1642_v45 = vadd.f32 %v4925_v16, %v1148_v33  ;;  %v715_v16 = vsel %vm583_vm4, %v710_v63, %v714_v7  ;;  %v1472_v33 = vor.u32 %v1471_v2, %v1468_v17  ;;  %v2684_v63 = vunpack.c.l.b16 %v2680_v50 }
 0x14e   : > { %v968_v2 = vrot.slane %v720_v12, 2 }
 0x14f   : > { %v1808_v9 = vpop.f32.mrf.mxu0  ;;  %v4989_v39 = vadd.f32 %v1806_v43, %v1642_v45  ;;  %v1473_v24 = vsel %vm894_vm3, %v1463_v35, %v1472_v33  ;;  %v722_v33 = vrot.slane %v720_v12, 1 }
 0x152   : > { %v1078_v34 = vpop.f32.mrf.mxu2 }
 0x153   : > { %v1149_v29 = vadd.f32 %v1078_v34, %v831_v47  ;;  %v833_v18 = vpop.f32.mrf.mxu1 }
 0x154   : > { %v4996_v43 = vpop.f32.mrf.mxu3  ;;  %v834_v15 = vadd.f32 %v833_v18, %v4673_v6  ;;  %v888_v6 = vld [vmem:[%s4350_s30 + $0x98] sm:$0x3] }
 0x155   : > { %v1643_v40 = vadd.f32 %v4938_v3, %v1149_v29  ;;  %v724_v3 = vshrl.u32 %v5005_v1, 16  ;;  %v5012_v29 = vld [vmem:[%s4350_s30 + $0x1c] sm:$0xf] }
 0x156   : > { %3889 = vmatmul.msk.bf16.gmra.mxu1 %vm422_vm2, %v715_v16  ;;  %v718_v16 = vor.u32 %v716_v59, %v714_v7  ;;  %v1706_v7 = vrot.slane %v4948_v14, 2 }
 0x157   : > { %v1811_v44 = vpop.f32.mrf.mxu0  ;;  %3908 = vmatmul.msk.bf16.gmra.mxu2 %vm422_vm2, %v966_v11  ;;  %v5002_v41 = vadd.f32 %v1808_v9, %v1643_v40  ;;  %v6013_v9 = vunpack.c.l.b16 %v5012_v29  ;;  %v967_v17 = vrot.slane %v724_v3, 1  ;;  %v5022_v11 = vld [vmem:[%s4350_s30 + $0x20] sm:$0xff] }
 0x159   : > { %6037 = vst [vmem:[#allocation25_spill] sm:$0xff] %v5002_v41  ;;  %3997 = vmatmul.msk.bf16.gmra.mxu3 %vm422_vm2, %v1473_v24  ;;  %v5026_v40 = vpack.c.b16 %v6013_v9, %v2684_v63  ;;  %v6038_v24 = vshrl.u32 %v4463_v4, 16  ;;  %v969_v50 = vor.u32 %v968_v2, %v967_v17  ;;  %v723_v63 = vsel %vm583_vm4, %v718_v16, %v722_v33 }
 0x15a   : > { %4014 = vmatmul.msk.bf16.gmra.mxu0 %vm422_vm2, %v1705_v49  ;;  %v1081_v5 = vpop.f32.mrf.mxu2  ;;  %v1707_v2 = vsel %vm1672_vm5, %v1704_v62, %v1706_v7  ;;  %v728_v62 = vshll.u32 %v4437_v53, 16  ;;  %v1708_v53 = vrot.slane %v4979_v19, 2  ;;  %v1910_v19 = vshrl.u32 %v4540_v31, 16 }
 0x15b   : > { %v1150_v35 = vadd.f32 %v1081_v5, %v834_v15  ;;  %v835_v45 = vpop.f32.mrf.mxu1  ;;  %v1917_v1 = vrot.slane %v6038_v24, 2  ;;  %v6039_v15 = vshll.u32 %v4463_v4, 16  ;;  %v892_v5 = vunpack.c.l.b16 %v888_v6 }
 0x15c   : > { %v5018_v34 = vpop.f32.mrf.mxu3  ;;  %v970_v24 = vsel %vm894_vm3, %v965_v36, %v969_v50 }
 0x15d   : > { %v1644_v47 = vadd.f32 %v4956_v21, %v1150_v35  ;;  %v1918_v21 = vrot.slane %v6039_v15, 3  ;;  %v836_v35 = vadd.f32 %v835_v45, %v4694_v25  ;;  %v893_v9 = vpack.c.b16 %v892_v5, %v892_v5 }
 0x15f   : > { %v1813_v18 = vpop.f32.mrf.mxu0  ;;  %v5028_v49 = vadd.f32 %v1811_v44, %v1644_v47  ;;  %v2687_v44 = vrot.slane %v5026_v40, 3  ;;  %v2688_v47 = vrot.slane %v5022_v11, 3  ;;  %v5040_v4 = vor.u32 %v1918_v21, %v1917_v1 }
 0x160   : > { %v972_v36 = vshrl.u32 %v893_v9, 16  ;;  %v975_v15 = vshll.u32 %v893_v9, 16 }
 0x161   : > { %v2689_v6 = vsel %vm2686_vm6, %v2687_v44, %v2688_v47  ;;  %v726_v44 = vor.u32 %v724_v3, %v722_v33  ;;  %v6040_v33 = vunpack.c.l.b16 %v5012_v29 }
 0x162   : > { %v1083_v59 = vpop.f32.mrf.mxu2 }
 0x163   : > { %v1151_v12 = vadd.f32 %v1083_v59, %v836_v35  ;;  %v838_v41 = vpop.f32.mrf.mxu1  ;;  %v974_v35 = vrot.slane %v972_v36, 1  ;;  %v977_v59 = vrot.slane %v975_v15, 2 }
 0x164   : > { %v5043_v25 = vpop.f32.mrf.mxu3  ;;  %v839_v1 = vadd.f32 %v838_v41, %v4709_v30  ;;  %v5060_v30 = vld [vmem:[%s4350_s30 + $0x28] sm:$0xff] }
 0x165   : > { %v1645_v17 = vadd.f32 %v4969_v27, %v1151_v12 }
 0x166   : > { %3890 = vmatmul.msk.bf16.gmra.mxu1 %vm422_vm2, %v723_v63  ;;  %v2186_v63 = vld [vmem:[%s4350_s30 + $0x18] sm:$0xc] }
 0x167   : > { %v1816_v45 = vpop.f32.mrf.mxu0  ;;  %3909 = vmatmul.msk.bf16.gmra.mxu2 %vm422_vm2, %v970_v24  ;;  %v5049_v16 = vadd.f32 %v1813_v18, %v1645_v17  ;;  %v730_v24 = vrot.slane %v728_v62, 1  ;;  %v978_v17 = vor.u32 %v977_v59, %v974_v35 }
 0x169   : > { %4124 = vmatmul.msk.bf16.vlgmr.msra.gmra.mxu3 %vm422_vm2, %v2689_v6  ;;  %v979_v3 = vsel %vm894_vm3, %v969_v50, %v978_v17  ;;  %v1912_v17 = vrot.slane %v1910_v19, 2 }
 0x16a   : > { %4015 = vmatmul.msk.bf16.gmra.mxu0 %vm422_vm2, %v1707_v2  ;;  %v1086_v27 = vpop.f32.mrf.mxu2  ;;  %v2262_v2 = vunpack.c.l.b16 %v2186_v63  ;;  %v2330_v63 = vshll.u32 %v5022_v11, 16 }
 0x16b   : > { %v1152_v21 = vadd.f32 %v1086_v27, %v839_v1  ;;  %v840_v5 = vpop.f32.mrf.mxu1  ;;  %v2690_v27 = vrot.slane %v5060_v30, 3 }
 0x16c   : > { %v5056_v18 = vpop.f32.mrf.mxu3  ;;  %v841_v6 = vadd.f32 %v840_v5, %v4730_v52  ;;  %v1709_v52 = vsel %vm1672_vm5, %v1706_v7, %v1708_v53  ;;  %v1913_v5 = vshll.u32 %v4540_v31, 16  ;;  %v2927_v31 = vshll.u32 %v5026_v40, 16 }
 0x16d   : > { %v1646_v12 = vadd.f32 %v4987_v58, %v1152_v21  ;;  %v731_v58 = vsel %vm583_vm4, %v726_v44, %v730_v24  ;;  %v2299_v21 = vpack.c.b16 %v6040_v33, %v2262_v2  ;;  %v2691_v29 = vsel %vm2686_vm6, %v2688_v47, %v2690_v27 }
 0x16e   : > { %v2924_v44 = vshrl.u32 %v5026_v40, 16  ;;  %v1915_v2 = vrot.slane %v1913_v5, 3  ;;  %v2932_v40 = vrot.slane %v2330_v63, 4 }
 0x16f   : > { %v1818_v9 = vpop.f32.mrf.mxu0  ;;  %v5062_v41 = vadd.f32 %v1816_v45, %v1646_v12  ;;  %v2322_v59 = vshll.u32 %v2299_v21, 16  ;;  %v2327_v12 = vshrl.u32 %v5022_v11, 16  ;;  %v2332_v11 = vrot.slane %v2330_v63, 3 }
 0x171   : > { %v2329_v53 = vrot.slane %v2327_v12, 2  ;;  %v2931_v33 = vrot.slane %v2327_v12, 3  ;;  %v3348_v12 = vld [vmem:[%s5961_s3] sm:$0xff] }
 0x172   : > { %v1088_v1 = vpop.f32.mrf.mxu2 }
 0x173   : > { %v1153_v36 = vadd.f32 %v1088_v1, %v841_v6  ;;  %v843_v15 = vpop.f32.mrf.mxu1  ;;  %v2324_v1 = vrot.slane %v2322_v59, 3 }
 0x174   : > { %v5072_v62 = vpop.f32.mrf.mxu3  ;;  %v844_v7 = vadd.f32 %v843_v15, %v4743_v20 }
 0x175   : > { %v1647_v45 = vadd.f32 %v4996_v43, %v1153_v36  ;;  %v2319_v43 = vshrl.u32 %v2299_v21, 16  ;;  %v2926_v36 = vrot.slane %v2924_v44, 3  ;;  %v1916_v21 = vor.u32 %v1915_v2, %v1912_v17 }
 0x176   : > { %3891 = vmatmul.msk.bf16.gmra.mxu1 %vm422_vm2, %v731_v58 }
 0x177   : > { %v1821_v35 = vpop.f32.mrf.mxu0  ;;  %3910 = vmatmul.msk.bf16.gmra.mxu2 %vm422_vm2, %v979_v3  ;;  %v5082_v50 = vadd.f32 %v1818_v9, %v1647_v45  ;;  %v2321_v6 = vrot.slane %v2319_v43, 2  ;;  %v2929_v3 = vrot.slane %v2927_v31, 4  ;;  %v5095_v45 = vld [vmem:[%s4350_s30 + $0x30] sm:$0xff] }
 0x179   : > { %4125 = vmatmul.msk.bf16.gmra.mxu3 %vm422_vm2, %v2691_v29  ;;  %v2325_v5 = vor.u32 %v2324_v1, %v2321_v6  ;;  %v2333_v29 = vor.u32 %v2332_v11, %v2329_v53  ;;  %v2930_v59 = vor.u32 %v2929_v3, %v2926_v36  ;;  %v2336_v1 = vshrl.u32 %v5060_v30, 16 }
 0x17a   : > { %4016 = vmatmul.msk.bf16.gmra.mxu0 %vm422_vm2, %v1709_v52  ;;  %v1091_v24 = vpop.f32.mrf.mxu2  ;;  %v4284_v52 = vmov 0   ;;  %v2339_v53 = vshll.u32 %v5060_v30, 16 }
 0x17b   : > { %v1154_v47 = vadd.f32 %v1091_v24, %v844_v7  ;;  %v845_v9 = vpop.f32.mrf.mxu1  ;;  %4252 = vset.pattern.permute.xlu0 %v4284_v52  ;;  %4253 = vset.pattern.permute.xlu1 %v4284_v52  ;;  %v2933_v7 = vor.u32 %v2932_v40, %v2931_v33  ;;  %v1920_v24 = vsel %vm1908_vm7, %v1916_v21, %v5040_v4  ;;  %v6042_v33 = vshll.u32 %v4495_v46, 16 }
 0x17c   : > { %v5092_v15 = vpop.f32.mrf.mxu3  ;;  %4254 = vset.pattern.permute.xlu2 %v4284_v52  ;;  %3386 = vperm.xlu0 %4252, %v3348_v12   ;;  %v2334_v31 = vsel %vm1908_vm7, %v2325_v5, %v2333_v29  ;;  %v2341_v40 = vrot.slane %v2339_v53, 3  ;;  %v5134_v12 = vld [vmem:[%s4350_s30 + $0x38] sm:$0xff] }
 0x17d   : > { %v1648_v20 = vadd.f32 %v5018_v34, %v1154_v47  ;;  %v846_v34 = vadd.f32 %v845_v9, %v4764_v61  ;;  %v2934_v17 = vsel %vm2922_vm8, %v2930_v59, %v2933_v7  ;;  %v1922_v30 = vrot.slane %v6042_v33, 3 }
 0x17f   : > { %v1823_v58 = vpop.f32.mrf.mxu0  ;;  %v5097_v19 = vadd.f32 %v1821_v35, %v1648_v20  ;;  %v2692_v35 = vrot.slane %v5095_v45, 3  ;;  %v3349_v20 = vld [vmem:[%s5961_s3 + $0x8] sm:$0xff] }
 0x181   : > { %v2693_v2 = vsel %vm2686_vm6, %v2690_v27, %v2692_v35 }
 0x182   : > { %v1093_v43 = vpop.f32.mrf.mxu2 }
 0x183   : > { %v1155_v63 = vadd.f32 %v1093_v43, %v846_v34  ;;  %v848_v44 = vpop.f32.mrf.mxu1  ;;  %v2935_v34 = vrot.slane %v2336_v1, 3  ;;  %v2936_v43 = vrot.slane %v2339_v53, 4 }
 0x184   : > { %v5108_v47 = vpop.f32.mrf.mxu3  ;;  %3391 = vperm.xlu0 %4252, %v3349_v20  }
 0x185   : > { %v1649_v61 = vadd.f32 %v5043_v25, %v1155_v63  ;;  %v849_v25 = vadd.f32 %v848_v44, %v4619_v57  ;;  %v2338_v57 = vrot.slane %v2336_v1, 2  ;;  %v2694_v1 = vrot.slane %v5134_v12, 3 }
 0x186   : > { %4018 = vmatmul.msk.bf16.vlgmr.msra.gmra.mxu1 %vm422_vm2, %v1920_v24 }
 0x187   : > { %v1826_v9 = vpop.f32.mrf.mxu0  ;;  %4105 = vmatmul.msk.bf16.vlgmr.msra.gmra.mxu2 %vm422_vm2, %v2334_v31  ;;  %v5116_v6 = vadd.f32 %v1823_v58, %v1649_v61  ;;  %v6041_v58 = vshrl.u32 %v4495_v46, 16  ;;  %v2342_v44 = vor.u32 %v2341_v40, %v2338_v57  ;;  %v2937_v31 = vor.u32 %v2936_v43, %v2935_v34  ;;  %v3350_v61 = vld [vmem:[%s5961_s3 + $0x10] sm:$0xff] }
 0x188   : > { %3396 = vperm.xlu1 %4253, %v3350_v61   ;;  %v2695_v20 = vsel %vm2686_vm6, %v2692_v35, %v2694_v1  ;;  %v5171_v61 = vld [vmem:[%s4350_s30 + $0x40] sm:$0xff] }
 0x189   : > { %4126 = vmatmul.msk.bf16.gmra.mxu3 %vm422_vm2, %v2693_v2  ;;  %v1921_v3 = vrot.slane %v6041_v58, 2 }
 0x18a   : > { %4143 = vmatmul.msk.bf16.vlgmr.msra.gmra.mxu0 %vm422_vm2, %v2934_v17  ;;  %v1096_v11 = vpop.f32.mrf.mxu2 }
 0x18b   : > { %v1156_v36 = vadd.f32 %v1096_v11, %v849_v25  ;;  %v850_v27 = vpop.f32.mrf.mxu1  ;;  %v1923_v59 = vor.u32 %v1922_v30, %v1921_v3  ;;  %v2938_v11 = vsel %vm2922_vm8, %v2933_v7, %v2937_v31  ;;  %v3351_v7 = vld [vmem:[%s5961_s3 + $0x18] sm:$0xff]  ;;  %v6043_v3 = vld [vmem:[#allocation2_spill] sm:$0xff] }
 0x18c   : > { %v5131_v52 = vpop.f32.mrf.mxu3  ;;  %v851_v24 = vadd.f32 %v850_v27, %v4634_v28  ;;  %v2348_v27 = vshll.u32 %v5095_v45, 16  ;;  %v6044_v33 = vshrl.u32 %v6043_v3, 16  ;;  %v6045_v57 = vshll.u32 %v6043_v3, 16 }
 0x18d   : > { %v1650_v21 = vadd.f32 %v5056_v18, %v1156_v36  ;;  %v1924_v2 = vsel %vm1908_vm7, %v5040_v4, %v1923_v59  ;;  %v2345_v4 = vshrl.u32 %v5095_v45, 16 }
 0x18e   : > { %v1925_v30 = vrot.slane %v6044_v33, 2  ;;  %v1926_v45 = vrot.slane %v6045_v57, 3  ;;  %v2350_v40 = vrot.slane %v2348_v27, 3  ;;  %v2357_v33 = vshll.u32 %v5134_v12, 16 }
 0x18f   : > { %v1828_v5 = vpop.f32.mrf.mxu0  ;;  %v5136_v63 = vadd.f32 %v1826_v9, %v1650_v21  ;;  %v2343_v9 = vsel %vm1908_vm7, %v2333_v29, %v2342_v44  ;;  %v2939_v43 = vrot.slane %v2345_v4, 3 }
 0x190   : > { %3401 = vperm.xlu1 %4253, %v3351_v7  }
 0x192   : > { %v1098_v46 = vpop.f32.mrf.mxu2 }
 0x193   : > { %v1157_v18 = vadd.f32 %v1098_v46, %v851_v24  ;;  %v853_v17 = vpop.f32.mrf.mxu1  ;;  %v2940_v24 = vrot.slane %v2348_v27, 4  ;;  %v1927_v46 = vor.u32 %v1926_v45, %v1925_v30  ;;  %v6048_v45 = vld [vmem:[#allocation3_spill] sm:$0xff] }
 0x194   : > { %v5147_v25 = vpop.f32.mrf.mxu3  ;;  %v854_v29 = vadd.f32 %v853_v17, %v4655_v38  ;;  %v2347_v38 = vrot.slane %v2345_v4, 2 }
 0x195   : > { %v1651_v53 = vadd.f32 %v5072_v62, %v1157_v18 }
 0x196   : > { %4019 = vmatmul.msk.bf16.gmra.mxu1 %vm422_vm2, %v1924_v2  ;;  %v2351_v17 = vor.u32 %v2350_v40, %v2347_v38  ;;  %v6046_v2 = vld [vmem:[#allocation11_spill] sm:$0xff]  ;;  %v6049_v38 = vshrl.u32 %v6048_v45, 16 }
 0x197   : > { %v1831_v28 = vpop.f32.mrf.mxu0  ;;  %4106 = vmatmul.msk.bf16.gmra.mxu2 %vm422_vm2, %v2343_v9  ;;  %v5153_v36 = vadd.f32 %v1828_v5, %v1651_v53 }
 0x198   : > { %v2352_v7 = vsel %vm1908_vm7, %v2342_v44, %v2351_v17  ;;  %v6047_v44 = vld [vmem:[#allocation14_spill] sm:$0xff]  ;;  %v1929_v40 = vrot.slane %v6049_v38, 2 }
 0x199   : > { %4127 = vmatmul.msk.bf16.gmra.mxu3 %vm422_vm2, %v2695_v20 }
 0x19a   : > { %4144 = vmatmul.msk.bf16.gmra.mxu0 %vm422_vm2, %v2938_v11  ;;  %v1101_v62 = vpop.f32.mrf.mxu2  ;;  %v2941_v11 = vor.u32 %v2940_v24, %v2939_v43  ;;  %v2359_v43 = vrot.slane %v2357_v33, 3 }
 0x19b   : > { %v1158_v58 = vadd.f32 %v1101_v62, %v854_v29  ;;  %v855_v35 = vpop.f32.mrf.mxu1  ;;  %v1928_v62 = vsel %vm1908_vm7, %v1923_v59, %v1927_v46  ;;  %v2354_v59 = vshrl.u32 %v5134_v12, 16 }
 0x19c   : > { %v5168_v5 = vpop.f32.mrf.mxu3  ;;  %v856_v9 = vadd.f32 %v855_v35, %v6046_v2 }
 0x19d   : > { %v1652_v21 = vadd.f32 %v5092_v15, %v1158_v58  ;;  %v2696_v15 = vrot.slane %v5171_v61, 3 }
 0x19f   : > { %v1833_v34 = vpop.f32.mrf.mxu0  ;;  %v5173_v18 = vadd.f32 %v1831_v28, %v1652_v21  ;;  %v2942_v28 = vsel %vm2922_vm8, %v2937_v31, %v2941_v11  ;;  %v2697_v35 = vsel %vm2686_vm6, %v2694_v1, %v2696_v15  ;;  %v6050_v1 = vshll.u32 %v6048_v45, 16 }
 0x1a1   : > { %v1930_v21 = vrot.slane %v6050_v1, 3 }
 0x1a2   : > { %v1103_v53 = vpop.f32.mrf.mxu2 }
 0x1a3   : > { %v1159_v20 = vadd.f32 %v1103_v53, %v856_v9  ;;  %v858_v29 = vpop.f32.mrf.mxu1  ;;  %v2943_v9 = vrot.slane %v2354_v59, 3  ;;  %v2944_v53 = vrot.slane %v2357_v33, 4 }
 0x1a4   : > { %v5180_v27 = vpop.f32.mrf.mxu3  ;;  %v859_v30 = vadd.f32 %v858_v29, %v6047_v44  ;;  %v5201_v29 = vld [vmem:[%s4350_s30 + $0x48] sm:$0xff] }
 0x1a5   : > { %v1653_v4 = vadd.f32 %v5108_v47, %v1159_v20  ;;  %v1931_v20 = vor.u32 %v1930_v21, %v1929_v40  ;;  %v2945_v44 = vor.u32 %v2944_v53, %v2943_v9  ;;  %v2366_v21 = vshll.u32 %v5171_v61, 16 }
 0x1a6   : > { %4020 = vmatmul.msk.bf16.gmra.mxu1 %vm422_vm2, %v1928_v62 }
 0x1a7   : > { %v1836_v58 = vpop.f32.mrf.mxu0  ;;  %4107 = vmatmul.msk.bf16.gmra.mxu2 %vm422_vm2, %v2352_v7  ;;  %v5186_v3 = vadd.f32 %v1833_v34, %v1653_v4  ;;  %v2356_v34 = vrot.slane %v2354_v59, 2  ;;  %v6051_v4 = vld [vmem:[#allocation16_spill] sm:$0xff]  ;;  %v2698_v59 = vrot.slane %v5201_v29, 3  ;;  %v2946_v38 = vsel %vm2922_vm8, %v2941_v11, %v2945_v44  ;;  %v3352_v11 = vld [vmem:[%s5961_s3 + $0x20] sm:$0xff] }
 0x1a8   : > { %3406 = vperm.xlu2 %4254, %v3352_v11  }
 0x1a9   : > { %4128 = vmatmul.msk.bf16.gmra.mxu3 %vm422_vm2, %v2697_v35  ;;  %v2360_v7 = vor.u32 %v2359_v43, %v2356_v34  ;;  %v2699_v40 = vsel %vm2686_vm6, %v2696_v15, %v2698_v59  ;;  %v3355_v15 = vld [vmem:[%s5961_s3 + $0x38] sm:$0xff] }
 0x1aa   : > { %4145 = vmatmul.msk.bf16.gmra.mxu0 %vm422_vm2, %v2942_v28  ;;  %v1106_v47 = vpop.f32.mrf.mxu2  ;;  %3421 = vperm.xlu1 %4253, %v3355_v15   ;;  %v3353_v15 = vld [vmem:[%s5961_s3 + $0x28] sm:$0xff] }
 0x1ab   : > { %v1160_v57 = vadd.f32 %v1106_v47, %v859_v30  ;;  %v860_v31 = vpop.f32.mrf.mxu1  ;;  %v3354_v30 = vld [vmem:[%s5961_s3 + $0x30] sm:$0xff]  ;;  %v2361_v33 = vsel %vm1908_vm7, %v2351_v17, %v2360_v7  ;;  %v6052_v17 = vld [vmem:[#allocation18_spill] sm:$0xff] }
 0x1ac   : > { %v5198_v24 = vpop.f32.mrf.mxu3  ;;  %v861_v28 = vadd.f32 %v860_v31, %v6051_v4  ;;  %3416 = vperm.xlu0 %4252, %v3354_v30  }
 0x1ad   : > { %v1654_v12 = vadd.f32 %v5131_v52, %v1160_v57  ;;  %v1932_v57 = vsel %vm1908_vm7, %v1927_v46, %v1931_v20  ;;  %v2363_v46 = vshrl.u32 %v5171_v61, 16 }
 0x1af   : > { %v1838_v2 = vpop.f32.mrf.mxu0  ;;  %v5203_v62 = vadd.f32 %v1836_v58, %v1654_v12 }
 0x1b0   : > { %3411 = vperm.xlu2 %4254, %v3353_v15  }
 0x1b2   : > { %v1108_v35 = vpop.f32.mrf.mxu2 }
 0x1b3   : > { %v1161_v52 = vadd.f32 %v1108_v35, %v861_v28  ;;  %v863_v47 = vpop.f32.mrf.mxu1  ;;  %v2365_v28 = vrot.slane %v2363_v46, 2  ;;  %v2368_v35 = vrot.slane %v2366_v21, 3 }
 0x1b4   : > { %v5213_v45 = vpop.f32.mrf.mxu3  ;;  %v864_v34 = vadd.f32 %v863_v47, %v6052_v17 }
 0x1b5   : > { %v1655_v58 = vadd.f32 %v5147_v25, %v1161_v52  ;;  %v2369_v17 = vor.u32 %v2368_v35, %v2365_v28  ;;  %v2375_v35 = vshll.u32 %v5201_v29, 16 }
 0x1b6   : > { %4021 = vmatmul.msk.bf16.gmra.mxu1 %vm422_vm2, %v1932_v57  ;;  %v2947_v57 = vrot.slane %v2363_v46, 3 }
 0x1b7   : > { %v1841_v31 = vpop.f32.mrf.mxu0  ;;  %4108 = vmatmul.msk.bf16.gmra.mxu2 %vm422_vm2, %v2361_v33  ;;  %v5219_v1 = vadd.f32 %v1838_v2, %v1655_v58  ;;  %v6053_v2 = vld [vmem:[#allocation4_spill] sm:$0xff]  ;;  %v2948_v33 = vrot.slane %v2366_v21, 4  ;;  %v2370_v21 = vsel %vm1908_vm7, %v2360_v7, %v2369_v17  ;;  %v2377_v15 = vrot.slane %v2375_v35, 3 }
 0x1b8   : > { %v6054_v61 = vshrl.u32 %v6053_v2, 16  ;;  %v6055_v53 = vshll.u32 %v6053_v2, 16  ;;  %v6058_v7 = vld [vmem:[#allocation20_spill] sm:$0xff] }
 0x1b9   : > { %4129 = vmatmul.msk.bf16.gmra.mxu3 %vm422_vm2, %v2699_v40  ;;  %v2949_v11 = vor.u32 %v2948_v33, %v2947_v57 }
 0x1ba   : > { %4146 = vmatmul.msk.bf16.gmra.mxu0 %vm422_vm2, %v2946_v38  ;;  %v1111_v25 = vpop.f32.mrf.mxu2  ;;  %v1933_v9 = vrot.slane %v6054_v61, 2  ;;  %v1934_v4 = vrot.slane %v6055_v53, 3  ;;  %v5240_v38 = vld [vmem:[%s4350_s30 + $0x50] sm:$0xff] }
 0x1bb   : > { %v1162_v43 = vadd.f32 %v1111_v25, %v864_v34  ;;  %v865_v12 = vpop.f32.mrf.mxu1  ;;  %v6056_v34 = vld [vmem:[#allocation19_spill] sm:$0xff]  ;;  %v2700_v46 = vrot.slane %v5240_v38, 3  ;;  %v2950_v53 = vsel %vm2922_vm8, %v2945_v44, %v2949_v11 }
 0x1bc   : > { %v5237_v52 = vpop.f32.mrf.mxu3  ;;  %v1935_v58 = vor.u32 %v1934_v4, %v1933_v9  ;;  %v866_v25 = vadd.f32 %v865_v12, %v6056_v34  ;;  %v3357_v44 = vld [vmem:[%s5961_s3 + $0x48] sm:$0xff] }
 0x1bd   : > { %v1656_v30 = vadd.f32 %v5168_v5, %v1162_v43  ;;  %v2701_v4 = vsel %vm2686_vm6, %v2698_v59, %v2700_v46  ;;  %3431 = vperm.xlu0 %4252, %v3357_v44   ;;  %v3358_v44 = vld [vmem:[%s5961_s3 + $0x50] sm:$0xff] }
 0x1be   : > { %v1936_v61 = vsel %vm1908_vm7, %v1931_v20, %v1935_v58  ;;  %v2372_v20 = vshrl.u32 %v5201_v29, 16  ;;  %3436 = vperm.xlu1 %4253, %v3358_v44  }
 0x1bf   : > { %v1843_v47 = vpop.f32.mrf.mxu0  ;;  %v5242_v40 = vadd.f32 %v1841_v31, %v1656_v30 }
 0x1c2   : > { %v1113_v2 = vpop.f32.mrf.mxu2 }
 0x1c3   : > { %v1163_v5 = vadd.f32 %v1113_v2, %v866_v25  ;;  %v868_v43 = vpop.f32.mrf.mxu1  ;;  %v2374_v2 = vrot.slane %v2372_v20, 2 }
 0x1c4   : > { %v5252_v9 = vpop.f32.mrf.mxu3  ;;  %v869_v30 = vadd.f32 %v868_v43, %v6058_v7 }
 0x1c5   : > { %v1657_v31 = vadd.f32 %v5180_v27, %v1163_v5 }
 0x1c6   : > { %4022 = vmatmul.msk.bf16.gmra.mxu1 %vm422_vm2, %v1936_v61 }
 0x1c7   : > { %v1846_v12 = vpop.f32.mrf.mxu0  ;;  %4109 = vmatmul.msk.bf16.gmra.mxu2 %vm422_vm2, %v2370_v21  ;;  %v5258_v28 = vadd.f32 %v1843_v47, %v1657_v31  ;;  %v6059_v47 = vld [vmem:[#allocation5_spill] sm:$0xff]  ;;  %v2951_v21 = vrot.slane %v2372_v20, 3  ;;  %v2952_v31 = vrot.slane %v2375_v35, 4 }
 0x1c8   : > { %v6060_v33 = vshrl.u32 %v6059_v47, 16  ;;  %v6061_v25 = vshll.u32 %v6059_v47, 16 }
 0x1c9   : > { %6057 = vst [vmem:[#allocation2_spill] sm:$0xff] %v5258_v28  ;;  %4130 = vmatmul.msk.bf16.gmra.mxu3 %vm422_vm2, %v2701_v4  ;;  %v5276_v4 = vld [vmem:[%s4350_s30 + $0x58] sm:$0xff] }
 0x1ca   : > { %4147 = vmatmul.msk.bf16.gmra.mxu0 %vm422_vm2, %v2950_v53  ;;  %v1116_v27 = vpop.f32.mrf.mxu2  ;;  %v1937_v34 = vrot.slane %v6060_v33, 2  ;;  %v1938_v29 = vrot.slane %v6061_v25, 3  ;;  %v2953_v25 = vor.u32 %v2952_v31, %v2951_v21  ;;  %v2702_v20 = vrot.slane %v5276_v4, 3 }
 0x1cb   : > { %v1164_v57 = vadd.f32 %v1116_v27, %v869_v30  ;;  %v870_v59 = vpop.f32.mrf.mxu1  ;;  %v2378_v30 = vor.u32 %v2377_v15, %v2374_v2  ;;  %v6063_v27 = vld [vmem:[#allocation21_spill] sm:$0xff] }
 0x1cc   : > { %v5273_v43 = vpop.f32.mrf.mxu3  ;;  %v1939_v53 = vor.u32 %v1938_v29, %v1937_v34  ;;  %v871_v33 = vadd.f32 %v870_v59, %v6063_v27  ;;  %v2954_v29 = vsel %vm2922_vm8, %v2949_v11, %v2953_v25  ;;  %v2703_v2 = vsel %vm2686_vm6, %v2700_v46, %v2702_v20  ;;  %v3356_v11 = vld [vmem:[%s5961_s3 + $0x40] sm:$0xff] }
 0x1cd   : > { %v1658_v5 = vadd.f32 %v5198_v24, %v1164_v57  ;;  %v2379_v35 = vsel %vm1908_vm7, %v2369_v17, %v2378_v30  ;;  %v6065_v17 = vld [vmem:[#allocation7_spill] sm:$0xff]  ;;  %3426 = vperm.xlu2 %4254, %v3356_v11   ;;  %v3360_v11 = vld [vmem:[%s5961_s3 + $0x60] sm:$0xff] }
 0x1ce   : > { %v1940_v28 = vsel %vm1908_vm7, %v1935_v58, %v1939_v53  ;;  %v2381_v58 = vshrl.u32 %v5240_v38, 16  ;;  %3446 = vperm.xlu0 %4252, %v3360_v11  }
 0x1cf   : > { %v1848_v61 = vpop.f32.mrf.mxu0  ;;  %v5278_v7 = vadd.f32 %v1846_v12, %v1658_v5  ;;  %v2384_v5 = vshll.u32 %v5240_v38, 16 }
 0x1d1   : > { %6062 = vst [vmem:[#allocation11_spill] sm:$0xff] %v5278_v7  ;;  %v2386_v44 = vrot.slane %v2384_v5, 3 }
 0x1d2   : > { %v1118_v47 = vpop.f32.mrf.mxu2 }
 0x1d3   : > { %v1165_v24 = vadd.f32 %v1118_v47, %v871_v33  ;;  %v873_v57 = vpop.f32.mrf.mxu1  ;;  %v2383_v47 = vrot.slane %v2381_v58, 2 }
 0x1d4   : > { %v5288_v34 = vpop.f32.mrf.mxu3  ;;  %v874_v21 = vadd.f32 %v873_v57, %v6065_v17  ;;  %v5312_v17 = vld [vmem:[%s4350_s30 + $0x60] sm:$0xff] }
 0x1d5   : > { %v1659_v12 = vadd.f32 %v5213_v45, %v1165_v24 }
 0x1d6   : > { %4023 = vmatmul.msk.bf16.gmra.mxu1 %vm422_vm2, %v1940_v28 }
 0x1d7   : > { %v1851_v59 = vpop.f32.mrf.mxu0  ;;  %4110 = vmatmul.msk.bf16.gmra.mxu2 %vm422_vm2, %v2379_v35  ;;  %v5294_v15 = vadd.f32 %v1848_v61, %v1659_v12  ;;  %v6066_v61 = vld [vmem:[#allocation6_spill] sm:$0xff]  ;;  %v2955_v12 = vrot.slane %v2381_v58, 3  ;;  %v2704_v58 = vrot.slane %v5312_v17, 3 }
 0x1d8   : > { %v6067_v31 = vshrl.u32 %v6066_v61, 16  ;;  %v6068_v33 = vshll.u32 %v6066_v61, 16 }
 0x1d9   : > { %6064 = vst [vmem:[#allocation14_spill] sm:$0xff] %v5294_v15  ;;  %4131 = vmatmul.msk.bf16.gmra.mxu3 %vm422_vm2, %v2703_v2 }
 0x1da   : > { %4148 = vmatmul.msk.bf16.gmra.mxu0 %vm422_vm2, %v2954_v29  ;;  %v1121_v45 = vpop.f32.mrf.mxu2  ;;  %v1941_v27 = vrot.slane %v6067_v31, 2  ;;  %v1942_v38 = vrot.slane %v6068_v33, 3  ;;  %v2956_v29 = vrot.slane %v2384_v5, 4  ;;  %v6070_v31 = vld [vmem:[#allocation8_spill] sm:$0xff] }
 0x1db   : > { %v1166_v28 = vadd.f32 %v1121_v45, %v874_v21  ;;  %v875_v46 = vpop.f32.mrf.mxu1  ;;  %v2387_v45 = vor.u32 %v2386_v44, %v2383_v47  ;;  %v2393_v44 = vshll.u32 %v5276_v4, 16 }
 0x1dc   : > { %v5309_v57 = vpop.f32.mrf.mxu3  ;;  %v1943_v2 = vor.u32 %v1942_v38, %v1941_v27  ;;  %v876_v15 = vadd.f32 %v875_v46, %v6070_v31  ;;  %v2957_v33 = vor.u32 %v2956_v29, %v2955_v12 }
 0x1dd   : > { %v1660_v24 = vadd.f32 %v5237_v52, %v1166_v28  ;;  %v2388_v5 = vsel %vm1908_vm7, %v2378_v30, %v2387_v45  ;;  %v6072_v30 = vld [vmem:[#allocation10_spill] sm:$0xff]  ;;  %v2395_v11 = vrot.slane %v2393_v44, 3 }
 0x1de   : > { %v1944_v7 = vsel %vm1908_vm7, %v1939_v53, %v1943_v2  ;;  %v2958_v38 = vsel %vm2922_vm8, %v2953_v25, %v2957_v33  ;;  %v2390_v53 = vshrl.u32 %v5276_v4, 16 }
 0x1df   : > { %v1853_v35 = vpop.f32.mrf.mxu0  ;;  %v5314_v21 = vadd.f32 %v1851_v59, %v1660_v24 }
 0x1e1   : > { %6069 = vst [vmem:[#allocation3_spill] sm:$0xff] %v5314_v21 }
 0x1e2   : > { %v1123_v61 = vpop.f32.mrf.mxu2 }
 0x1e3   : > { %v1167_v52 = vadd.f32 %v1123_v61, %v876_v15  ;;  %v878_v28 = vpop.f32.mrf.mxu1  ;;  %v2705_v15 = vsel %vm2686_vm6, %v2702_v20, %v2704_v58  ;;  %v2392_v61 = vrot.slane %v2390_v53, 2 }
 0x1e4   : > { %v5324_v27 = vpop.f32.mrf.mxu3  ;;  %v879_v24 = vadd.f32 %v878_v28, %v6072_v30  ;;  %v5348_v30 = vld [vmem:[%s4350_s30 + $0x68] sm:$0xff] }
 0x1e5   : > { %v1661_v59 = vadd.f32 %v5252_v9, %v1167_v52 }
 0x1e6   : > { %4024 = vmatmul.msk.bf16.gmra.mxu1 %vm422_vm2, %v1944_v7  ;;  %v3361_v7 = vld [vmem:[%s5961_s3 + $0x68] sm:$0xff] }
 0x1e7   : > { %v1856_v46 = vpop.f32.mrf.mxu0  ;;  %4111 = vmatmul.msk.bf16.gmra.mxu2 %vm422_vm2, %v2388_v5  ;;  %v5330_v47 = vadd.f32 %v1853_v35, %v1661_v59  ;;  %v6073_v35 = vld [vmem:[#allocation9_spill] sm:$0xff]  ;;  %3451 = vperm.xlu1 %4253, %v3361_v7   ;;  %v2959_v59 = vrot.slane %v2390_v53, 3  ;;  %v2706_v53 = vrot.slane %v5348_v30, 3 }
 0x1e8   : > { %v6074_v12 = vshrl.u32 %v6073_v35, 16  ;;  %v6075_v31 = vshll.u32 %v6073_v35, 16  ;;  %v3359_v7 = vld [vmem:[%s5961_s3 + $0x58] sm:$0xff] }
 0x1e9   : > { %6071 = vst [vmem:[#allocation16_spill] sm:$0xff] %v5330_v47  ;;  %4132 = vmatmul.msk.bf16.gmra.mxu3 %vm422_vm2, %v2705_v15  ;;  %3441 = vperm.xlu2 %4254, %v3359_v7  }
 0x1ea   : > { %4149 = vmatmul.msk.bf16.gmra.mxu0 %vm422_vm2, %v2958_v38  ;;  %v1126_v9 = vpop.f32.mrf.mxu2  ;;  %v1945_v29 = vrot.slane %v6074_v12, 2  ;;  %v1946_v4 = vrot.slane %v6075_v31, 3  ;;  %v2960_v38 = vrot.slane %v2393_v44, 4  ;;  %v6077_v12 = vld [vmem:[#allocation12_spill] sm:$0xff] }
 0x1eb   : > { %v1168_v25 = vadd.f32 %v1126_v9, %v879_v24  ;;  %v880_v20 = vpop.f32.mrf.mxu1  ;;  %v2396_v9 = vor.u32 %v2395_v11, %v2392_v61  ;;  %v2402_v11 = vshll.u32 %v5312_v17, 16 }
 0x1ec   : > { %v5345_v28 = vpop.f32.mrf.mxu3  ;;  %v1947_v15 = vor.u32 %v1946_v4, %v1945_v29  ;;  %v881_v47 = vadd.f32 %v880_v20, %v6077_v12  ;;  %v2961_v31 = vor.u32 %v2960_v38, %v2959_v59 }
 0x1ed   : > { %v1662_v52 = vadd.f32 %v5273_v43, %v1168_v25  ;;  %v2397_v44 = vsel %vm1908_vm7, %v2387_v45, %v2396_v9  ;;  %v6079_v45 = vld [vmem:[#allocation15_spill] sm:$0xff]  ;;  %v2404_v7 = vrot.slane %v2402_v11, 3 }
 0x1ee   : > { %v1948_v21 = vsel %vm1908_vm7, %v1943_v2, %v1947_v15  ;;  %v2962_v4 = vsel %vm2922_vm8, %v2957_v33, %v2961_v31  ;;  %v2399_v2 = vshrl.u32 %v5312_v17, 16 }
 0x1ef   : > { %v1858_v5 = vpop.f32.mrf.mxu0  ;;  %v5350_v24 = vadd.f32 %v1856_v46, %v1662_v52 }
 0x1f1   : > { %6076 = vst [vmem:[#allocation18_spill] sm:$0xff] %v5350_v24 }
 0x1f2   : > { %v1128_v35 = vpop.f32.mrf.mxu2 }
 0x1f3   : > { %v1169_v43 = vadd.f32 %v1128_v35, %v881_v47  ;;  %v883_v25 = vpop.f32.mrf.mxu1  ;;  %v2707_v47 = vsel %vm2686_vm6, %v2704_v58, %v2706_v53  ;;  %v2401_v35 = vrot.slane %v2399_v2, 2 }
 0x1f4   : > { %v5360_v29 = vpop.f32.mrf.mxu3  ;;  %v884_v52 = vadd.f32 %v883_v25, %v6079_v45  ;;  %v5384_v45 = vld [vmem:[%s4350_s30 + $0x70] sm:$0xff] }
 0x1f5   : > { %v1663_v46 = vadd.f32 %v5288_v34, %v1169_v43 }
 0x1f6   : > { %4025 = vmatmul.msk.bf16.gmra.mxu1 %vm422_vm2, %v1948_v21  ;;  %v3363_v21 = vld [vmem:[%s5961_s3 + $0x78] sm:$0xff] }
 0x1f7   : > { %v1861_v20 = vpop.f32.mrf.mxu0  ;;  %4112 = vmatmul.msk.bf16.gmra.mxu2 %vm422_vm2, %v2397_v44  ;;  %v5366_v61 = vadd.f32 %v1858_v5, %v1663_v46  ;;  %v6080_v5 = vld [vmem:[#allocation13_spill] sm:$0xff]  ;;  %3461 = vperm.xlu0 %4252, %v3363_v21   ;;  %v2963_v46 = vrot.slane %v2399_v2, 3  ;;  %v3364_v21 = vld [vmem:[%s5961_s3 + $0x80] sm:$0xff]  ;;  %v2708_v2 = vrot.slane %v5384_v45, 3 }
 0x1f8   : > { %v6081_v59 = vshrl.u32 %v6080_v5, 16  ;;  %v6082_v12 = vshll.u32 %v6080_v5, 16  ;;  %3466 = vperm.xlu1 %4253, %v3364_v21  }
 0x1f9   : > { %6078 = vst [vmem:[#allocation4_spill] sm:$0xff] %v5366_v61  ;;  %4133 = vmatmul.msk.bf16.gmra.mxu3 %vm422_vm2, %v2707_v47 }
 0x1fa   : > { %4150 = vmatmul.msk.bf16.gmra.mxu0 %vm422_vm2, %v2962_v4  ;;  %v1131_v34 = vpop.f32.mrf.mxu2  ;;  %v1949_v38 = vrot.slane %v6081_v59, 2  ;;  %v1950_v17 = vrot.slane %v6082_v12, 3  ;;  %v2964_v4 = vrot.slane %v2402_v11, 4  ;;  %v6083_v59 = vld [vmem:[#allocation17_spill] sm:$0xff] }
 0x1fb   : > { %v1170_v33 = vadd.f32 %v1131_v34, %v884_v52  ;;  %v885_v58 = vpop.f32.mrf.mxu1  ;;  %v2405_v34 = vor.u32 %v2404_v7, %v2401_v35  ;;  %v2411_v7 = vshll.u32 %v5348_v30, 16 }
 0x1fc   : > { %v5381_v25 = vpop.f32.mrf.mxu3  ;;  %v1951_v47 = vor.u32 %v1950_v17, %v1949_v38  ;;  %v886_v61 = vadd.f32 %v885_v58, %v6083_v59  ;;  %v2965_v12 = vor.u32 %v2964_v4, %v2963_v46 }
 0x1fd   : > { %v1664_v43 = vadd.f32 %v5309_v57, %v1170_v33  ;;  %v2406_v11 = vsel %vm1908_vm7, %v2396_v9, %v2405_v34  ;;  %v2413_v4 = vrot.slane %v2411_v7, 3 }
 0x1fe   : > { %v1952_v24 = vsel %vm1908_vm7, %v1947_v15, %v1951_v47  ;;  %v2966_v17 = vsel %vm2922_vm8, %v2961_v31, %v2965_v12  ;;  %v2408_v15 = vshrl.u32 %v5348_v30, 16  ;;  %v6085_v31 = vshll.u32 %v4724_v32, 16 }
 0x1ff   : > { %v1863_v44 = vpop.f32.mrf.mxu0  ;;  %v5386_v52 = vadd.f32 %v1861_v20, %v1664_v43  ;;  %v6084_v43 = vshrl.u32 %v4724_v32, 16 }
 0x200   : > { %v1954_v46 = vrot.slane %v6085_v31, 3 }
 0x202   : > { %v1133_v5 = vpop.f32.mrf.mxu2 }
 0x203   : > { %v1171_v57 = vadd.f32 %v1133_v5, %v886_v61  ;;  %v2060_v33 = vpop.f32.mrf.mxu1  ;;  %v2709_v61 = vsel %vm2686_vm6, %v2706_v53, %v2708_v2  ;;  %v3362_v53 = vld [vmem:[%s5961_s3 + $0x70] sm:$0xff]  ;;  %v5420_v5 = vld [vmem:[%s5960_s2] ss:$0 sm:$0xff] }
 0x204   : > { %v5396_v38 = vpop.f32.mrf.mxu3  ;;  %v2150_v9 = vadd.f32 %v2060_v33, %v4803_v26  ;;  %3456 = vperm.xlu2 %4254, %v3362_v53   ;;  %v2410_v26 = vrot.slane %v2408_v15, 2  ;;  %v2967_v33 = vrot.slane %v2408_v15, 3  ;;  %v3366_v15 = vld [vmem:[%s5961_s3 + $0x90] sm:$0xff] }
 0x205   : > { %v1665_v20 = vadd.f32 %v5324_v27, %v1171_v57  ;;  %3476 = vperm.xlu0 %4252, %v3366_v15  }
 0x206   : > { %4026 = vmatmul.msk.bf16.gmra.mxu1 %vm422_vm2, %v1952_v24  ;;  %v1953_v24 = vrot.slane %v6084_v43, 2 }
 0x207   : > { %v3074_v58 = vpop.f32.mrf.mxu0  ;;  %4113 = vmatmul.msk.bf16.gmra.mxu2 %vm422_vm2, %v2406_v11  ;;  %v5402_v35 = vadd.f32 %v1863_v44, %v1665_v20  ;;  %v2968_v11 = vrot.slane %v2411_v7, 4 }
 0x208   : > { %v5424_v57 = vor.u32 %v1954_v46, %v1953_v24 }
 0x209   : > { %4134 = vmatmul.msk.bf16.gmra.mxu3 %vm422_vm2, %v2709_v61  ;;  %v5429_v61 = vor.u32 %v2413_v4, %v2410_v26  ;;  %v5435_v53 = vor.u32 %v2968_v11, %v2967_v33  ;;  %v2417_v11 = vshrl.u32 %v5384_v45, 16 }
 0x20a   : > { %4151 = vmatmul.msk.bf16.gmra.mxu0 %vm422_vm2, %v2966_v17  ;;  %v2554_v27 = vpop.f32.mrf.mxu2  ;;  %v5427_v17 = vld [vmem:[%s4350_s30 + $0x78] sm:$0xff]  ;;  %v1956_v31 = vsel %vm1908_vm7, %v1951_v47, %v5424_v57 }
 0x20b   : > { %v2644_v44 = vadd.f32 %v2554_v27, %v2150_v9  ;;  %v2062_v30 = vpop.f32.mrf.mxu1  ;;  %v3387_v9 = vpop.permute.xlu0 %3386  ;;  %v2415_v46 = vsel %vm1908_vm7, %v2405_v34, %v5429_v61 }
 0x20c   : > { %v5422_v32 = vpop.f32.mrf.mxu3 }
 0x20d   : > { %v2880_v59 = vadd.f32 %v5345_v28, %v2644_v44  ;;  %v2151_v28 = vadd.f32 %v2062_v30, %v4816_v55  ;;  %v2710_v55 = vrot.slane %v5427_v17, 3 }
 0x20f   : > { %v3076_v21 = vpop.f32.mrf.mxu0  ;;  %v3164_v20 = vadd.f32 %v3074_v58, %v2880_v59  ;;  %v2970_v59 = vsel %vm2922_vm8, %v2965_v12, %v5435_v53 }
 0x211   : > { %v3204_v27 = vadd.f32 %v5420_v5, %v3164_v20  ;;  %v2420_v20 = vshll.u32 %v5384_v45, 16  ;;  %v3367_v45 = vld [vmem:[%s5961_s3 + $0x98] sm:$0xff] }
 0x212   : > { %v2556_v43 = vpop.f32.mrf.mxu2  ;;  %3481 = vperm.xlu1 %4253, %v3367_v45   ;;  %v3397_v45 = vpop.permute.xlu1 %3396 }
 0x213   : > { %v2645_v58 = vadd.f32 %v2556_v43, %v2151_v28  ;;  %v2065_v7 = vpop.f32.mrf.mxu1  ;;  %vm3240_vm9 = vcmp.ge.f32.partialorder %v3204_v27, 0.0  ;;  %v3276_v24 = vmul.f32 0.01, %v3204_v27  ;;  %v6087_v43 = vshll.u32 %v4758_v48, 16  ;;  %v3392_v15 = vpop.permute.xlu0 %3391 }
 0x214   : > { %v5445_v30 = vpop.f32.mrf.mxu3  ;;  %v2152_v12 = vadd.f32 %v2065_v7, %v4835_v60  ;;  %v2419_v7 = vrot.slane %v2417_v11, 2 }
 0x215   : > { %v2881_v44 = vadd.f32 %v5360_v29, %v2645_v58  ;;  %v3312_v47 = vsel %vm3240_vm9, %v3204_v27, %v3276_v24  ;;  %v2711_v29 = vsel %vm2686_vm6, %v2708_v2, %v2710_v55  ;;  %v1958_v2 = vrot.slane %v6087_v43, 3 }
 0x216   : > { %v3564_v26 = vmul.f32 %v3387_v9, %v3312_v47  ;;  %4027 = vmatmul.msk.bf16.gmra.mxu1 %vm422_vm2, %v1956_v31  ;;  %v6086_v9 = vshrl.u32 %v4758_v48, 16  ;;  %v2422_v24 = vrot.slane %v2420_v20, 3 }
 0x217   : > { %v3079_v4 = vpop.f32.mrf.mxu0  ;;  %v3165_v33 = vadd.f32 %v3076_v21, %v2881_v44  ;;  %4114 = vmatmul.msk.bf16.gmra.mxu2 %vm422_vm2, %v2415_v46 }
 0x218   : > { %v3600_v34 = vpack.c.bf16 %v3564_v26, %v3564_v26  ;;  %v1957_v27 = vrot.slane %v6086_v9, 2  ;;  %v5482_v9 = vor.u32 %v2422_v24, %v2419_v7 }
 0x219   : > { %v3205_v21 = vadd.f32 %v5420_v5, %v3165_v33  ;;  %4135 = vmatmul.msk.bf16.gmra.mxu3 %vm422_vm2, %v2711_v29  ;;  %v2971_v33 = vrot.slane %v2417_v11, 3  ;;  %v2972_v29 = vrot.slane %v2420_v20, 4  ;;  %v3369_v20 = vld [vmem:[%s5961_s3 + $0xa8] sm:$0xff] }
 0x21a   : > { %4152 = vmatmul.msk.bf16.gmra.mxu0 %vm422_vm2, %v2970_v59  ;;  %3637 = vst.msk [vmem:[%s5453_s13] sm:$0xf] %vm3636_vm10, %v3600_v34  ;;  %v2559_v28 = vpop.f32.mrf.mxu2  ;;  %v5477_v59 = vor.u32 %v1958_v2, %v1957_v27  ;;  %3491 = vperm.xlu0 %4252, %v3369_v20  }
 0x21b   : > { %v2646_v60 = vadd.f32 %v2559_v28, %v2152_v12  ;;  %v2067_v31 = vpop.f32.mrf.mxu1  ;;  %vm3241_vm11 = vcmp.ge.f32.partialorder %v3205_v21, 0.0  ;;  %v3277_v58 = vmul.f32 0.01, %v3205_v21  ;;  %v5480_v12 = vld [vmem:[%s4350_s30 + $0x80] sm:$0xff]  ;;  %v5491_v11 = vor.u32 %v2972_v29, %v2971_v33 }
 0x21c   : > { %v5475_v44 = vpop.f32.mrf.mxu3  ;;  %v2153_v43 = vadd.f32 %v2067_v31, %v4848_v54  ;;  %v1960_v27 = vsel %vm1908_vm7, %v5424_v57, %v5477_v59  ;;  %v3370_v54 = vld [vmem:[%s5961_s3 + $0xb0] sm:$0xff]  ;;  %v2712_v57 = vrot.slane %v5480_v12, 3  ;;  %v2426_v29 = vshrl.u32 %v5427_v17, 16 }
 0x21d   : > { %v2882_v46 = vadd.f32 %v5381_v25, %v2646_v60  ;;  %v3313_v48 = vsel %vm3241_vm11, %v3205_v21, %v3277_v58  ;;  %3496 = vperm.xlu1 %4253, %v3370_v54  }
 0x21e   : > { %v3565_v47 = vmul.f32 %v3392_v15, %v3313_v48  ;;  %v2424_v15 = vsel %vm1908_vm7, %v5429_v61, %v5482_v9  ;;  %v2428_v20 = vrot.slane %v2426_v29, 2 }
 0x21f   : > { %v3081_v26 = vpop.f32.mrf.mxu0  ;;  %v3166_v34 = vadd.f32 %v3079_v4, %v2882_v46  ;;  %v3365_v4 = vld [vmem:[%s5961_s3 + $0x88] sm:$0xff] }
 0x220   : > { %v3601_v28 = vpack.c.bf16 %v3565_v47, %v3565_v47  ;;  %3471 = vperm.xlu2 %4254, %v3365_v4   ;;  %v2974_v47 = vsel %vm2922_vm8, %v5435_v53, %v5491_v11  ;;  %v3402_v4 = vpop.permute.xlu1 %3401 }
 0x221   : > { %v3206_v25 = vadd.f32 %v5420_v5, %v3166_v34  ;;  %v2429_v34 = vshll.u32 %v5427_v17, 16  ;;  %v3373_v17 = vld [vmem:[%s5961_s3 + $0xc8] sm:$0xff] }
 0x222   : > { %3638 = vst.msk [vmem:[%s5453_s13 + $0x4] sm:$0xf] %vm3636_vm10, %v3601_v28  ;;  %v2561_v21 = vpop.f32.mrf.mxu2 }
 0x223   : > { %v2647_v2 = vadd.f32 %v2561_v21, %v2153_v43  ;;  %v2070_v60 = vpop.f32.mrf.mxu1  ;;  %vm3242_vm12 = vcmp.ge.f32.partialorder %v3206_v25, 0.0  ;;  %v3278_v31 = vmul.f32 0.01, %v3206_v25  ;;  %v6088_v43 = vshrl.u32 %v4790_v42, 16 }
 0x224   : > { %v5507_v24 = vpop.f32.mrf.mxu3  ;;  %v2154_v28 = vadd.f32 %v2070_v60, %v4867_v13  ;;  %v3372_v13 = vld [vmem:[%s5961_s3 + $0xc0] sm:$0xff] }
 0x225   : > { %v2883_v58 = vadd.f32 %v5396_v38, %v2647_v2  ;;  %v3314_v7 = vsel %vm3242_vm12, %v3206_v25, %v3278_v31  ;;  %v2713_v38 = vsel %vm2686_vm6, %v2710_v55, %v2712_v57  ;;  %v6089_v25 = vshll.u32 %v4790_v42, 16  ;;  %3511 = vperm.xlu1 %4253, %v3373_v17   ;;  %3506 = vperm.xlu0 %4252, %v3372_v13  }
 0x226   : > { %v3566_v46 = vmul.f32 %v3397_v45, %v3314_v7  ;;  %4028 = vmatmul.msk.bf16.gmra.mxu1 %vm422_vm2, %v1960_v27  ;;  %v1961_v45 = vrot.slane %v6088_v43, 2  ;;  %v2431_v42 = vrot.slane %v2429_v34, 3  ;;  %v3407_v43 = vpop.permute.xlu2 %3406 }
 0x227   : > { %v3084_v48 = vpop.f32.mrf.mxu0  ;;  %v3167_v33 = vadd.f32 %v3081_v26, %v2883_v58  ;;  %4115 = vmatmul.msk.bf16.gmra.mxu2 %vm422_vm2, %v2424_v15  ;;  %v1962_v55 = vrot.slane %v6089_v25, 3 }
 0x228   : > { %v3602_v61 = vpack.c.bf16 %v3566_v46, %v3566_v46  ;;  %v2975_v46 = vrot.slane %v2426_v29, 3 }
 0x229   : > { %v3207_v53 = vadd.f32 %v5420_v5, %v3167_v33  ;;  %4136 = vmatmul.msk.bf16.gmra.mxu3 %vm422_vm2, %v2713_v38  ;;  %v5540_v7 = vor.u32 %v1962_v55, %v1961_v45  ;;  %v5543_v38 = vld [vmem:[%s4350_s30 + $0x88] sm:$0xff] }
 0x22a   : > { %4153 = vmatmul.msk.bf16.gmra.mxu0 %vm422_vm2, %v2974_v47  ;;  %3639 = vst.msk [vmem:[%s5453_s13 + $0x8] sm:$0xf] %vm3636_vm10, %v3602_v61  ;;  %v2564_v26 = vpop.f32.mrf.mxu2  ;;  %v2976_v47 = vrot.slane %v2429_v34, 4  ;;  %v3375_v34 = vld [vmem:[%s5961_s3 + $0xd8] sm:$0xff] }
 0x22b   : > { %v2648_v21 = vadd.f32 %v2564_v26, %v2154_v28  ;;  %v2072_v27 = vpop.f32.mrf.mxu1  ;;  %vm3243_vm13 = vcmp.ge.f32.partialorder %v3207_v53, 0.0  ;;  %v3279_v54 = vmul.f32 0.01, %v3207_v53  ;;  %v5545_v28 = vor.u32 %v2431_v42, %v2428_v20 }
 0x22c   : > { %v5538_v31 = vpop.f32.mrf.mxu3  ;;  %v2155_v26 = vadd.f32 %v2072_v27, %v4880_v22  ;;  %v1964_v45 = vsel %vm1908_vm7, %v5477_v59, %v5540_v7  ;;  %v5554_v29 = vor.u32 %v2976_v47, %v2975_v46  ;;  %v3376_v22 = vld [vmem:[%s5961_s3 + $0xe0] sm:$0xff]  ;;  %v2714_v59 = vrot.slane %v5543_v38, 3 }
 0x22d   : > { %v2884_v2 = vadd.f32 %v5422_v32, %v2648_v21  ;;  %v3315_v60 = vsel %vm3243_vm13, %v3207_v53, %v3279_v54  ;;  %3526 = vperm.xlu1 %4253, %v3376_v22   ;;  %v2433_v13 = vsel %vm1908_vm7, %v5482_v9, %v5545_v28  ;;  %3521 = vperm.xlu0 %4252, %v3375_v34  }
 0x22e   : > { %v3567_v15 = vmul.f32 %v3402_v4, %v3315_v60  ;;  %v2978_v42 = vsel %vm2922_vm8, %v5491_v11, %v5554_v29  ;;  %v2435_v60 = vshrl.u32 %v5480_v12, 16 }
 0x22f   : > { %v3086_v58 = vpop.f32.mrf.mxu0  ;;  %v3168_v33 = vadd.f32 %v3084_v48, %v2884_v2  ;;  %v3368_v48 = vld [vmem:[%s5961_s3 + $0xa0] sm:$0xff] }
 0x230   : > { %v3603_v61 = vpack.c.bf16 %v3567_v15, %v3567_v15  ;;  %3486 = vperm.xlu2 %4254, %v3368_v48   ;;  %v2438_v15 = vshll.u32 %v5480_v12, 16  ;;  %v3371_v12 = vld [vmem:[%s5961_s3 + $0xb8] sm:$0xff] }
 0x231   : > { %v3208_v32 = vadd.f32 %v5420_v5, %v3168_v33 }
 0x232   : > { %3640 = vst.msk [vmem:[%s5453_s13 + $0xc] sm:$0xf] %vm3636_vm10, %v3603_v61  ;;  %v2566_v53 = vpop.f32.mrf.mxu2  ;;  %v6091_v61 = vshll.u32 %v4821_v51, 16  ;;  %v2440_v48 = vrot.slane %v2438_v15, 3 }
 0x233   : > { %v2649_v25 = vadd.f32 %v2566_v53, %v2155_v26  ;;  %v2075_v55 = vpop.f32.mrf.mxu1  ;;  %vm3244_vm14 = vcmp.ge.f32.partialorder %v3208_v32, 0.0  ;;  %v3280_v17 = vmul.f32 0.01, %v3208_v32  ;;  %v3378_v26 = vld [vmem:[%s5961_s3 + $0xf0] sm:$0xff]  ;;  %v3412_v53 = vpop.permute.xlu2 %3411 }
 0x234   : > { %v5570_v4 = vpop.f32.mrf.mxu3  ;;  %v2156_v46 = vadd.f32 %v2075_v55, %v4899_v10  ;;  %v3379_v10 = vld [vmem:[%s5961_s3 + $0xf8] sm:$0xff] }
 0x235   : > { %v2885_v21 = vadd.f32 %v5445_v30, %v2649_v25  ;;  %v3316_v27 = vsel %vm3244_vm14, %v3208_v32, %v3280_v17  ;;  %v2715_v30 = vsel %vm2686_vm6, %v2712_v57, %v2714_v59  ;;  %v1966_v57 = vrot.slane %v6091_v61, 3  ;;  %3541 = vperm.xlu1 %4253, %v3379_v10   ;;  %3536 = vperm.xlu0 %4252, %v3378_v26  }
 0x236   : > { %v3568_v54 = vmul.f32 %v3407_v43, %v3316_v27  ;;  %4029 = vmatmul.msk.bf16.gmra.mxu1 %vm422_vm2, %v1964_v45  ;;  %v2437_v45 = vrot.slane %v2435_v60, 2  ;;  %v2980_v27 = vrot.slane %v2438_v15, 4 }
 0x237   : > { %v3089_v20 = vpop.f32.mrf.mxu0  ;;  %v3169_v2 = vadd.f32 %v3086_v58, %v2885_v21  ;;  %4116 = vmatmul.msk.bf16.gmra.mxu2 %vm422_vm2, %v2433_v13  ;;  %v6090_v58 = vshrl.u32 %v4821_v51, 16  ;;  %v2979_v21 = vrot.slane %v2435_v60, 3  ;;  %v3382_v60 = vld [vmem:[%s5961_s3 + $0x110] sm:$0xff] }
 0x238   : > { %v3604_v9 = vpack.c.bf16 %v3568_v54, %v3568_v54  ;;  %3501 = vperm.xlu2 %4254, %v3371_v12  }
 0x239   : > { %v3209_v11 = vadd.f32 %v5420_v5, %v3169_v2  ;;  %v1965_v47 = vrot.slane %v6090_v58, 2  ;;  %4137 = vmatmul.msk.bf16.gmra.mxu3 %vm422_vm2, %v2715_v30  ;;  %v5611_v30 = vor.u32 %v2440_v48, %v2437_v45  ;;  %v5620_v58 = vor.u32 %v2980_v27, %v2979_v21 }
 0x23a   : > { %4154 = vmatmul.msk.bf16.gmra.mxu0 %vm422_vm2, %v2978_v42  ;;  %3641 = vst.msk [vmem:[%s5453_s13 + $0x10] sm:$0xf] %vm3636_vm10, %v3604_v9  ;;  %v2569_v33 = vpop.f32.mrf.mxu2  ;;  %v5609_v42 = vld [vmem:[%s4350_s30 + $0x90] sm:$0xff]  ;;  %v2444_v45 = vshrl.u32 %v5543_v38, 16  ;;  %v2447_v48 = vshll.u32 %v5543_v38, 16  ;;  %v6093_v21 = vshll.u32 %v4853_v0, 16 }
 0x23b   : > { %v2650_v43 = vadd.f32 %v2569_v33, %v2156_v46  ;;  %v2077_v32 = vpop.f32.mrf.mxu1  ;;  %vm3245_vm15 = vcmp.ge.f32.partialorder %v3209_v11, 0.0  ;;  %v3281_v51 = vmul.f32 0.01, %v3209_v11  ;;  %v5606_v13 = vor.u32 %v1966_v57, %v1965_v47  ;;  %v3417_v33 = vpop.permute.xlu0 %3416  ;;  %v3377_v38 = vld [vmem:[%s5961_s3 + $0xe8] sm:$0xff] }
 0x23c   : > { %v5604_v25 = vpop.f32.mrf.mxu3  ;;  %v2157_v9 = vadd.f32 %v2077_v32, %v4912_v56  ;;  %v3381_v56 = vld [vmem:[%s5961_s3 + $0x108] sm:$0xff]  ;;  %v2442_v57 = vsel %vm1908_vm7, %v5545_v28, %v5611_v30 }
 0x23d   : > { %v2886_v22 = vadd.f32 %v5475_v44, %v2650_v43  ;;  %v3317_v34 = vsel %vm3245_vm15, %v3209_v11, %v3281_v51  ;;  %v1968_v11 = vsel %vm1908_vm7, %v5540_v7, %v5606_v13  ;;  %v2716_v7 = vrot.slane %v5609_v42, 3  ;;  %3556 = vperm.xlu1 %4253, %v3382_v60   ;;  %3551 = vperm.xlu0 %4252, %v3381_v56  }
 0x23e   : > { %v3569_v55 = vmul.f32 %v3412_v53, %v3317_v34  ;;  %v2982_v53 = vsel %vm2922_vm8, %v5554_v29, %v5620_v58 }
 0x23f   : > { %v3091_v17 = vpop.f32.mrf.mxu0  ;;  %v3170_v54 = vadd.f32 %v3089_v20, %v2886_v22  ;;  %v3374_v20 = vld [vmem:[%s5961_s3 + $0xd0] sm:$0xff] }
 0x240   : > { %v3605_v2 = vpack.c.bf16 %v3569_v55, %v3569_v55  ;;  %3516 = vperm.xlu2 %4254, %v3374_v20   ;;  %v6092_v55 = vshrl.u32 %v4853_v0, 16 }
 0x241   : > { %v3210_v46 = vadd.f32 %v5420_v5, %v3170_v54  ;;  %v3422_v54 = vpop.permute.xlu1 %3421 }
 0x242   : > { %3642 = vst.msk [vmem:[%s5453_s13 + $0x14] sm:$0xf] %vm3636_vm10, %v3605_v2  ;;  %v2571_v44 = vpop.f32.mrf.mxu2 }
 0x243   : > { %v2651_v15 = vadd.f32 %v2571_v44, %v2157_v9  ;;  %v2080_v47 = vpop.f32.mrf.mxu1  ;;  %vm3246_vm0 = vcmp.ge.f32.partialorder %v3210_v46, 0.0  ;;  %v3282_v61 = vmul.f32 0.01, %v3210_v46  ;;  %v2446_v9 = vrot.slane %v2444_v45, 2 }
 0x244   : > { %v5636_v26 = vpop.f32.mrf.mxu3  ;;  %v2158_v22 = vadd.f32 %v2080_v47, %v4931_v23  ;;  %v2984_v47 = vrot.slane %v2447_v48, 4 }
 0x245   : > { %v2887_v12 = vadd.f32 %v5507_v24, %v2651_v15  ;;  %v3318_v10 = vsel %vm3246_vm0, %v3210_v46, %v3282_v61  ;;  %v2717_v24 = vsel %vm2686_vm6, %v2714_v59, %v2716_v7  ;;  %v1970_v59 = vrot.slane %v6093_v21, 3  ;;  %v5669_v61 = vld [vmem:[%s4350_s30 + $0x98] sm:$0xff] }
 0x246   : > { %v3570_v43 = vmul.f32 %v3417_v33, %v3318_v10  ;;  %4030 = vmatmul.msk.bf16.gmra.mxu1 %vm422_vm2, %v1968_v11  ;;  %v2449_v46 = vrot.slane %v2447_v48, 3  ;;  %v2983_v15 = vrot.slane %v2444_v45, 3  ;;  %v6094_v10 = vld [vmem:[#allocation23_spill] sm:$0xff]  ;;  %v3427_v48 = vpop.permute.xlu2 %3426 }
 0x247   : > { %v3094_v32 = vpop.f32.mrf.mxu0  ;;  %v3171_v51 = vadd.f32 %v3091_v17, %v2887_v12  ;;  %4117 = vmatmul.msk.bf16.gmra.mxu2 %vm422_vm2, %v2442_v57  ;;  %v1969_v17 = vrot.slane %v6092_v55, 2 }
 0x248   : > { %v3606_v28 = vpack.c.bf16 %v3570_v43, %v3570_v43  ;;  %3531 = vperm.xlu2 %4254, %v3377_v38   ;;  %v5671_v12 = vor.u32 %v2449_v46, %v2446_v9  ;;  %v6095_v46 = vld [vmem:[#allocation22_spill] sm:$0xff] }
 0x249   : > { %v3211_v29 = vadd.f32 %v5420_v5, %v3171_v51  ;;  %4138 = vmatmul.msk.bf16.gmra.mxu3 %vm422_vm2, %v2717_v24  ;;  %v5666_v56 = vor.u32 %v1970_v59, %v1969_v17  ;;  %v5680_v24 = vor.u32 %v2984_v47, %v2983_v15  ;;  %v3432_v15 = vpop.permute.xlu0 %3431 }
 0x24a   : > { %4155 = vmatmul.msk.bf16.gmra.mxu0 %vm422_vm2, %v2982_v53  ;;  %3643 = vst.msk [vmem:[%s5453_s13 + $0x18] sm:$0xf] %vm3636_vm10, %v3606_v28  ;;  %v2574_v34 = vpop.f32.mrf.mxu2 }
 0x24b   : > { %v2652_v23 = vadd.f32 %v2574_v34, %v2158_v22  ;;  %v2082_v27 = vpop.f32.mrf.mxu1  ;;  %vm3247_vm1 = vcmp.ge.f32.partialorder %v3211_v29, 0.0  ;;  %v3283_v2 = vmul.f32 0.01, %v3211_v29  ;;  %v1972_v51 = vsel %vm1908_vm7, %v5606_v13, %v5666_v56 }
 0x24c   : > { %v5664_v11 = vpop.f32.mrf.mxu3  ;;  %v2159_v43 = vadd.f32 %v2082_v27, %v6094_v10  ;;  %v2451_v34 = vsel %vm1908_vm7, %v5611_v30, %v5671_v12  ;;  %v2986_v38 = vsel %vm2922_vm8, %v5620_v58, %v5680_v24  ;;  %v2453_v27 = vshrl.u32 %v5609_v42, 16 }
 0x24d   : > { %v2888_v44 = vadd.f32 %v5538_v31, %v2652_v23  ;;  %v3319_v0 = vsel %vm3247_vm1, %v3211_v29, %v3283_v2  ;;  %v2718_v29 = vrot.slane %v5669_v61, 3 }
 0x24e   : > { %v3571_v20 = vmul.f32 %v3422_v54, %v3319_v0  ;;  %v2456_v54 = vshll.u32 %v5609_v42, 16  ;;  %v3383_v42 = vld [vmem:[%s5961_s3 + $0x118] sm:$0xff] }
 0x24f   : > { %v3096_v60 = vpop.f32.mrf.mxu0  ;;  %v3172_v33 = vadd.f32 %v3094_v32, %v2888_v44  ;;  %v3380_v32 = vld [vmem:[%s5961_s3 + $0x100] sm:$0xff]  ;;  %v6096_v44 = vshrl.u32 %v6095_v46, 16 }
 0x250   : > { %v3607_v57 = vpack.c.bf16 %v3571_v20, %v3571_v20  ;;  %3546 = vperm.xlu2 %4254, %v3380_v32   ;;  %v6097_v20 = vshll.u32 %v6095_v46, 16 }
 0x251   : > { %v3212_v53 = vadd.f32 %v5420_v5, %v3172_v33  ;;  %v1973_v0 = vrot.slane %v6096_v44, 2  ;;  %v2455_v33 = vrot.slane %v2453_v27, 2 }
 0x252   : > { %3644 = vst.msk [vmem:[%s5453_s13 + $0x1c] sm:$0xf] %vm3636_vm10, %v3607_v57  ;;  %v2576_v31 = vpop.f32.mrf.mxu2  ;;  %v2458_v57 = vrot.slane %v2456_v54, 3 }
 0x253   : > { %v2653_v28 = vadd.f32 %v2576_v31, %v2159_v43  ;;  %v2085_v45 = vpop.f32.mrf.mxu1  ;;  %vm3248_vm3 = vcmp.ge.f32.partialorder %v3212_v53, 0.0  ;;  %v3284_v22 = vmul.f32 0.01, %v3212_v53 }
 0x254   : > { %v5690_v17 = vpop.f32.mrf.mxu3  ;;  %v2160_v2 = vadd.f32 %v2085_v45, %v4962_v37  ;;  %v2988_v45 = vrot.slane %v2456_v54, 4 }
 0x255   : > { %v2889_v13 = vadd.f32 %v5570_v4, %v2653_v28  ;;  %v3320_v55 = vsel %vm3248_vm3, %v3212_v53, %v3284_v22  ;;  %v2719_v4 = vsel %vm2686_vm6, %v2716_v7, %v2718_v29  ;;  %v1974_v7 = vrot.slane %v6097_v20, 3  ;;  %v5723_v22 = vld [vmem:[%s4350_s30 + $0xa0] sm:$0xff] }
 0x256   : > { %v3572_v21 = vmul.f32 %v3427_v48, %v3320_v55  ;;  %4031 = vmatmul.msk.bf16.gmra.mxu1 %vm422_vm2, %v1972_v51  ;;  %v2987_v28 = vrot.slane %v2453_v27, 3  ;;  %v6098_v55 = vld [vmem:[#allocation24_spill] sm:$0xff]  ;;  %v3437_v27 = vpop.permute.xlu1 %3436 }
 0x257   : > { %v3099_v59 = vpop.f32.mrf.mxu0  ;;  %v3173_v23 = vadd.f32 %v3096_v60, %v2889_v13  ;;  %4118 = vmatmul.msk.bf16.gmra.mxu2 %vm422_vm2, %v2451_v34  ;;  %v5720_v32 = vor.u32 %v1974_v7, %v1973_v0  ;;  %v5725_v13 = vor.u32 %v2458_v57, %v2455_v33  ;;  %v6099_v33 = vshrl.u32 %v4917_v8, 16 }
 0x258   : > { %v3608_v30 = vpack.c.bf16 %v3572_v21, %v3572_v21  ;;  %3561 = vperm.xlu2 %4254, %v3383_v42   ;;  %v2462_v42 = vshrl.u32 %v5669_v61, 16 }
 0x259   : > { %v3213_v58 = vadd.f32 %v5420_v5, %v3173_v23  ;;  %4139 = vmatmul.msk.bf16.gmra.mxu3 %vm422_vm2, %v2719_v4  ;;  %v1976_v23 = vsel %vm1908_vm7, %v5666_v56, %v5720_v32  ;;  %v5734_v4 = vor.u32 %v2988_v45, %v2987_v28  ;;  %v1977_v57 = vrot.slane %v6099_v33, 2 }
 0x25a   : > { %4156 = vmatmul.msk.bf16.gmra.mxu0 %vm422_vm2, %v2986_v38  ;;  %3645 = vst.msk [vmem:[%s5453_s13 + $0x20] sm:$0xf] %vm3636_vm10, %v3608_v30  ;;  %v2579_v9 = vpop.f32.mrf.mxu2  ;;  %v2464_v28 = vrot.slane %v2462_v42, 2 }
 0x25b   : > { %v2654_v37 = vadd.f32 %v2579_v9, %v2160_v2  ;;  %v2087_v60 = vpop.f32.mrf.mxu1  ;;  %vm3249_vm4 = vcmp.ge.f32.partialorder %v3213_v58, 0.0  ;;  %v3285_v47 = vmul.f32 0.01, %v3213_v58  ;;  %v2720_v2 = vrot.slane %v5723_v22, 3 }
 0x25c   : > { %v5718_v53 = vpop.f32.mrf.mxu3  ;;  %v2161_v21 = vadd.f32 %v2087_v60, %v6098_v55  ;;  %v2990_v20 = vsel %vm2922_vm8, %v5680_v24, %v5734_v4 }
 0x25d   : > { %v2890_v10 = vadd.f32 %v5604_v25, %v2654_v37  ;;  %v3321_v43 = vsel %vm3249_vm4, %v3213_v58, %v3285_v47  ;;  %v2460_v58 = vsel %vm1908_vm7, %v5671_v12, %v5725_v13  ;;  %v2465_v37 = vshll.u32 %v5669_v61, 16 }
 0x25e   : > { %v3573_v31 = vmul.f32 %v3432_v15, %v3321_v43  ;;  %v2222_v15 = vld [vmem:[%s4350_s30 + $0xa8] sm:$0x7] }
 0x25f   : > { %v3101_v51 = vpop.f32.mrf.mxu0  ;;  %v3174_v48 = vadd.f32 %v3099_v59, %v2890_v10  ;;  %v2467_v45 = vrot.slane %v2465_v37, 3 }
 0x260   : > { %v3609_v34 = vpack.c.bf16 %v3573_v31, %v3573_v31  ;;  %v3442_v31 = vpop.permute.xlu2 %3441 }
 0x261   : > { %v3214_v38 = vadd.f32 %v5420_v5, %v3174_v48 }
 0x262   : > { %3646 = vst.msk [vmem:[%s5453_s13 + $0x24] sm:$0xf] %vm3636_vm10, %v3609_v34  ;;  %v2581_v25 = vpop.f32.mrf.mxu2 }
 0x263   : > { %v2655_v30 = vadd.f32 %v2581_v25, %v2161_v21  ;;  %v2090_v59 = vpop.f32.mrf.mxu1  ;;  %vm3250_vm5 = vcmp.ge.f32.partialorder %v3214_v38, 0.0  ;;  %v3286_v54 = vmul.f32 0.01, %v3214_v38  ;;  %v2991_v25 = vrot.slane %v2462_v42, 3 }
 0x264   : > { %v5741_v44 = vpop.f32.mrf.mxu3  ;;  %v2162_v60 = vadd.f32 %v2090_v59, %v4989_v39 }
 0x265   : > { %v2891_v9 = vadd.f32 %v5636_v26, %v2655_v30  ;;  %v3322_v46 = vsel %vm3250_vm5, %v3214_v38, %v3286_v54  ;;  %v2721_v26 = vsel %vm2686_vm6, %v2718_v29, %v2720_v2  ;;  %v6100_v29 = vshll.u32 %v4917_v8, 16 }
 0x266   : > { %v3574_v56 = vmul.f32 %v3437_v27, %v3322_v46  ;;  %4032 = vmatmul.msk.bf16.gmra.mxu1 %vm422_vm2, %v1976_v23  ;;  %v2992_v23 = vrot.slane %v2465_v37, 4  ;;  %v5773_v54 = vor.u32 %v2467_v45, %v2464_v28  ;;  %v3452_v28 = vpop.permute.xlu1 %3451 }
 0x267   : > { %v3104_v0 = vpop.f32.mrf.mxu0  ;;  %v3175_v7 = vadd.f32 %v3101_v51, %v2891_v9  ;;  %4119 = vmatmul.msk.bf16.gmra.mxu2 %vm422_vm2, %v2460_v58  ;;  %v1978_v10 = vrot.slane %v6100_v29, 3  ;;  %v2298_v51 = vunpack.c.l.b16 %v2222_v15  ;;  %v6101_v58 = vld [vmem:[#allocation25_spill] sm:$0xff]  ;;  %v2471_v29 = vshrl.u32 %v5723_v22, 16 }
 0x268   : > { %v3610_v12 = vpack.c.bf16 %v3574_v56, %v3574_v56  ;;  %v2469_v37 = vsel %vm1908_vm7, %v5725_v13, %v5773_v54 }
 0x269   : > { %v3215_v24 = vadd.f32 %v5420_v5, %v3175_v7  ;;  %4140 = vmatmul.msk.bf16.gmra.mxu3 %vm422_vm2, %v2721_v26  ;;  %v5769_v8 = vor.u32 %v1978_v10, %v1977_v57  ;;  %v5771_v59 = vpack.c.b16 %v2298_v51, %v2298_v51  ;;  %v3447_v26 = vpop.permute.xlu0 %3446  ;;  %v2474_v10 = vshll.u32 %v5723_v22, 16 }
 0x26a   : > { %4157 = vmatmul.msk.bf16.gmra.mxu0 %vm422_vm2, %v2990_v20  ;;  %3647 = vst.msk [vmem:[%s5453_s13 + $0x28] sm:$0xf] %vm3636_vm10, %v3610_v12  ;;  %v2584_v47 = vpop.f32.mrf.mxu2  ;;  %v5782_v20 = vor.u32 %v2992_v23, %v2991_v25 }
 0x26b   : > { %v2656_v43 = vadd.f32 %v2584_v47, %v2162_v60  ;;  %v2092_v61 = vpop.f32.mrf.mxu1  ;;  %vm3251_vm9 = vcmp.ge.f32.partialorder %v3215_v24, 0.0  ;;  %v3287_v39 = vmul.f32 0.01, %v3215_v24  ;;  %v1980_v56 = vsel %vm1908_vm7, %v5720_v32, %v5769_v8 }
 0x26c   : > { %v5767_v55 = vpop.f32.mrf.mxu3  ;;  %v2163_v9 = vadd.f32 %v2092_v61, %v6101_v58  ;;  %v2722_v42 = vrot.slane %v5771_v59, 3  ;;  %v2994_v33 = vsel %vm2922_vm8, %v5734_v4, %v5782_v20  ;;  %v2995_v58 = vrot.slane %v2471_v29, 3 }
 0x26d   : > { %v2892_v48 = vadd.f32 %v5664_v11, %v2656_v43  ;;  %v3323_v34 = vsel %vm3251_vm9, %v3215_v24, %v3287_v39 }
 0x26e   : > { %v3575_v21 = vmul.f32 %v3442_v31, %v3323_v34  ;;  %v2723_v13 = vsel %vm2686_vm6, %v2720_v2, %v2722_v42  ;;  %v6102_v31 = vshrl.u32 %v4948_v14, 16  ;;  %v2473_v34 = vrot.slane %v2471_v29, 2 }
 0x26f   : > { %v3106_v38 = vpop.f32.mrf.mxu0  ;;  %v3176_v30 = vadd.f32 %v3104_v0, %v2892_v48  ;;  %v1902_v48 = vld [vmem:[%s4350_s30 + $0xa0] sm:$0x7] }
 0x270   : > { %v3611_v27 = vpack.c.bf16 %v3575_v21, %v3575_v21  ;;  %v1981_v39 = vrot.slane %v6102_v31, 2  ;;  %v2476_v21 = vrot.slane %v2474_v10, 3 }
 0x271   : > { %v3216_v46 = vadd.f32 %v5420_v5, %v3176_v30 }
 0x272   : > { %3648 = vst.msk [vmem:[%s5453_s13 + $0x2c] sm:$0xf] %vm3636_vm10, %v3611_v27  ;;  %v2586_v11 = vpop.f32.mrf.mxu2 }
 0x273   : > { %v2657_v7 = vadd.f32 %v2586_v11, %v2163_v9  ;;  %v2095_v0 = vpop.f32.mrf.mxu1  ;;  %vm3252_vm11 = vcmp.ge.f32.partialorder %v3216_v46, 0.0  ;;  %v3288_v12 = vmul.f32 0.01, %v3216_v46  ;;  %v2996_v9 = vrot.slane %v2474_v10, 4 }
 0x274   : > { %v5789_v15 = vpop.f32.mrf.mxu3  ;;  %v2164_v43 = vadd.f32 %v2095_v0, %v5028_v49  ;;  %v6103_v49 = vshll.u32 %v4948_v14, 16  ;;  %v5818_v0 = vor.u32 %v2476_v21, %v2473_v34  ;;  %v3462_v21 = vpop.permute.xlu0 %3461 }
 0x275   : > { %v2893_v60 = vadd.f32 %v5690_v17, %v2657_v7  ;;  %v3324_v24 = vsel %vm3252_vm11, %v3216_v46, %v3288_v12  ;;  %v1906_v46 = vunpack.c.l.b16 %v1902_v48  ;;  %v2916_v7 = vld [vmem:[%s4350_s30 + $0xa8] sm:$0xf]  ;;  %v5824_v42 = vor.u32 %v2996_v9, %v2995_v58 }
 0x276   : > { %v3576_v32 = vmul.f32 %v3447_v26, %v3324_v24  ;;  %4033 = vmatmul.msk.bf16.gmra.mxu1 %vm422_vm2, %v1980_v56  ;;  %v1982_v45 = vrot.slane %v6103_v49, 3 }
 0x277   : > { %v3109_v47 = vpop.f32.mrf.mxu0  ;;  %v3177_v57 = vadd.f32 %v3106_v38, %v2893_v60  ;;  %4120 = vmatmul.msk.bf16.gmra.mxu2 %vm422_vm2, %v2469_v37  ;;  %v1907_v37 = vpack.c.b16 %v1906_v46, %v1906_v46  ;;  %v2920_v60 = vunpack.c.l.b16 %v2916_v7 }
 0x278   : > { %v3612_v17 = vpack.c.bf16 %v3576_v32, %v3576_v32  ;;  %v5815_v56 = vor.u32 %v1982_v45, %v1981_v39 }
 0x279   : > { %v3217_v61 = vadd.f32 %v5420_v5, %v3177_v57  ;;  %4141 = vmatmul.msk.bf16.gmra.mxu3 %vm422_vm2, %v2723_v13 }
 0x27a   : > { %4158 = vmatmul.msk.bf16.gmra.mxu0 %vm422_vm2, %v2994_v33  ;;  %3649 = vst.msk [vmem:[%s5453_s13 + $0x30] sm:$0xf] %vm3636_vm10, %v3612_v17  ;;  %v2589_v4 = vpop.f32.mrf.mxu2  ;;  %v1984_v57 = vsel %vm1908_vm7, %v5769_v8, %v5815_v56  ;;  %v2921_v8 = vpack.c.b16 %v2920_v60, %v2920_v60 }
 0x27b   : > { %v2658_v2 = vadd.f32 %v2589_v4, %v2164_v43  ;;  %v2097_v51 = vpop.f32.mrf.mxu1  ;;  %vm3253_vm6 = vcmp.ge.f32.partialorder %v3217_v61, 0.0  ;;  %v3289_v22 = vmul.f32 0.01, %v3217_v61  ;;  %v1986_v4 = vshrl.u32 %v1907_v37, 16 }
 0x27c   : > { %v5813_v23 = vpop.f32.mrf.mxu3  ;;  %v2165_v26 = vadd.f32 %v2097_v51, %v5049_v16  ;;  %v2478_v16 = vsel %vm1908_vm7, %v5773_v54, %v5818_v0  ;;  %v1989_v54 = vshll.u32 %v1907_v37, 16  ;;  %v3000_v49 = vshrl.u32 %v2921_v8, 16 }
 0x27d   : > { %v2894_v38 = vadd.f32 %v5718_v53, %v2658_v2  ;;  %v3325_v25 = vsel %vm3253_vm6, %v3217_v61, %v3289_v22  ;;  %v2998_v61 = vsel %vm2922_vm8, %v5782_v20, %v5824_v42  ;;  %v2483_v2 = vshll.u32 %v5771_v59, 16 }
 0x27e   : > { %v3577_v30 = vmul.f32 %v3452_v28, %v3325_v25  ;;  %v1988_v22 = vrot.slane %v1986_v4, 2  ;;  %v3003_v45 = vshll.u32 %v2921_v8, 16  ;;  %v1991_v25 = vrot.slane %v1989_v54, 3 }
 0x27f   : > { %v3111_v27 = vpop.f32.mrf.mxu0  ;;  %v3178_v11 = vadd.f32 %v3109_v47, %v2894_v38  ;;  %v3457_v47 = vpop.permute.xlu2 %3456  ;;  %v3002_v46 = vrot.slane %v3000_v49, 3 }
 0x280   : > { %v3613_v14 = vpack.c.bf16 %v3577_v30, %v3577_v30  ;;  %v2485_v30 = vrot.slane %v2483_v2, 3 }
 0x281   : > { %v3218_v12 = vadd.f32 %v5420_v5, %v3178_v11  ;;  %v3005_v11 = vrot.slane %v3003_v45, 4 }
 0x282   : > { %3650 = vst.msk [vmem:[%s5453_s13 + $0x34] sm:$0xf] %vm3636_vm10, %v3613_v14  ;;  %v2591_v53 = vpop.f32.mrf.mxu2 }
 0x283   : > { %v2659_v24 = vadd.f32 %v2591_v53, %v2165_v26  ;;  %v2100_v32 = vpop.f32.mrf.mxu1  ;;  %vm3254_vm12 = vcmp.ge.f32.partialorder %v3218_v12, 0.0  ;;  %v3290_v33 = vmul.f32 0.01, %v3218_v12  ;;  %v1992_v26 = vor.u32 %v1991_v25, %v1988_v22 }
 0x284   : > { %v5833_v29 = vpop.f32.mrf.mxu3  ;;  %v2166_v51 = vadd.f32 %v2100_v32, %v5062_v41  ;;  %v3006_v32 = vor.u32 %v3005_v11, %v3002_v46 }
 0x285   : > { %v2895_v13 = vadd.f32 %v5741_v44, %v2659_v24  ;;  %v3326_v17 = vsel %vm3254_vm12, %v3218_v12, %v3290_v33  ;;  %v2480_v44 = vshrl.u32 %v5771_v59, 16  ;;  %v3467_v33 = vpop.permute.xlu1 %3466 }
 0x286   : > { %v3578_v10 = vmul.f32 %v3457_v47, %v3326_v17  ;;  %4034 = vmatmul.msk.bf16.gmra.mxu1 %vm422_vm2, %v1984_v57 }
 0x287   : > { %v3114_v43 = vpop.f32.mrf.mxu0  ;;  %v3179_v31 = vadd.f32 %v3111_v27, %v2895_v13  ;;  %4121 = vmatmul.msk.bf16.gmra.mxu2 %vm422_vm2, %v2478_v16  ;;  %v2482_v59 = vrot.slane %v2480_v44, 2  ;;  %v1993_v16 = vsel %vm1908_vm7, %v5815_v56, %v1992_v26  ;;  %v3472_v44 = vpop.permute.xlu2 %3471 }
 0x288   : > { %v3614_v39 = vpack.c.bf16 %v3578_v10, %v3578_v10 }
 0x289   : > { %v3219_v28 = vadd.f32 %v5420_v5, %v3179_v31  ;;  %v2486_v53 = vor.u32 %v2485_v30, %v2482_v59 }
 0x28a   : > { %4159 = vmatmul.msk.bf16.gmra.mxu0 %vm422_vm2, %v2998_v61  ;;  %3651 = vst.msk [vmem:[%s5453_s13 + $0x38] sm:$0xf] %vm3636_vm10, %v3614_v39  ;;  %v2594_v20 = vpop.f32.mrf.mxu2  ;;  %v3007_v61 = vsel %vm2922_vm8, %v5824_v42, %v3006_v32 }
 0x28b   : > { %v2660_v48 = vadd.f32 %v2594_v20, %v2166_v51  ;;  %v2102_v34 = vpop.f32.mrf.mxu1  ;;  %vm3255_vm13 = vcmp.ge.f32.partialorder %v3219_v28, 0.0  ;;  %v3291_v38 = vmul.f32 0.01, %v3219_v28  ;;  %v2487_v13 = vsel %vm1908_vm7, %v5818_v0, %v2486_v53 }
 0x28c   : > { %v5848_v7 = vpop.f32.mrf.mxu3  ;;  %v2167_v37 = vadd.f32 %v2102_v34, %v5082_v50 }
 0x28d   : > { %v2896_v41 = vadd.f32 %v5767_v55, %v2660_v48  ;;  %v3327_v27 = vsel %vm3255_vm13, %v3219_v28, %v3291_v38  ;;  %v3477_v38 = vpop.permute.xlu0 %3476 }
 0x28e   : > { %v3579_v58 = vmul.f32 %v3462_v21, %v3327_v27 }
 0x28f   : > { %v3116_v9 = vpop.f32.mrf.mxu0  ;;  %v3180_v14 = vadd.f32 %v3114_v43, %v2896_v41 }
 0x290   : > { %v3615_v12 = vpack.c.bf16 %v3579_v58, %v3579_v58 }
 0x291   : > { %v3220_v60 = vadd.f32 %v5420_v5, %v3180_v14 }
 0x292   : > { %3652 = vst.msk [vmem:[%s5453_s13 + $0x3c] sm:$0xf] %vm3636_vm10, %v3615_v12  ;;  %v2596_v24 = vpop.f32.mrf.mxu2  ;;  %v3482_v12 = vpop.permute.xlu1 %3481 }
 0x293   : > { %v2661_v55 = vadd.f32 %v2596_v24, %v2167_v37  ;;  %v2105_v47 = vpop.f32.mrf.mxu1  ;;  %vm3256_vm14 = vcmp.ge.f32.partialorder %v3220_v60, 0.0  ;;  %v3292_v57 = vmul.f32 0.01, %v3220_v60 }
 0x294   : > { %v2842_v31 = vpop.f32.mrf.mxu3  ;;  %v2168_v56 = vadd.f32 %v2105_v47, %v5097_v19 }
 0x295   : > { %v2897_v50 = vadd.f32 %v5789_v15, %v2661_v55  ;;  %v3328_v17 = vsel %vm3256_vm14, %v3220_v60, %v3292_v57 }
 0x296   : > { %v3580_v10 = vmul.f32 %v3467_v33, %v3328_v17  ;;  %4035 = vmatmul.msk.bf16.gmra.mxu1 %vm422_vm2, %v1993_v16  ;;  %v3487_v17 = vpop.permute.xlu2 %3486 }
 0x297   : > { %v3119_v43 = vpop.f32.mrf.mxu0  ;;  %v3181_v4 = vadd.f32 %v3116_v9, %v2897_v50  ;;  %4122 = vmatmul.msk.bf16.gmra.mxu2 %vm422_vm2, %v2487_v13 }
 0x298   : > { %v3616_v8 = vpack.c.bf16 %v3580_v10, %v3580_v10 }
 0x299   : > { %v3221_v0 = vadd.f32 %v5420_v5, %v3181_v4  ;;  %v5873_v5 = vld [vmem:[%s5960_s2] ss:$0 sm:$0xff] }
 0x29a   : > { %4160 = vmatmul.msk.bf16.gmra.mxu0 %vm422_vm2, %v3007_v61  ;;  %3653 = vst.msk [vmem:[%s5453_s13 + $0x40] sm:$0xf] %vm3636_vm10, %v3616_v8  ;;  %v2599_v15 = vpop.f32.mrf.mxu2 }
 0x29b   : > { %v2662_v54 = vadd.f32 %v2599_v15, %v2168_v56  ;;  %v2107_v39 = vpop.f32.mrf.mxu1  ;;  %vm3257_vm7 = vcmp.ge.f32.partialorder %v3221_v0, 0.0  ;;  %v3293_v42 = vmul.f32 0.01, %v3221_v0 }
 0x29c   : > { %v2169_v49 = vadd.f32 %v2107_v39, %v5116_v6  ;;  %v2845_v34 = vpop.f32.mrf.mxu3 }
 0x29d   : > { %v2898_v2 = vadd.f32 %v5813_v23, %v2662_v54  ;;  %v3329_v51 = vsel %vm3257_vm7, %v3221_v0, %v3293_v42  ;;  %v3492_v42 = vpop.permute.xlu0 %3491 }
 0x29e   : > { %v3581_v28 = vmul.f32 %v3472_v44, %v3329_v51 }
 0x29f   : > { %v3121_v20 = vpop.f32.mrf.mxu0  ;;  %v3182_v22 = vadd.f32 %v3119_v43, %v2898_v2 }
 0x2a0   : > { %v3617_v19 = vpack.c.bf16 %v3581_v28, %v3581_v28 }
 0x2a1   : > { %v3222_v45 = vadd.f32 %v5873_v5, %v3182_v22 }
 0x2a2   : > { %3654 = vst.msk [vmem:[%s5453_s13 + $0x44] sm:$0xf] %vm3636_vm10, %v3617_v19  ;;  %v2601_v48 = vpop.f32.mrf.mxu2 }
 0x2a3   : > { %v2663_v23 = vadd.f32 %v2601_v48, %v2169_v49  ;;  %v2110_v21 = vpop.f32.mrf.mxu1  ;;  %vm3258_vm2 = vcmp.ge.f32.partialorder %v3222_v45, 0.0  ;;  %v3294_v25 = vmul.f32 0.01, %v3222_v45 }
 0x2a4   : > { %v2170_v9 = vadd.f32 %v2110_v21, %v5136_v63  ;;  %v2847_v37 = vpop.f32.mrf.mxu3 }
 0x2a5   : > { %v2899_v59 = vadd.f32 %v5833_v29, %v2663_v23  ;;  %v3330_v6 = vsel %vm3258_vm2, %v3222_v45, %v3294_v25 }
 0x2a6   : > { %v3582_v30 = vmul.f32 %v3477_v38, %v3330_v6  ;;  %v3497_v38 = vpop.permute.xlu1 %3496 }
 0x2a7   : > { %v3124_v41 = vpop.f32.mrf.mxu0  ;;  %v3183_v27 = vadd.f32 %v3121_v20, %v2899_v59 }
 0x2a8   : > { %v3618_v58 = vpack.c.bf16 %v3582_v30, %v3582_v30 }
 0x2a9   : > { %v3223_v46 = vadd.f32 %v5873_v5, %v3183_v27 }
 0x2aa   : > { %3655 = vst.msk [vmem:[%s5453_s13 + $0x48] sm:$0xf] %vm3636_vm10, %v3618_v58  ;;  %v2604_v11 = vpop.f32.mrf.mxu2 }
 0x2ab   : > { %v2664_v14 = vadd.f32 %v2604_v11, %v2170_v9  ;;  %v2112_v26 = vpop.f32.mrf.mxu1  ;;  %vm3259_vm8 = vcmp.ge.f32.partialorder %v3223_v46, 0.0  ;;  %v3295_v53 = vmul.f32 0.01, %v3223_v46 }
 0x2ac   : > { %v2171_v63 = vadd.f32 %v2112_v26, %v5153_v36  ;;  %v2850_v4 = vpop.f32.mrf.mxu3  ;;  %v3502_v26 = vpop.permute.xlu2 %3501 }
 0x2ad   : > { %v2900_v29 = vadd.f32 %v5848_v7, %v2664_v14  ;;  %v3331_v60 = vsel %vm3259_vm8, %v3223_v46, %v3295_v53 }
 0x2ae   : > { %v3583_v24 = vmul.f32 %v3482_v12, %v3331_v60 }
 0x2af   : > { %v3126_v32 = vpop.f32.mrf.mxu0  ;;  %v3184_v55 = vadd.f32 %v3124_v41, %v2900_v29 }
 0x2b0   : > { %v3619_v47 = vpack.c.bf16 %v3583_v24, %v3583_v24 }
 0x2b1   : > { %v3224_v33 = vadd.f32 %v5873_v5, %v3184_v55 }
 0x2b2   : > { %3656 = vst.msk [vmem:[%s5453_s13 + $0x4c] sm:$0xf] %vm3636_vm10, %v3619_v47  ;;  %v2606_v57 = vpop.f32.mrf.mxu2 }
 0x2b3   : > { %vm3260_vm15 = vcmp.ge.f32.partialorder %v3224_v33, 0.0  ;;  %v3296_v16 = vmul.f32 0.01, %v3224_v33  ;;  %v2665_v13 = vadd.f32 %v2606_v57, %v2171_v63  ;;  %v2115_v50 = vpop.f32.mrf.mxu1 }
 0x2b4   : > { %v2172_v36 = vadd.f32 %v2115_v50, %v5173_v18  ;;  %v2852_v19 = vpop.f32.mrf.mxu3 }
 0x2b5   : > { %v3332_v10 = vsel %vm3260_vm15, %v3224_v33, %v3296_v16  ;;  %v2901_v7 = vadd.f32 %v2842_v31, %v2665_v13  ;;  %v3507_v16 = vpop.permute.xlu0 %3506 }
 0x2b6   : > { %v3584_v43 = vmul.f32 %v3487_v17, %v3332_v10 }
 0x2b7   : > { %v3129_v61 = vpop.f32.mrf.mxu0  ;;  %v3185_v8 = vadd.f32 %v3126_v32, %v2901_v7 }
 0x2b8   : > { %v3620_v56 = vpack.c.bf16 %v3584_v43, %v3584_v43 }
 0x2b9   : > { %v3225_v0 = vadd.f32 %v5873_v5, %v3185_v8 }
 0x2ba   : > { %3657 = vst.msk [vmem:[%s5453_s13 + $0x50] sm:$0xf] %vm3636_vm10, %v3620_v56  ;;  %v2609_v15 = vpop.f32.mrf.mxu2 }
 0x2bb   : > { %vm3261_vm0 = vcmp.ge.f32.partialorder %v3225_v0, 0.0  ;;  %v3297_v54 = vmul.f32 0.01, %v3225_v0  ;;  %v2666_v39 = vadd.f32 %v2609_v15, %v2172_v36  ;;  %v2117_v44 = vpop.f32.mrf.mxu1 }
 0x2bc   : > { %v2173_v49 = vadd.f32 %v2117_v44, %v5186_v3  ;;  %v2855_v9 = vpop.f32.mrf.mxu3 }
 0x2bd   : > { %v3333_v2 = vsel %vm3261_vm0, %v3225_v0, %v3297_v54  ;;  %v2902_v31 = vadd.f32 %v2845_v34, %v2666_v39  ;;  %v3512_v0 = vpop.permute.xlu1 %3511 }
 0x2be   : > { %v3585_v51 = vmul.f32 %v3492_v42, %v3333_v2 }
 0x2bf   : > { %v3131_v28 = vpop.f32.mrf.mxu0  ;;  %v3186_v20 = vadd.f32 %v3129_v61, %v2902_v31 }
 0x2c0   : > { %v3621_v22 = vpack.c.bf16 %v3585_v51, %v3585_v51 }
 0x2c1   : > { %v3226_v18 = vadd.f32 %v5873_v5, %v3186_v20 }
 0x2c2   : > { %3658 = vst.msk [vmem:[%s5453_s13 + $0x54] sm:$0xf] %vm3636_vm10, %v3621_v22  ;;  %v2611_v45 = vpop.f32.mrf.mxu2 }
 0x2c3   : > { %vm3262_vm1 = vcmp.ge.f32.partialorder %v3226_v18, 0.0  ;;  %v3298_v48 = vmul.f32 0.01, %v3226_v18  ;;  %v2667_v23 = vadd.f32 %v2611_v45, %v2173_v49  ;;  %v2120_v21 = vpop.f32.mrf.mxu1  ;;  %v3517_v49 = vpop.permute.xlu2 %3516 }
 0x2c4   : > { %v2174_v58 = vadd.f32 %v2120_v21, %v5203_v62  ;;  %v2857_v57 = vpop.f32.mrf.mxu3 }
 0x2c5   : > { %v3334_v25 = vsel %vm3262_vm1, %v3226_v18, %v3298_v48  ;;  %v2903_v34 = vadd.f32 %v2847_v37, %v2667_v23 }
 0x2c6   : > { %v3586_v59 = vmul.f32 %v3497_v38, %v3334_v25 }
 0x2c7   : > { %v3134_v6 = vpop.f32.mrf.mxu0  ;;  %v3187_v30 = vadd.f32 %v3131_v28, %v2903_v34  ;;  %v6104_v28 = vld [vmem:[#allocation2_spill] sm:$0xff] }
 0x2c8   : > { %v3622_v41 = vpack.c.bf16 %v3586_v59, %v3586_v59 }
 0x2c9   : > { %v3227_v27 = vadd.f32 %v5873_v5, %v3187_v30 }
 0x2ca   : > { %3659 = vst.msk [vmem:[%s5453_s13 + $0x58] sm:$0xf] %vm3636_vm10, %v3622_v41  ;;  %v2614_v3 = vpop.f32.mrf.mxu2 }
 0x2cb   : > { %vm3263_vm3 = vcmp.ge.f32.partialorder %v3227_v27, 0.0  ;;  %v3299_v46 = vmul.f32 0.01, %v3227_v27  ;;  %v2668_v11 = vadd.f32 %v2614_v3, %v2174_v58  ;;  %v2122_v14 = vpop.f32.mrf.mxu1 }
 0x2cc   : > { %v2175_v62 = vadd.f32 %v2122_v14, %v5219_v1  ;;  %v2860_v42 = vpop.f32.mrf.mxu3 }
 0x2cd   : > { %v3335_v12 = vsel %vm3263_vm3, %v3227_v27, %v3299_v46  ;;  %v2904_v53 = vadd.f32 %v2850_v4, %v2668_v11 }
 0x2ce   : > { %v3587_v37 = vmul.f32 %v3502_v26, %v3335_v12 }
 0x2cf   : > { %v3136_v29 = vpop.f32.mrf.mxu0  ;;  %v3188_v60 = vadd.f32 %v3134_v6, %v2904_v53  ;;  %v6105_v6 = vld [vmem:[#allocation11_spill] sm:$0xff] }
 0x2d0   : > { %v3623_v24 = vpack.c.bf16 %v3587_v37, %v3587_v37 }
 0x2d1   : > { %v3228_v32 = vadd.f32 %v5873_v5, %v3188_v60 }
 0x2d2   : > { %3660 = vst.msk [vmem:[%s5453_s13 + $0x5c] sm:$0xf] %vm3636_vm10, %v3623_v24  ;;  %v2616_v55 = vpop.f32.mrf.mxu2 }
 0x2d3   : > { %vm3264_vm4 = vcmp.ge.f32.partialorder %v3228_v32, 0.0  ;;  %v3300_v47 = vmul.f32 0.01, %v3228_v32  ;;  %v2669_v63 = vadd.f32 %v2616_v55, %v2175_v62  ;;  %v2125_v33 = vpop.f32.mrf.mxu1 }
 0x2d4   : > { %v2176_v1 = vadd.f32 %v2125_v33, %v5242_v40  ;;  %v2862_v34 = vpop.f32.mrf.mxu3 }
 0x2d5   : > { %v3336_v13 = vsel %vm3264_vm4, %v3228_v32, %v3300_v47  ;;  %v2905_v50 = vadd.f32 %v2852_v19, %v2669_v63  ;;  %v3527_v63 = vpop.permute.xlu1 %3526 }
 0x2d6   : > { %v3588_v17 = vmul.f32 %v3507_v16, %v3336_v13 }
 0x2d7   : > { %v3139_v10 = vpop.f32.mrf.mxu0  ;;  %v3189_v7 = vadd.f32 %v3136_v29, %v2905_v50  ;;  %v6106_v29 = vld [vmem:[#allocation14_spill] sm:$0xff] }
 0x2d8   : > { %v3624_v43 = vpack.c.bf16 %v3588_v17, %v3588_v17 }
 0x2d9   : > { %v3229_v61 = vadd.f32 %v5873_v5, %v3189_v7  ;;  %v6107_v7 = vld [vmem:[#allocation3_spill] sm:$0xff] }
 0x2da   : > { %3661 = vst.msk [vmem:[%s5453_s13 + $0x60] sm:$0xf] %vm3636_vm10, %v3624_v43  ;;  %v2619_v4 = vpop.f32.mrf.mxu2 }
 0x2db   : > { %vm3265_vm5 = vcmp.ge.f32.partialorder %v3229_v61, 0.0  ;;  %v3301_v8 = vmul.f32 0.01, %v3229_v61  ;;  %v2670_v56 = vadd.f32 %v2619_v4, %v2176_v1  ;;  %v2127_v36 = vpop.f32.mrf.mxu1 }
 0x2dc   : > { %v2177_v40 = vadd.f32 %v2127_v36, %v6104_v28  ;;  %v2865_v32 = vpop.f32.mrf.mxu3  ;;  %v3532_v36 = vpop.permute.xlu2 %3531 }
 0x2dd   : > { %v3337_v15 = vsel %vm3265_vm5, %v3229_v61, %v3301_v8  ;;  %v2906_v54 = vadd.f32 %v2855_v9, %v2670_v56  ;;  %v3522_v9 = vpop.permute.xlu0 %3521 }
 0x2de   : > { %v3589_v39 = vmul.f32 %v3512_v0, %v3337_v15 }
 0x2df   : > { %v3141_v44 = vpop.f32.mrf.mxu0  ;;  %v3190_v2 = vadd.f32 %v3139_v10, %v2906_v54 }
 0x2e0   : > { %v3625_v31 = vpack.c.bf16 %v3589_v39, %v3589_v39 }
 0x2e1   : > { %v3230_v51 = vadd.f32 %v5873_v5, %v3190_v2 }
 0x2e2   : > { %3662 = vst.msk [vmem:[%s5453_s13 + $0x64] sm:$0xf] %vm3636_vm10, %v3625_v31  ;;  %v2621_v20 = vpop.f32.mrf.mxu2  ;;  %v6108_v31 = vld [vmem:[#allocation16_spill] sm:$0xff] }
 0x2e3   : > { %vm3266_vm9 = vcmp.ge.f32.partialorder %v3230_v51, 0.0  ;;  %v3302_v22 = vmul.f32 0.01, %v3230_v51  ;;  %v2671_v19 = vadd.f32 %v2621_v20, %v2177_v40  ;;  %v2130_v18 = vpop.f32.mrf.mxu1 }
 0x2e4   : > { %v2178_v30 = vadd.f32 %v2130_v18, %v6105_v6  ;;  %v2867_v56 = vpop.f32.mrf.mxu3 }
 0x2e5   : > { %v3338_v45 = vsel %vm3266_vm9, %v3230_v51, %v3302_v22  ;;  %v2907_v48 = vadd.f32 %v2857_v57, %v2671_v19  ;;  %v3537_v19 = vpop.permute.xlu0 %3536 }
 0x2e6   : > { %v3590_v23 = vmul.f32 %v3517_v49, %v3338_v45 }
 0x2e7   : > { %v3144_v21 = vpop.f32.mrf.mxu0  ;;  %v3191_v38 = vadd.f32 %v3141_v44, %v2907_v48 }
 0x2e8   : > { %v3626_v25 = vpack.c.bf16 %v3590_v23, %v3590_v23 }
 0x2e9   : > { %v3231_v59 = vadd.f32 %v5873_v5, %v3191_v38 }
 0x2ea   : > { %3663 = vst.msk [vmem:[%s5453_s13 + $0x68] sm:$0xf] %vm3636_vm10, %v3626_v25  ;;  %v2624_v41 = vpop.f32.mrf.mxu2 }
 0x2eb   : > { %vm3267_vm11 = vcmp.ge.f32.partialorder %v3231_v59, 0.0  ;;  %v3303_v27 = vmul.f32 0.01, %v3231_v59  ;;  %v2672_v58 = vadd.f32 %v2624_v41, %v2178_v30  ;;  %v2132_v3 = vpop.f32.mrf.mxu1 }
 0x2ec   : > { %v2179_v60 = vadd.f32 %v2132_v3, %v6106_v29  ;;  %v2870_v48 = vpop.f32.mrf.mxu3 }
 0x2ed   : > { %v3339_v46 = vsel %vm3267_vm11, %v3231_v59, %v3303_v27  ;;  %v2908_v11 = vadd.f32 %v2860_v42, %v2672_v58  ;;  %v3542_v58 = vpop.permute.xlu1 %3541 }
 0x2ee   : > { %v3591_v14 = vmul.f32 %v3522_v9, %v3339_v46 }
 0x2ef   : > { %v3146_v26 = vpop.f32.mrf.mxu0  ;;  %v3192_v12 = vadd.f32 %v3144_v21, %v2908_v11 }
 0x2f0   : > { %v3627_v53 = vpack.c.bf16 %v3591_v14, %v3591_v14 }
 0x2f1   : > { %v3232_v37 = vadd.f32 %v5873_v5, %v3192_v12 }
 0x2f2   : > { %3664 = vst.msk [vmem:[%s5453_s13 + $0x6c] sm:$0xf] %vm3636_vm10, %v3627_v53  ;;  %v2626_v24 = vpop.f32.mrf.mxu2  ;;  %v6110_v53 = vld [vmem:[#allocation4_spill] sm:$0xff] }
 0x2f3   : > { %vm3268_vm6 = vcmp.ge.f32.partialorder %v3232_v37, 0.0  ;;  %v3304_v62 = vmul.f32 0.01, %v3232_v37  ;;  %v2673_v55 = vadd.f32 %v2626_v24, %v2179_v60  ;;  %v2135_v47 = vpop.f32.mrf.mxu1 }
 0x2f4   : > { %v2180_v43 = vadd.f32 %v2135_v47, %v6107_v7 }
 0x2f5   : > { %v3340_v33 = vsel %vm3268_vm6, %v3232_v37, %v3304_v62  ;;  %v2909_v57 = vadd.f32 %v2862_v34, %v2673_v55  ;;  %v6109_v34 = vld [vmem:[#allocation18_spill] sm:$0xff]  ;;  %v3547_v55 = vpop.permute.xlu2 %3546 }
 0x2f6   : > { %v3592_v16 = vmul.f32 %v3527_v63, %v3340_v33 }
 0x2f7   : > { %v3149_v13 = vpop.f32.mrf.mxu0  ;;  %v3193_v50 = vadd.f32 %v3146_v26, %v2909_v57  ;;  %v2872_v26 = vpop.f32.mrf.mxu3 }
 0x2f8   : > { %v3628_v17 = vpack.c.bf16 %v3592_v16, %v3592_v16 }
 0x2f9   : > { %v3233_v10 = vadd.f32 %v5873_v5, %v3193_v50 }
 0x2fa   : > { %3665 = vst.msk [vmem:[%s5453_s13 + $0x70] sm:$0xf] %vm3636_vm10, %v3628_v17  ;;  %v2629_v61 = vpop.f32.mrf.mxu2 }
 0x2fb   : > { %vm3269_vm12 = vcmp.ge.f32.partialorder %v3233_v10, 0.0  ;;  %v3305_v1 = vmul.f32 0.01, %v3233_v10  ;;  %v2674_v4 = vadd.f32 %v2629_v61, %v2180_v43  ;;  %v2137_v8 = vpop.f32.mrf.mxu1 }
 0x2fc   : > { %v2181_v51 = vadd.f32 %v2137_v8, %v6108_v31  ;;  %v3557_v31 = vpop.permute.xlu1 %3556 }
 0x2fd   : > { %v3341_v0 = vsel %vm3269_vm12, %v3233_v10, %v3305_v1  ;;  %v2910_v15 = vadd.f32 %v2865_v32, %v2674_v4  ;;  %v3552_v1 = vpop.permute.xlu0 %3551 }
 0x2fe   : > { %v3593_v54 = vmul.f32 %v3532_v36, %v3341_v0 }
 0x2ff   : > { %v3151_v39 = vpop.f32.mrf.mxu0  ;;  %v3194_v44 = vadd.f32 %v3149_v13, %v2910_v15  ;;  %v2875_v17 = vpop.f32.mrf.mxu3 }
 0x300   : > { %v3629_v42 = vpack.c.bf16 %v3593_v54, %v3593_v54 }
 0x301   : > { %v3234_v2 = vadd.f32 %v5873_v5, %v3194_v44 }
 0x302   : > { %3666 = vst.msk [vmem:[%s5453_s13 + $0x74] sm:$0xf] %vm3636_vm10, %v3629_v42  ;;  %v2631_v28 = vpop.f32.mrf.mxu2 }
 0x303   : > { %vm3270_vm13 = vcmp.ge.f32.partialorder %v3234_v2, 0.0  ;;  %v3306_v40 = vmul.f32 0.01, %v3234_v2  ;;  %v2675_v20 = vadd.f32 %v2631_v28, %v2181_v51  ;;  %v2140_v22 = vpop.f32.mrf.mxu1 }
 0x304   : > { %v2182_v59 = vadd.f32 %v2140_v22, %v6109_v34 }
 0x305   : > { %v3342_v18 = vsel %vm3270_vm13, %v3234_v2, %v3306_v40  ;;  %v2911_v49 = vadd.f32 %v2867_v56, %v2675_v20 }
 0x306   : > { %v3594_v45 = vmul.f32 %v3537_v19, %v3342_v18 }
 0x307   : > { %v3195_v23 = vadd.f32 %v3151_v39, %v2911_v49  ;;  %v3154_v38 = vpop.f32.mrf.mxu0  ;;  %v2877_v2 = vpop.f32.mrf.mxu3 }
 0x308   : > { %v3630_v21 = vpack.c.bf16 %v3594_v45, %v3594_v45  ;;  %v3562_v49 = vpop.permute.xlu2 %3561 }
 0x309   : > { %v3235_v25 = vadd.f32 %v5873_v5, %v3195_v23 }
 0x30a   : > { %3667 = vst.msk [vmem:[%s5453_s13 + $0x78] sm:$0xf] %vm3636_vm10, %v3630_v21  ;;  %v2634_v6 = vpop.f32.mrf.mxu2 }
 0x30b   : > { %vm3271_vm14 = vcmp.ge.f32.partialorder %v3235_v25, 0.0  ;;  %v3307_v30 = vmul.f32 0.01, %v3235_v25  ;;  %v2676_v41 = vadd.f32 %v2634_v6, %v2182_v59  ;;  %v2142_v27 = vpop.f32.mrf.mxu1 }
 0x30c   : > { %v2183_v37 = vadd.f32 %v2142_v27, %v6110_v53 }
 0x30d   : > { %v3343_v3 = vsel %vm3271_vm14, %v3235_v25, %v3307_v30  ;;  %v2912_v9 = vadd.f32 %v2870_v48, %v2676_v41 }
 0x30e   : > { %v3595_v46 = vmul.f32 %v3542_v58, %v3343_v3 }
 0x30f   : > { %v3196_v11 = vadd.f32 %v3154_v38, %v2912_v9  ;;  %v3156_v29 = vpop.f32.mrf.mxu0 }
 0x310   : > { %v3631_v14 = vpack.c.bf16 %v3595_v46, %v3595_v46 }
 0x311   : > { %v3236_v12 = vadd.f32 %v5873_v5, %v3196_v11 }
 0x312   : > { %3668 = vst.msk [vmem:[%s5453_s13 + $0x7c] sm:$0xf] %vm3636_vm10, %v3631_v14  ;;  %v2636_v60 = vpop.f32.mrf.mxu2 }
 0x313   : > { %vm3272_vm7 = vcmp.ge.f32.partialorder %v3236_v12, 0.0  ;;  %v3308_v24 = vmul.f32 0.01, %v3236_v12  ;;  %v2677_v32 = vadd.f32 %v2636_v60, %v2183_v37  ;;  %v2145_v62 = vpop.f32.mrf.mxu1 }
 0x314   : > { %v2184_v50 = vadd.f32 %v2145_v62, %v5386_v52 }
 0x315   : > { %v3344_v47 = vsel %vm3272_vm7, %v3236_v12, %v3308_v24  ;;  %v2913_v63 = vadd.f32 %v2872_v26, %v2677_v32 }
 0x316   : > { %v3596_v33 = vmul.f32 %v3547_v55, %v3344_v47 }
 0x317   : > { %v3197_v57 = vadd.f32 %v3156_v29, %v2913_v63  ;;  %v3159_v61 = vpop.f32.mrf.mxu0 }
 0x318   : > { %v3632_v16 = vpack.c.bf16 %v3596_v33, %v3596_v33 }
 0x319   : > { %v3237_v13 = vadd.f32 %v5873_v5, %v3197_v57 }
 0x31a   : > { %3669 = vst.msk [vmem:[%s5453_s13 + $0x80] sm:$0xf] %vm3636_vm10, %v3632_v16  ;;  %v2639_v10 = vpop.f32.mrf.mxu2 }
 0x31b   : > { %vm3273_vm2 = vcmp.ge.f32.partialorder %v3237_v13, 0.0  ;;  %v3309_v7 = vmul.f32 0.01, %v3237_v13  ;;  %v2678_v43 = vadd.f32 %v2639_v10, %v2184_v50  ;;  %v2147_v36 = vpop.f32.mrf.mxu1 }
 0x31c   : > { %v2185_v52 = vadd.f32 %v2147_v36, %v5402_v35 }
 0x31d   : > { %v3345_v4 = vsel %vm3273_vm2, %v3237_v13, %v3309_v7  ;;  %v2914_v8 = vadd.f32 %v2875_v17, %v2678_v43 }
 0x31e   : > { %v3597_v56 = vmul.f32 %v3552_v1, %v3345_v4 }
 0x31f   : > { %v3198_v0 = vadd.f32 %v3159_v61, %v2914_v8  ;;  %v3161_v20 = vpop.f32.mrf.mxu0 }
 0x320   : > { %v3633_v15 = vpack.c.bf16 %v3597_v56, %v3597_v56 }
 0x321   : > { %v3238_v54 = vadd.f32 %v5873_v5, %v3198_v0 }
 0x322   : > { %3670 = vst.msk [vmem:[%s5453_s13 + $0x84] sm:$0xf] %vm3636_vm10, %v3633_v15  ;;  %v2641_v39 = vpop.f32.mrf.mxu2 }
 0x323   : > { %vm3274_vm8 = vcmp.ge.f32.partialorder %v3238_v54, 0.0  ;;  %v3310_v44 = vmul.f32 0.01, %v3238_v54  ;;  %v2679_v42 = vadd.f32 %v2641_v39, %v2185_v52 }
 0x325   : > { %v3346_v51 = vsel %vm3274_vm8, %v3238_v54, %v3310_v44  ;;  %v2915_v28 = vadd.f32 %v2877_v2, %v2679_v42 }
 0x326   : > { %v3598_v40 = vmul.f32 %v3557_v31, %v3346_v51 }
 0x327   : > { %v3199_v22 = vadd.f32 %v3161_v20, %v2915_v28 }
 0x328   : > { %v3634_v19 = vpack.c.bf16 %v3598_v40, %v3598_v40 }
 0x329   : > { %v3239_v18 = vadd.f32 %v5873_v5, %v3199_v22 }
 0x32a   : > { %3671 = vst.msk [vmem:[%s5453_s13 + $0x88] sm:$0xf] %vm3636_vm10, %v3634_v19 }
 0x32b   : > { %vm3275_vm15 = vcmp.ge.f32.partialorder %v3239_v18, 0.0  ;;  %v3311_v35 = vmul.f32 0.01, %v3239_v18 }
 0x32d   : > { %v3347_v45 = vsel %vm3275_vm15, %v3239_v18, %v3311_v35 }
 0x32e   : > { %v3599_v48 = vmul.f32 %v3562_v49, %v3347_v45 }
 0x330   : > { %v3635_v23 = vpack.c.bf16 %v3599_v48, %v3599_v48 }
 0x332   : > { %3672 = vst.msk [vmem:[%s5453_s13 + $0x8c] sm:$0xf] %vm3636_vm10, %v3635_v23 }
 0x333 PF: > { %s14_s17 = sadd.s32 1, %s4282_s17   ;;  %s6111_s15 = smov %s4278_s16 }
 0x334   : > { %p11_p5 = scmp.ge.s32.totalorder %s14_s17, 4   ;;  %s6112_s16 = smov %s6114_s18 }
 0x336   :  { %13 = sbr.rel (!%p11_p5) target bundleno = 2 (0x2), region = 80 }

</bundles_post_ra>
